<compile_context>
chip_gen: v5e
topology: v5e:2x2
jax: 0.10.0
libtpu: 0.0.40
codegen_flags: <defaults>
</compile_context>

<pallas_src>
import functools

import jax
import jax.numpy as jnp
from jax.experimental import pallas as pl
from jax.experimental.pallas import tpu as pltpu


# ----------------------------------------------------------------------------
# Fused forward kernel (one grid step == one batch element)
# ----------------------------------------------------------------------------

def _fused_forward_kernel(
    xq_ref, xm_ref, mask_ref,
    qg_ref, qb_ref, mg_ref, mb_ref,
    wq_ref, wkv_ref, wo_ref, bo_ref,
    g2_ref, bt2_ref, w1_ref, b1_ref, w2_ref, b2_ref,
    o_ref,
    *, heads, eps):
  f32 = jnp.float32
  bf16 = jnp.bfloat16

  xq = xq_ref[...].astype(f32)          # (Lq, Cq)  pre-norm encoder output
  xm = xm_ref[...].astype(f32)          # (Lk, Cm)
  lq, _ = xq.shape
  lk, _ = xm.shape
  d_model = wq_ref.shape[1]
  dh = d_model // heads

  def layer_norm(x, g, b):
    mu = jnp.mean(x, axis=-1, keepdims=True)
    var = jnp.mean((x - mu) ** 2, axis=-1, keepdims=True)
    return (x - mu) * jax.lax.rsqrt(var + eps) * g + b

  # --- pre-norms (f32 elementwise) ---
  qn = layer_norm(xq, qg_ref[...].astype(f32), qb_ref[...].astype(f32))
  mn = layer_norm(xm, mg_ref[...].astype(f32), mb_ref[...].astype(f32))

  # --- Q projection and fused K|V projection (bf16 MXU, f32 accumulate) ---
  q = jnp.dot(qn.astype(bf16), wq_ref[...],
              preferred_element_type=f32)               # (Lq, d_model)
  kv = jnp.dot(mn.astype(bf16), wkv_ref[...],
               preferred_element_type=f32)              # (Lk, 2*d_model)
  k = kv[:, :d_model]
  v = kv[:, d_model:]

  # --- multi-head scaled-dot-product attention, all heads at once ---
  scale = 1.0 / jnp.sqrt(jnp.float32(dh))
  qh = jnp.transpose((q * scale).reshape(lq, heads, dh), (1, 0, 2))  # (H,Lq,dh)
  kh = jnp.transpose(k.reshape(lk, heads, dh), (1, 0, 2))            # (H,Lk,dh)
  vh = jnp.transpose(v.reshape(lk, heads, dh), (1, 0, 2))            # (H,Lk,dh)

  s = jnp.einsum('hqd,hkd->hqk', qh.astype(bf16), kh.astype(bf16),
                 preferred_element_type=f32)            # (H, Lq, Lk)

  # mask: score - 1e9 * (1 - mask), mask broadcast over heads & query positions
  m = mask_ref[...].astype(f32)                         # (1, Lk)
  s = s - 1e9 * (1.0 - m[jnp.newaxis, :, :])            # (H, Lq, Lk)

  # stable softmax over keys (f32); reciprocal routed to EUP
  s = s - jnp.max(s, axis=-1, keepdims=True)
  p = jnp.exp(s)
  p = p * pl.reciprocal(jnp.sum(p, axis=-1, keepdims=True), approx=True)

  ctx = jnp.einsum('hqk,hkd->hqd', p.astype(bf16), vh.astype(bf16),
                   preferred_element_type=f32)          # (H, Lq, dh)
  # residual with the (unscaled) projected query, as in DotProductAttention
  head = jnp.transpose(ctx, (1, 0, 2)).reshape(lq, d_model) + q   # (Lq, d_model)

  # --- output dense (with bias) + residual with original encoder output ---
  att = jnp.dot(head.astype(bf16), wo_ref[...],
                preferred_element_type=f32) + bo_ref[...].astype(f32)
  att = att + xq

  # --- layer_norm2 ---
  att = layer_norm(att, g2_ref[...].astype(f32), bt2_ref[...].astype(f32))

  # --- MLP: Linear -> Hardswish -> Linear ---
  h = jnp.dot(att.astype(bf16), w1_ref[...],
              preferred_element_type=f32) + b1_ref[...].astype(f32)
  h = h * jnp.clip(h + 3.0, 0.0, 6.0) * (1.0 / 6.0)     # Hardswish (f32 VPU)
  out = jnp.dot(h.astype(bf16), w2_ref[...],
                preferred_element_type=f32) + b2_ref[...].astype(f32)

  o_ref[...] = out.astype(o_ref.dtype)


# ----------------------------------------------------------------------------
# Module forward: single pallas_call, weights resident in VMEM
# ----------------------------------------------------------------------------

def memory_attention_forward(params, query_encoder, memory, memory_mask, cfg):
  qs, qh, qw, cq = cfg["query_shape"]
  ks, kh, kw, cm = cfg["memory_shape"]
  heads = cfg["heads"]
  d_model = cfg["d_model"]
  bsz = query_encoder.shape[0]
  lq = qh * qw * qs            # query_seq_len assumed 1 (see reference reshape)
  lk = kh * kw * ks
  hid = params["W1"].shape[1]
  eps = 1e-3                   # nn.LayerNorm(eps=0.001) in the reference

  f32 = jnp.float32
  bf16 = jnp.bfloat16

  xq = query_encoder.reshape(bsz, lq, cq)
  xm = memory.reshape(bsz, lk, cm)
  mask = memory_mask.reshape(bsz, 1, lk).astype(f32)

  # fuse K|V projection weights into one matmul
  wkv = jnp.concatenate([params["Wk"], params["Wv"]], axis=1).astype(bf16)

  const = lambda b: (0, 0)   # weights: same VMEM block every grid step

  out = pl.pallas_call(
      functools.partial(_fused_forward_kernel, heads=heads, eps=eps),
      out_shape=jax.ShapeDtypeStruct((bsz, lq, cq), query_encoder.dtype),
      grid=(bsz,),
      in_specs=[
          pl.BlockSpec((None, lq, cq), lambda b: (b, 0, 0)),    # xq
          pl.BlockSpec((None, lk, cm), lambda b: (b, 0, 0)),    # xm
          pl.BlockSpec((None, 1, lk), lambda b: (b, 0, 0)),     # mask
          pl.BlockSpec((1, cq), const),                         # q_gamma
          pl.BlockSpec((1, cq), const),                         # q_beta
          pl.BlockSpec((1, cm), const),                         # m_gamma
          pl.BlockSpec((1, cm), const),                         # m_beta
          pl.BlockSpec((cq, d_model), const),                   # Wq
          pl.BlockSpec((cm, 2 * d_model), const),               # Wk|Wv
          pl.BlockSpec((d_model, cq), const),                   # Wo
          pl.BlockSpec((1, cq), const),                         # bo
          pl.BlockSpec((1, cq), const),                         # ln2_gamma
          pl.BlockSpec((1, cq), const),                         # ln2_beta
          pl.BlockSpec((cq, hid), const),                       # W1
          pl.BlockSpec((1, hid), const),                        # b1
          pl.BlockSpec((hid, cq), const),                       # W2
          pl.BlockSpec((1, cq), const),                         # b2
      ],
      out_specs=pl.BlockSpec((None, lq, cq), lambda b: (b, 0, 0)),
      compiler_params=pltpu.CompilerParams(
          dimension_semantics=("parallel",)),
  )(xq, xm, mask,
    params["q_gamma"].reshape(1, cq), params["q_beta"].reshape(1, cq),
    params["m_gamma"].reshape(1, cm), params["m_beta"].reshape(1, cm),
    params["Wq"].astype(bf16), wkv, params["Wo"].astype(bf16),
    params["bo"].reshape(1, cq),
    params["ln2_gamma"].reshape(1, cq), params["ln2_beta"].reshape(1, cq),
    params["W1"].astype(bf16), params["b1"].reshape(1, hid),
    params["W2"].astype(bf16), params["b2"].reshape(1, cq))

  return out.reshape(bsz, qh, qw, cq)


def init_params(key, cq, cm, d_model, hidden_dim=512):
  ks = jax.random.split(key, 6)
  s = 0.02
  f32 = jnp.float32
  return dict(
      q_gamma=jnp.ones((cq,), f32), q_beta=jnp.zeros((cq,), f32),
      m_gamma=jnp.ones((cm,), f32), m_beta=jnp.zeros((cm,), f32),
      Wq=s * jax.random.normal(ks[0], (cq, d_model), f32),
      Wk=s * jax.random.normal(ks[1], (cm, d_model), f32),
      Wv=s * jax.random.normal(ks[2], (cm, d_model), f32),
      Wo=s * jax.random.normal(ks[3], (d_model, cq), f32),
      bo=jnp.zeros((cq,), f32),
      ln2_gamma=jnp.ones((cq,), f32), ln2_beta=jnp.zeros((cq,), f32),
      W1=s * jax.random.normal(ks[4], (cq, hidden_dim), f32),
      b1=jnp.zeros((hidden_dim,), f32),
      W2=s * jax.random.normal(ks[5], (hidden_dim, cq), f32),
      b2=jnp.zeros((cq,), f32),
  )


if __name__ == "__main__":
  # small, module-consistent shapes
  B = 2
  query_shape = (1, 8, 8, 32)     # (query_seq_len, qh, qw, Cq)
  memory_shape = (2, 4, 4, 32)    # (key_seq_len, kh, kw, Cm)
  heads = 8
  d_model = 128                   # value_dim = key_dim = 128 (module default)

  cfg = dict(query_shape=query_shape, memory_shape=memory_shape,
             heads=heads, d_model=d_model)

  qs, qh, qw, cq = query_shape
  ks_, kh, kw, cm = memory_shape

  root = jax.random.PRNGKey(0)
  kp, kq, km, kmask = jax.random.split(root, 4)

  params = init_params(kp, cq, cm, d_model)
  query_encoder = jax.random.normal(kq, (B, qh, qw, cq), jnp.float32)
  memory = jax.random.normal(km, (B, ks_, kh, kw, cm), jnp.float32)
  memory_mask = (jax.random.uniform(kmask, (B, ks_, kh, kw)) > 0.3
                 ).astype(jnp.float32)

  fwd = jax.jit(functools.partial(memory_attention_forward, cfg=cfg))
  out = fwd(params, query_encoder, memory, memory_mask)
  out = jax.block_until_ready(out)
  assert out.shape == (B, qh, qw, cq), out.shape
  assert jnp.all(jnp.isfinite(out))
  print("KERNEL_OK")
</pallas_src>

<mosaic_0001>
module attributes {stable_mosaic.version = 11 : i64} {
  func.func @_fused_forward_kernel(%arg0: i32, %arg1: memref<1x64x32xf32, #tpu.memory_space<vmem>>, %arg2: memref<1x32x32xf32, #tpu.memory_space<vmem>>, %arg3: memref<1x1x32xf32, #tpu.memory_space<vmem>>, %arg4: memref<1x32xf32, #tpu.memory_space<vmem>>, %arg5: memref<1x32xf32, #tpu.memory_space<vmem>>, %arg6: memref<1x32xf32, #tpu.memory_space<vmem>>, %arg7: memref<1x32xf32, #tpu.memory_space<vmem>>, %arg8: memref<32x128xbf16, #tpu.memory_space<vmem>>, %arg9: memref<32x256xbf16, #tpu.memory_space<vmem>>, %arg10: memref<128x32xbf16, #tpu.memory_space<vmem>>, %arg11: memref<1x32xf32, #tpu.memory_space<vmem>>, %arg12: memref<1x32xf32, #tpu.memory_space<vmem>>, %arg13: memref<1x32xf32, #tpu.memory_space<vmem>>, %arg14: memref<32x512xbf16, #tpu.memory_space<vmem>>, %arg15: memref<1x512xf32, #tpu.memory_space<vmem>>, %arg16: memref<512x32xbf16, #tpu.memory_space<vmem>>, %arg17: memref<1x32xf32, #tpu.memory_space<vmem>>, %arg18: memref<1x64x32xf32, #tpu.memory_space<vmem>>) attributes {dimension_semantics = [#tpu.dimension_semantics<parallel>], iteration_bounds = array<i64: 2>, scalar_prefetch = 0 : i64, scratch_operands = 0 : i64, tpu.core_type = #tpu.core_type<tc>, window_params = [{transform_indices = @transform_0, window_bounds = array<i64: 1, 64, 32>}, {transform_indices = @transform_1, window_bounds = array<i64: 1, 32, 32>}, {transform_indices = @transform_2, window_bounds = array<i64: 1, 1, 32>}, {pipeline_mode = #tpu.pipeline_mode<synchronous>, transform_indices = @transform_3, window_bounds = array<i64: 1, 32>}, {pipeline_mode = #tpu.pipeline_mode<synchronous>, transform_indices = @transform_4, window_bounds = array<i64: 1, 32>}, {pipeline_mode = #tpu.pipeline_mode<synchronous>, transform_indices = @transform_5, window_bounds = array<i64: 1, 32>}, {pipeline_mode = #tpu.pipeline_mode<synchronous>, transform_indices = @transform_6, window_bounds = array<i64: 1, 32>}, {pipeline_mode = #tpu.pipeline_mode<synchronous>, transform_indices = @transform_7, window_bounds = array<i64: 32, 128>}, {pipeline_mode = #tpu.pipeline_mode<synchronous>, transform_indices = @transform_8, window_bounds = array<i64: 32, 256>}, {pipeline_mode = #tpu.pipeline_mode<synchronous>, transform_indices = @transform_9, window_bounds = array<i64: 128, 32>}, {pipeline_mode = #tpu.pipeline_mode<synchronous>, transform_indices = @transform_10, window_bounds = array<i64: 1, 32>}, {pipeline_mode = #tpu.pipeline_mode<synchronous>, transform_indices = @transform_11, window_bounds = array<i64: 1, 32>}, {pipeline_mode = #tpu.pipeline_mode<synchronous>, transform_indices = @transform_12, window_bounds = array<i64: 1, 32>}, {pipeline_mode = #tpu.pipeline_mode<synchronous>, transform_indices = @transform_13, window_bounds = array<i64: 32, 512>}, {pipeline_mode = #tpu.pipeline_mode<synchronous>, transform_indices = @transform_14, window_bounds = array<i64: 1, 512>}, {pipeline_mode = #tpu.pipeline_mode<synchronous>, transform_indices = @transform_15, window_bounds = array<i64: 512, 32>}, {pipeline_mode = #tpu.pipeline_mode<synchronous>, transform_indices = @transform_16, window_bounds = array<i64: 1, 32>}, {transform_indices = @transform_17, window_bounds = array<i64: 1, 64, 32>}]} {
    %c0 = arith.constant 0 : index
    %c0_0 = arith.constant 0 : index
    %c0_1 = arith.constant 0 : index
    %0 = vector.load %arg1[%c0, %c0_0, %c0_1] : memref<1x64x32xf32, #tpu.memory_space<vmem>>, vector<1x64x32xf32>
    %1 = vector.shape_cast %0 : vector<1x64x32xf32> to vector<64x32xf32>
    %c0_2 = arith.constant 0 : index
    %c0_3 = arith.constant 0 : index
    %c0_4 = arith.constant 0 : index
    %2 = vector.load %arg2[%c0_2, %c0_3, %c0_4] : memref<1x32x32xf32, #tpu.memory_space<vmem>>, vector<1x32x32xf32>
    %3 = vector.shape_cast %2 : vector<1x32x32xf32> to vector<32x32xf32>
    %c0_5 = arith.constant 0 : index
    %c0_6 = arith.constant 0 : index
    %4 = vector.load %arg4[%c0_5, %c0_6] : memref<1x32xf32, #tpu.memory_space<vmem>>, vector<1x32xf32>
    %c0_7 = arith.constant 0 : index
    %c0_8 = arith.constant 0 : index
    %5 = vector.load %arg5[%c0_7, %c0_8] : memref<1x32xf32, #tpu.memory_space<vmem>>, vector<1x32xf32>
    %cst = arith.constant dense<0.000000e+00> : vector<64xf32>
    %6 = vector.multi_reduction <add>, %1, %cst [1] : vector<64x32xf32> to vector<64xf32>
    %7 = vector.shape_cast %6 : vector<64xf32> to vector<64x1xf32>
    %cst_9 = arith.constant 3.200000e+01 : f32
    %8 = vector.broadcast %cst_9 : f32 to vector<64x1xf32>
    %9 = arith.divf %7, %8 : vector<64x1xf32>
    %10 = vector.broadcast %9 : vector<64x1xf32> to vector<64x32xf32>
    %11 = arith.subf %1, %10 : vector<64x32xf32>
    %12 = arith.mulf %11, %11 : vector<64x32xf32>
    %cst_10 = arith.constant dense<0.000000e+00> : vector<64xf32>
    %13 = vector.multi_reduction <add>, %12, %cst_10 [1] : vector<64x32xf32> to vector<64xf32>
    %14 = vector.shape_cast %13 : vector<64xf32> to vector<64x1xf32>
    %cst_11 = arith.constant 3.200000e+01 : f32
    %15 = vector.broadcast %cst_11 : f32 to vector<64x1xf32>
    %16 = arith.divf %14, %15 : vector<64x1xf32>
    %17 = vector.broadcast %9 : vector<64x1xf32> to vector<64x32xf32>
    %18 = arith.subf %1, %17 : vector<64x32xf32>
    %cst_12 = arith.constant 1.000000e-03 : f32
    %19 = vector.broadcast %cst_12 : f32 to vector<64x1xf32>
    %20 = arith.addf %16, %19 : vector<64x1xf32>
    %21 = math.rsqrt %20 : vector<64x1xf32>
    %22 = vector.broadcast %21 : vector<64x1xf32> to vector<64x32xf32>
    %23 = arith.mulf %18, %22 : vector<64x32xf32>
    %24 = vector.broadcast %4 : vector<1x32xf32> to vector<64x32xf32>
    %25 = arith.mulf %23, %24 : vector<64x32xf32>
    %26 = vector.broadcast %5 : vector<1x32xf32> to vector<64x32xf32>
    %27 = arith.addf %25, %26 : vector<64x32xf32>
    %c0_13 = arith.constant 0 : index
    %c0_14 = arith.constant 0 : index
    %28 = vector.load %arg6[%c0_13, %c0_14] : memref<1x32xf32, #tpu.memory_space<vmem>>, vector<1x32xf32>
    %c0_15 = arith.constant 0 : index
    %c0_16 = arith.constant 0 : index
    %29 = vector.load %arg7[%c0_15, %c0_16] : memref<1x32xf32, #tpu.memory_space<vmem>>, vector<1x32xf32>
    %cst_17 = arith.constant dense<0.000000e+00> : vector<32xf32>
    %30 = vector.multi_reduction <add>, %3, %cst_17 [1] : vector<32x32xf32> to vector<32xf32>
    %31 = vector.shape_cast %30 : vector<32xf32> to vector<32x1xf32>
    %cst_18 = arith.constant 3.200000e+01 : f32
    %32 = vector.broadcast %cst_18 : f32 to vector<32x1xf32>
    %33 = arith.divf %31, %32 : vector<32x1xf32>
    %34 = vector.broadcast %33 : vector<32x1xf32> to vector<32x32xf32>
    %35 = arith.subf %3, %34 : vector<32x32xf32>
    %36 = arith.mulf %35, %35 : vector<32x32xf32>
    %cst_19 = arith.constant dense<0.000000e+00> : vector<32xf32>
    %37 = vector.multi_reduction <add>, %36, %cst_19 [1] : vector<32x32xf32> to vector<32xf32>
    %38 = vector.shape_cast %37 : vector<32xf32> to vector<32x1xf32>
    %cst_20 = arith.constant 3.200000e+01 : f32
    %39 = vector.broadcast %cst_20 : f32 to vector<32x1xf32>
    %40 = arith.divf %38, %39 : vector<32x1xf32>
    %41 = vector.broadcast %33 : vector<32x1xf32> to vector<32x32xf32>
    %42 = arith.subf %3, %41 : vector<32x32xf32>
    %cst_21 = arith.constant 1.000000e-03 : f32
    %43 = vector.broadcast %cst_21 : f32 to vector<32x1xf32>
    %44 = arith.addf %40, %43 : vector<32x1xf32>
    %45 = math.rsqrt %44 : vector<32x1xf32>
    %46 = vector.broadcast %45 : vector<32x1xf32> to vector<32x32xf32>
    %47 = arith.mulf %42, %46 : vector<32x32xf32>
    %48 = vector.broadcast %28 : vector<1x32xf32> to vector<32x32xf32>
    %49 = arith.mulf %47, %48 : vector<32x32xf32>
    %50 = vector.broadcast %29 : vector<1x32xf32> to vector<32x32xf32>
    %51 = arith.addf %49, %50 : vector<32x32xf32>
    %52 = arith.truncf %27 : vector<64x32xf32> to vector<64x32xbf16>
    %c0_22 = arith.constant 0 : index
    %c0_23 = arith.constant 0 : index
    %53 = vector.load %arg8[%c0_22, %c0_23] : memref<32x128xbf16, #tpu.memory_space<vmem>>, vector<32x128xbf16>
    %cst_24 = arith.constant dense<0.000000e+00> : vector<64x128xf32>
    %54 = tpu.matmul %52, %53, %cst_24 {dimension_numbers = #tpu.dot_dimension_numbers<[1], [0], [0], [1], [0, 0, 1, 1], [], []>} : vector<64x32xbf16>, vector<32x128xbf16>, vector<64x128xf32> -> vector<64x128xf32>
    %55 = arith.truncf %51 : vector<32x32xf32> to vector<32x32xbf16>
    %c0_25 = arith.constant 0 : index
    %c0_26 = arith.constant 0 : index
    %56 = vector.load %arg9[%c0_25, %c0_26] : memref<32x256xbf16, #tpu.memory_space<vmem>>, vector<32x256xbf16>
    %cst_27 = arith.constant dense<0.000000e+00> : vector<32x256xf32>
    %57 = tpu.matmul %55, %56, %cst_27 {dimension_numbers = #tpu.dot_dimension_numbers<[1], [0], [0], [1], [0, 0, 1, 1], [], []>} : vector<32x32xbf16>, vector<32x256xbf16>, vector<32x256xf32> -> vector<32x256xf32>
    %58 = vector.extract_strided_slice %57 {offsets = [0, 0], sizes = [32, 128], strides = [1, 1]} : vector<32x256xf32> to vector<32x128xf32>
    %59 = vector.extract_strided_slice %57 {offsets = [0, 128], sizes = [32, 128], strides = [1, 1]} : vector<32x256xf32> to vector<32x128xf32>
    %cst_28 = arith.constant 1.600000e+01 : f32
    %60 = math.sqrt %cst_28 : f32
    %cst_29 = arith.constant 1.000000e+00 : f32
    %61 = arith.divf %cst_29, %60 : f32
    %62 = vector.broadcast %61 : f32 to vector<64x128xf32>
    %63 = arith.mulf %54, %62 : vector<64x128xf32>
    %64 = vector.shape_cast %63 : vector<64x128xf32> to vector<64x8x16xf32>
    %65 = tpu.transpose %64, [1, 0, 2] : vector<64x8x16xf32> -> vector<8x64x16xf32>
    %66 = vector.shape_cast %58 : vector<32x128xf32> to vector<32x8x16xf32>
    %67 = tpu.transpose %66, [1, 0, 2] : vector<32x8x16xf32> -> vector<8x32x16xf32>
    %68 = vector.shape_cast %59 : vector<32x128xf32> to vector<32x8x16xf32>
    %69 = tpu.transpose %68, [1, 0, 2] : vector<32x8x16xf32> -> vector<8x32x16xf32>
    %70 = arith.truncf %65 : vector<8x64x16xf32> to vector<8x64x16xbf16>
    %71 = arith.truncf %67 : vector<8x32x16xf32> to vector<8x32x16xbf16>
    "tpu.trace_start"() <{level = 10 : i32, message = "hqd,hkd->hqk"}> : () -> ()
    %cst_30 = arith.constant dense<0.000000e+00> : vector<8x64x32xf32>
    %72 = tpu.matmul %70, %71, %cst_30 {dimension_numbers = #tpu.dot_dimension_numbers<[2], [2], [1], [1], [0, 0, 0, 1, 1, 1], [0], [0]>} : vector<8x64x16xbf16>, vector<8x32x16xbf16>, vector<8x64x32xf32> -> vector<8x64x32xf32>
    "tpu.trace_stop"() : () -> ()
    %c0_31 = arith.constant 0 : index
    %c0_32 = arith.constant 0 : index
    %c0_33 = arith.constant 0 : index
    %73 = vector.load %arg3[%c0_31, %c0_32, %c0_33] : memref<1x1x32xf32, #tpu.memory_space<vmem>>, vector<1x1x32xf32>
    %74 = vector.shape_cast %73 : vector<1x1x32xf32> to vector<1x32xf32>
    %75 = vector.shape_cast %74 : vector<1x32xf32> to vector<1x1x32xf32>
    %cst_34 = arith.constant 1.000000e+00 : f32
    %76 = vector.broadcast %cst_34 : f32 to vector<1x1x32xf32>
    %77 = arith.subf %76, %75 : vector<1x1x32xf32>
    %cst_35 = arith.constant 1.000000e+09 : f32
    %78 = vector.broadcast %cst_35 : f32 to vector<1x1x32xf32>
    %79 = arith.mulf %78, %77 : vector<1x1x32xf32>
    %80 = vector.broadcast %79 : vector<1x1x32xf32> to vector<8x64x32xf32>
    %81 = arith.subf %72, %80 : vector<8x64x32xf32>
    %cst_36 = arith.constant dense<0xFF800000> : vector<8x64xf32>
    %82 = vector.multi_reduction <maximumf>, %81, %cst_36 [2] : vector<8x64x32xf32> to vector<8x64xf32>
    %83 = vector.shape_cast %82 : vector<8x64xf32> to vector<8x64x1xf32>
    %84 = vector.broadcast %83 : vector<8x64x1xf32> to vector<8x64x32xf32>
    %85 = arith.subf %81, %84 : vector<8x64x32xf32>
    %86 = math.exp %85 : vector<8x64x32xf32>
    %cst_37 = arith.constant dense<0.000000e+00> : vector<8x64xf32>
    %87 = vector.multi_reduction <add>, %86, %cst_37 [2] : vector<8x64x32xf32> to vector<8x64xf32>
    %88 = vector.shape_cast %87 : vector<8x64xf32> to vector<8x64x1xf32>
    %89 = tpu.reciprocal %88 {approx = true} : vector<8x64x1xf32> -> vector<8x64x1xf32>
    %90 = vector.broadcast %89 : vector<8x64x1xf32> to vector<8x64x32xf32>
    %91 = arith.mulf %86, %90 : vector<8x64x32xf32>
    %92 = arith.truncf %91 : vector<8x64x32xf32> to vector<8x64x32xbf16>
    %93 = arith.truncf %69 : vector<8x32x16xf32> to vector<8x32x16xbf16>
    "tpu.trace_start"() <{level = 10 : i32, message = "hqk,hkd->hqd"}> : () -> ()
    %cst_38 = arith.constant dense<0.000000e+00> : vector<8x64x16xf32>
    %94 = tpu.matmul %92, %93, %cst_38 {dimension_numbers = #tpu.dot_dimension_numbers<[2], [1], [1], [2], [0, 0, 0, 1, 1, 2], [0], [0]>} : vector<8x64x32xbf16>, vector<8x32x16xbf16>, vector<8x64x16xf32> -> vector<8x64x16xf32>
    "tpu.trace_stop"() : () -> ()
    %95 = tpu.transpose %94, [1, 0, 2] : vector<8x64x16xf32> -> vector<64x8x16xf32>
    %96 = vector.shape_cast %95 : vector<64x8x16xf32> to vector<64x128xf32>
    %97 = arith.addf %96, %54 : vector<64x128xf32>
    %98 = arith.truncf %97 : vector<64x128xf32> to vector<64x128xbf16>
    %c0_39 = arith.constant 0 : index
    %c0_40 = arith.constant 0 : index
    %99 = vector.load %arg10[%c0_39, %c0_40] : memref<128x32xbf16, #tpu.memory_space<vmem>>, vector<128x32xbf16>
    %cst_41 = arith.constant dense<0.000000e+00> : vector<64x32xf32>
    %100 = tpu.matmul %98, %99, %cst_41 {dimension_numbers = #tpu.dot_dimension_numbers<[1], [0], [0], [1], [0, 0, 1, 1], [], []>} : vector<64x128xbf16>, vector<128x32xbf16>, vector<64x32xf32> -> vector<64x32xf32>
    %c0_42 = arith.constant 0 : index
    %c0_43 = arith.constant 0 : index
    %101 = vector.load %arg11[%c0_42, %c0_43] : memref<1x32xf32, #tpu.memory_space<vmem>>, vector<1x32xf32>
    %102 = vector.broadcast %101 : vector<1x32xf32> to vector<64x32xf32>
    %103 = arith.addf %100, %102 : vector<64x32xf32>
    %104 = arith.addf %103, %1 : vector<64x32xf32>
    %c0_44 = arith.constant 0 : index
    %c0_45 = arith.constant 0 : index
    %105 = vector.load %arg12[%c0_44, %c0_45] : memref<1x32xf32, #tpu.memory_space<vmem>>, vector<1x32xf32>
    %c0_46 = arith.constant 0 : index
    %c0_47 = arith.constant 0 : index
    %106 = vector.load %arg13[%c0_46, %c0_47] : memref<1x32xf32, #tpu.memory_space<vmem>>, vector<1x32xf32>
    %cst_48 = arith.constant dense<0.000000e+00> : vector<64xf32>
    %107 = vector.multi_reduction <add>, %104, %cst_48 [1] : vector<64x32xf32> to vector<64xf32>
    %108 = vector.shape_cast %107 : vector<64xf32> to vector<64x1xf32>
    %cst_49 = arith.constant 3.200000e+01 : f32
    %109 = vector.broadcast %cst_49 : f32 to vector<64x1xf32>
    %110 = arith.divf %108, %109 : vector<64x1xf32>
    %111 = vector.broadcast %110 : vector<64x1xf32> to vector<64x32xf32>
    %112 = arith.subf %104, %111 : vector<64x32xf32>
    %113 = arith.mulf %112, %112 : vector<64x32xf32>
    %cst_50 = arith.constant dense<0.000000e+00> : vector<64xf32>
    %114 = vector.multi_reduction <add>, %113, %cst_50 [1] : vector<64x32xf32> to vector<64xf32>
    %115 = vector.shape_cast %114 : vector<64xf32> to vector<64x1xf32>
    %cst_51 = arith.constant 3.200000e+01 : f32
    %116 = vector.broadcast %cst_51 : f32 to vector<64x1xf32>
    %117 = arith.divf %115, %116 : vector<64x1xf32>
    %118 = vector.broadcast %110 : vector<64x1xf32> to vector<64x32xf32>
    %119 = arith.subf %104, %118 : vector<64x32xf32>
    %cst_52 = arith.constant 1.000000e-03 : f32
    %120 = vector.broadcast %cst_52 : f32 to vector<64x1xf32>
    %121 = arith.addf %117, %120 : vector<64x1xf32>
    %122 = math.rsqrt %121 : vector<64x1xf32>
    %123 = vector.broadcast %122 : vector<64x1xf32> to vector<64x32xf32>
    %124 = arith.mulf %119, %123 : vector<64x32xf32>
    %125 = vector.broadcast %105 : vector<1x32xf32> to vector<64x32xf32>
    %126 = arith.mulf %124, %125 : vector<64x32xf32>
    %127 = vector.broadcast %106 : vector<1x32xf32> to vector<64x32xf32>
    %128 = arith.addf %126, %127 : vector<64x32xf32>
    %129 = arith.truncf %128 : vector<64x32xf32> to vector<64x32xbf16>
    %c0_53 = arith.constant 0 : index
    %c0_54 = arith.constant 0 : index
    %130 = vector.load %arg14[%c0_53, %c0_54] : memref<32x512xbf16, #tpu.memory_space<vmem>>, vector<32x512xbf16>
    %cst_55 = arith.constant dense<0.000000e+00> : vector<64x512xf32>
    %131 = tpu.matmul %129, %130, %cst_55 {dimension_numbers = #tpu.dot_dimension_numbers<[1], [0], [0], [1], [0, 0, 1, 1], [], []>} : vector<64x32xbf16>, vector<32x512xbf16>, vector<64x512xf32> -> vector<64x512xf32>
    %c0_56 = arith.constant 0 : index
    %c0_57 = arith.constant 0 : index
    %132 = vector.load %arg15[%c0_56, %c0_57] : memref<1x512xf32, #tpu.memory_space<vmem>>, vector<1x512xf32>
    %133 = vector.broadcast %132 : vector<1x512xf32> to vector<64x512xf32>
    %134 = arith.addf %131, %133 : vector<64x512xf32>
    %cst_58 = arith.constant 3.000000e+00 : f32
    %135 = vector.broadcast %cst_58 : f32 to vector<64x512xf32>
    %136 = arith.addf %134, %135 : vector<64x512xf32>
    %cst_59 = arith.constant 0.000000e+00 : f32
    %cst_60 = arith.constant 6.000000e+00 : f32
    %137 = vector.broadcast %cst_59 : f32 to vector<64x512xf32>
    %138 = arith.maximumf %137, %136 : vector<64x512xf32>
    %139 = vector.broadcast %cst_60 : f32 to vector<64x512xf32>
    %140 = arith.minimumf %139, %138 : vector<64x512xf32>
    %141 = arith.mulf %134, %140 : vector<64x512xf32>
    %cst_61 = arith.constant 0.166666672 : f32
    %142 = vector.broadcast %cst_61 : f32 to vector<64x512xf32>
    %143 = arith.mulf %141, %142 : vector<64x512xf32>
    %144 = arith.truncf %143 : vector<64x512xf32> to vector<64x512xbf16>
    %c0_62 = arith.constant 0 : index
    %c0_63 = arith.constant 0 : index
    %145 = vector.load %arg16[%c0_62, %c0_63] : memref<512x32xbf16, #tpu.memory_space<vmem>>, vector<512x32xbf16>
    %cst_64 = arith.constant dense<0.000000e+00> : vector<64x32xf32>
    %146 = tpu.matmul %144, %145, %cst_64 {dimension_numbers = #tpu.dot_dimension_numbers<[1], [0], [0], [1], [0, 0, 1, 1], [], []>} : vector<64x512xbf16>, vector<512x32xbf16>, vector<64x32xf32> -> vector<64x32xf32>
    %c0_65 = arith.constant 0 : index
    %c0_66 = arith.constant 0 : index
    %147 = vector.load %arg17[%c0_65, %c0_66] : memref<1x32xf32, #tpu.memory_space<vmem>>, vector<1x32xf32>
    %148 = vector.broadcast %147 : vector<1x32xf32> to vector<64x32xf32>
    %149 = arith.addf %146, %148 : vector<64x32xf32>
    %c0_67 = arith.constant 0 : index
    %c0_68 = arith.constant 0 : index
    %c0_69 = arith.constant 0 : index
    %150 = vector.load %arg18[%c0_67, %c0_68, %c0_69] : memref<1x64x32xf32, #tpu.memory_space<vmem>>, vector<1x64x32xf32>
    %151 = vector.shape_cast %150 : vector<1x64x32xf32> to vector<64x32xf32>
    %152 = vector.shape_cast %149 : vector<64x32xf32> to vector<1x64x32xf32>
    tpu.vector_store %arg18[%c0_67, %c0_68, %c0_69], %152 {strides = array<i32>} : memref<1x64x32xf32, #tpu.memory_space<vmem>>, vector<1x64x32xf32>,
    return
  }
  func.func @transform_0(%arg0: i32) -> (i32, i32, i32) {
    %c0_i32 = arith.constant 0 : i32
    %c0_i32_0 = arith.constant 0 : i32
    %c0_i32_1 = arith.constant 0 : i32
    return %arg0, %c0_i32, %c0_i32_0 : i32, i32, i32
  }
  func.func @transform_1(%arg0: i32) -> (i32, i32, i32) {
    %c0_i32 = arith.constant 0 : i32
    %c0_i32_0 = arith.constant 0 : i32
    %c0_i32_1 = arith.constant 0 : i32
    return %arg0, %c0_i32, %c0_i32_0 : i32, i32, i32
  }
  func.func @transform_2(%arg0: i32) -> (i32, i32, i32) {
    %c0_i32 = arith.constant 0 : i32
    %c0_i32_0 = arith.constant 0 : i32
    %c0_i32_1 = arith.constant 0 : i32
    return %arg0, %c0_i32, %c0_i32_0 : i32, i32, i32
  }
  func.func @transform_3(%arg0: i32) -> (i32, i32) {
    %c0_i32 = arith.constant 0 : i32
    %c0_i32_0 = arith.constant 0 : i32
    %c0_i32_1 = arith.constant 0 : i32
    return %c0_i32, %c0_i32_0 : i32, i32
  }
  func.func @transform_4(%arg0: i32) -> (i32, i32) {
    %c0_i32 = arith.constant 0 : i32
    %c0_i32_0 = arith.constant 0 : i32
    %c0_i32_1 = arith.constant 0 : i32
    return %c0_i32, %c0_i32_0 : i32, i32
  }
  func.func @transform_5(%arg0: i32) -> (i32, i32) {
    %c0_i32 = arith.constant 0 : i32
    %c0_i32_0 = arith.constant 0 : i32
    %c0_i32_1 = arith.constant 0 : i32
    return %c0_i32, %c0_i32_0 : i32, i32
  }
  func.func @transform_6(%arg0: i32) -> (i32, i32) {
    %c0_i32 = arith.constant 0 : i32
    %c0_i32_0 = arith.constant 0 : i32
    %c0_i32_1 = arith.constant 0 : i32
    return %c0_i32, %c0_i32_0 : i32, i32
  }
  func.func @transform_7(%arg0: i32) -> (i32, i32) {
    %c0_i32 = arith.constant 0 : i32
    %c0_i32_0 = arith.constant 0 : i32
    %c0_i32_1 = arith.constant 0 : i32
    return %c0_i32, %c0_i32_0 : i32, i32
  }
  func.func @transform_8(%arg0: i32) -> (i32, i32) {
    %c0_i32 = arith.constant 0 : i32
    %c0_i32_0 = arith.constant 0 : i32
    %c0_i32_1 = arith.constant 0 : i32
    return %c0_i32, %c0_i32_0 : i32, i32
  }
  func.func @transform_9(%arg0: i32) -> (i32, i32) {
    %c0_i32 = arith.constant 0 : i32
    %c0_i32_0 = arith.constant 0 : i32
    %c0_i32_1 = arith.constant 0 : i32
    return %c0_i32, %c0_i32_0 : i32, i32
  }
  func.func @transform_10(%arg0: i32) -> (i32, i32) {
    %c0_i32 = arith.constant 0 : i32
    %c0_i32_0 = arith.constant 0 : i32
    %c0_i32_1 = arith.constant 0 : i32
    return %c0_i32, %c0_i32_0 : i32, i32
  }
  func.func @transform_11(%arg0: i32) -> (i32, i32) {
    %c0_i32 = arith.constant 0 : i32
    %c0_i32_0 = arith.constant 0 : i32
    %c0_i32_1 = arith.constant 0 : i32
    return %c0_i32, %c0_i32_0 : i32, i32
  }
  func.func @transform_12(%arg0: i32) -> (i32, i32) {
    %c0_i32 = arith.constant 0 : i32
    %c0_i32_0 = arith.constant 0 : i32
    %c0_i32_1 = arith.constant 0 : i32
    return %c0_i32, %c0_i32_0 : i32, i32
  }
  func.func @transform_13(%arg0: i32) -> (i32, i32) {
    %c0_i32 = arith.constant 0 : i32
    %c0_i32_0 = arith.constant 0 : i32
    %c0_i32_1 = arith.constant 0 : i32
    return %c0_i32, %c0_i32_0 : i32, i32
  }
  func.func @transform_14(%arg0: i32) -> (i32, i32) {
    %c0_i32 = arith.constant 0 : i32
    %c0_i32_0 = arith.constant 0 : i32
    %c0_i32_1 = arith.constant 0 : i32
    return %c0_i32, %c0_i32_0 : i32, i32
  }
  func.func @transform_15(%arg0: i32) -> (i32, i32) {
    %c0_i32 = arith.constant 0 : i32
    %c0_i32_0 = arith.constant 0 : i32
    %c0_i32_1 = arith.constant 0 : i32
    return %c0_i32, %c0_i32_0 : i32, i32
  }
  func.func @transform_16(%arg0: i32) -> (i32, i32) {
    %c0_i32 = arith.constant 0 : i32
    %c0_i32_0 = arith.constant 0 : i32
    %c0_i32_1 = arith.constant 0 : i32
    return %c0_i32, %c0_i32_0 : i32, i32
  }
  func.func @transform_17(%arg0: i32) -> (i32, i32, i32) {
    %c0_i32 = arith.constant 0 : i32
    %c0_i32_0 = arith.constant 0 : i32
    %c0_i32_1 = arith.constant 0 : i32
    return %arg0, %c0_i32, %c0_i32_0 : i32, i32, i32
  }
}

</mosaic_0001>

<bundles_post_ra>
// kernel: memory_attention_forward.1
= control target key start
LH: loop header
LB: loop body
LE: loop exit
PB: predicated region body
PF: predicated region fallthrough
CT: control target
= control target key end

     0   :  { %s18632_s0 = inlined_call_operand.vmem [shape: f32[2,64,32], index: 0, kind: input, shape index: {}]   ;;  %s18633_s1 = inlined_call_operand.vmem [shape: f32[2,32,32], index: 1, kind: input, shape index: {}]   ;;  %s18634_s2 = inlined_call_operand.vmem [shape: f32[2,1,32], index: 2, kind: input, shape index: {}]   ;;  %s18635_s3 = inlined_call_operand.vmem [shape: f32[1,32], index: 3, kind: input, shape index: {}]   ;;  %s18636_s4 = inlined_call_operand.vmem [shape: f32[1,32], index: 4, kind: input, shape index: {}]   ;;  %s18637_s5 = inlined_call_operand.vmem [shape: f32[1,32], index: 5, kind: input, shape index: {}]   ;;  %s18638_s6 = inlined_call_operand.vmem [shape: f32[1,32], index: 6, kind: input, shape index: {}]   ;;  %s18639_s7 = inlined_call_operand.vmem [shape: bf16[32,128], index: 7, kind: input, shape index: {}]   ;;  %s18640_s8 = inlined_call_operand.vmem [shape: bf16[32,256], index: 8, kind: input, shape index: {}]   ;;  %s18641_s9 = inlined_call_operand.vmem [shape: bf16[128,32], index: 9, kind: input, shape index: {}]   ;;  %s18642_s10 = inlined_call_operand.vmem [shape: f32[1,32], index: 10, kind: input, shape index: {}]   ;;  %s18643_s11 = inlined_call_operand.vmem [shape: f32[1,32], index: 11, kind: input, shape index: {}]   ;;  %s18644_s12 = inlined_call_operand.vmem [shape: f32[1,32], index: 12, kind: input, shape index: {}]   ;;  %s18645_s13 = inlined_call_operand.vmem [shape: bf16[32,512], index: 13, kind: input, shape index: {}]   ;;  %s18646_s14 = inlined_call_operand.vmem [shape: f32[1,512], index: 14, kind: input, shape index: {}]   ;;  %s18647_s15 = inlined_call_operand.vmem [shape: bf16[512,32], index: 15, kind: input, shape index: {}]   ;;  %s18648_s16 = inlined_call_operand.vmem [shape: f32[1,32], index: 16, kind: input, shape index: {}]   ;;  %s18649_s17 = inlined_call_operand.hbm [shape: f32[2,64,32], index: 17, kind: output, shape index: {}]  }
   0x1   :  { %18909 = sst [smem:[#allocation108_spill]] %s18632_s0 }
   0x2   :  { %18910 = sst [smem:[#allocation109_spill]] %s18633_s1 }
   0x3   :  { %18911 = sst [smem:[#allocation110_spill]] %s18634_s2 }
   0x4   :  { %18912 = sst [smem:[#allocation111_spill]] %s18635_s3 }
   0x5   :  { %22 = vsyncpa [#allocation3], 0 }
   0x6   :  { %24 = vsyncpa [#allocation3 + $0x1], 0  ;;  %s11580_s24 = smov 0   ;;  %s11582_s25 = smov 0  }
   0x7   :  { %s11584_s26 = smov 0   ;;  %s11586_s27 = smov 0  }
   0x8 LB: > { %18913 = sst [smem:[#allocation5_spill]] %s11464_s24  ;;  %s11601_s28 = sadd.s32 4294967295, %s11476_s27   ;;  %s11476_s27 = sphi %s11586_s27, %s19672_s27   ;;  %s11472_s26 = sphi %s11584_s26, %s19674_s26   ;;  %s11468_s25 = sphi %s11582_s25, %s19676_s25   ;;  %s11464_s24 = sphi %s11580_s24, %s19675_s24  }
   0x9   : > { %18914 = sst [smem:[#allocation6_spill]] %s11472_s26  ;;  %s10392_s29 = sadd.s32 4294967294, %s11476_s27  }
   0xa   : > { %s11605_s0 = sadd.s32 1, %s11476_s27   ;;  %s409_s30 = sadd.s32 1, %s11472_s26 }
   0xb   : > { %18915 = sst [smem:[#allocation7_spill]] %s11605_s0  ;;  %s406_s18 = ssub.s32 %s11476_s27, %s11605_s0 }
   0xc   : > { %p419_p0 = scmp.ne.s32.totalorder %s11472_s26, %s11468_s25  ;;  %p407_p1 = scmp.eq.s32.totalorder %s406_s18, 0 }
   0xd   : > { %p420_p2 = scmp.eq.s32.totalorder %s11601_s28, 1  ;;  %p425_p3 = scmp.ne.s32.totalorder %s11468_s25, %s11464_s24 }
   0xe   : > { %p426_p4 = scmp.eq.s32.totalorder %s10392_s29, 1  ;;  %p10395_p7 = scmp.ge.s32.totalorder %s11476_s27, 1 }
   0xf   : > { %s11616_s19 = scalar_select %p407_p1, %s11472_s26, %s409_s30  }
  0x10   : > { %p11618_p5 = por %p420_p2, %p419_p0  ;;  %p11622_p6 = por %p426_p4, %p425_p3 }
  0x11   : > { %18916 = sst [smem:[#allocation8_spill]] %s11616_s19  ;;  %p508_p8 = scmp.lt.s32.totalorder %s11476_s27, 3 }
  0x12   : > { %s18918_s20 = scalar_select %p11622_p6, 1, 0 }
  0x13   : > { %p509_p9 = pnand %p10395_p7, %p508_p8 }
  0x14   : > { %18919 = sst [smem:[#allocation9_spill]] %s18918_s20 }
  0x15   : > { %512 = sbr.rel (%p509_p9) target bundleno = 2802 (0xaf2), region = 88 }
  0x1a   : > { %p568_p10 = scmp.lt.s32.totalorder %s11601_s28, 1  ;;  %vm596_vm0 = vcmask 261120   ;;  %s18920_s30 = sld [smem:[#allocation109_spill]]  ;;  %v11478_v18 = vmov 32.0  }
  0x1b   : > { %s18921_s20 = sld [smem:[#allocation108_spill]]  ;;  %11108 = vrcp.f32 %v11478_v18  ;;  %s11479_s0 = smov 96  }
  0x1c   : > { %s11630_s21 = scalar_select %p568_p10, %s11601_s28, 1 }
  0x1d   : > { %s18931_s3 = sld [smem:[#allocation111_spill]]  ;;  %s11483_s23 = smov 32  }
  0x1e   : > { %s10711_s22 = sshll.u32 %s11630_s21, 5  ;;  %s10710_s19 = sshll.u32 %s11630_s21, 6 }
  0x1f   : > { %s18655_s29 = smov 80   ;;  %s18936_s2 = sld [smem:[#allocation110_spill]] }
  0x20   : > { %s577_s18 = scalar_lea.vmem %s18920_s30, %s10711_s22  ;;  %s11482_s22 = smov 48  }
  0x21   : > { %v592_v0 = vld [vmem:[%s577_s18 + $0x10] sm:$0xff]  ;;  %s11640_s24 = scalar_lea.vmem %s18921_s20, %s10710_s19  ;;  %v590_v1 = vld [vmem:[%s577_s18] sm:$0xff]  ;;  %v593_v6 = vld [vmem:[%s577_s18 + $0x18] sm:$0xff]  ;;  %v11109_v19 = vpop.eup %11108  ;;  %s11480_s19 = smov 64  }
  0x22   : > { %v810_v2 = vsel %vm596_vm0, %v592_v0, 0.0  ;;  %v804_v3 = vsel %vm596_vm0, %v590_v1, 0.0  ;;  %v582_v4 = vld [vmem:[%s11640_s24] sm:$0xff]  ;;  %v591_v7 = vld [vmem:[%s577_s18 + $0x8] sm:$0xff]  ;;  %v813_v9 = vsel %vm596_vm0, %v593_v6, 0.0  ;;  %v585_v12 = vld [vmem:[%s11640_s24 + $0x18] sm:$0xff]  ;;  %vm626_vm1 = vweird.f32 %v11109_v19 }
  0x23   : > { %811 = vadd.xlane.f32.xlu1 %v810_v2  ;;  %805 = vadd.xlane.f32.xlu0 %v804_v3  ;;  %v597_v5 = vsel %vm596_vm0, %v582_v4, 0.0  ;;  %v583_v8 = vld [vmem:[%s11640_s24 + $0x8] sm:$0xff]  ;;  %v807_v10 = vsel %vm596_vm0, %v591_v7, 0.0  ;;  %v11652_v13 = vld [vmem:[%s11640_s24 + $0x10] sm:$0xff]  ;;  %v606_v14 = vsel %vm596_vm0, %v585_v12, 0.0  ;;  %v11658_v16 = vld [vmem:[%s11640_s24 + $0x20] sm:$0xff] }
  0x24   : > { %598 = vadd.xlane.f32.xlu2 %v597_v5  ;;  %v600_v11 = vsel %vm596_vm0, %v583_v8, 0.0  ;;  %v603_v15 = vsel %vm596_vm0, %v11652_v13, 0.0  ;;  %v609_v17 = vsel %vm596_vm0, %v11658_v16, 0.0  ;;  %v622_v20 = vmul.f32 32.0, %v11109_v19  ;;  %v11679_v40 = vld [vmem:[%s11640_s24 + $0x28] sm:$0xff]  ;;  %v11696_v52 = vld [vmem:[%s11640_s24 + $0x30] sm:$0xff] }
  0x25   : > { %v612_v43 = vsel %vm596_vm0, %v11679_v40, 0.0  ;;  %v615_v55 = vsel %vm596_vm0, %v11696_v52, 0.0  ;;  %v11717_v2 = vld [vmem:[%s11640_s24 + $0x38] sm:$0xff]  ;;  %s18907_s20 = smov 112   ;;  %s11485_s30 = smov 16  }
  0x26   : > { %v623_v21 = vsub.f32 1.0, %v622_v20 }
  0x28   : > { %v624_v22 = vmul.f32 %v11109_v19, %v623_v21  ;;  %v10415_v21 = vld [vmem:[%s18640_s8] sm:$0xf] }
  0x2a   : > { %v625_v23 = vadd.f32 %v11109_v19, %v624_v22  ;;  %v10715_v22 = vld [vmem:[%s18640_s8 + $0x4] sm:$0xf0] }
  0x2b   : > { %814 = vadd.xlane.f32.xlu1 %v813_v9  ;;  %808 = vadd.xlane.f32.xlu0 %v807_v10 }
  0x2c   : > { %601 = vadd.xlane.f32.xlu2 %v600_v11  ;;  %v11662_v24 = vsel %vm626_vm1, %v11109_v19, %v625_v23  ;;  %v10416_v23 = vor.u32 %v10715_v22, %v10415_v21 }
  0x2d   : > { %18922 = vst [vmem:[#allocation10_spill] sm:$0xff] %v11662_v24 }
  0x33   : > { %607 = vadd.xlane.f32.xlu1 %v606_v14  ;;  %604 = vadd.xlane.f32.xlu0 %v603_v15  ;;  %v10716_v14 = vld [vmem:[%s18640_s8 + $0x14] sm:$0xf] }
  0x3b   : > { %610 = vadd.xlane.f32.xlu1 %v609_v17  ;;  %v10425_v17 = vld [vmem:[%s18640_s8 + $0x18] sm:$0xf0] }
  0x3c   : > { %v10428_v19 = vor.u32 %v10716_v14, %v10425_v17 }
  0x3e   : > { %1024 = vmatpush.bf16.msra.mxu2 %v10428_v19 }
  0x96   : > { %v812_v25 = vpop.xlane.xlu1 %811  ;;  %v806_v26 = vpop.xlane.xlu0 %805 }
  0x97   : > { %v816_v27 = vmul.f32 %v806_v26, %v11662_v24  ;;  %v599_v29 = vpop.xlane.xlu2 %598  ;;  %v818_v37 = vmul.f32 %v812_v25, %v11662_v24  ;;  %v10714_v25 = vld [vmem:[%s18640_s8 + $0x4] sm:$0xf]  ;;  %v10417_v26 = vld [vmem:[%s18640_s8 + $0x8] sm:$0xf0] }
  0x98   : > { %v628_v36 = vmul.f32 %v11662_v24, %v599_v29 }
  0x99   : > { %v11665_v28 = vsub.f32 %v590_v1, %v816_v27  ;;  %v11689_v46 = vsub.f32 %v592_v0, %v818_v37  ;;  %v10420_v27 = vor.u32 %v10714_v25, %v10417_v26 }
  0x9a   : > { %v11687_v44 = vsub.f32 %v582_v4, %v628_v36 }
  0x9b   : > { %v824_v30 = vmul.f32 %v11665_v28, %v11665_v28  ;;  %v826_v54 = vmul.f32 %v11689_v46, %v11689_v46  ;;  %1025 = vmatpush.bf16.msra.mxu2 %v10420_v27 }
  0x9c   : > { %v644_v53 = vmul.f32 %v11687_v44, %v11687_v44 }
  0x9d   : > { %v828_v31 = vsel %vm596_vm0, %v824_v30, 0.0  ;;  %v834_v60 = vsel %vm596_vm0, %v826_v54, 0.0 }
  0x9e   : > { %v815_v32 = vpop.xlane.xlu1 %814  ;;  %v809_v33 = vpop.xlane.xlu0 %808  ;;  %829 = vadd.xlane.f32.xlu2 %v828_v31  ;;  %v652_v58 = vsel %vm596_vm0, %v644_v53, 0.0 }
  0x9f   : > { %v819_v34 = vmul.f32 %v815_v32, %v11662_v24  ;;  %v817_v35 = vmul.f32 %v809_v33, %v11662_v24  ;;  %v602_v45 = vpop.xlane.xlu2 %601 }
  0xa0   : > { %v629_v51 = vmul.f32 %v11662_v24, %v602_v45 }
  0xa1   : > { %v11674_v38 = vsub.f32 %v593_v6, %v819_v34  ;;  %v11676_v39 = vsub.f32 %v591_v7, %v817_v35  ;;  %v618_v7 = vsel %vm596_vm0, %v11717_v2, 0.0 }
  0xa2   : > { %v11706_v57 = vsub.f32 %v583_v8, %v629_v51 }
  0xa3   : > { %v827_v41 = vmul.f32 %v11674_v38, %v11674_v38  ;;  %v825_v42 = vmul.f32 %v11676_v39, %v11676_v39 }
  0xa4   : > { %v645_v0 = vmul.f32 %v11706_v57, %v11706_v57 }
  0xa5   : > { %v837_v47 = vsel %vm596_vm0, %v827_v41, 0.0  ;;  %v831_v48 = vsel %vm596_vm0, %v825_v42, 0.0 }
  0xa6   : > { %838 = vadd.xlane.f32.xlu1 %v837_v47  ;;  %832 = vadd.xlane.f32.xlu0 %v831_v48  ;;  %v608_v49 = vpop.xlane.xlu1 %607  ;;  %v605_v59 = vpop.xlane.xlu0 %604  ;;  %v655_v5 = vsel %vm596_vm0, %v645_v0, 0.0 }
  0xa7   : > { %613 = vadd.xlane.f32.xlu2 %v612_v43  ;;  %v631_v50 = vmul.f32 %v11662_v24, %v608_v49  ;;  %v630_v63 = vmul.f32 %v11662_v24, %v605_v59  ;;  %v10713_v59 = vld [vmem:[%s18639_s7 + $0x8] sm:$0xff] }
  0xa8   : > { %944 = vmatpush.bf16.msra.mxu0 %v10713_v59 }
  0xa9   : > { %v11704_v56 = vsub.f32 %v585_v12, %v631_v50  ;;  %v11721_v4 = vsub.f32 %v11652_v13, %v630_v63  ;;  %v10423_v12 = vld [vmem:[%s18640_s8 + $0x10] sm:$0xf]  ;;  %v10717_v13 = vld [vmem:[%s18640_s8 + $0x14] sm:$0xf0] }
  0xab   : > { %v647_v62 = vmul.f32 %v11704_v56, %v11704_v56  ;;  %v646_v8 = vmul.f32 %v11721_v4, %v11721_v4 }
  0xad   : > { %v661_v3 = vsel %vm596_vm0, %v647_v62, 0.0  ;;  %v658_v10 = vsel %vm596_vm0, %v646_v8, 0.0 }
  0xae   : > { %616 = vadd.xlane.f32.xlu1 %v615_v55  ;;  %835 = vadd.xlane.f32.xlu0 %v834_v60  ;;  %v611_v61 = vpop.xlane.xlu1 %610 }
  0xaf   : > { %653 = vadd.xlane.f32.xlu2 %v652_v58  ;;  %v632_v1 = vmul.f32 %v11662_v24, %v611_v61 }
  0xb1   : > { %v11725_v6 = vsub.f32 %v11658_v16, %v632_v1  ;;  %v10424_v16 = vor.u32 %v10717_v13, %v10423_v12 }
  0xb3   : > { %v648_v9 = vmul.f32 %v11725_v6, %v11725_v6  ;;  %1005 = vmatpush.bf16.msra.mxu1 %v10424_v16 }
  0xb5   : > { %v664_v11 = vsel %vm596_vm0, %v648_v9, 0.0 }
  0xb6   : > { %662 = vadd.xlane.f32.xlu1 %v661_v3  ;;  %656 = vadd.xlane.f32.xlu0 %v655_v5  ;;  %v10712_v3 = vld [vmem:[%s18639_s7] sm:$0xff] }
  0xb7   : > { %619 = vadd.xlane.f32.xlu2 %v618_v7  ;;  %1006 = vmatpush.bf16.msra.mxu1 %v10416_v23 }
  0xb8   : > { %945 = vmatpush.bf16.msra.mxu0 %v10712_v3 }
  0xbe   : > { %659 = vadd.xlane.f32.xlu0 %v658_v10 }
  0xbf   : > { %665 = vadd.xlane.f32.xlu2 %v664_v11 }
 0x111   : > { %v830_v15 = vpop.xlane.xlu2 %829 }
 0x112   : > { %v840_v18 = vmul.f32 %v830_v15, %v11662_v24 }
 0x114   : > { %v11748_v20 = vadd.f32 0.001, %v840_v18 }
 0x116   : > { %11110 = vrsqrt.f32 %v11748_v20  ;;  %vm854_vm3 = vweird.f32 %v11748_v20 }
 0x119   : > { %v839_v29 = vpop.xlane.xlu1 %838  ;;  %v833_v30 = vpop.xlane.xlu0 %832 }
 0x11a   : > { %v843_v31 = vmul.f32 %v839_v29, %v11662_v24  ;;  %v841_v32 = vmul.f32 %v833_v30, %v11662_v24  ;;  %v614_v33 = vpop.xlane.xlu2 %613 }
 0x11b   : > { %v633_v34 = vmul.f32 %v11662_v24, %v614_v33 }
 0x11c   : > { %v11766_v35 = vpop.eup %11110  ;;  %v11768_v36 = vadd.f32 0.001, %v843_v31  ;;  %v845_v37 = vadd.f32 0.001, %v841_v32 }
 0x11d   : > { %v849_v41 = vmul.f32 %v11766_v35, %v11748_v20  ;;  %v11773_v42 = vsub.f32 %v11679_v40, %v633_v34  ;;  %vm855_vm2 = vweird.f32 %v11766_v35  ;;  %v11847_v34 = vld [vmem:[%s18637_s5] ss:$0 sm:$0xff] }
 0x11e   : > { %11112 = vrsqrt.f32 %v845_v37  ;;  %vm864_vm4 = vweird.f32 %v845_v37  ;;  %vm11815_vm5 = vmor %vm854_vm3, %vm855_vm2  ;;  %vm884_vm11 = vweird.f32 %v11768_v36 }
 0x11f   : > { %v850_v43 = vmul.f32 %v11766_v35, %v849_v41  ;;  %v649_v45 = vmul.f32 %v11773_v42, %v11773_v42  ;;  %11114 = vrsqrt.f32 %v11768_v36 }
 0x121   : > { %v851_v47 = vmul.f32 0.5, %v850_v43  ;;  %v617_v48 = vpop.xlane.xlu1 %616  ;;  %v836_v49 = vpop.xlane.xlu0 %835  ;;  %v667_v50 = vsel %vm596_vm0, %v649_v45, 0.0 }
 0x122   : > { %v634_v51 = vmul.f32 %v11662_v24, %v617_v48  ;;  %v842_v53 = vmul.f32 %v836_v49, %v11662_v24  ;;  %668 = vadd.xlane.f32.xlu0 %v667_v50  ;;  %v654_v40 = vpop.xlane.xlu2 %653 }
 0x123   : > { %v676_v54 = vmul.f32 %v654_v40, %v11662_v24  ;;  %v852_v61 = vsub.f32 1.5, %v851_v47 }
 0x124   : > { %v11784_v55 = vsub.f32 %v11696_v52, %v634_v51  ;;  %v11786_v58 = vadd.f32 0.001, %v842_v53  ;;  %v11113_v60 = vpop.eup %11112 }
 0x125   : > { %v11791_v62 = vadd.f32 0.001, %v676_v54  ;;  %v11793_v63 = vpop.eup %11114  ;;  %v859_v0 = vmul.f32 %v11113_v60, %v845_v37  ;;  %v853_v5 = vmul.f32 %v11766_v35, %v852_v61  ;;  %vm865_vm6 = vweird.f32 %v11113_v60  ;;  %v11859_v54 = vld [vmem:[%s18638_s6] ss:$0 sm:$0xff] }
 0x126   : > { %11116 = vrsqrt.f32 %v11786_v58  ;;  %v650_v1 = vmul.f32 %v11784_v55, %v11784_v55  ;;  %v879_v7 = vmul.f32 %v11793_v63, %v11768_v36  ;;  %vm866_vm7 = vmor %vm864_vm4, %vm865_vm6  ;;  %vm885_vm12 = vweird.f32 %v11793_v63 }
 0x127   : > { %11118 = vrsqrt.f32 %v11791_v62  ;;  %v860_v52 = vmul.f32 %v11113_v60, %v859_v0  ;;  %v857_v20 = vsel %vm11815_vm5, %v11766_v35, %v853_v5  ;;  %vm698_vm10 = vweird.f32 %v11791_v62  ;;  %vm11892_vm1 = vmor %vm884_vm11, %vm885_vm12 }
 0x128   : > { %v670_v11 = vsel %vm596_vm0, %v650_v1, 0.0  ;;  %v880_v23 = vmul.f32 %v11793_v63, %v879_v7  ;;  %vm874_vm13 = vweird.f32 %v11786_v58 }
 0x129   : > { %v663_v8 = vpop.xlane.xlu1 %662  ;;  %v657_v9 = vpop.xlane.xlu0 %656  ;;  %v861_v10 = vmul.f32 0.5, %v860_v52  ;;  %671 = vadd.xlane.f32.xlu1 %v670_v11 }
 0x12a   : > { %v679_v12 = vmul.f32 %v663_v8, %v11662_v24  ;;  %v677_v13 = vmul.f32 %v657_v9, %v11662_v24  ;;  %v620_v14 = vpop.xlane.xlu2 %619  ;;  %v881_v35 = vmul.f32 0.5, %v880_v23 }
 0x12b   : > { %v635_v15 = vmul.f32 %v11662_v24, %v620_v14  ;;  %v862_v18 = vsub.f32 1.5, %v861_v10 }
 0x12c   : > { %v11811_v16 = vpop.eup %11116  ;;  %v11819_v19 = vadd.f32 0.001, %v679_v12  ;;  %v11821_v21 = vadd.f32 0.001, %v677_v13  ;;  %v882_v59 = vsub.f32 1.5, %v881_v35 }
 0x12d   : > { %v11823_v22 = vpop.eup %11118  ;;  %v869_v25 = vmul.f32 %v11811_v16, %v11786_v58  ;;  %v11832_v26 = vsub.f32 %v11717_v2, %v635_v15  ;;  %v863_v27 = vmul.f32 %v11113_v60, %v862_v18  ;;  %v888_v2 = vmul.f32 %v857_v20, %v11665_v28  ;;  %v11906_v18 = vld [vmem:[%s18931_s3] ss:$0 sm:$0xff] }
 0x12e   : > { %v693_v29 = vmul.f32 %v11823_v22, %v11791_v62  ;;  %11120 = vrsqrt.f32 %v11819_v19  ;;  %vm699_vm8 = vweird.f32 %v11823_v22  ;;  %vm875_vm9 = vweird.f32 %v11811_v16 }
 0x12f   : > { %v870_v30 = vmul.f32 %v11811_v16, %v869_v25  ;;  %11122 = vrsqrt.f32 %v11821_v21  ;;  %v867_v31 = vsel %vm866_vm7, %v11113_v60, %v863_v27  ;;  %v651_v33 = vmul.f32 %v11832_v26, %v11832_v26  ;;  %vm11877_vm14 = vmor %vm698_vm10, %vm699_vm8 }
 0x130   : > { %v694_v32 = vmul.f32 %v11823_v22, %v693_v29  ;;  %v889_v43 = vmul.f32 %v867_v31, %v11676_v39  ;;  %v895_v53 = vmul.f32 %v11847_v34, %v888_v2  ;;  %v883_v7 = vmul.f32 %v11793_v63, %v882_v59  ;;  %vm11881_vm15 = vmor %vm874_vm13, %vm875_vm9 }
 0x131   : > { %v871_v37 = vmul.f32 0.5, %v870_v30  ;;  %v660_v41 = vpop.xlane.xlu0 %659  ;;  %v673_v48 = vsel %vm596_vm0, %v651_v33, 0.0  ;;  %vm708_vm2 = vweird.f32 %v11821_v21  ;;  %vm728_vm7 = vweird.f32 %v11819_v19 }
 0x132   : > { %v695_v45 = vmul.f32 0.5, %v694_v32  ;;  %v678_v47 = vmul.f32 %v660_v41, %v11662_v24  ;;  %674 = vadd.xlane.f32.xlu2 %v673_v48  ;;  %v896_v40 = vmul.f32 %v11847_v34, %v889_v43  ;;  %v902_v3 = vadd.f32 %v11859_v54, %v895_v53 }
 0x133   : > { %v872_v49 = vsub.f32 1.5, %v871_v37  ;;  %v887_v15 = vsel %vm11892_vm1, %v11793_v63, %v883_v7 }
 0x134   : > { %v11852_v50 = vpop.eup %11120  ;;  %v696_v28 = vsub.f32 1.5, %v695_v45  ;;  %v686_v51 = vadd.f32 0.001, %v678_v47  ;;  %v903_v5 = vadd.f32 %v11859_v54, %v896_v40  ;;  %v891_v27 = vmul.f32 %v887_v15, %v11674_v38 }
 0x135   : > { %v11123_v39 = vpop.eup %11122  ;;  %v723_v61 = vmul.f32 %v11852_v50, %v11819_v19  ;;  %v873_v52 = vmul.f32 %v11811_v16, %v872_v49  ;;  %vm729_vm8 = vweird.f32 %v11852_v50 }
 0x136   : > { %v697_v60 = vmul.f32 %v11823_v22, %v696_v28  ;;  %v703_v0 = vmul.f32 %v11123_v39, %v11821_v21  ;;  %11124 = vrsqrt.f32 %v686_v51  ;;  %v967_v11 = vpack.c.bf16 %v903_v5, %v902_v3  ;;  %vm730_vm10 = vmor %vm728_vm7, %vm729_vm8 }
 0x137   : > { %v724_v36 = vmul.f32 %v11852_v50, %v723_v61  ;;  %v877_v58 = vsel %vm11881_vm15, %v11811_v16, %v873_v52  ;;  %vm709_vm3 = vweird.f32 %v11123_v39  ;;  %vm718_vm5 = vweird.f32 %v686_v51 }
 0x138   : > { %v704_v1 = vmul.f32 %v11123_v39, %v703_v0  ;;  %v701_v9 = vsel %vm11877_vm14, %v11823_v22, %v697_v60  ;;  %10429 = vmatmul.msk.bf16.vlgmr.msra.gmra.mxu1 %vm596_vm0, %v967_v11  ;;  %10431 = vmatmul.msk.bf16.vlgmr.msra.gmra.mxu2 %vm596_vm0, %v967_v11  ;;  %v890_v21 = vmul.f32 %v877_v58, %v11689_v46  ;;  %vm710_vm4 = vmor %vm708_vm2, %vm709_vm3  ;;  %vm1222_vm8 = vcmask 1047556  }
 0x139   : > { %v772_v16 = vmul.f32 %v701_v9, %v11687_v44  ;;  %v725_v22 = vmul.f32 0.5, %v724_v36  ;;  %v11915_v44 = vld [vmem:[%s18636_s4] ss:$0 sm:$0xff]  ;;  %v898_v38 = vmul.f32 %v11847_v34, %v891_v27 }
 0x13a   : > { %v705_v10 = vmul.f32 0.5, %v704_v1  ;;  %v897_v46 = vmul.f32 %v11847_v34, %v890_v21 }
 0x13b   : > { %v783_v30 = vmul.f32 %v11906_v18, %v772_v16  ;;  %v726_v31 = vsub.f32 1.5, %v725_v22  ;;  %v905_v47 = vadd.f32 %v11859_v54, %v898_v38 }
 0x13c   : > { %v11125_v12 = vpop.eup %11124  ;;  %v706_v14 = vsub.f32 1.5, %v705_v10  ;;  %v904_v41 = vadd.f32 %v11859_v54, %v897_v46 }
 0x13d   : > { %v713_v17 = vmul.f32 %v11125_v12, %v686_v51  ;;  %vm719_vm6 = vweird.f32 %v11125_v12  ;;  %v794_v2 = vadd.f32 %v11915_v44, %v783_v30  ;;  %v727_v37 = vmul.f32 %v11852_v50, %v726_v31 }
 0x13e   : > { %v707_v20 = vmul.f32 %v11123_v39, %v706_v14  ;;  %vm720_vm9 = vmor %vm718_vm5, %vm719_vm6  ;;  %v968_v34 = vpack.c.bf16 %v905_v47, %v904_v41 }
 0x13f   : > { %v714_v23 = vmul.f32 %v11125_v12, %v713_v17  ;;  %v731_v19 = vsel %vm730_vm10, %v11852_v50, %v727_v37  ;;  %v666_v50 = vpop.xlane.xlu2 %665  ;;  %vm9181_vm10 = vcmask 392192  }
 0x140   : > { %v711_v25 = vsel %vm710_vm4, %v11123_v39, %v707_v20  ;;  %v775_v49 = vmul.f32 %v731_v19, %v11704_v56 }
 0x141   : > { %v715_v29 = vmul.f32 0.5, %v714_v23  ;;  %v773_v63 = vmul.f32 %v711_v25, %v11706_v57 }
 0x142   : > { %v786_v51 = vmul.f32 %v11906_v18, %v775_v49 }
 0x143   : > { %v716_v32 = vsub.f32 1.5, %v715_v29  ;;  %v784_v33 = vmul.f32 %v11906_v18, %v773_v63 }
 0x144   : > { %v797_v40 = vadd.f32 %v11915_v44, %v786_v51 }
 0x145   : > { %v717_v57 = vmul.f32 %v11125_v12, %v716_v32  ;;  %v795_v35 = vadd.f32 %v11915_v44, %v784_v33 }
 0x147   : > { %v906_v43 = vpack.c.bf16 %v795_v35, %v794_v2  ;;  %v721_v45 = vsel %vm720_vm9, %v11125_v12, %v717_v57  ;;  %vm5108_vm9 = vcmask 130048  }
 0x148   : > { %v774_v48 = vmul.f32 %v721_v45, %v11721_v4  ;;  %10430 = vmatmul.msk.bf16.gmra.mxu1 %vm596_vm0, %v968_v34  ;;  %10432 = vmatmul.msk.bf16.gmra.mxu2 %vm596_vm0, %v968_v34  ;;  %v680_v4 = vmul.f32 %v666_v50, %v11662_v24 }
 0x149   : > { %10409 = vmatmul.msk.bf16.vlgmr.msra.gmra.mxu0 %vm596_vm0, %v906_v43 }
 0x14a   : > { %v785_v28 = vmul.f32 %v11906_v18, %v774_v48  ;;  %v688_v39 = vadd.f32 0.001, %v680_v4 }
 0x14c   : > { %v796_v53 = vadd.f32 %v11915_v44, %v785_v28  ;;  %11126 = vrsqrt.f32 %v688_v39  ;;  %vm738_vm11 = vweird.f32 %v688_v39 }
 0x14e   : > { %v907_v54 = vpack.c.bf16 %v797_v40, %v796_v53 }
 0x152   : > { %v11127_v59 = vpop.eup %11126 }
 0x153   : > { %v733_v60 = vmul.f32 %v11127_v59, %v688_v39  ;;  %vm739_vm12 = vweird.f32 %v11127_v59 }
 0x154   : > { %vm740_vm13 = vmor %vm738_vm11, %vm739_vm12  ;;  %vm9190_vm11 = vcmask 523264   ;;  %vm9199_vm12 = vcmask 654336  }
 0x155   : > { %v734_v61 = vmul.f32 %v11127_v59, %v733_v60 }
 0x157   : > { %v735_v1 = vmul.f32 0.5, %v734_v61 }
 0x159   : > { %10410 = vmatmul.msk.bf16.gmra.mxu0 %vm596_vm0, %v907_v54  ;;  %v736_v3 = vsub.f32 1.5, %v735_v1 }
 0x15b   : > { %v737_v62 = vmul.f32 %v11127_v59, %v736_v3 }
 0x15d   : > { %v741_v11 = vsel %vm740_vm13, %v11127_v59, %v737_v62  ;;  %vm9208_vm13 = vcmask 785408  }
 0x15e   : > { %v776_v15 = vmul.f32 %v741_v11, %v11725_v6 }
 0x160   : > { %v787_v27 = vmul.f32 %v11906_v18, %v776_v15 }
 0x162   : > { %v798_v31 = vadd.f32 %v11915_v44, %v787_v27 }
 0x195   : > { %v669_v56 = vpop.xlane.xlu0 %668 }
 0x196   : > { %v681_v0 = vmul.f32 %v669_v56, %v11662_v24 }
 0x198   : > { %v689_v52 = vadd.f32 0.001, %v681_v0 }
 0x19a   : > { %11128 = vrsqrt.f32 %v689_v52  ;;  %vm748_vm15 = vweird.f32 %v689_v52 }
 0x19c   : > { %v672_v5 = vpop.xlane.xlu1 %671 }
 0x19d   : > { %v682_v7 = vmul.f32 %v672_v5, %v11662_v24 }
 0x19f   : > { %v690_v36 = vadd.f32 0.001, %v682_v7 }
 0x1a0   : > { %v11129_v8 = vpop.eup %11128 }
 0x1a1   : > { %v743_v9 = vmul.f32 %v11129_v8, %v689_v52  ;;  %11130 = vrsqrt.f32 %v690_v36  ;;  %vm749_vm14 = vweird.f32 %v11129_v8  ;;  %vm758_vm2 = vweird.f32 %v690_v36 }
 0x1a2   : > { %vm750_vm1 = vmor %vm748_vm15, %vm749_vm14  ;;  %vm9217_vm14 = vcmask 916480  }
 0x1a3   : > { %v744_v10 = vmul.f32 %v11129_v8, %v743_v9 }
 0x1a5   : > { %v745_v58 = vmul.f32 0.5, %v744_v10  ;;  %v675_v12 = vpop.xlane.xlu2 %674 }
 0x1a6   : > { %v683_v14 = vmul.f32 %v675_v12, %v11662_v24 }
 0x1a7   : > { %v746_v13 = vsub.f32 1.5, %v745_v58  ;;  %v11131_v17 = vpop.eup %11130 }
 0x1a8   : > { %v691_v22 = vadd.f32 0.001, %v683_v14  ;;  %v753_v20 = vmul.f32 %v11131_v17, %v690_v36  ;;  %vm759_vm3 = vweird.f32 %v11131_v17 }
 0x1a9   : > { %v747_v16 = vmul.f32 %v11129_v8, %v746_v13  ;;  %vm760_vm4 = vmor %vm758_vm2, %vm759_vm3  ;;  %v11486_v13 = vmov 1983009808  }
 0x1aa   : > { %11132 = vrsqrt.f32 %v691_v22  ;;  %v754_v23 = vmul.f32 %v11131_v17, %v753_v20  ;;  %vm768_vm6 = vweird.f32 %v691_v22  ;;  %v1227_v14 = vunpack.c.l.s4 %v11486_v13 }
 0x1ab   : > { %v751_v21 = vsel %vm750_vm1, %v11129_v8, %v747_v16 }
 0x1ac   : > { %v777_v25 = vmul.f32 %v751_v21, %v11773_v42  ;;  %v755_v29 = vmul.f32 0.5, %v754_v23  ;;  %v12049_v21 = vunpack.c.0.s8 %v1227_v14 }
 0x1ae   : > { %v788_v63 = vmul.f32 %v11906_v18, %v777_v25  ;;  %v756_v30 = vsub.f32 1.5, %v755_v29  ;;  %18937 = vst [vmem:[#allocation15_spill] sm:$0xff] %v12049_v21 }
 0x1b0   : > { %v799_v6 = vadd.f32 %v11915_v44, %v788_v63  ;;  %v11133_v46 = vpop.eup %11132  ;;  %v757_v32 = vmul.f32 %v11131_v17, %v756_v30 }
 0x1b1   : > { %v763_v33 = vmul.f32 %v11133_v46, %v691_v22  ;;  %vm769_vm5 = vweird.f32 %v11133_v46 }
 0x1b2   : > { %v908_v38 = vpack.c.bf16 %v799_v6, %v798_v31  ;;  %v761_v42 = vsel %vm760_vm4, %v11131_v17, %v757_v32  ;;  %vm770_vm7 = vmor %vm768_vm6, %vm769_vm5  ;;  %v11487_v6 = vmov 1934713408  }
 0x1b3   : > { %v764_v57 = vmul.f32 %v11133_v46, %v763_v33  ;;  %v778_v41 = vmul.f32 %v761_v42, %v11784_v55 }
 0x1b4   : > { %10411 = vmatmul.msk.bf16.gmra.mxu0 %vm596_vm0, %v908_v38 }
 0x1b5   : > { %v765_v2 = vmul.f32 0.5, %v764_v57  ;;  %v11949_v37 = vpop.f32.mrf.mxu1  ;;  %v789_v19 = vmul.f32 %v11906_v18, %v778_v41 }
 0x1b6   : > { %v3104_v30 = vrot.slane %v11949_v37, 4 }
 0x1b7   : > { %v766_v35 = vsub.f32 1.5, %v765_v2  ;;  %v800_v49 = vadd.f32 %v11915_v44, %v789_v19 }
 0x1b9   : > { %v767_v43 = vmul.f32 %v11133_v46, %v766_v35 }
 0x1bb   : > { %v771_v45 = vsel %vm770_vm7, %v11133_v46, %v767_v43  ;;  %v11982_v54 = vpop.f32.mrf.mxu2  ;;  %v1275_v46 = vunpack.c.l.s4 %v11487_v6 }
 0x1bc   : > { %v779_v47 = vmul.f32 %v771_v45, %v11832_v26 }
 0x1bd   : > { %v11955_v48 = vpop.f32.mrf.mxu1 }
 0x1be   : > { %v790_v34 = vmul.f32 %v11906_v18, %v779_v47  ;;  %v10825_v51 = vpack.i.bf16 %v11955_v48, %v11949_v37  ;;  %v3216_v32 = vrot.slane %v11955_v48, 4 }
 0x1c0   : > { %v801_v28 = vadd.f32 %v11915_v44, %v790_v34  ;;  %10826 = vrot.lane.b32.xlu1 %v10825_v51, %s11479_s0  ;;  %10831 = vrot.lane.b32.xlu0 %v10825_v51, %s11480_s19 }
 0x1c1   : > { %10821 = vrot.lane.b32.xlu2 %v10825_v51, %s18907_s20 }
 0x1c2   : > { %v909_v55 = vpack.c.bf16 %v801_v28, %v800_v49  ;;  %v12080_v28 = vunpack.c.0.s8 %v1275_v46 }
 0x1c3   : > { %v11988_v50 = vpop.f32.mrf.mxu2 }
 0x1c4   : > { %10412 = vmatmul.msk.bf16.gmra.mxu0 %vm596_vm0, %v909_v55  ;;  %v10895_v4 = vpack.i.bf16 %v11988_v50, %v11982_v54  ;;  %18941 = vst [vmem:[#allocation18_spill] sm:$0xff] %v12080_v28 }
 0x1c5   : > { %v11994_v39 = vpop.f32.mrf.mxu1 }
 0x1c6   : > { %v11965_v26 = vpop.f32.mrf.mxu0 }
 0x1c7   : > { %18932 = vst [vmem:[#allocation11_spill] sm:$0xff] %v11965_v26  ;;  %v11973_v44 = vmul.f32 0.25, %v11965_v26  ;;  %v18974_v26 = vrot.slane %v11988_v50, 4 }
 0x1c8   : > { %10841 = vrot.lane.b32.xlu1 %v10825_v51, %s11482_s22  ;;  %10846 = vrot.lane.b32.xlu0 %v10825_v51, %s11483_s23 }
 0x1c9   : > { %10836 = vrot.lane.b32.xlu2 %v10825_v51, %s18655_s29 }
 0x1cb   : > { %v12027_v3 = vpop.f32.mrf.mxu2 }
 0x1cd   : > { %v12000_v59 = vpop.f32.mrf.mxu1 }
 0x1ce   : > { %v11970_v18 = vpop.f32.mrf.mxu0  ;;  %v10925_v60 = vpack.i.bf16 %v12000_v59, %v11994_v39 }
 0x1cf   : > { %18933 = vst [vmem:[#allocation12_spill] sm:$0xff] %v11970_v18  ;;  %v11976_v53 = vmul.f32 0.25, %v11970_v18 }
 0x1d1   : > { %v10860_v40 = vpack.i.bf16 %v11976_v53, %v11973_v44  ;;  %10851 = vrot.lane.b32.xlu2 %v10825_v51, %s11485_s30 }
 0x1d3   : > { %10861 = vrot.lane.b32.xlu0 %v10860_v40, %s11479_s0  ;;  %10856 = vrot.lane.b32.xlu1 %v10860_v40, %s18907_s20  ;;  %v12033_v5 = vpop.f32.mrf.mxu2 }
 0x1d4   : > { %v11000_v7 = vpack.i.bf16 %v12033_v5, %v12027_v3 }
 0x1d6   : > { %v12007_v61 = vpop.f32.mrf.mxu0 }
 0x1d7   : > { %18934 = vst [vmem:[#allocation13_spill] sm:$0xff] %v12007_v61  ;;  %v12021_v52 = vmul.f32 0.25, %v12007_v61 }
 0x1d9   : > { %10866 = vrot.lane.b32.xlu2 %v10860_v40, %s11480_s19 }
 0x1db   : > { %10876 = vrot.lane.b32.xlu0 %v10860_v40, %s11482_s22  ;;  %10871 = vrot.lane.b32.xlu1 %v10860_v40, %s18655_s29 }
 0x1de   : > { %v12012_v56 = vpop.f32.mrf.mxu0 }
 0x1df   : > { %18935 = vst [vmem:[#allocation14_spill] sm:$0xff] %v12012_v56  ;;  %v12018_v0 = vmul.f32 0.25, %v12012_v56 }
 0x1e1   : > { %10881 = vrot.lane.b32.xlu2 %v10860_v40, %s11483_s23  ;;  %v10970_v1 = vpack.i.bf16 %v12018_v0, %v12021_v52 }
 0x1e3   : > { %10896 = vrot.lane.b32.xlu0 %v10895_v4, %s18907_s20  ;;  %10886 = vrot.lane.b32.xlu1 %v10860_v40, %s11485_s30 }
 0x1e9   : > { %10891 = vrot.lane.b32.xlu2 %v10895_v4, %s11480_s19 }
 0x1eb   : > { %10911 = vrot.lane.b32.xlu0 %v10895_v4, %s11483_s23  ;;  %10906 = vrot.lane.b32.xlu1 %v10895_v4, %s11482_s22 }
 0x1f1   : > { %10901 = vrot.lane.b32.xlu2 %v10895_v4, %s11479_s0 }
 0x1f3   : > { %10926 = vrot.lane.b32.xlu0 %v10925_v60, %s18907_s20  ;;  %10921 = vrot.lane.b32.xlu1 %v10895_v4, %s11485_s30 }
 0x1f9   : > { %10916 = vrot.lane.b32.xlu2 %v10895_v4, %s18655_s29 }
 0x1fb   : > { %10941 = vrot.lane.b32.xlu0 %v10925_v60, %s18655_s29  ;;  %10931 = vrot.lane.b32.xlu1 %v10925_v60, %s11479_s0 }
 0x201   : > { %10936 = vrot.lane.b32.xlu2 %v10925_v60, %s11480_s19 }
 0x203   : > { %10956 = vrot.lane.b32.xlu0 %v10925_v60, %s11485_s30  ;;  %10951 = vrot.lane.b32.xlu1 %v10925_v60, %s11483_s23 }
 0x209   : > { %10946 = vrot.lane.b32.xlu2 %v10925_v60, %s11482_s22 }
 0x20b   : > { %10971 = vrot.lane.b32.xlu1 %v10970_v1, %s11479_s0  ;;  %10961 = vrot.lane.b32.xlu0 %v10970_v1, %s11480_s19 }
 0x211   : > { %10966 = vrot.lane.b32.xlu2 %v10970_v1, %s18907_s20 }
 0x213   : > { %10986 = vrot.lane.b32.xlu1 %v10970_v1, %s18655_s29  ;;  %10976 = vrot.lane.b32.xlu0 %v10970_v1, %s11482_s22  ;;  %s580_s29 = scalar_lea.vmem %s18936_s2, %s11630_s21  ;;  %s18940_s21 = smov 80  }
 0x214   : > { %v5695_v62 = vld [vmem:[%s580_s29] sm:$0x1]  ;;  %s565_s29 = sand.u32 1, %s11468_s25  }
 0x215   : > { %v5696_v36 = vsub.f32 1.0, %v5695_v62 }
 0x217   : > { %v5697_v17 = vmul.f32 1e+09, %v5696_v36 }
 0x219   : > { %10981 = vrot.lane.b32.xlu2 %v10970_v1, %s11483_s23  ;;  %v12056_v63 = vperm.slane %v5697_v17, 0 }
 0x21b   : > { %11001 = vrot.lane.b32.xlu1 %v11000_v7, %s18907_s20  ;;  %10991 = vrot.lane.b32.xlu0 %v10970_v1, %s11485_s30  ;;  %v10822_v8 = vpop.permute.xlu2 %10821  ;;  %18938 = vst [vmem:[#allocation16_spill] sm:$0xff] %v12056_v63 }
 0x21c   : > { %v10824_v11 = vunpack.i.h.bf16 %v10822_v8  ;;  %v10823_v58 = vunpack.i.l.bf16 %v10822_v8 }
 0x21e   : > { %v3228_v16 = vrot.slane %v10824_v11, 4  ;;  %v3116_v22 = vrot.slane %v10823_v58, 4 }
 0x221   : > { %10996 = vrot.lane.b32.xlu2 %v11000_v7, %s11480_s19 }
 0x223   : > { %11026 = vrot.lane.b32.xlu1 %v11000_v7, %s11485_s30  ;;  %11006 = vrot.lane.b32.xlu0 %v11000_v7, %s11479_s0  ;;  %v10837_v9 = vpop.permute.xlu2 %10836 }
 0x224   : > { %v10838_v10 = vunpack.i.l.bf16 %v10837_v9  ;;  %v10839_v12 = vunpack.i.h.bf16 %v10837_v9 }
 0x226   : > { %v3114_v15 = vrot.slane %v10838_v10, 4  ;;  %v3226_v20 = vrot.slane %v10839_v12, 4  ;;  %v3117_v25 = vsel %vm1222_vm8, %v10838_v10, %v3116_v22  ;;  %v3229_v27 = vsel %vm1222_vm8, %v10839_v12, %v3228_v16 }
 0x227   : > { %v3125_v57 = vperm.slane %v3117_v25, %v12049_v21  ;;  %v12067_v42 = vperm.slane %v3229_v27, %v12049_v21 }
 0x228   : > { %v3115_v23 = vsel %vm1222_vm8, %v3114_v15, %v10823_v58  ;;  %v3227_v31 = vsel %vm1222_vm8, %v3226_v20, %v10824_v11 }
 0x229   : > { %11011 = vrot.lane.b32.xlu2 %v11000_v7, %s11482_s22  ;;  %v12063_v38 = vperm.slane %v3115_v23, %v12049_v21  ;;  %v3233_v45 = vperm.slane %v3227_v31, %v12049_v21  ;;  %v3162_v60 = vrot.slane %v3125_v57, 4  ;;  %v3274_v1 = vrot.slane %v12067_v42, 4 }
 0x22b   : > { %11016 = vrot.lane.b32.xlu0 %v11000_v7, %s11483_s23  ;;  %v12054_v29 = vpop.permute.xlu2 %10851  ;;  %v3150_v4 = vrot.slane %v12063_v38, 4  ;;  %v3262_v12 = vrot.slane %v3233_v45, 4 }
 0x22c   : > { %v10854_v47 = vunpack.i.h.bf16 %v12054_v29  ;;  %v10853_v8 = vunpack.i.l.bf16 %v12054_v29 }
 0x22e   : > { %v3250_v13 = vrot.slane %v10854_v47, 4  ;;  %v3138_v23 = vrot.slane %v10853_v8, 4 }
 0x231   : > { %v12075_v19 = vpop.f32.mrf.mxu0 }
 0x232   : > { %18939 = vst [vmem:[#allocation17_spill] sm:$0xff] %v12075_v19  ;;  %v12088_v62 = vpop.permute.xlu0 %10831  ;;  %v12103_v25 = vmul.f32 0.25, %v12075_v19 }
 0x233   : > { %11021 = vrot.lane.b32.xlu0 %v11000_v7, %s18940_s21  ;;  %v10827_v7 = vpop.permute.xlu1 %10826  ;;  %v10834_v10 = vunpack.i.h.bf16 %v12088_v62  ;;  %v10833_v11 = vunpack.i.l.bf16 %v12088_v62  ;;  %v12092_v58 = vpop.permute.xlu2 %10866 }
 0x234   : > { %v10829_v9 = vunpack.i.h.bf16 %v10827_v7  ;;  %v10828_v36 = vunpack.i.l.bf16 %v10827_v7  ;;  %v18657_v14 = vunpack.i.h.bf16 %v12092_v58  ;;  %v18658_v15 = vunpack.i.l.bf16 %v12092_v58  ;;  %18942 = vst [vmem:[#allocation19_spill] sm:$0xff] %v12103_v25 }
 0x236   : > { %v3214_v17 = vrot.slane %v10829_v9, 4  ;;  %v3102_v16 = vrot.slane %v10828_v36, 4  ;;  %v3105_v22 = vsel %vm1222_vm8, %v10828_v36, %v3104_v30  ;;  %v3217_v20 = vsel %vm1222_vm8, %v10829_v9, %v3216_v32 }
 0x237   : > { %v3113_v27 = vperm.slane %v3105_v22, %v12049_v21  ;;  %v3225_v31 = vperm.slane %v3217_v20, %v12049_v21  ;;  %v3240_v30 = vrot.slane %v10834_v10, 4  ;;  %v3128_v32 = vrot.slane %v10833_v11, 4 }
 0x238   : > { %v3215_v6 = vsel %vm1222_vm8, %v3214_v17, %v11955_v48  ;;  %v3103_v46 = vsel %vm1222_vm8, %v3102_v16, %v11949_v37  ;;  %v12123_v37 = vrot.slane %v18657_v14, 4  ;;  %v12127_v17 = vrot.slane %v18658_v15, 4 }
 0x239   : > { %v3221_v7 = vperm.slane %v3215_v6, %v12049_v21  ;;  %v3109_v9 = vperm.slane %v3103_v46, %v12049_v21  ;;  %v3163_v36 = vsel %vm1222_vm8, %v3162_v60, %v3113_v27  ;;  %v3164_v22 = vrot.slane %v3113_v27, 4  ;;  %v12131_v60 = vpop.f32.mrf.mxu0 }
 0x23a   : > { %v12119_v20 = vperm.slane %v3163_v36, %v12080_v28  ;;  %v3276_v48 = vrot.slane %v3225_v31, 4  ;;  %18944 = vst [vmem:[#allocation21_spill] sm:$0xff] %v12131_v60  ;;  %v3275_v55 = vsel %vm1222_vm8, %v3274_v1, %v3225_v31  ;;  %v12157_v31 = vmul.f32 0.25, %v12131_v60 }
 0x23b   : > { %v3264_v16 = vrot.slane %v3221_v7, 4  ;;  %v3151_v6 = vsel %vm1222_vm8, %v3150_v4, %v3109_v9  ;;  %v3152_v49 = vrot.slane %v3109_v9, 4  ;;  %v3165_v46 = vsel %vm1222_vm8, %v3125_v57, %v3164_v22  ;;  %v10842_v51 = vpop.permute.xlu1 %10841  ;;  %v10847_v22 = vpop.permute.xlu0 %10846 }
 0x23c   : > { %18943 = vst [vmem:[#allocation20_spill] sm:$0xff] %v12119_v20  ;;  %v12134_v27 = vperm.slane %v3151_v6, %v12080_v28  ;;  %v12137_v36 = vperm.slane %v3165_v46, %v12080_v28  ;;  %v3263_v40 = vsel %vm1222_vm8, %v3262_v12, %v3221_v7  ;;  %v3277_v9 = vsel %vm1222_vm8, %v12067_v42, %v3276_v48 }
 0x23d   : > { %v3153_v43 = vsel %vm1222_vm8, %v12063_v38, %v3152_v49  ;;  %v3265_v4 = vsel %vm1222_vm8, %v3233_v45, %v3264_v16  ;;  %v12145_v57 = vperm.slane %v3263_v40, %v12080_v28  ;;  %18949 = vst [vmem:[#allocation26_spill] sm:$0xff] %v12157_v31  ;;  %v12162_v49 = vperm.slane %v3275_v55, %v12080_v28 }
 0x23e   : > { %18945 = vst [vmem:[#allocation22_spill] sm:$0xff] %v12134_v27  ;;  %v12150_v6 = vperm.slane %v3153_v43, %v12080_v28  ;;  %v12154_v1 = vperm.slane %v3265_v4, %v12080_v28  ;;  %v3212_v45 = vrot.slane %v12137_v36, 4  ;;  %v10844_v42 = vunpack.i.h.bf16 %v10842_v51 }
 0x23f   : > { %18946 = vst [vmem:[#allocation23_spill] sm:$0xff] %v12145_v57  ;;  %v12165_v40 = vperm.slane %v3277_v9, %v12080_v28  ;;  %v10843_v7 = vunpack.i.l.bf16 %v10842_v51  ;;  %v10849_v48 = vunpack.i.h.bf16 %v10847_v22  ;;  %v10848_v43 = vunpack.i.l.bf16 %v10847_v22 }
 0x240   : > { %18947 = vst [vmem:[#allocation24_spill] sm:$0xff] %v12150_v6  ;;  %v3204_v16 = vrot.slane %v12150_v6, 4  ;;  %v3316_v46 = vrot.slane %v12154_v1, 4  ;;  %v3252_v4 = vrot.slane %v10844_v42, 4  ;;  %v3251_v38 = vsel %vm1222_vm8, %v3250_v13, %v10844_v42 }
 0x241   : > { %18948 = vst [vmem:[#allocation25_spill] sm:$0xff] %v12154_v1  ;;  %v3139_v34 = vsel %vm1222_vm8, %v3138_v23, %v10843_v7  ;;  %v3140_v33 = vrot.slane %v10843_v7, 4  ;;  %v3257_v55 = vperm.slane %v3251_v38, %v12049_v21  ;;  %v3238_v41 = vrot.slane %v10849_v48, 4 }
 0x242   : > { %18950 = vst [vmem:[#allocation27_spill] sm:$0xff] %v12162_v49  ;;  %v3145_v9 = vperm.slane %v3139_v34, %v12049_v21  ;;  %v3253_v51 = vsel %vm1222_vm8, %v10854_v47, %v3252_v4  ;;  %v3241_v2 = vsel %vm1222_vm8, %v10849_v48, %v3240_v30  ;;  %v3126_v7 = vrot.slane %v10848_v43, 4 }
 0x243   : > { %v3141_v35 = vsel %vm1222_vm8, %v10853_v8, %v3140_v33  ;;  %v3261_v13 = vperm.slane %v3253_v51, %v12049_v21  ;;  %v3286_v23 = vrot.slane %v3257_v55, 4  ;;  %v3239_v38 = vsel %vm1222_vm8, %v3238_v41, %v10834_v10  ;;  %v10882_v8 = vpop.permute.xlu2 %10881 }
 0x244   : > { %v3149_v34 = vperm.slane %v3141_v35, %v12049_v21  ;;  %v3174_v42 = vrot.slane %v3145_v9, 4  ;;  %v3129_v47 = vsel %vm1222_vm8, %v10848_v43, %v3128_v32  ;;  %v3245_v29 = vperm.slane %v3239_v38, %v12049_v21 }
 0x245   : > { %v3298_v22 = vrot.slane %v3261_v13, 4  ;;  %v3137_v30 = vperm.slane %v3129_v47, %v12049_v21  ;;  %v3249_v33 = vperm.slane %v3241_v2, %v12049_v21  ;;  %v3320_v48 = vrot.slane %v12162_v49, 4 }
 0x246   : > { %v3324_v4 = vrot.slane %v12165_v40, 4  ;;  %v3186_v51 = vrot.slane %v3149_v34, 4  ;;  %v3127_v35 = vsel %vm1222_vm8, %v3126_v7, %v10833_v11  ;;  %v3287_v32 = vsel %vm1222_vm8, %v3286_v23, %v3245_v29 }
 0x247   : > { %v3133_v41 = vperm.slane %v3127_v35, %v12049_v21  ;;  %v3188_v10 = vrot.slane %v3137_v30, 4  ;;  %v3288_v43 = vrot.slane %v3245_v29, 4  ;;  %v12199_v2 = vperm.slane %v3287_v32, %v12080_v28 }
 0x248   : > { %v3187_v38 = vsel %vm1222_vm8, %v3186_v51, %v3137_v30  ;;  %v3299_v47 = vsel %vm1222_vm8, %v3298_v22, %v3249_v33  ;;  %v3300_v14 = vrot.slane %v3249_v33, 4  ;;  %v10883_v51 = vunpack.i.l.bf16 %v10882_v8 }
 0x249   : > { %18951 = vst [vmem:[#allocation28_spill] sm:$0xff] %v12199_v2  ;;  %v3175_v15 = vsel %vm1222_vm8, %v3174_v42, %v3133_v41  ;;  %v3176_v12 = vrot.slane %v3133_v41, 4  ;;  %v3189_v62 = vsel %vm1222_vm8, %v3149_v34, %v3188_v10  ;;  %v12205_v11 = vperm.slane %v3187_v38, %v12080_v28 }
 0x24a   : > { %v12208_v7 = vperm.slane %v3175_v15, %v12080_v28  ;;  %v3197_v23 = vperm.slane %v3189_v62, %v12080_v28  ;;  %v3289_v30 = vsel %vm1222_vm8, %v3257_v55, %v3288_v43  ;;  %v3301_v29 = vsel %vm1222_vm8, %v3261_v13, %v3300_v14 }
 0x24b   : > { %18952 = vst [vmem:[#allocation29_spill] sm:$0xff] %v12205_v11  ;;  %v3177_v22 = vsel %vm1222_vm8, %v3145_v9, %v3176_v12  ;;  %v12215_v33 = vperm.slane %v3289_v30, %v12080_v28  ;;  %v10884_v42 = vunpack.i.h.bf16 %v10882_v8  ;;  %v18956_v15 = vrot.slane %v12119_v20, 4 }
 0x24c   : > { %18953 = vst [vmem:[#allocation30_spill] sm:$0xff] %v12208_v7  ;;  %v12218_v34 = vperm.slane %v3177_v22, %v12080_v28  ;;  %v3210_v55 = vrot.slane %v3197_v23, 4  ;;  %v12229_v12 = vsel %vm1222_vm8, %v3197_v23, %v3212_v45  ;;  %v12232_v9 = vperm.slane %v3299_v47, %v12080_v28  ;;  %v12254_v23 = vpop.permute.xlu2 %10891  ;;  %v10862_v22 = vpop.permute.xlu0 %10861 }
 0x24d   : > { %18954 = vst [vmem:[#allocation31_spill] sm:$0xff] %v12215_v33  ;;  %v12225_v41 = vsel %vm1222_vm8, %v12205_v11, %v18956_v15  ;;  %v3309_v13 = vperm.slane %v3301_v29, %v12080_v28  ;;  %v12248_v45 = vsel %vm1222_vm8, %v12215_v33, %v3316_v46  ;;  %v12262_v15 = vpop.permute.xlu1 %10856  ;;  %v1246_v47 = vrot.slane %v10883_v51, 4 }
 0x24e   : > { %18955 = vst [vmem:[#allocation32_spill] sm:$0xff] %v12218_v34  ;;  %v12238_v10 = vsel %vm1222_vm8, %v12218_v34, %v3204_v16  ;;  %v12244_v38 = vsel %vm1222_vm8, %v3210_v55, %v12137_v36  ;;  %v12258_v16 = vsel %vm1222_vm8, %v12232_v9, %v3320_v48  ;;  %v1358_v55 = vrot.slane %v10884_v42, 4  ;;  %v12276_v36 = vpop.f32.mrf.mxu0 }
 0x24f   : > { %18957 = vst [vmem:[#allocation33_spill] sm:$0xff] %v12225_v41  ;;  %v12252_v62 = vsel %vm1222_vm8, %v3309_v13, %v3324_v4  ;;  %v3322_v30 = vrot.slane %v3309_v13, 4  ;;  %v1249_v4 = vsel %vm1222_vm8, %v10883_v51, %v12127_v17  ;;  %v1361_v48 = vsel %vm1222_vm8, %v10884_v42, %v12123_v37 }
 0x250   : > { %18958 = vst [vmem:[#allocation34_spill] sm:$0xff] %v12229_v12  ;;  %v12268_v32 = vperm.slane %v1249_v4, %v12049_v21  ;;  %v12274_v13 = vpack.i.bf16 %v12157_v31, %v12103_v25  ;;  %v18966_v29 = vunpack.i.l.bf16 %v12092_v58  ;;  %v18967_v43 = vunpack.i.h.bf16 %v12092_v58 }
 0x251   : > { %18959 = vst [vmem:[#allocation35_spill] sm:$0xff] %v12232_v9  ;;  %v12285_v51 = vperm.slane %v1361_v48, %v12049_v21  ;;  %v12289_v37 = vsel %vm1222_vm8, %v3322_v30, %v12165_v40  ;;  %v18661_v40 = vunpack.i.h.bf16 %v12254_v23  ;;  %v18970_v42 = vrot.slane %v11976_v53, 4 }
 0x252   : > { %18960 = vst [vmem:[#allocation36_spill] sm:$0xff] %v12238_v10  ;;  %v1247_v46 = vsel %vm1222_vm8, %v1246_v47, %v18966_v29  ;;  %v1359_v17 = vsel %vm1222_vm8, %v1358_v55, %v18967_v43  ;;  %11041 = vrot.lane.b32.xlu0 %v12274_v13, %s11479_s0  ;;  %11036 = vrot.lane.b32.xlu1 %v12274_v13, %s18907_s20  ;;  %v10864_v47 = vunpack.i.h.bf16 %v10862_v22  ;;  %v10863_v55 = vunpack.i.l.bf16 %v10862_v22 }
 0x253   : > { %18961 = vst [vmem:[#allocation37_spill] sm:$0xff] %v12244_v38  ;;  %v12293_v4 = vperm.slane %v1247_v46, %v12049_v21  ;;  %v12296_v35 = vperm.slane %v1359_v17, %v12049_v21  ;;  %11031 = vrot.lane.b32.xlu2 %v12274_v13, %s11480_s19  ;;  %v12310_v46 = vmul.f32 0.25, %v12276_v36  ;;  %v10859_v14 = vunpack.i.h.bf16 %v12262_v15 }
 0x254   : > { %18962 = vst [vmem:[#allocation38_spill] sm:$0xff] %v12248_v45  ;;  %v1334_v17 = vrot.slane %v10864_v47, 4  ;;  %v1337_v8 = vsel %vm1222_vm8, %v10864_v47, %v18970_v42  ;;  %v12319_v58 = vrot.slane %v18661_v40, 4  ;;  %v1221_v30 = vrot.slane %v10863_v55, 4 }
 0x255   : > { %18963 = vst [vmem:[#allocation39_spill] sm:$0xff] %v12252_v62  ;;  %v18971_v29 = vrot.slane %v11973_v44, 4  ;;  %v12325_v22 = vperm.slane %v1337_v8, %v12049_v21  ;;  %v18972_v48 = vunpack.i.l.bf16 %v12254_v23  ;;  %v10858_v40 = vunpack.i.l.bf16 %v12262_v15  ;;  %v10872_v8 = vpop.permute.xlu1 %10871 }
 0x256   : > { %18964 = vst [vmem:[#allocation40_spill] sm:$0xff] %v12258_v16  ;;  %v1335_v42 = vsel %vm1222_vm8, %v1334_v17, %v11976_v53  ;;  %v1348_v56 = vrot.slane %v10859_v14, 4  ;;  %v12346_v15 = vpop.f32.mrf.mxu0  ;;  %v18975_v25 = vrot.slane %v11982_v54, 4  ;;  %v10873_v45 = vunpack.i.l.bf16 %v10872_v8 }
 0x257   : > { %18965 = vst [vmem:[#allocation41_spill] sm:$0xff] %v12276_v36  ;;  %v1225_v43 = vsel %vm1222_vm8, %v10863_v55, %v18971_v29  ;;  %v12329_v24 = vrot.slane %v18972_v48, 4  ;;  %v10902_v36 = vpop.permute.xlu2 %10901  ;;  %v1341_v60 = vperm.slane %v1335_v42, %v12049_v21  ;;  %v1223_v29 = vsel %vm1222_vm8, %v1221_v30, %v11973_v44  ;;  %v12338_v55 = vpop.permute.xlu0 %10876 }
 0x258   : > { %18968 = vst [vmem:[#allocation42_spill] sm:$0xff] %v12289_v37  ;;  %v1233_v47 = vperm.slane %v1225_v43, %v12049_v21  ;;  %v1229_v19 = vperm.slane %v1223_v29, %v12049_v21  ;;  %v1396_v48 = vrot.slane %v12325_v22, 4  ;;  %v1236_v53 = vrot.slane %v10858_v40, 4 }
 0x259   : > { %18969 = vst [vmem:[#allocation43_spill] sm:$0xff] %v12310_v46  ;;  %v10904_v43 = vunpack.i.h.bf16 %v10902_v36  ;;  %v10903_v44 = vunpack.i.l.bf16 %v10902_v36  ;;  %v1384_v30 = vrot.slane %v1341_v60, 4  ;;  %v10874_v29 = vunpack.i.h.bf16 %v10872_v8 }
 0x25a   : > { %v1284_v61 = vrot.slane %v1233_v47, 4  ;;  %11056 = vrot.lane.b32.xlu0 %v12274_v13, %s18940_s21  ;;  %11051 = vrot.lane.b32.xlu1 %v12274_v13, %s11483_s23  ;;  %18973 = vst [vmem:[#allocation44_spill] sm:$0xff] %v12346_v15  ;;  %v1272_v36 = vrot.slane %v1229_v19, 4  ;;  %v12359_v16 = vmul.f32 0.25, %v12346_v15  ;;  %v18977_v15 = vunpack.i.h.bf16 %v12338_v55 }
 0x25b   : > { %11046 = vrot.lane.b32.xlu2 %v12274_v13, %s11482_s22  ;;  %v4198_v18 = vrot.slane %v10904_v43, 4  ;;  %v4201_v63 = vsel %vm1222_vm8, %v10904_v43, %v18974_v26  ;;  %v4086_v31 = vrot.slane %v10903_v44, 4  ;;  %v4089_v62 = vsel %vm1222_vm8, %v10903_v44, %v18975_v25 }
 0x25c   : > { %18976 = vst [vmem:[#allocation45_spill] sm:$0xff] %v12359_v16  ;;  %v12362_v37 = vperm.slane %v4201_v63, %v12049_v21  ;;  %v12365_v42 = vperm.slane %v4089_v62, %v12049_v21  ;;  %v1346_v43 = vrot.slane %v10874_v29, 4  ;;  %v1372_v63 = vrot.slane %v18977_v15, 4 }
 0x25d   : > { %v4199_v17 = vsel %vm1222_vm8, %v4198_v18, %v11988_v50  ;;  %v4087_v26 = vsel %vm1222_vm8, %v4086_v31, %v11982_v54  ;;  %v18978_v12 = vunpack.i.l.bf16 %v12338_v55  ;;  %v1234_v41 = vrot.slane %v10873_v45, 4 }
 0x25e   : > { %v12372_v25 = vperm.slane %v4199_v17, %v12049_v21  ;;  %v1237_v18 = vsel %vm1222_vm8, %v10873_v45, %v1236_v53  ;;  %v1347_v50 = vsel %vm1222_vm8, %v1346_v43, %v10859_v14  ;;  %v1349_v54 = vsel %vm1222_vm8, %v10874_v29, %v1348_v56 }
 0x25f   : > { %v12379_v62 = vrot.slane %v18978_v12, 4  ;;  %v12385_v31 = vperm.slane %v4087_v26, %v12049_v21  ;;  %v1245_v17 = vperm.slane %v1237_v18, %v12049_v21  ;;  %v1353_v15 = vperm.slane %v1347_v50, %v12049_v21 }
 0x260   : > { %v1235_v44 = vsel %vm1222_vm8, %v1234_v41, %v10858_v40  ;;  %v1357_v12 = vperm.slane %v1349_v54, %v12049_v21  ;;  %v12394_v45 = vpack.i.bf16 %v12359_v16, %v12310_v46  ;;  %v4248_v54 = vrot.slane %v12372_v25, 4 }
 0x261   : > { %v1241_v14 = vperm.slane %v1235_v44, %v12049_v21  ;;  %v1282_v56 = vrot.slane %v1245_v17, 4  ;;  %v1285_v53 = vsel %vm1222_vm8, %v1245_v17, %v1284_v61  ;;  %v1382_v29 = vrot.slane %v1353_v15, 4 }
 0x262   : > { %v12399_v26 = vperm.slane %v1285_v53, %v12080_v28  ;;  %v1385_v43 = vsel %vm1222_vm8, %v1353_v15, %v1384_v30  ;;  %v1394_v18 = vrot.slane %v1357_v12, 4  ;;  %v1397_v41 = vsel %vm1222_vm8, %v1357_v12, %v1396_v48  ;;  %11071 = vrot.lane.b32.xlu0 %v12394_v45, %s18907_s20  ;;  %11066 = vrot.lane.b32.xlu1 %v12394_v45, %s11480_s19 }
 0x263   : > { %11061 = vrot.lane.b32.xlu2 %v12274_v13, %s11485_s30  ;;  %v1270_v40 = vrot.slane %v1241_v14, 4  ;;  %v1273_v44 = vsel %vm1222_vm8, %v1241_v14, %v1272_v36  ;;  %v1283_v61 = vsel %vm1222_vm8, %v1282_v56, %v1233_v47  ;;  %v1383_v50 = vsel %vm1222_vm8, %v1382_v29, %v1341_v60  ;;  %v10917_v36 = vpop.permute.xlu2 %10916  ;;  %v12435_v29 = vpop.permute.xlu1 %10886 }
 0x264   : > { %v12412_v30 = vperm.slane %v1273_v44, %v12080_v28  ;;  %v12415_v48 = vperm.slane %v1283_v61, %v12080_v28  ;;  %v12418_v13 = vperm.slane %v1383_v50, %v12080_v28  ;;  %v12422_v15 = vperm.slane %v1385_v43, %v12080_v28 }
 0x265   : > { %v1271_v17 = vsel %vm1222_vm8, %v1270_v40, %v1229_v19  ;;  %v1395_v47 = vsel %vm1222_vm8, %v1394_v18, %v12325_v22  ;;  %v12427_v60 = vperm.slane %v1397_v41, %v12080_v28  ;;  %v4136_v12 = vrot.slane %v12385_v31, 4  ;;  %v10897_v19 = vpop.permute.xlu0 %10896 }
 0x266   : > { %18979 = vst [vmem:[#allocation46_spill] sm:$0xff] %v12418_v13  ;;  %v12431_v14 = vperm.slane %v1271_v17, %v12080_v28  ;;  %v12439_v22 = vperm.slane %v1395_v47, %v12080_v28  ;;  %v10919_v44 = vunpack.i.h.bf16 %v10917_v36  ;;  %v10918_v61 = vunpack.i.l.bf16 %v10917_v36 }
 0x267   : > { %v10899_v50 = vunpack.i.h.bf16 %v10897_v19  ;;  %v10898_v17 = vunpack.i.l.bf16 %v10897_v19  ;;  %v10889_v53 = vunpack.i.h.bf16 %v12435_v29  ;;  %v10888_v43 = vunpack.i.l.bf16 %v12435_v29 }
 0x268   : > { %18980 = vst [vmem:[#allocation47_spill] sm:$0xff] %v12431_v14  ;;  %v4210_v56 = vrot.slane %v10919_v44, 4  ;;  %v4098_v47 = vrot.slane %v10918_v61, 4 }
 0x269   : > { %v4212_v18 = vrot.slane %v10899_v50, 4  ;;  %v4100_v16 = vrot.slane %v10898_v17, 4  ;;  %v1373_v41 = vsel %vm1222_vm8, %v10889_v53, %v1372_v63  ;;  %v1370_v38 = vrot.slane %v10889_v53, 4 }
 0x26a   : > { %v4099_v36 = vsel %vm1222_vm8, %v4098_v47, %v10898_v17  ;;  %v4211_v46 = vsel %vm1222_vm8, %v4210_v56, %v10899_v50  ;;  %11086 = vrot.lane.b32.xlu0 %v12394_v45, %s11483_s23  ;;  %v1381_v56 = vperm.slane %v1373_v41, %v12049_v21  ;;  %v1258_v53 = vrot.slane %v10888_v43, 4  ;;  %11081 = vrot.lane.b32.xlu1 %v12394_v45, %s11482_s22 }
 0x26b   : > { %11076 = vrot.lane.b32.xlu2 %v12394_v45, %s11479_s0  ;;  %v4101_v19 = vsel %vm1222_vm8, %v10918_v61, %v4100_v16  ;;  %v4105_v29 = vperm.slane %v4099_v36, %v12049_v21  ;;  %v4213_v8 = vsel %vm1222_vm8, %v10919_v44, %v4212_v18  ;;  %v4217_v63 = vperm.slane %v4211_v46, %v12049_v21 }
 0x26c   : > { %v4109_v40 = vperm.slane %v4101_v19, %v12049_v21  ;;  %v4221_v17 = vperm.slane %v4213_v8, %v12049_v21  ;;  %v18981_v18 = vrot.slane %v12365_v42, 4  ;;  %v18982_v44 = vunpack.i.h.bf16 %v12338_v55 }
 0x26d   : > { %v4134_v50 = vrot.slane %v4105_v29, 4  ;;  %v4137_v47 = vsel %vm1222_vm8, %v4105_v29, %v4136_v12  ;;  %v4246_v9 = vrot.slane %v4217_v63, 4  ;;  %v4249_v49 = vsel %vm1222_vm8, %v4217_v63, %v4248_v54 }
 0x26e   : > { %v12467_v16 = vperm.slane %v4137_v47, %v12080_v28  ;;  %v4146_v61 = vrot.slane %v4109_v40, 4  ;;  %v4149_v46 = vsel %vm1222_vm8, %v4109_v40, %v18981_v18  ;;  %v1371_v8 = vsel %vm1222_vm8, %v1370_v38, %v18982_v44 }
 0x26f   : > { %v4135_v41 = vsel %vm1222_vm8, %v4134_v50, %v12385_v31  ;;  %v12478_v12 = vperm.slane %v4149_v46, %v12080_v28  ;;  %v4247_v54 = vsel %vm1222_vm8, %v4246_v9, %v12372_v25  ;;  %v4258_v36 = vrot.slane %v4221_v17, 4 }
 0x270   : > { %v12483_v19 = vperm.slane %v4135_v41, %v12080_v28  ;;  %v4147_v40 = vsel %vm1222_vm8, %v4146_v61, %v12365_v42  ;;  %v12488_v29 = vperm.slane %v4247_v54, %v12080_v28  ;;  %v12491_v38 = vperm.slane %v4249_v49, %v12080_v28 }
 0x271   : > { %v12494_v31 = vperm.slane %v4147_v40, %v12080_v28  ;;  %v4259_v63 = vsel %vm1222_vm8, %v4258_v36, %v12362_v37  ;;  %v18985_v9 = vrot.slane %v12362_v37, 4  ;;  %v1418_v50 = vrot.slane %v1381_v56, 4 }
 0x272   : > { %18983 = vst [vmem:[#allocation48_spill] sm:$0xff] %v12483_v19  ;;  %v12505_v49 = vperm.slane %v4259_v63, %v12080_v28  ;;  %v1377_v44 = vperm.slane %v1371_v8, %v12049_v21  ;;  %v18986_v37 = vunpack.i.l.bf16 %v12338_v55  ;;  %v1261_v36 = vsel %vm1222_vm8, %v10888_v43, %v12379_v62  ;;  %11096 = vrot.lane.b32.xlu1 %v12394_v45, %s11485_s30 }
 0x273   : > { %18984 = vst [vmem:[#allocation49_spill] sm:$0xff] %v12488_v29  ;;  %v4261_v25 = vsel %vm1222_vm8, %v4221_v17, %v18985_v9  ;;  %v18987_v8 = vrot.slane %v12296_v35, 4  ;;  %v1419_v47 = vsel %vm1222_vm8, %v1418_v50, %v12285_v51  ;;  %v18989_v62 = vrot.slane %v12285_v51, 4  ;;  %11091 = vrot.lane.b32.xlu2 %v12394_v45, %s18940_s21 }
 0x274   : > { %v12508_v18 = vperm.slane %v4261_v25, %v12080_v28  ;;  %v1259_v17 = vsel %vm1222_vm8, %v1258_v53, %v18986_v37  ;;  %v1406_v9 = vrot.slane %v1377_v44, 4  ;;  %v1269_v25 = vperm.slane %v1261_v36, %v12049_v21 }
 0x275   : > { %v1265_v40 = vperm.slane %v1259_v17, %v12049_v21  ;;  %v1409_v55 = vsel %vm1222_vm8, %v1377_v44, %v18987_v8  ;;  %v18988_v53 = vrot.slane %v12293_v4, 4  ;;  %v1421_v43 = vsel %vm1222_vm8, %v1381_v56, %v18989_v62  ;;  %v12533_v17 = vpop.permute.xlu2 %10936 }
 0x276   : > { %v1306_v63 = vrot.slane %v1269_v25, 4  ;;  %v18990_v54 = vrot.slane %v12268_v32, 4  ;;  %v1407_v8 = vsel %vm1222_vm8, %v1406_v9, %v12296_v35  ;;  %v1417_v56 = vperm.slane %v1409_v55, %v12080_v28 }
 0x277   : > { %v1294_v46 = vrot.slane %v1265_v40, 4  ;;  %v1297_v37 = vsel %vm1222_vm8, %v1265_v40, %v18988_v53  ;;  %v12545_v51 = vperm.slane %v1407_v8, %v12080_v28  ;;  %v1429_v9 = vperm.slane %v1421_v43, %v12080_v28 }
 0x278   : > { %v1305_v36 = vperm.slane %v1297_v37, %v12080_v28  ;;  %v1309_v44 = vsel %vm1222_vm8, %v1269_v25, %v18990_v54  ;;  %v1307_v37 = vsel %vm1222_vm8, %v1306_v63, %v12268_v32  ;;  %v1425_v25 = vperm.slane %v1419_v47, %v12080_v28 }
 0x279   : > { %v1295_v40 = vsel %vm1222_vm8, %v1294_v46, %v12293_v4  ;;  %v1317_v50 = vperm.slane %v1309_v44, %v12080_v28  ;;  %18991 = vst [vmem:[#allocation50_spill] sm:$0xff] %v12545_v51  ;;  %v1313_v4 = vperm.slane %v1307_v37, %v12080_v28  ;;  %v18993_v55 = vrot.slane %v12431_v14, 4 }
 0x27a   : > { %v12549_v53 = vperm.slane %v1295_v40, %v12080_v28  ;;  %v1322_v54 = vrot.slane %v1305_v36, 4  ;;  %v18995_v32 = vrot.slane %v12412_v30, 4  ;;  %v18997_v47 = vrot.slane %v12399_v26, 4  ;;  %v10912_v40 = vpop.permute.xlu0 %10911 }
 0x27b   : > { %v1330_v46 = vrot.slane %v1317_v50, 4  ;;  %v1326_v37 = vrot.slane %v1313_v4, 4  ;;  %v18999_v62 = vrot.slane %v12415_v48, 4  ;;  %v1442_v35 = vrot.slane %v1429_v9, 4 }
 0x27c   : > { %18992 = vst [vmem:[#allocation51_spill] sm:$0xff] %v12549_v53  ;;  %v12562_v44 = vsel %vm1222_vm8, %v12549_v53, %v18993_v55  ;;  %v12567_v63 = vsel %vm1222_vm8, %v1305_v36, %v18995_v32  ;;  %v1333_v8 = vsel %vm1222_vm8, %v1317_v50, %v18997_v47  ;;  %v12574_v43 = vsel %vm1222_vm8, %v1322_v54, %v12412_v30 }
 0x27d   : > { %18994 = vst [vmem:[#allocation52_spill] sm:$0xff] %v12562_v44  ;;  %v1329_v55 = vsel %vm1222_vm8, %v1313_v4, %v18999_v62  ;;  %v12582_v36 = vsel %vm1222_vm8, %v1330_v46, %v12399_v26  ;;  %v19001_v32 = vrot.slane %v12418_v13, 4  ;;  %v1434_v47 = vrot.slane %v1417_v56, 4  ;;  %v12622_v61 = vpop.permute.xlu2 %10946 }
 0x27e   : > { %18996 = vst [vmem:[#allocation53_spill] sm:$0xff] %v12567_v63  ;;  %v1438_v30 = vrot.slane %v1425_v25, 4  ;;  %v12592_v54 = vsel %vm1222_vm8, %v1326_v37, %v12415_v48  ;;  %v19004_v4 = vrot.slane %v12422_v15, 4  ;;  %v19006_v26 = vrot.slane %v12439_v22, 4 }
 0x27f   : > { %18998 = vst [vmem:[#allocation54_spill] sm:$0xff] %v12574_v43  ;;  %v12588_v50 = vsel %vm1222_vm8, %v12545_v51, %v19001_v32  ;;  %v12604_v32 = vsel %vm1222_vm8, %v1434_v47, %v12422_v15  ;;  %v19009_v48 = vrot.slane %v12427_v60, 4  ;;  %v2154_v47 = vrot.slane %v1333_v8, 4 }
 0x280   : > { %19000 = vst [vmem:[#allocation55_spill] sm:$0xff] %v12582_v36  ;;  %v12597_v62 = vsel %vm1222_vm8, %v1417_v56, %v19004_v4  ;;  %v1441_v46 = vsel %vm1222_vm8, %v1425_v25, %v19006_v26  ;;  %v12608_v41 = vsel %vm1222_vm8, %v1438_v30, %v12439_v22  ;;  %v12614_v4 = vpop.permute.xlu1 %10906  ;;  %v12618_v25 = vsel %vm1222_vm8, %v1442_v35, %v12427_v60 }
 0x281   : > { %19002 = vst [vmem:[#allocation56_spill] sm:$0xff] %v12588_v50  ;;  %v1445_v37 = vsel %vm1222_vm8, %v1429_v9, %v19009_v48  ;;  %v2156_v9 = vrot.slane %v1329_v55, 4  ;;  %v12628_v56 = vsel %vm1222_vm8, %v2154_v47, %v1329_v55  ;;  %v2268_v42 = vrot.slane %v1441_v46, 4 }
 0x282   : > { %19003 = vst [vmem:[#allocation57_spill] sm:$0xff] %v12592_v54  ;;  %v2266_v26 = vrot.slane %v1445_v37, 4  ;;  %v18696_v29 = vunpack.i.h.bf16 %v12533_v17  ;;  %v10914_v19 = vunpack.i.h.bf16 %v10912_v40  ;;  %v10913_v35 = vunpack.i.l.bf16 %v10912_v40 }
 0x283   : > { %19005 = vst [vmem:[#allocation58_spill] sm:$0xff] %v12597_v62  ;;  %v2157_v15 = vsel %vm1222_vm8, %v1333_v8, %v2156_v9  ;;  %v2269_v55 = vsel %vm1222_vm8, %v1445_v37, %v2268_v42  ;;  %v10909_v8 = vunpack.i.h.bf16 %v12614_v4  ;;  %v12644_v9 = vpop.permute.xlu0 %10926 }
 0x284   : > { %19007 = vst [vmem:[#allocation59_spill] sm:$0xff] %v12604_v32  ;;  %v12635_v22 = vperm.slane %v2157_v15, %v12049_v21  ;;  %v12647_v15 = vsel %vm1222_vm8, %v2266_v26, %v1441_v46  ;;  %v12651_v30 = vrot.slane %v18696_v29, 4  ;;  %v4222_v48 = vrot.slane %v10914_v19, 4 }
 0x285   : > { %19008 = vst [vmem:[#allocation60_spill] sm:$0xff] %v12608_v41  ;;  %v4225_v42 = vsel %vm1222_vm8, %v10914_v19, %v12319_v58  ;;  %v12656_v37 = vperm.slane %v2269_v55, %v12049_v21  ;;  %v4110_v60 = vrot.slane %v10913_v35, 4  ;;  %v4113_v40 = vsel %vm1222_vm8, %v10913_v35, %v12329_v24 }
 0x286   : > { %19010 = vst [vmem:[#allocation61_spill] sm:$0xff] %v12618_v25  ;;  %v4233_v47 = vperm.slane %v4225_v42, %v12049_v21  ;;  %v4121_v46 = vperm.slane %v4113_v40, %v12049_v21  ;;  %v19015_v26 = vunpack.i.h.bf16 %v12254_v23  ;;  %v19017_v19 = vunpack.i.l.bf16 %v12254_v23 }
 0x287   : > { %19011 = vst [vmem:[#allocation62_spill] sm:$0xff] %v12628_v56  ;;  %v4236_v35 = vrot.slane %v10909_v8, 4  ;;  %v19018_v36 = vunpack.i.h.bf16 %v12644_v9  ;;  %v19019_v45 = vunpack.i.l.bf16 %v12644_v9 }
 0x288   : > { %19012 = vst [vmem:[#allocation63_spill] sm:$0xff] %v12635_v22  ;;  %v4223_v29 = vsel %vm1222_vm8, %v4222_v48, %v19015_v26  ;;  %v10908_v22 = vunpack.i.l.bf16 %v12614_v4  ;;  %v4111_v55 = vsel %vm1222_vm8, %v4110_v60, %v19017_v19  ;;  %v10922_v42 = vpop.permute.xlu1 %10921  ;;  %v18713_v4 = vunpack.i.h.bf16 %v12622_v61  ;;  %v12678_v48 = vpop.permute.xlu2 %10966 }
 0x289   : > { %19013 = vst [vmem:[#allocation64_spill] sm:$0xff] %v12647_v15  ;;  %v19016_v15 = vunpack.i.l.bf16 %v12533_v17  ;;  %v4229_v24 = vperm.slane %v4223_v29, %v12049_v21  ;;  %v4117_v40 = vperm.slane %v4111_v55, %v12049_v21  ;;  %v18716_v26 = vunpack.i.l.bf16 %v12622_v61 }
 0x28a   : > { %19014 = vst [vmem:[#allocation65_spill] sm:$0xff] %v12656_v37  ;;  %v4284_v37 = vrot.slane %v4233_v47, 4  ;;  %v4124_v19 = vrot.slane %v10908_v22, 4  ;;  %v10924_v25 = vunpack.i.h.bf16 %v10922_v42  ;;  %v10923_v41 = vunpack.i.l.bf16 %v10922_v42 }
 0x28b   : > { %v12668_v58 = vrot.slane %v19016_v15, 4  ;;  %v4172_v15 = vrot.slane %v4121_v46, 4  ;;  %v4272_v29 = vrot.slane %v4229_v24, 4  ;;  %v4160_v55 = vrot.slane %v4117_v40, 4  ;;  %v12706_v44 = vpop.permute.xlu0 %10941 }
 0x28c   : > { %v12687_v62 = vrot.slane %v18713_v4, 4  ;;  %v12691_v50 = vrot.slane %v18716_v26, 4  ;;  %v4234_v32 = vrot.slane %v10924_v25, 4  ;;  %v4122_v60 = vrot.slane %v10923_v41, 4 }
 0x28d   : > { %v4125_v56 = vsel %vm1222_vm8, %v10923_v41, %v4124_v19  ;;  %v4237_v42 = vsel %vm1222_vm8, %v10924_v25, %v4236_v35  ;;  %v12698_v54 = vrot.slane %v19018_v36, 4  ;;  %v12702_v4 = vrot.slane %v19019_v45, 4 }
 0x28e   : > { %v4133_v63 = vperm.slane %v4125_v56, %v12049_v21  ;;  %v4245_v26 = vperm.slane %v4237_v42, %v12049_v21  ;;  %v4123_v23 = vsel %vm1222_vm8, %v4122_v60, %v10908_v22  ;;  %v4235_v41 = vsel %vm1222_vm8, %v4234_v32, %v10909_v8 }
 0x28f   : > { %v19020_v25 = vunpack.i.h.bf16 %v12678_v48  ;;  %v4129_v19 = vperm.slane %v4123_v23, %v12049_v21  ;;  %v4241_v56 = vperm.slane %v4235_v41, %v12049_v21  ;;  %v10944_v22 = vunpack.i.h.bf16 %v12706_v44 }
 0x290   : > { %v4170_v45 = vrot.slane %v4133_v63, 4  ;;  %v4173_v43 = vsel %vm1222_vm8, %v4133_v63, %v4172_v15  ;;  %v4282_v51 = vrot.slane %v4245_v26, 4  ;;  %v10943_v32 = vunpack.i.l.bf16 %v12706_v44 }
 0x291   : > { %v12712_v35 = vrot.slane %v19020_v25, 4  ;;  %v4181_v42 = vperm.slane %v4173_v43, %v12080_v28  ;;  %v4158_v8 = vrot.slane %v4129_v19, 4  ;;  %v4161_v60 = vsel %vm1222_vm8, %v4129_v19, %v4160_v55 }
 0x292   : > { %v4171_v25 = vsel %vm1222_vm8, %v4170_v45, %v4121_v46  ;;  %v4270_v36 = vrot.slane %v4241_v56, 4  ;;  %v4169_v23 = vperm.slane %v4161_v60, %v12080_v28  ;;  %v4285_v15 = vsel %vm1222_vm8, %v4245_v26, %v4284_v37 }
 0x293   : > { %v4177_v13 = vperm.slane %v4171_v25, %v12080_v28  ;;  %v4194_v63 = vrot.slane %v4181_v42, 4  ;;  %v4159_v43 = vsel %vm1222_vm8, %v4158_v8, %v4117_v40  ;;  %v4273_v53 = vsel %vm1222_vm8, %v4241_v56, %v4272_v29 }
 0x294   : > { %v4271_v41 = vsel %vm1222_vm8, %v4270_v36, %v4229_v24  ;;  %v4283_v44 = vsel %vm1222_vm8, %v4282_v51, %v4233_v47  ;;  %v12731_v55 = vperm.slane %v4159_v43, %v12080_v28  ;;  %v4186_v46 = vrot.slane %v4169_v23, 4  ;;  %v12829_v43 = vpop.permute.xlu2 %10981 }
 0x295   : > { %v4190_v19 = vrot.slane %v4177_v13, 4  ;;  %v19022_v45 = vunpack.i.l.bf16 %v12678_v48  ;;  %v19023_v25 = vrot.slane %v12467_v16, 4  ;;  %v19025_v24 = vrot.slane %v12478_v12, 4 }
 0x296   : > { %19021 = vst [vmem:[#allocation66_spill] sm:$0xff] %v12731_v55  ;;  %v12748_v51 = vperm.slane %v4271_v41, %v12080_v28  ;;  %v4281_v47 = vperm.slane %v4273_v53, %v12080_v28  ;;  %v12753_v26 = vsel %vm1222_vm8, %v4186_v46, %v12467_v16  ;;  %v19029_v29 = vrot.slane %v12494_v31, 4 }
 0x297   : > { %v12735_v60 = vrot.slane %v19022_v45, 4  ;;  %v12740_v37 = vsel %vm1222_vm8, %v4169_v23, %v19023_v25  ;;  %v12745_v40 = vsel %vm1222_vm8, %v4181_v42, %v19025_v24  ;;  %19028 = vst [vmem:[#allocation70_spill] sm:$0xff] %v12753_v26  ;;  %v12762_v56 = vsel %vm1222_vm8, %v4194_v63, %v12478_v12 }
 0x298   : > { %19024 = vst [vmem:[#allocation67_spill] sm:$0xff] %v12740_v37  ;;  %v12758_v36 = vsel %vm1222_vm8, %v4177_v13, %v19029_v29  ;;  %v4289_v42 = vperm.slane %v4283_v44, %v12080_v28  ;;  %v12768_v53 = vsel %vm1222_vm8, %v4190_v19, %v12494_v31  ;;  %v4293_v16 = vperm.slane %v4285_v15, %v12080_v28 }
 0x299   : > { %19026 = vst [vmem:[#allocation68_spill] sm:$0xff] %v12745_v40  ;;  %v4298_v23 = vrot.slane %v4281_v47, 4  ;;  %v19033_v13 = vrot.slane %v12491_v38, 4  ;;  %v19035_v63 = vrot.slane %v12505_v49, 4  ;;  %v19039_v25 = vrot.slane %v12508_v18, 4 }
 0x29a   : > { %19027 = vst [vmem:[#allocation69_spill] sm:$0xff] %v12748_v51  ;;  %v4302_v12 = vrot.slane %v4289_v42, 4  ;;  %v4306_v46 = vrot.slane %v4293_v16, 4  ;;  %v4572_v29 = vrot.slane %v12758_v36, 4  ;;  %v19044_v15 = vunpack.i.h.bf16 %v12644_v9 }
 0x29b   : > { %19030 = vst [vmem:[#allocation71_spill] sm:$0xff] %v12758_v36  ;;  %v12775_v41 = vsel %vm1222_vm8, %v4281_v47, %v19033_v13  ;;  %v12780_v44 = vsel %vm1222_vm8, %v4289_v42, %v19035_v63  ;;  %v12784_v31 = vsel %vm1222_vm8, %v4298_v23, %v12491_v38  ;;  %v12795_v24 = vsel %vm1222_vm8, %v4293_v16, %v19039_v25  ;;  %v10932_v13 = vpop.permute.xlu1 %10931 }
 0x29c   : > { %19031 = vst [vmem:[#allocation72_spill] sm:$0xff] %v12762_v56  ;;  %v12790_v45 = vsel %vm1222_vm8, %v4302_v12, %v12505_v49  ;;  %v12801_v38 = vsel %vm1222_vm8, %v4306_v46, %v12508_v18  ;;  %v12808_v12 = vsel %vm1222_vm8, %v12745_v40, %v4572_v29  ;;  %v3450_v47 = vrot.slane %v10944_v22, 4 }
 0x29d   : > { %19032 = vst [vmem:[#allocation73_spill] sm:$0xff] %v12768_v53  ;;  %v3338_v18 = vrot.slane %v10943_v32, 4  ;;  %v3341_v46 = vsel %vm1222_vm8, %v10943_v32, %v12702_v4  ;;  %v3453_v42 = vsel %vm1222_vm8, %v10944_v22, %v12698_v54  ;;  %v10934_v19 = vunpack.i.h.bf16 %v10932_v13 }
 0x29e   : > { %19034 = vst [vmem:[#allocation74_spill] sm:$0xff] %v12775_v41  ;;  %v3349_v23 = vperm.slane %v3341_v46, %v12049_v21  ;;  %v3461_v29 = vperm.slane %v3453_v42, %v12049_v21  ;;  %v4684_v16 = vrot.slane %v12780_v44, 4  ;;  %v19043_v63 = vunpack.i.l.bf16 %v12644_v9 }
 0x29f   : > { %19036 = vst [vmem:[#allocation75_spill] sm:$0xff] %v12780_v44  ;;  %v3451_v4 = vsel %vm1222_vm8, %v3450_v47, %v19044_v15  ;;  %v10933_v32 = vunpack.i.l.bf16 %v10932_v13  ;;  %v3438_v42 = vrot.slane %v10934_v19, 4  ;;  %v19045_v8 = vrot.slane %v12000_v59, 4 }
 0x2a0   : > { %19037 = vst [vmem:[#allocation76_spill] sm:$0xff] %v12784_v31  ;;  %v3339_v25 = vsel %vm1222_vm8, %v3338_v18, %v19043_v63  ;;  %v3386_v22 = vrot.slane %v3349_v23, 4  ;;  %v3457_v49 = vperm.slane %v3451_v4, %v12049_v21  ;;  %v3498_v46 = vrot.slane %v3461_v29, 4 }
 0x2a1   : > { %19038 = vst [vmem:[#allocation77_spill] sm:$0xff] %v12790_v45  ;;  %v3345_v54 = vperm.slane %v3339_v25, %v12049_v21  ;;  %v3326_v44 = vrot.slane %v10933_v32, 4  ;;  %v19046_v63 = vrot.slane %v11994_v39, 4  ;;  %v12841_v18 = vsel %vm1222_vm8, %v12795_v24, %v4684_v16 }
 0x2a2   : > { %19040 = vst [vmem:[#allocation78_spill] sm:$0xff] %v12795_v24  ;;  %v3486_v47 = vrot.slane %v3457_v49, 4  ;;  %v3439_v4 = vsel %vm1222_vm8, %v3438_v42, %v12000_v59  ;;  %v18727_v59 = vunpack.i.l.bf16 %v12829_v43  ;;  %v19067_v6 = vunpack.i.h.bf16 %v12678_v48 }
 0x2a3   : > { %19041 = vst [vmem:[#allocation79_spill] sm:$0xff] %v12801_v38  ;;  %v3329_v9 = vsel %vm1222_vm8, %v10933_v32, %v19046_v63  ;;  %v3374_v15 = vrot.slane %v3345_v54, 4  ;;  %v3445_v32 = vperm.slane %v3439_v4, %v12049_v21 }
 0x2a4   : > { %19042 = vst [vmem:[#allocation80_spill] sm:$0xff] %v12808_v12  ;;  %v3441_v12 = vsel %vm1222_vm8, %v10934_v19, %v19045_v8  ;;  %v3337_v25 = vperm.slane %v3329_v9, %v12049_v21  ;;  %v3327_v8 = vsel %vm1222_vm8, %v3326_v44, %v11994_v39  ;;  %v10952_v19 = vpop.permute.xlu1 %10951 }
 0x2a5   : > { %v3449_v13 = vperm.slane %v3441_v12, %v12049_v21  ;;  %19047 = vst [vmem:[#allocation81_spill] sm:$0xff] %v12841_v18  ;;  %v3333_v12 = vperm.slane %v3327_v8, %v12049_v21  ;;  %v3487_v42 = vsel %vm1222_vm8, %v3486_v47, %v3445_v32  ;;  %v3488_v39 = vrot.slane %v3445_v32, 4 }
 0x2a6   : > { %v3387_v16 = vsel %vm1222_vm8, %v3386_v22, %v3337_v25  ;;  %v3388_v18 = vrot.slane %v3337_v25, 4  ;;  %v19048_v22 = vunpack.i.h.bf16 %v12829_v43 }
 0x2a7   : > { %v3499_v63 = vsel %vm1222_vm8, %v3498_v46, %v3449_v13  ;;  %v3500_v38 = vrot.slane %v3449_v13, 4  ;;  %v3375_v4 = vsel %vm1222_vm8, %v3374_v15, %v3333_v12  ;;  %v12860_v46 = vperm.slane %v3487_v42, %v12080_v28  ;;  %v10957_v15 = vpop.permute.xlu0 %10956 }
 0x2a8   : > { %v12852_v9 = vperm.slane %v3499_v63, %v12080_v28  ;;  %v3376_v8 = vrot.slane %v3333_v12, 4  ;;  %v12867_v25 = vrot.slane %v19048_v22, 4  ;;  %v3489_v63 = vsel %vm1222_vm8, %v3457_v49, %v3488_v39 }
 0x2a9   : > { %v3501_v44 = vsel %vm1222_vm8, %v3461_v29, %v3500_v38  ;;  %v12871_v47 = vperm.slane %v3375_v4, %v12080_v28  ;;  %v3389_v38 = vsel %vm1222_vm8, %v3349_v23, %v3388_v18  ;;  %v12875_v29 = vperm.slane %v3387_v16, %v12080_v28 }
 0x2aa   : > { %v12863_v13 = vperm.slane %v3501_v44, %v12080_v28  ;;  %v12878_v32 = vperm.slane %v3489_v63, %v12080_v28  ;;  %v3377_v42 = vsel %vm1222_vm8, %v3345_v54, %v3376_v8  ;;  %v12884_v44 = vrot.slane %v18727_v59, 4 }
 0x2ab   : > { %v12889_v23 = vperm.slane %v3377_v42, %v12080_v28  ;;  %v12892_v18 = vperm.slane %v3389_v38, %v12080_v28  ;;  %v10959_v4 = vunpack.i.h.bf16 %v10957_v15  ;;  %v10958_v22 = vunpack.i.l.bf16 %v10957_v15 }
 0x2ac   : > { %v10954_v63 = vunpack.i.h.bf16 %v10952_v19  ;;  %v3432_v59 = vrot.slane %v12875_v29, 4  ;;  %v10953_v49 = vunpack.i.l.bf16 %v10952_v19  ;;  %v19049_v54 = vunpack.i.l.bf16 %v12622_v61  ;;  %v12916_v40 = vpop.permute.xlu1 %10971 }
 0x2ad   : > { %v3428_v8 = vrot.slane %v12889_v23, 4  ;;  %v3474_v12 = vrot.slane %v10959_v4, 4  ;;  %v3362_v39 = vrot.slane %v10958_v22, 4  ;;  %v3365_v42 = vsel %vm1222_vm8, %v10958_v22, %v12691_v50 }
 0x2ae   : > { %v3477_v38 = vsel %vm1222_vm8, %v10959_v4, %v12687_v62  ;;  %v3373_v16 = vperm.slane %v3365_v42, %v12049_v21  ;;  %v3462_v24 = vrot.slane %v10954_v63, 4  ;;  %v3350_v45 = vrot.slane %v10953_v49, 4 }
 0x2af   : > { %v3485_v15 = vperm.slane %v3477_v38, %v12049_v21  ;;  %v3363_v41 = vsel %vm1222_vm8, %v3362_v39, %v19049_v54  ;;  %v19050_v19 = vunpack.i.h.bf16 %v12622_v61  ;;  %v3353_v50 = vsel %vm1222_vm8, %v10953_v49, %v12668_v58 }
 0x2b0   : > { %v3465_v62 = vsel %vm1222_vm8, %v10954_v63, %v12651_v30  ;;  %v3369_v4 = vperm.slane %v3363_v41, %v12049_v21  ;;  %v3410_v22 = vrot.slane %v3373_v16, 4  ;;  %v19051_v39 = vunpack.i.l.bf16 %v12533_v17 }
 0x2b1   : > { %v3475_v31 = vsel %vm1222_vm8, %v3474_v12, %v19050_v19  ;;  %v3522_v38 = vrot.slane %v3485_v15, 4  ;;  %v3361_v12 = vperm.slane %v3353_v50, %v12049_v21  ;;  %v19052_v54 = vunpack.i.h.bf16 %v12533_v17  ;;  %v12928_v19 = vpop.permute.xlu2 %10996 }
 0x2b2   : > { %v3481_v42 = vperm.slane %v3475_v31, %v12049_v21  ;;  %v3351_v61 = vsel %vm1222_vm8, %v3350_v45, %v19051_v39  ;;  %v3473_v30 = vperm.slane %v3465_v62, %v12049_v21  ;;  %v3398_v49 = vrot.slane %v3369_v4, 4  ;;  %19053 = vst [vmem:[#allocation82_spill] sm:$0xff] %v12928_v19 }
 0x2b3   : > { %v3463_v58 = vsel %vm1222_vm8, %v3462_v24, %v19052_v54  ;;  %v3357_v63 = vperm.slane %v3351_v61, %v12049_v21  ;;  %v3436_v36 = vrot.slane %v12892_v18, 4  ;;  %v3411_v45 = vsel %vm1222_vm8, %v3410_v22, %v3361_v12 }
 0x2b4   : > { %v3510_v41 = vrot.slane %v3481_v42, 4  ;;  %v3469_v31 = vperm.slane %v3463_v58, %v12049_v21  ;;  %v3412_v39 = vrot.slane %v3361_v12, 4  ;;  %v3524_v50 = vrot.slane %v3473_v30, 4 }
 0x2b5   : > { %v3399_v17 = vsel %vm1222_vm8, %v3398_v49, %v3357_v63  ;;  %v3400_v56 = vrot.slane %v3357_v63, 4  ;;  %v12934_v24 = vperm.slane %v3411_v45, %v12080_v28  ;;  %v3523_v53 = vsel %vm1222_vm8, %v3522_v38, %v3473_v30 }
 0x2b6   : > { %v3511_v62 = vsel %vm1222_vm8, %v3510_v41, %v3469_v31  ;;  %v12938_v61 = vperm.slane %v3399_v17, %v12080_v28  ;;  %v3413_v54 = vsel %vm1222_vm8, %v3373_v16, %v3412_v39  ;;  %v3512_v58 = vrot.slane %v3469_v31, 4 }
 0x2b7   : > { %v3401_v22 = vsel %vm1222_vm8, %v3369_v4, %v3400_v56  ;;  %v3421_v12 = vperm.slane %v3413_v54, %v12080_v28  ;;  %v12945_v49 = vperm.slane %v3511_v62, %v12080_v28  ;;  %v18745_v63 = vunpack.i.h.bf16 %v12928_v19 }
 0x2b8   : > { %v12949_v45 = vperm.slane %v3401_v22, %v12080_v28  ;;  %v3513_v17 = vsel %vm1222_vm8, %v3481_v42, %v3512_v58  ;;  %v3525_v16 = vsel %vm1222_vm8, %v3485_v15, %v3524_v50  ;;  %v12956_v38 = vsel %vm1222_vm8, %v12934_v24, %v3432_v59  ;;  %v10962_v42 = vpop.permute.xlu0 %10961  ;;  %v10987_v58 = vpop.permute.xlu1 %10986 }
 0x2b9   : > { %v3434_v56 = vrot.slane %v3421_v12, 4  ;;  %v12959_v4 = vperm.slane %v3513_v17, %v12080_v28  ;;  %v12962_v30 = vperm.slane %v3523_v53, %v12080_v28  ;;  %v12967_v62 = vsel %vm1222_vm8, %v3421_v12, %v3436_v36  ;;  %v13001_v41 = vpop.permute.xlu2 %11011 }
 0x2ba   : > { %v3533_v15 = vperm.slane %v3525_v16, %v12080_v28  ;;  %v12972_v59 = vsel %vm1222_vm8, %v12949_v45, %v3428_v8  ;;  %v19054_v22 = vrot.slane %v12878_v32, 4  ;;  %v19055_v12 = vrot.slane %v12852_v9, 4 }
 0x2bb   : > { %v12976_v50 = vsel %vm1222_vm8, %v3434_v56, %v12892_v18  ;;  %v19056_v18 = vrot.slane %v12863_v13, 4  ;;  %v10974_v31 = vunpack.i.h.bf16 %v12916_v40  ;;  %v10964_v53 = vunpack.i.h.bf16 %v10962_v42 }
 0x2bc   : > { %v12984_v36 = vsel %vm1222_vm8, %v12959_v4, %v19054_v22  ;;  %v12990_v8 = vsel %vm1222_vm8, %v12962_v30, %v19055_v12  ;;  %v3546_v17 = vrot.slane %v3533_v15, 4  ;;  %v13006_v12 = vrot.slane %v18745_v63, 4 }
 0x2bd   : > { %v12995_v16 = vsel %vm1222_vm8, %v3533_v15, %v19056_v18  ;;  %v10973_v15 = vunpack.i.l.bf16 %v12916_v40  ;;  %v10963_v22 = vunpack.i.l.bf16 %v10962_v42  ;;  %v1558_v56 = vrot.slane %v10974_v31, 4 }
 0x2be   : > { %v13012_v18 = vsel %vm1222_vm8, %v3546_v17, %v12863_v13  ;;  %v19057_v39 = vrot.slane %v12021_v52, 4  ;;  %v19058_v40 = vrot.slane %v12018_v0, 4  ;;  %v1584_v13 = vrot.slane %v10964_v53, 4 }
 0x2bf   : > { %v1446_v37 = vrot.slane %v10973_v15, 4  ;;  %v1471_v17 = vsel %vm1222_vm8, %v12884_v44, %v10963_v22  ;;  %v1559_v42 = vsel %vm1222_vm8, %v1558_v56, %v12018_v0  ;;  %v19059_v44 = vunpack.i.l.bf16 %v12928_v19 }
 0x2c0   : > { %v1449_v26 = vsel %vm1222_vm8, %v10973_v15, %v19057_v39  ;;  %v1561_v55 = vsel %vm1222_vm8, %v10974_v31, %v19058_v40  ;;  %v1472_v15 = vrot.slane %v10963_v22, 4  ;;  %v1565_v63 = vperm.slane %v1559_v42, %v12049_v21  ;;  %v13048_v56 = vpop.permute.xlu0 %10976 }
 0x2c1   : > { %v1457_v51 = vperm.slane %v1449_v26, %v12049_v21  ;;  %v1447_v54 = vsel %vm1222_vm8, %v1446_v37, %v12021_v52  ;;  %v1569_v39 = vperm.slane %v1561_v55, %v12049_v21  ;;  %v13033_v14 = vperm.slane %v1471_v17, %v12049_v21 }
 0x2c2   : > { %v1453_v26 = vperm.slane %v1447_v54, %v12049_v21  ;;  %v13038_v40 = vrot.slane %v19059_v44, 4  ;;  %v19061_v0 = vunpack.i.l.bf16 %v12829_v43  ;;  %v1583_v55 = vsel %vm1222_vm8, %v12867_v25, %v10964_v53  ;;  %v13053_v44 = vpop.permute.xlu1 %11001 }
 0x2c3   : > { %v19062_v37 = vunpack.i.h.bf16 %v12829_v43  ;;  %v1608_v22 = vrot.slane %v1565_v63, 4  ;;  %v1508_v17 = vrot.slane %v1457_v51, 4  ;;  %v1620_v42 = vrot.slane %v1569_v39, 4  ;;  %19063 = vst [vmem:[#allocation84_spill] sm:$0xff] %v13053_v44 }
 0x2c4   : > { %19060 = vst [vmem:[#allocation83_spill] sm:$0xff] %v13038_v40  ;;  %v1473_v52 = vsel %vm1222_vm8, %v19061_v0, %v1472_v15  ;;  %v1496_v2 = vrot.slane %v1453_v26, 4  ;;  %v13057_v0 = vperm.slane %v1583_v55, %v12049_v21  ;;  %v19064_v25 = vunpack.i.h.bf16 %v13001_v41 }
 0x2c5   : > { %v1585_v54 = vsel %vm1222_vm8, %v19062_v37, %v1584_v13  ;;  %v13051_v31 = vperm.slane %v1473_v52, %v12049_v21  ;;  %v10989_v13 = vunpack.i.h.bf16 %v10987_v58  ;;  %v10988_v37 = vunpack.i.l.bf16 %v10987_v58 }
 0x2c6   : > { %v13060_v43 = vperm.slane %v1585_v54, %v12049_v21  ;;  %v13064_v53 = vrot.slane %v19064_v25, 4  ;;  %v10979_v52 = vunpack.i.h.bf16 %v13048_v56  ;;  %v19065_v33 = vunpack.i.l.bf16 %v13001_v41 }
 0x2c7   : > { %v10978_v55 = vunpack.i.l.bf16 %v13048_v56  ;;  %v1570_v54 = vrot.slane %v10989_v13, 4  ;;  %v1458_v11 = vrot.slane %v10988_v37, 4  ;;  %v1461_v25 = vsel %vm1222_vm8, %v10988_v37, %v12735_v60 }
 0x2c8   : > { %v13070_v1 = vrot.slane %v19065_v33, 4  ;;  %v1573_v58 = vsel %vm1222_vm8, %v10989_v13, %v12712_v35  ;;  %v1644_v57 = vrot.slane %v13060_v43, 4  ;;  %v1469_v34 = vperm.slane %v1461_v25, %v12049_v21 }
 0x2c9   : > { %v1581_v33 = vperm.slane %v1573_v58, %v12049_v21  ;;  %v19066_v56 = vunpack.i.l.bf16 %v12678_v48  ;;  %v1571_v7 = vsel %vm1222_vm8, %v1570_v54, %v19067_v6  ;;  %v1596_v60 = vrot.slane %v10979_v52, 4 }
 0x2ca   : > { %v1484_v37 = vrot.slane %v10978_v55, 4  ;;  %v1506_v13 = vrot.slane %v1469_v34, 4  ;;  %v1509_v20 = vsel %vm1222_vm8, %v1469_v34, %v1508_v17  ;;  %v1577_v27 = vperm.slane %v1571_v7, %v12049_v21 }
 0x2cb   : > { %v1459_v15 = vsel %vm1222_vm8, %v1458_v11, %v19066_v56  ;;  %v13092_v25 = vperm.slane %v1509_v20, %v12080_v28  ;;  %v1618_v58 = vrot.slane %v1581_v33, 4  ;;  %v19068_v10 = vunpack.i.h.bf16 %v13053_v44 }
 0x2cc   : > { %v1465_v35 = vperm.slane %v1459_v15, %v12049_v21  ;;  %v1507_v15 = vsel %vm1222_vm8, %v1506_v13, %v1457_v51  ;;  %v1606_v56 = vrot.slane %v1577_v27, 4  ;;  %v1609_v20 = vsel %vm1222_vm8, %v1577_v27, %v1608_v22 }
 0x2cd   : > { %v13096_v11 = vrot.slane %v19068_v10, 4  ;;  %v13105_v7 = vperm.slane %v1507_v15, %v12080_v28  ;;  %v1621_v17 = vsel %vm1222_vm8, %v1581_v33, %v1620_v42  ;;  %v10992_v10 = vpop.permute.xlu0 %10991  ;;  %v1619_v51 = vsel %vm1222_vm8, %v1618_v58, %v1569_v39 }
 0x2ce   : > { %v1494_v6 = vrot.slane %v1465_v35, 4  ;;  %v1497_v54 = vsel %vm1222_vm8, %v1465_v35, %v1496_v2  ;;  %v1607_v48 = vsel %vm1222_vm8, %v1606_v56, %v1565_v63  ;;  %v13112_v2 = vperm.slane %v1609_v20, %v12080_v28  ;;  %v13115_v35 = vpop.permute.xlu1 %11026 }
 0x2cf   : > { %19069 = vst [vmem:[#allocation85_spill] sm:$0xff] %v13096_v11  ;;  %v13102_v34 = vperm.slane %v1497_v54, %v12080_v28  ;;  %v1556_v54 = vrot.slane %v13092_v25, 4  ;;  %v13122_v27 = vperm.slane %v1607_v48, %v12080_v28  ;;  %v19073_v22 = vunpack.i.l.bf16 %v13053_v44 }
 0x2d0   : > { %19070 = vst [vmem:[#allocation86_spill] sm:$0xff] %v13105_v7  ;;  %v1495_v11 = vsel %vm1222_vm8, %v1494_v6, %v1453_v26  ;;  %v13130_v42 = vperm.slane %v1619_v51, %v12080_v28  ;;  %v13133_v39 = vperm.slane %v1621_v17, %v12080_v28  ;;  %v10994_v33 = vunpack.i.h.bf16 %v10992_v10 }
 0x2d1   : > { %v13118_v13 = vperm.slane %v1495_v11, %v12080_v28  ;;  %19072 = vst [vmem:[#allocation88_spill] sm:$0xff] %v13122_v27  ;;  %v13126_v26 = vrot.slane %v19073_v22, 4  ;;  %v1548_v63 = vrot.slane %v13102_v34, 4  ;;  %v1552_v58 = vrot.slane %v13105_v7, 4 }
 0x2d2   : > { %19075 = vst [vmem:[#allocation90_spill] sm:$0xff] %v13130_v42  ;;  %v1660_v11 = vrot.slane %v13112_v2, 4  ;;  %v10993_v6 = vunpack.i.l.bf16 %v10992_v10  ;;  %v11029_v48 = vunpack.i.h.bf16 %v13115_v35  ;;  %v1594_v20 = vrot.slane %v10994_v33, 4 }
 0x2d3   : > { %19071 = vst [vmem:[#allocation87_spill] sm:$0xff] %v13118_v13  ;;  %v1597_v22 = vsel %vm1222_vm8, %v10994_v33, %v1596_v60  ;;  %v1664_v51 = vrot.slane %v13130_v42, 4  ;;  %v1668_v7 = vrot.slane %v13133_v39, 4  ;;  %v11028_v60 = vunpack.i.l.bf16 %v13115_v35  ;;  %v19152_v13 = vld [vmem:[#allocation39_spill] sm:$0xff] }
 0x2d4   : > { %19074 = vst [vmem:[#allocation89_spill] sm:$0xff] %v13126_v26  ;;  %v1482_v26 = vrot.slane %v10993_v6, 4  ;;  %v1485_v17 = vsel %vm1222_vm8, %v10993_v6, %v1484_v37  ;;  %v1605_v44 = vperm.slane %v1597_v22, %v12049_v21  ;;  %v1595_v40 = vsel %vm1222_vm8, %v1594_v20, %v10979_v52 }
 0x2d5   : > { %v1493_v10 = vperm.slane %v1485_v17, %v12049_v21  ;;  %v4458_v19 = vrot.slane %v11029_v48, 4  ;;  %v1601_v56 = vperm.slane %v1595_v40, %v12049_v21  ;;  %v19076_v37 = vrot.slane %v13051_v31, 4 }
 0x2d6   : > { %v1483_v15 = vsel %vm1222_vm8, %v1482_v26, %v10978_v55  ;;  %v1642_v27 = vrot.slane %v1605_v44, 4  ;;  %v1645_v22 = vsel %vm1222_vm8, %v1605_v44, %v1644_v57  ;;  %v19077_v20 = vrot.slane %v13057_v0, 4 }
 0x2d7   : > { %v1489_v33 = vperm.slane %v1483_v15, %v12049_v21  ;;  %v1530_v42 = vrot.slane %v1493_v10, 4  ;;  %v1533_v6 = vsel %vm1222_vm8, %v1493_v10, %v19076_v37  ;;  %v1630_v52 = vrot.slane %v1601_v56, 4 }
 0x2d8   : > { %v1541_v17 = vperm.slane %v1533_v6, %v12080_v28  ;;  %v1633_v55 = vsel %vm1222_vm8, %v1601_v56, %v19077_v20  ;;  %v1643_v40 = vsel %vm1222_vm8, %v1642_v27, %v13060_v43  ;;  %v19078_v26 = vrot.slane %v13033_v14, 4 }
 0x2d9   : > { %v1518_v35 = vrot.slane %v1489_v33, 4  ;;  %v1531_v10 = vsel %vm1222_vm8, %v1530_v42, %v13051_v31  ;;  %v1641_v57 = vperm.slane %v1633_v55, %v12080_v28  ;;  %v1653_v56 = vperm.slane %v1645_v22, %v12080_v28 }
 0x2da   : > { %v1521_v15 = vsel %vm1222_vm8, %v1489_v33, %v19078_v26  ;;  %v13169_v37 = vperm.slane %v1531_v10, %v12080_v28  ;;  %v1554_v6 = vrot.slane %v1541_v17, 4  ;;  %v1631_v27 = vsel %vm1222_vm8, %v1630_v52, %v13057_v0 }
 0x2db   : > { %v1529_v44 = vperm.slane %v1521_v15, %v12080_v28  ;;  %v1519_v43 = vsel %vm1222_vm8, %v1518_v35, %v13033_v14  ;;  %v13177_v33 = vperm.slane %v1643_v40, %v12080_v28  ;;  %v1658_v31 = vrot.slane %v1641_v57, 4 }
 0x2dc   : > { %19079 = vst [vmem:[#allocation91_spill] sm:$0xff] %v13169_v37  ;;  %v13180_v42 = vperm.slane %v1519_v43, %v12080_v28  ;;  %v13183_v55 = vsel %vm1222_vm8, %v1541_v17, %v1556_v54  ;;  %v4461_v22 = vsel %vm1222_vm8, %v11029_v48, %v13064_v53  ;;  %v13193_v0 = vsel %vm1222_vm8, %v13169_v37, %v1552_v58 }
 0x2dd   : > { %19080 = vst [vmem:[#allocation92_spill] sm:$0xff] %v13177_v33  ;;  %v1546_v20 = vrot.slane %v1529_v44, 4  ;;  %v13188_v26 = vsel %vm1222_vm8, %v1529_v44, %v1548_v63  ;;  %v13196_v52 = vperm.slane %v1631_v27, %v12080_v28  ;;  %v13205_v53 = vsel %vm1222_vm8, %v1554_v6, %v13092_v25 }
 0x2de   : > { %19081 = vst [vmem:[#allocation93_spill] sm:$0xff] %v13180_v42  ;;  %v13209_v63 = vsel %vm1222_vm8, %v1658_v31, %v13112_v2  ;;  %v13212_v58 = vsel %vm1222_vm8, %v1641_v57, %v1660_v11  ;;  %v13216_v48 = vsel %vm1222_vm8, %v13177_v33, %v1664_v51  ;;  %v1666_v17 = vrot.slane %v1653_v56, 4  ;;  %v19149_v33 = vld [vmem:[#allocation38_spill] sm:$0xff] }
 0x2df   : > { %19082 = vst [vmem:[#allocation94_spill] sm:$0xff] %v13183_v55  ;;  %v13201_v54 = vsel %vm1222_vm8, %v1546_v20, %v13102_v34  ;;  %v13219_v35 = vsel %vm1222_vm8, %v1653_v56, %v1668_v7  ;;  %v2380_v2 = vrot.slane %v13193_v0, 4  ;;  %v2492_v57 = vrot.slane %v13216_v48, 4  ;;  %v11007_v7 = vpop.permute.xlu0 %11006 }
 0x2e0   : > { %19083 = vst [vmem:[#allocation95_spill] sm:$0xff] %v13188_v26  ;;  %v13227_v11 = vsel %vm1222_vm8, %v1666_v17, %v13133_v39  ;;  %v4346_v56 = vrot.slane %v11028_v60, 4  ;;  %v4349_v43 = vsel %vm1222_vm8, %v11028_v60, %v13070_v1  ;;  %v19094_v31 = vunpack.i.h.bf16 %v13001_v41 }
 0x2e1   : > { %19084 = vst [vmem:[#allocation96_spill] sm:$0xff] %v13193_v0  ;;  %v13238_v27 = vsel %vm1222_vm8, %v13183_v55, %v2380_v2  ;;  %v13241_v39 = vperm.slane %v4349_v43, %v12049_v21  ;;  %v13247_v17 = vperm.slane %v4461_v22, %v12049_v21  ;;  %v19095_v6 = vunpack.i.l.bf16 %v13001_v41 }
 0x2e2   : > { %19085 = vst [vmem:[#allocation97_spill] sm:$0xff] %v13196_v52  ;;  %v4459_v20 = vsel %vm1222_vm8, %v4458_v19, %v19094_v31  ;;  %v11009_v60 = vunpack.i.h.bf16 %v11007_v7  ;;  %v11008_v2 = vunpack.i.l.bf16 %v11007_v7  ;;  %v13258_v43 = vsel %vm1222_vm8, %v13219_v35, %v2492_v57  ;;  %v19150_v52 = vld [vmem:[#allocation42_spill] sm:$0xff] }
 0x2e3   : > { %19086 = vst [vmem:[#allocation98_spill] sm:$0xff] %v13201_v54  ;;  %v4347_v44 = vsel %vm1222_vm8, %v4346_v56, %v19095_v6  ;;  %v13253_v1 = vperm.slane %v4459_v20, %v12049_v21  ;;  %v19097_v6 = vrot.slane %v12033_v5, 4  ;;  %v19098_v57 = vrot.slane %v12027_v3, 4 }
 0x2e4   : > { %19087 = vst [vmem:[#allocation99_spill] sm:$0xff] %v13205_v53  ;;  %v13261_v19 = vperm.slane %v4347_v44, %v12049_v21  ;;  %v4422_v31 = vrot.slane %v11009_v60, 4  ;;  %v4310_v20 = vrot.slane %v11008_v2, 4  ;;  %v19099_v10 = vrot.slane %v12938_v61, 4 }
 0x2e5   : > { %19088 = vst [vmem:[#allocation100_spill] sm:$0xff] %v13209_v63  ;;  %v4425_v56 = vsel %vm1222_vm8, %v11009_v60, %v19097_v6  ;;  %v4313_v44 = vsel %vm1222_vm8, %v11008_v2, %v19098_v57  ;;  %v3674_v54 = vrot.slane %v19149_v33, 4  ;;  %v3686_v37 = vrot.slane %v19150_v52, 4 }
 0x2e6   : > { %19089 = vst [vmem:[#allocation101_spill] sm:$0xff] %v13212_v58  ;;  %v13270_v51 = vperm.slane %v4425_v56, %v12049_v21  ;;  %v13279_v15 = vsel %vm1222_vm8, %v19099_v10, %v12871_v47  ;;  %v4423_v25 = vsel %vm1222_vm8, %v4422_v31, %v12033_v5  ;;  %v4311_v60 = vsel %vm1222_vm8, %v4310_v20, %v12027_v3 }
 0x2e7   : > { %19090 = vst [vmem:[#allocation102_spill] sm:$0xff] %v13216_v48  ;;  %v13286_v6 = vperm.slane %v4313_v44, %v12049_v21  ;;  %v19100_v56 = vrot.slane %v12949_v45, 4  ;;  %v13296_v10 = vperm.slane %v4423_v25, %v12049_v21  ;;  %v13299_v34 = vperm.slane %v4311_v60, %v12049_v21 }
 0x2e8   : > { %19091 = vst [vmem:[#allocation103_spill] sm:$0xff] %v13219_v35  ;;  %v19101_v5 = vrot.slane %v12871_v47, 4  ;;  %v19103_v25 = vrot.slane %v12959_v4, 4  ;;  %v19153_v33 = vrot.slane %v19152_v13, 4 }
 0x2e9   : > { %19092 = vst [vmem:[#allocation104_spill] sm:$0xff] %v13227_v11  ;;  %v13292_v2 = vsel %vm1222_vm8, %v19100_v56, %v12889_v23  ;;  %v19102_v23 = vrot.slane %v12934_v24, 4  ;;  %v19105_v56 = vrot.slane %v12860_v46, 4 }
 0x2ea   : > { %19093 = vst [vmem:[#allocation105_spill] sm:$0xff] %v13238_v27  ;;  %v13305_v3 = vsel %vm1222_vm8, %v12938_v61, %v19101_v5  ;;  %v13319_v44 = vsel %vm1222_vm8, %v19103_v25, %v12878_v32  ;;  %v19104_v61 = vrot.slane %v12945_v49, 4  ;;  %v3774_v24 = vrot.slane %v13292_v2, 4 }
 0x2eb   : > { %19096 = vst [vmem:[#allocation106_spill] sm:$0xff] %v13258_v43  ;;  %v13313_v20 = vsel %vm1222_vm8, %v19102_v23, %v12875_v29  ;;  %v13332_v29 = vsel %vm1222_vm8, %v12945_v49, %v19105_v56  ;;  %v19106_v32 = vrot.slane %v12962_v30, 4  ;;  %v3786_v23 = vrot.slane %v12972_v59, 4 }
 0x2ec   : > { %v13326_v60 = vsel %vm1222_vm8, %v19104_v61, %v12860_v46  ;;  %v3798_v25 = vrot.slane %v12976_v50, 4  ;;  %v3775_v46 = vsel %vm1222_vm8, %v3774_v24, %v13279_v15  ;;  %v19107_v61 = vrot.slane %v12967_v62, 4 }
 0x2ed   : > { %v13340_v5 = vsel %vm1222_vm8, %v19106_v32, %v12852_v9  ;;  %v3886_v14 = vrot.slane %v13319_v44, 4  ;;  %v3787_v9 = vsel %vm1222_vm8, %v3786_v23, %v13305_v3  ;;  %v3781_v24 = vperm.slane %v3775_v46, %v12049_v21 }
 0x2ee   : > { %v3811_v56 = vsel %vm1222_vm8, %v19107_v61, %v12956_v38  ;;  %v3799_v32 = vsel %vm1222_vm8, %v3798_v25, %v13313_v20  ;;  %v3793_v31 = vperm.slane %v3787_v9, %v12049_v21  ;;  %v3898_v30 = vrot.slane %v12984_v36, 4 }
 0x2ef   : > { %v3817_v40 = vperm.slane %v3811_v56, %v12049_v21  ;;  %v3805_v47 = vperm.slane %v3799_v32, %v12049_v21  ;;  %v3887_v61 = vsel %vm1222_vm8, %v3886_v14, %v13326_v60  ;;  %v3910_v56 = vrot.slane %v13012_v18, 4 }
 0x2f0   : > { %v3822_v49 = vrot.slane %v3793_v31, 4  ;;  %v3893_v25 = vperm.slane %v3887_v61, %v12049_v21  ;;  %v19108_v46 = vrot.slane %v12995_v16, 4  ;;  %v3899_v14 = vsel %vm1222_vm8, %v3898_v30, %v13332_v29 }
 0x2f1   : > { %v3846_v4 = vrot.slane %v3817_v40, 4  ;;  %v3905_v57 = vperm.slane %v3899_v14, %v12049_v21  ;;  %v3911_v22 = vsel %vm1222_vm8, %v3910_v56, %v13340_v5  ;;  %v3824_v7 = vrot.slane %v3781_v24, 4 }
 0x2f2   : > { %v3923_v9 = vsel %vm1222_vm8, %v19108_v46, %v12990_v8  ;;  %v3823_v41 = vsel %vm1222_vm8, %v3822_v49, %v3781_v24  ;;  %v3848_v43 = vrot.slane %v3805_v47, 4  ;;  %v3936_v49 = vrot.slane %v3893_v25, 4 }
 0x2f3   : > { %v3847_v32 = vsel %vm1222_vm8, %v3846_v4, %v3805_v47  ;;  %v3929_v23 = vperm.slane %v3923_v9, %v12049_v21  ;;  %v13385_v46 = vperm.slane %v3823_v41, %v12080_v28  ;;  %v3917_v4 = vperm.slane %v3911_v22, %v12049_v21 }
 0x2f4   : > { %v13379_v61 = vperm.slane %v3847_v32, %v12080_v28  ;;  %v3934_v9 = vrot.slane %v3905_v57, 4  ;;  %v3825_v14 = vsel %vm1222_vm8, %v3793_v31, %v3824_v7  ;;  %v3849_v32 = vsel %vm1222_vm8, %v3817_v40, %v3848_v43  ;;  %v11017_v40 = vpop.permute.xlu0 %11016 }
 0x2f5   : > { %v3958_v30 = vrot.slane %v3929_v23, 4  ;;  %v3960_v35 = vrot.slane %v3917_v4, 4  ;;  %v3833_v24 = vperm.slane %v3825_v14, %v12080_v28  ;;  %v3857_v31 = vperm.slane %v3849_v32, %v12080_v28 }
 0x2f6   : > { %v3870_v45 = vrot.slane %v13379_v61, 4  ;;  %v3935_v56 = vsel %vm1222_vm8, %v3934_v9, %v3893_v25  ;;  %v11019_v11 = vunpack.i.h.bf16 %v11017_v40  ;;  %v11018_v26 = vunpack.i.l.bf16 %v11017_v40 }
 0x2f7   : > { %v3959_v27 = vsel %vm1222_vm8, %v3958_v30, %v3917_v4  ;;  %v13400_v47 = vperm.slane %v3935_v56, %v12080_v28  ;;  %v3937_v30 = vsel %vm1222_vm8, %v3905_v57, %v3936_v49  ;;  %v3961_v25 = vsel %vm1222_vm8, %v3929_v23, %v3960_v35 }
 0x2f8   : > { %v3871_v41 = vsel %vm1222_vm8, %v3870_v45, %v13385_v46  ;;  %v13396_v22 = vperm.slane %v3959_v27, %v12080_v28  ;;  %v3945_v45 = vperm.slane %v3937_v30, %v12080_v28  ;;  %v13408_v27 = vpop.permute.xlu2 %11031  ;;  %v3969_v14 = vperm.slane %v3961_v25, %v12080_v28 }
 0x2f9   : > { %v5048_v48 = vpack.c.bf16 %v3871_v41, %v3871_v41  ;;  %19109 = vst [vmem:[#allocation107_spill] sm:$0xff] %v13408_v27  ;;  %v3874_v49 = vrot.slane %v3857_v31, 4  ;;  %v3876_v32 = vrot.slane %v3833_v24, 4  ;;  %v4446_v0 = vrot.slane %v11019_v11, 4 }
 0x2fa   : > { %v3982_v7 = vrot.slane %v13396_v22, 4  ;;  %v3986_v56 = vrot.slane %v3969_v14, 4  ;;  %v3988_v23 = vrot.slane %v3945_v45, 4 }
 0x2fb   : > { %v5104_v57 = vunpack.c.l.b16 %v5048_v48  ;;  %v3875_v30 = vsel %vm1222_vm8, %v3874_v49, %v3833_v24  ;;  %v3877_v9 = vsel %vm1222_vm8, %v3857_v31, %v3876_v32  ;;  %v4449_v24 = vsel %vm1222_vm8, %v11019_v11, %v13006_v12  ;;  %v19110_v32 = vld [vmem:[#allocation82_spill] sm:$0xff] }
 0x2fc   : > { %v3983_v43 = vsel %vm1222_vm8, %v3982_v7, %v13400_v47  ;;  %v3987_v58 = vsel %vm1222_vm8, %v3986_v56, %v3945_v45  ;;  %v5056_v63 = vpack.c.bf16 %v3875_v30, %v3875_v30  ;;  %v3989_v48 = vsel %vm1222_vm8, %v3969_v14, %v3988_v23 }
 0x2fd   : > { %v5049_v41 = vpack.c.bf16 %v3983_v43, %v3983_v43  ;;  %v5057_v7 = vpack.c.bf16 %v3987_v58, %v3987_v58  ;;  %v5060_v55 = vpack.c.bf16 %v3877_v9, %v3877_v9  ;;  %v5061_v43 = vpack.c.bf16 %v3989_v48, %v3989_v48  ;;  %v19112_v58 = vld [vmem:[#allocation83_spill] sm:$0xff] }
 0x2fe   : > { %v5259_v35 = vunpack.c.l.b16 %v5056_v63  ;;  %v4334_v14 = vrot.slane %v11018_v26, 4  ;;  %v4337_v9 = vsel %vm1222_vm8, %v11018_v26, %v19112_v58  ;;  %v19113_v12 = vunpack.i.h.bf16 %v13408_v27 }
 0x2ff   : > { %v5105_v25 = vunpack.c.l.b16 %v5049_v41  ;;  %v5260_v49 = vunpack.c.l.b16 %v5057_v7  ;;  %v5336_v4 = vunpack.c.l.b16 %v5060_v55  ;;  %v5337_v31 = vunpack.c.l.b16 %v5061_v43 }
 0x300   : > { %v19111_v41 = vunpack.i.h.bf16 %v19110_v32  ;;  %v13432_v11 = vrot.slane %v19113_v12, 4  ;;  %v4345_v40 = vperm.slane %v4337_v9, %v12049_v21  ;;  %v4457_v23 = vperm.slane %v4449_v24, %v12049_v21 }
 0x301   : > { %v5107_v53 = vpack.c.b16 %v5105_v25, %v5104_v57  ;;  %v5262_v63 = vpack.c.b16 %v5260_v49, %v5259_v35  ;;  %v5339_v55 = vpack.c.b16 %v5337_v31, %v5336_v4  ;;  %v19116_v26 = vrot.slane %v13253_v1, 4 }
 0x302   : > { %v4447_v45 = vsel %vm1222_vm8, %v4446_v0, %v19111_v41  ;;  %19114 = vst [vmem:[#allocation82_spill] sm:$0xff] %v13432_v11  ;;  %v19115_v0 = vunpack.i.l.bf16 %v19110_v32  ;;  %v19117_v4 = vrot.slane %v13241_v39, 4  ;;  %v4396_v49 = vrot.slane %v4345_v40, 4  ;;  %v19146_v11 = vld [vmem:[#allocation33_spill] sm:$0xff] }
 0x303   : > { %v5125_v56 = vsel %vm5108_vm9, %v5107_v53, 0  ;;  %v4453_v57 = vperm.slane %v4447_v45, %v12049_v21  ;;  %v5279_v35 = vsel %vm5108_vm9, %v5262_v63, 0  ;;  %v5356_v48 = vsel %vm5108_vm9, %v5339_v55, 0 }
 0x304   : > { %5133 = vmatpush.bf16.xpose.msrb.mxu1 %v5125_v56  ;;  %10767 = vmatpush.bf16.xpose.msra.mxu3 %v5125_v56  ;;  %v4335_v53 = vsel %vm1222_vm8, %v4334_v14, %v19115_v0  ;;  %v4395_v43 = vsel %vm1222_vm8, %v19117_v4, %v4345_v40  ;;  %v19118_v41 = vrot.slane %v13261_v19, 4  ;;  %v19119_v58 = vrot.slane %v13247_v17, 4 }
 0x305   : > { %v4495_v30 = vsel %vm1222_vm8, %v19116_v26, %v4453_v57  ;;  %v4496_v25 = vrot.slane %v4453_v57, 4  ;;  %v4341_v7 = vperm.slane %v4335_v53, %v12049_v21  ;;  %5287 = vmatpush.bf16.xpose.msrb.mxu2 %v5279_v35  ;;  %5364 = vmatpush.bf16.xpose.msrb.mxu0 %v5356_v48  ;;  %v13449_v24 = vperm.slane %v4395_v43, %v12080_v28  ;;  %v19122_v26 = vld [vmem:[#allocation36_spill] sm:$0xff]  ;;  %v19134_v35 = vld [vmem:[#allocation31_spill] sm:$0xff] }
 0x306   : > { %v13454_v32 = vperm.slane %v4495_v30, %v12080_v28  ;;  %v4507_v9 = vsel %vm1222_vm8, %v19119_v58, %v4457_v23  ;;  %v19120_v57 = vunpack.i.l.bf16 %v13408_v27  ;;  %v4397_v12 = vsel %vm1222_vm8, %v13241_v39, %v4396_v49  ;;  %v19127_v58 = vld [vmem:[#allocation32_spill] sm:$0xff]  ;;  %v19131_v49 = vld [vmem:[#allocation29_spill] sm:$0xff] }
 0x307   : > { %v4497_v31 = vsel %vm1222_vm8, %v13253_v1, %v4496_v25  ;;  %v4383_v45 = vsel %vm1222_vm8, %v19118_v41, %v4341_v7  ;;  %v4384_v56 = vrot.slane %v4341_v7, 4  ;;  %v4508_v55 = vrot.slane %v4457_v23, 4  ;;  %v19124_v41 = vld [vmem:[#allocation30_spill] sm:$0xff]  ;;  %v19133_v23 = vld [vmem:[#allocation25_spill] sm:$0xff] }
 0x308   : > { %v13460_v14 = vperm.slane %v4497_v31, %v12080_v28  ;;  %v13467_v63 = vrot.slane %v19120_v57, 4  ;;  %v13470_v1 = vperm.slane %v4383_v45, %v12080_v28  ;;  %v13477_v0 = vperm.slane %v4397_v12, %v12080_v28  ;;  %v19123_v31 = vld [vmem:[#allocation22_spill] sm:$0xff]  ;;  %v19138_v12 = vld [vmem:[#allocation28_spill] sm:$0xff] }
 0x309   : > { %v4385_v40 = vsel %vm1222_vm8, %v13261_v19, %v4384_v56  ;;  %v13480_v53 = vperm.slane %v4507_v9, %v12080_v28  ;;  %v3562_v30 = vrot.slane %v19122_v26, 4  ;;  %v4509_v39 = vsel %vm1222_vm8, %v13247_v17, %v4508_v55  ;;  %v19126_v56 = vld [vmem:[#allocation24_spill] sm:$0xff] }
 0x30a   : > { %19121 = vst [vmem:[#allocation83_spill] sm:$0xff] %v13467_v63  ;;  %v13484_v25 = vperm.slane %v4385_v40, %v12080_v28  ;;  %v13493_v7 = vperm.slane %v4509_v39, %v12080_v28  ;;  %v19125_v45 = vrot.slane %v19124_v41, 4  ;;  %v19128_v9 = vrot.slane %v19127_v58, 4  ;;  %v19130_v39 = vld [vmem:[#allocation20_spill] sm:$0xff] }
 0x30b   : > { %v19129_v55 = vrot.slane %v19123_v31, 4  ;;  %v19132_v4 = vrot.slane %v19131_v49, 4  ;;  %v19135_v58 = vrot.slane %v19134_v35, 4  ;;  %v19139_v48 = vrot.slane %v19138_v12, 4 }
 0x30c   : > { %v13502_v17 = vsel %vm1222_vm8, %v19125_v45, %v19123_v31  ;;  %v13508_v57 = vsel %vm1222_vm8, %v19128_v9, %v19126_v56  ;;  %v19137_v9 = vld [vmem:[#allocation23_spill] sm:$0xff] }
 0x30d   : > { %v13515_v40 = vsel %vm1222_vm8, %v19124_v41, %v19129_v55  ;;  %v13521_v45 = vsel %vm1222_vm8, %v19132_v4, %v19130_v39  ;;  %v13527_v56 = vsel %vm1222_vm8, %v19135_v58, %v19133_v23  ;;  %v13533_v31 = vsel %vm1222_vm8, %v19139_v48, %v19137_v9  ;;  %v19142_v55 = vld [vmem:[#allocation27_spill] sm:$0xff] }
 0x30e   : > { %19136 = vst [vmem:[#allocation36_spill] sm:$0xff] %v13527_v56  ;;  %v19141_v41 = vrot.slane %v19137_v9, 4  ;;  %v3550_v4 = vrot.slane %v13508_v57, 4  ;;  %v3563_v35 = vsel %vm1222_vm8, %v3562_v30, %v13515_v40  ;;  %v19143_v23 = vld [vmem:[#allocation35_spill] sm:$0xff]  ;;  %v19145_v9 = vld [vmem:[#allocation37_spill] sm:$0xff]  ;;  %v19147_v30 = vld [vmem:[#allocation34_spill] sm:$0xff] }
 0x30f   : > { %19140 = vst [vmem:[#allocation22_spill] sm:$0xff] %v13533_v31  ;;  %v19144_v39 = vrot.slane %v19143_v23, 4  ;;  %v13552_v43 = vperm.slane %v3563_v35, %v12049_v21  ;;  %v3574_v19 = vrot.slane %v19145_v9, 4  ;;  %v19148_v63 = vrot.slane %v19147_v30, 4 }
 0x310   : > { %v13539_v49 = vsel %vm1222_vm8, %v19138_v12, %v19141_v41  ;;  %v3551_v12 = vsel %vm1222_vm8, %v3550_v4, %v13502_v17  ;;  %v19151_v41 = vld [vmem:[#allocation40_spill] sm:$0xff] }
 0x311   : > { %v13548_v58 = vsel %vm1222_vm8, %v19144_v39, %v19142_v55  ;;  %v3587_v23 = vsel %vm1222_vm8, %v19148_v63, %v19146_v11  ;;  %v3662_v55 = vrot.slane %v13527_v56, 4  ;;  %v13564_v39 = vperm.slane %v3551_v12, %v12049_v21 }
 0x312   : > { %v3575_v35 = vsel %vm1222_vm8, %v3574_v19, %v13521_v45  ;;  %v13569_v48 = vperm.slane %v3587_v23, %v12049_v21  ;;  %v3598_v4 = vrot.slane %v13552_v43, 4 }
 0x313   : > { %v13574_v27 = vperm.slane %v3575_v35, %v12049_v21  ;;  %v3663_v63 = vsel %vm1222_vm8, %v3662_v55, %v13533_v31  ;;  %v3675_v55 = vsel %vm1222_vm8, %v3674_v54, %v13539_v49 }
 0x314   : > { %v3599_v12 = vsel %vm1222_vm8, %v3598_v4, %v13564_v39  ;;  %v3622_v19 = vrot.slane %v13569_v48, 4  ;;  %v13588_v35 = vperm.slane %v3663_v63, %v12049_v21  ;;  %v3699_v4 = vsel %vm1222_vm8, %v19153_v33, %v19151_v41 }
 0x315   : > { %v13585_v42 = vperm.slane %v3599_v12, %v12080_v28  ;;  %v13599_v23 = vperm.slane %v3675_v55, %v12049_v21  ;;  %v3687_v12 = vsel %vm1222_vm8, %v3686_v37, %v13548_v58  ;;  %v13604_v63 = vperm.slane %v3699_v4, %v12049_v21 }
 0x316   : > { %v3623_v56 = vsel %vm1222_vm8, %v3622_v19, %v13574_v27  ;;  %v13610_v54 = vperm.slane %v3687_v12, %v12049_v21  ;;  %v19154_v33 = vrot.slane %v13385_v46, 4  ;;  %v19155_v55 = vrot.slane %v13400_v47, 4 }
 0x317   : > { %v13607_v52 = vperm.slane %v3623_v56, %v12080_v28  ;;  %v3710_v37 = vrot.slane %v13599_v23, 4  ;;  %v3734_v4 = vrot.slane %v13604_v63, 4  ;;  %v19156_v12 = vrot.slane %v13279_v15, 4 }
 0x318   : > { %v3873_v19 = vsel %vm1222_vm8, %v13379_v61, %v19154_v33  ;;  %v3985_v13 = vsel %vm1222_vm8, %v13396_v22, %v19155_v55  ;;  %v19157_v61 = vrot.slane %v13305_v3, 4  ;;  %v19158_v22 = vrot.slane %v13313_v20, 4 }
 0x319   : > { %v5052_v41 = vpack.c.bf16 %v3873_v19, %v3873_v19  ;;  %v5053_v56 = vpack.c.bf16 %v3985_v13, %v3985_v13  ;;  %v3646_v31 = vrot.slane %v13607_v52, 4  ;;  %v3777_v46 = vsel %vm1222_vm8, %v13292_v2, %v19156_v12 }
 0x31a   : > { %v3789_v47 = vsel %vm1222_vm8, %v12972_v59, %v19157_v61  ;;  %v3801_v33 = vsel %vm1222_vm8, %v12976_v50, %v19158_v22  ;;  %v3711_v13 = vsel %vm1222_vm8, %v3710_v37, %v13588_v35  ;;  %v3735_v19 = vsel %vm1222_vm8, %v3734_v4, %v13610_v54 }
 0x31b   : > { %v5182_v15 = vunpack.c.l.b16 %v5052_v41  ;;  %v5183_v55 = vunpack.c.l.b16 %v5053_v56  ;;  %v3647_v2 = vsel %vm1222_vm8, %v3646_v31, %v13585_v42  ;;  %v13642_v3 = vperm.slane %v3711_v13, %v12080_v28 }
 0x31c   : > { %v13645_v59 = vperm.slane %v3735_v19, %v12080_v28  ;;  %v13648_v20 = vperm.slane %v3777_v46, %v12049_v21  ;;  %v5046_v12 = vpack.c.bf16 %v3647_v2, %v3647_v2  ;;  %v13653_v41 = vperm.slane %v3789_v47, %v12049_v21 }
 0x31d   : > { %v5185_v31 = vpack.c.b16 %v5183_v55, %v5182_v15  ;;  %v19159_v56 = vrot.slane %v12956_v38, 4  ;;  %v19160_v22 = vrot.slane %v13326_v60, 4  ;;  %v3809_v13 = vperm.slane %v3801_v33, %v12049_v21 }
 0x31e   : > { %v3758_v4 = vrot.slane %v13645_v59, 4  ;;  %v3834_v47 = vrot.slane %v13653_v41, 4  ;;  %v3836_v2 = vrot.slane %v13648_v20, 4  ;;  %v5102_v38 = vunpack.c.l.b16 %v5046_v12 }
 0x31f   : > { %v3813_v61 = vsel %vm1222_vm8, %v12967_v62, %v19159_v56  ;;  %v3889_v46 = vsel %vm1222_vm8, %v13319_v44, %v19160_v22  ;;  %v19161_v62 = vrot.slane %v13332_v29, 4  ;;  %v5202_v22 = vsel %vm5108_vm9, %v5185_v31, 0 }
 0x320   : > { %v3821_v19 = vperm.slane %v3813_v61, %v12049_v21  ;;  %v3759_v15 = vsel %vm1222_vm8, %v3758_v4, %v13642_v3  ;;  %v13671_v55 = vperm.slane %v3889_v46, %v12049_v21  ;;  %v3835_v33 = vsel %vm1222_vm8, %v3834_v47, %v13648_v20 }
 0x321   : > { %v3901_v44 = vsel %vm1222_vm8, %v12984_v36, %v19161_v62  ;;  %v5047_v60 = vpack.c.bf16 %v3759_v15, %v3759_v15  ;;  %v13682_v4 = vperm.slane %v3835_v33, %v12080_v28  ;;  %v19162_v12 = vrot.slane %v13340_v5, 4 }
 0x322   : > { %v3858_v56 = vrot.slane %v3821_v19, 4  ;;  %v3909_v61 = vperm.slane %v3901_v44, %v12049_v21  ;;  %v19163_v46 = vrot.slane %v12990_v8, 4  ;;  %v3860_v62 = vrot.slane %v3809_v13, 4 }
 0x323   : > { %v3913_v29 = vsel %vm1222_vm8, %v13012_v18, %v19162_v12  ;;  %v5103_v15 = vunpack.c.l.b16 %v5047_v60  ;;  %v3600_v33 = vrot.slane %v13564_v39, 4  ;;  %v3948_v8 = vrot.slane %v13671_v55, 4 }
 0x324   : > { %v3925_v36 = vsel %vm1222_vm8, %v12995_v16, %v19163_v46  ;;  %v3859_v20 = vsel %vm1222_vm8, %v3858_v56, %v3809_v13  ;;  %v3921_v47 = vperm.slane %v3913_v29, %v12049_v21  ;;  %v3946_v5 = vrot.slane %v3909_v61, 4 }
 0x325   : > { %v3933_v31 = vperm.slane %v3925_v36, %v12049_v21  ;;  %v13696_v44 = vperm.slane %v3859_v20, %v12080_v28  ;;  %v5106_v18 = vpack.c.b16 %v5103_v15, %v5102_v38  ;;  %v3624_v16 = vrot.slane %v13574_v27, 4  ;;  %v13721_v15 = vpop.permute.xlu2 %11046 }
 0x326   : > { %v3947_v56 = vsel %vm1222_vm8, %v3946_v5, %v13671_v55  ;;  %v3601_v13 = vsel %vm1222_vm8, %v13552_v43, %v3600_v33  ;;  %v3712_v29 = vrot.slane %v13588_v35, 4  ;;  %v3736_v35 = vrot.slane %v13610_v54, 4 }
 0x327   : > { %v3970_v12 = vrot.slane %v3933_v31, 4  ;;  %v3878_v60 = vrot.slane %v13696_v44, 4  ;;  %v5122_v46 = vsel %vm5108_vm9, %v5106_v18, 0  ;;  %v13710_v38 = vperm.slane %v3947_v56, %v12080_v28 }
 0x328   : > { %5134 = vmatpush.bf16.xpose.msrb.mxu1 %v5122_v46  ;;  %10768 = vmatpush.bf16.xpose.msra.mxu3 %v5122_v46  ;;  %v3625_v43 = vsel %vm1222_vm8, %v13569_v48, %v3624_v16  ;;  %v3609_v5 = vperm.slane %v3601_v13, %v12080_v28  ;;  %v3713_v18 = vsel %vm1222_vm8, %v13599_v23, %v3712_v29  ;;  %v18801_v13 = vunpack.i.h.bf16 %v13721_v15 }
 0x329   : > { %v3971_v36 = vsel %vm1222_vm8, %v3970_v12, %v3921_v47  ;;  %v3879_v27 = vsel %vm1222_vm8, %v3878_v60, %v13682_v4  ;;  %v3633_v33 = vperm.slane %v3625_v43, %v12080_v28  ;;  %v3972_v12 = vrot.slane %v3921_v47, 4 }
 0x32a   : > { %v13716_v55 = vperm.slane %v3971_v36, %v12080_v28  ;;  %v5064_v20 = vpack.c.bf16 %v3879_v27, %v3879_v27  ;;  %v3737_v48 = vsel %vm1222_vm8, %v13604_v63, %v3736_v35  ;;  %v3721_v16 = vperm.slane %v3713_v18, %v12080_v28 }
 0x32b   : > { %v3650_v54 = vrot.slane %v3633_v33, 4  ;;  %v3837_v23 = vsel %vm1222_vm8, %v13653_v41, %v3836_v2  ;;  %v3861_v47 = vsel %vm1222_vm8, %v3821_v19, %v3860_v62  ;;  %v18800_v43 = vunpack.i.l.bf16 %v13721_v15 }
 0x32c   : > { %v3990_v60 = vrot.slane %v13716_v55, 4  ;;  %v5413_v36 = vunpack.c.l.b16 %v5064_v20  ;;  %v3845_v18 = vperm.slane %v3837_v23, %v12080_v28  ;;  %v3949_v56 = vsel %vm1222_vm8, %v3909_v61, %v3948_v8 }
 0x32d   : > { %v3651_v27 = vsel %vm1222_vm8, %v3650_v54, %v3609_v5  ;;  %v3957_v41 = vperm.slane %v3949_v56, %v12080_v28  ;;  %v3973_v19 = vsel %vm1222_vm8, %v3933_v31, %v3972_v12  ;;  %v3764_v37 = vrot.slane %v3721_v16, 4 }
 0x32e   : > { %v3991_v46 = vsel %vm1222_vm8, %v3990_v60, %v13710_v38  ;;  %v5054_v35 = vpack.c.bf16 %v3651_v27, %v3651_v27  ;;  %v3652_v27 = vrot.slane %v3609_v5, 4  ;;  %v3884_v23 = vrot.slane %v3845_v18, 4 }
 0x32f   : > { %v5065_v29 = vpack.c.bf16 %v3991_v46, %v3991_v46  ;;  %v3981_v46 = vperm.slane %v3973_v19, %v12080_v28  ;;  %v3996_v8 = vrot.slane %v3957_v41, 4 }
 0x330   : > { %5210 = vmatpush.bf16.xpose.msra.mxu1 %v5202_v22  ;;  %v3745_v22 = vperm.slane %v3737_v48, %v12080_v28  ;;  %v3869_v48 = vperm.slane %v3861_v47, %v12080_v28  ;;  %v5257_v62 = vunpack.c.l.b16 %v5054_v35  ;;  %v3653_v56 = vsel %vm1222_vm8, %v3633_v33, %v3652_v27 }
 0x331   : > { %v5414_v60 = vunpack.c.l.b16 %v5065_v29  ;;  %v3994_v61 = vrot.slane %v3981_v46, 4 }
 0x332   : > { %v3762_v63 = vrot.slane %v3745_v22, 4  ;;  %v3882_v54 = vrot.slane %v3869_v48, 4  ;;  %v3765_v31 = vsel %vm1222_vm8, %v3745_v22, %v3764_v37  ;;  %v13758_v37 = vrot.slane %v18801_v13, 4  ;;  %v19165_v22 = vld [vmem:[#allocation47_spill] sm:$0xff] }
 0x333   : > { %v5416_v39 = vpack.c.b16 %v5414_v60, %v5413_v36  ;;  %v3995_v35 = vsel %vm1222_vm8, %v3994_v61, %v3957_v41  ;;  %v5058_v36 = vpack.c.bf16 %v3653_v56, %v3653_v56  ;;  %v5059_v5 = vpack.c.bf16 %v3765_v31, %v3765_v31  ;;  %v19166_v41 = vld [vmem:[#allocation51_spill] sm:$0xff] }
 0x334   : > { %v3763_v20 = vsel %vm1222_vm8, %v3762_v63, %v3721_v16  ;;  %v3883_v47 = vsel %vm1222_vm8, %v3882_v54, %v3845_v18  ;;  %v5073_v16 = vpack.c.bf16 %v3995_v35, %v3995_v35  ;;  %v3997_v18 = vsel %vm1222_vm8, %v3981_v46, %v3996_v8  ;;  %19164 = vst [vmem:[#allocation30_spill] sm:$0xff] %v13758_v37 }
 0x335   : > { %v5055_v2 = vpack.c.bf16 %v3763_v20, %v3763_v20  ;;  %v5433_v29 = vsel %vm5108_vm9, %v5416_v39, 0  ;;  %v5072_v63 = vpack.c.bf16 %v3883_v47, %v3883_v47  ;;  %v3885_v20 = vsel %vm1222_vm8, %v3869_v48, %v3884_v23  ;;  %v19169_v23 = vld [vmem:[#allocation46_spill] sm:$0xff] }
 0x336   : > { %5441 = vmatpush.bf16.xpose.msrb.mxu3 %v5433_v29  ;;  %v5334_v39 = vunpack.c.l.b16 %v5058_v36  ;;  %v5076_v54 = vpack.c.bf16 %v3885_v20, %v3885_v20  ;;  %v5077_v33 = vpack.c.bf16 %v3997_v18, %v3997_v18  ;;  %v19170_v47 = vld [vmem:[#allocation50_spill] sm:$0xff]  ;;  %v19175_v36 = vld [vmem:[#allocation52_spill] sm:$0xff] }
 0x337   : > { %v5258_v50 = vunpack.c.l.b16 %v5055_v2  ;;  %v5567_v60 = vunpack.c.l.b16 %v5072_v63  ;;  %v5335_v2 = vunpack.c.l.b16 %v5059_v5  ;;  %v19171_v61 = vrot.slane %v19170_v47, 4  ;;  %v19173_v29 = vld [vmem:[#allocation54_spill] sm:$0xff]  ;;  %v19176_v5 = vld [vmem:[#allocation53_spill] sm:$0xff] }
 0x338   : > { %v5644_v46 = vunpack.c.l.b16 %v5076_v54  ;;  %v19174_v63 = vrot.slane %v19173_v29, 4 }
 0x339   : > { %v5261_v12 = vpack.c.b16 %v5258_v50, %v5257_v62  ;;  %v5568_v50 = vunpack.c.l.b16 %v5073_v16  ;;  %v19167_v62 = vrot.slane %v19166_v41, 4  ;;  %v5338_v48 = vpack.c.b16 %v5335_v2, %v5334_v39  ;;  %v19178_v39 = vld [vmem:[#allocation57_spill] sm:$0xff]  ;;  %v19179_v2 = vld [vmem:[#allocation55_spill] sm:$0xff] }
 0x33a   : > { %v13770_v8 = vsel %vm1222_vm8, %v19171_v61, %v19169_v23  ;;  %v19177_v16 = vrot.slane %v19176_v5, 4  ;;  %v19180_v54 = vrot.slane %v19179_v2, 4  ;;  %v13805_v61 = vrot.slane %v18800_v43, 4  ;;  %v19190_v43 = vld [vmem:[#allocation64_spill] sm:$0xff] }
 0x33b   : > { %v5276_v19 = vsel %vm5108_vm9, %v5261_v12, 0  ;;  %v13764_v27 = vsel %vm1222_vm8, %v19167_v62, %v19165_v22  ;;  %19172 = vst [vmem:[#allocation32_spill] sm:$0xff] %v13770_v8  ;;  %v5570_v31 = vpack.c.b16 %v5568_v50, %v5567_v60  ;;  %v5645_v12 = vunpack.c.l.b16 %v5077_v33  ;;  %v19181_v60 = vld [vmem:[#allocation62_spill] sm:$0xff] }
 0x33c   : > { %5288 = vmatpush.bf16.xpose.msrb.mxu2 %v5276_v19  ;;  %19168 = vst [vmem:[#allocation24_spill] sm:$0xff] %v13764_v27  ;;  %v2119_v56 = vsel %vm1222_vm8, %v19174_v63, %v13764_v27  ;;  %v2131_v20 = vsel %vm1222_vm8, %v19177_v16, %v19175_v36  ;;  %v5353_v18 = vsel %vm5108_vm9, %v5338_v48, 0  ;;  %v2143_v22 = vsel %vm1222_vm8, %v19180_v54, %v19178_v39  ;;  %v19182_v48 = vld [vmem:[#allocation59_spill] sm:$0xff]  ;;  %v19184_v16 = vld [vmem:[#allocation56_spill] sm:$0xff]  ;;  %v19198_v27 = vld [vmem:[#allocation89_spill] sm:$0xff] }
 0x33d   : > { %v13777_v35 = vperm.slane %v2119_v56, %v12049_v21  ;;  %v13785_v19 = vperm.slane %v2131_v20, %v12049_v21  ;;  %v13793_v50 = vperm.slane %v19181_v60, %v12049_v21  ;;  %v5587_v33 = vsel %vm5108_vm9, %v5570_v31, 0  ;;  %5365 = vmatpush.bf16.xpose.msrb.mxu0 %v5353_v18  ;;  %v19185_v20 = vld [vmem:[#allocation58_spill] sm:$0xff]  ;;  %v19188_v60 = vld [vmem:[#allocation61_spill] sm:$0xff] }
 0x33e   : > { %v5647_v41 = vpack.c.b16 %v5645_v12, %v5644_v46  ;;  %v13797_v62 = vperm.slane %v2143_v22, %v12049_v21  ;;  %v19183_v23 = vrot.slane %v19182_v48, 4  ;;  %v11022_v46 = vpop.permute.xlu0 %11021  ;;  %v19186_v18 = vrot.slane %v19185_v20, 4  ;;  %v19187_v22 = vld [vmem:[#allocation60_spill] sm:$0xff] }
 0x33f   : > { %v2166_v63 = vrot.slane %v13785_v19, 4  ;;  %v2190_v56 = vrot.slane %v13793_v50, 4  ;;  %v13823_v13 = vperm.slane %v19190_v43, %v12049_v21 }
 0x340   : > { %v2231_v47 = vsel %vm1222_vm8, %v19183_v23, %v13770_v8  ;;  %v5664_v12 = vsel %vm5108_vm9, %v5647_v41, 0  ;;  %v2243_v54 = vsel %vm1222_vm8, %v19186_v18, %v19184_v16  ;;  %v19189_v23 = vrot.slane %v19188_v60, 4 }
 0x341   : > { %v13810_v31 = vperm.slane %v2231_v47, %v12049_v21  ;;  %v2167_v47 = vsel %vm1222_vm8, %v2166_v63, %v13777_v35  ;;  %v2191_v41 = vsel %vm1222_vm8, %v2190_v56, %v13797_v62  ;;  %v13830_v20 = vperm.slane %v2243_v54, %v12049_v21  ;;  %v19194_v63 = vld [vmem:[#allocation85_spill] sm:$0xff] }
 0x342   : > { %v13836_v60 = vperm.slane %v2167_v47, %v12080_v28  ;;  %v2302_v43 = vrot.slane %v13823_v13, 4  ;;  %v11023_v54 = vunpack.i.l.bf16 %v11022_v46 }
 0x343   : > { %v2278_v56 = vrot.slane %v13830_v20, 4 }
 0x344   : > { %5595 = vmatpush.bf16.xpose.msra.mxu2 %v5587_v33  ;;  %v2255_v33 = vsel %vm1222_vm8, %v19189_v23, %v19187_v22  ;;  %19191 = vst [vmem:[#allocation20_spill] sm:$0xff] %v13836_v60  ;;  %v13839_v23 = vperm.slane %v2191_v41, %v12080_v28  ;;  %v4322_v8 = vrot.slane %v11023_v54, 4 }
 0x345   : > { %5672 = vmatpush.bf16.xpose.msra.mxu0 %v5664_v12  ;;  %v13833_v18 = vperm.slane %v2255_v33, %v12049_v21  ;;  %v11024_v12 = vunpack.i.h.bf16 %v11022_v46  ;;  %v2279_v41 = vsel %vm1222_vm8, %v2278_v56, %v13810_v31 }
 0x346   : > { %19192 = vst [vmem:[#allocation29_spill] sm:$0xff] %v13839_v23  ;;  %v2214_v16 = vrot.slane %v13839_v23, 4  ;;  %v13859_v39 = vperm.slane %v2279_v41, %v12080_v28  ;;  %v4325_v41 = vsel %vm1222_vm8, %v11023_v54, %v19198_v27 }
 0x347   : > { %v2303_v33 = vsel %vm1222_vm8, %v2302_v43, %v13833_v18  ;;  %v4434_v47 = vrot.slane %v11024_v12, 4  ;;  %v4437_v22 = vsel %vm1222_vm8, %v11024_v12, %v19194_v63  ;;  %v19195_v43 = vld [vmem:[#allocation84_spill] sm:$0xff] }
 0x348   : > { %v13852_v2 = vperm.slane %v2303_v33, %v12080_v28  ;;  %v2215_v46 = vsel %vm1222_vm8, %v2214_v16, %v13836_v60  ;;  %v19196_v5 = vunpack.i.h.bf16 %v19195_v43  ;;  %v4445_v36 = vperm.slane %v4437_v22, %v12049_v21 }
 0x349   : > { %v4982_v33 = vpack.c.bf16 %v2215_v46, %v2215_v46  ;;  %v19197_v12 = vunpack.i.l.bf16 %v19195_v43 }
 0x34a   : > { %19193 = vst [vmem:[#allocation25_spill] sm:$0xff] %v13852_v2  ;;  %v4435_v48 = vsel %vm1222_vm8, %v4434_v47, %v19196_v5  ;;  %v2326_v56 = vrot.slane %v13852_v2, 4  ;;  %v4482_v46 = vrot.slane %v4445_v36, 4 }
 0x34b   : > { %v4441_v29 = vperm.slane %v4435_v48, %v12049_v21  ;;  %v4323_v63 = vsel %vm1222_vm8, %v4322_v8, %v19197_v12  ;;  %v4333_v48 = vperm.slane %v4325_v41, %v12049_v21  ;;  %v5086_v43 = vunpack.c.l.b16 %v4982_v33 }
 0x34c   : > { %v4329_v23 = vperm.slane %v4323_v63, %v12049_v21  ;;  %v2327_v22 = vsel %vm1222_vm8, %v2326_v56, %v13859_v39  ;;  %v19199_v8 = vrot.slane %v13299_v34, 4  ;;  %v19200_v63 = vrot.slane %v13286_v6, 4 }
 0x34d   : > { %v4470_v47 = vrot.slane %v4441_v29, 4  ;;  %v4983_v2 = vpack.c.bf16 %v2327_v22, %v2327_v22  ;;  %v4370_v54 = vrot.slane %v4333_v48, 4  ;;  %v19201_v22 = vrot.slane %v13296_v10, 4 }
 0x34e   : > { %v4358_v37 = vrot.slane %v4329_v23, 4  ;;  %v4361_v12 = vsel %vm1222_vm8, %v4329_v23, %v19199_v8  ;;  %v4373_v16 = vsel %vm1222_vm8, %v4333_v48, %v19200_v63  ;;  %v19271_v8 = vld [vmem:[#allocation104_spill] sm:$0xff] }
 0x34f   : > { %v4369_v27 = vperm.slane %v4361_v12, %v12080_v28  ;;  %v4471_v56 = vsel %vm1222_vm8, %v4470_v47, %v13296_v10  ;;  %v5087_v5 = vunpack.c.l.b16 %v4983_v2  ;;  %v4381_v33 = vperm.slane %v4373_v16, %v12080_v28 }
 0x350   : > { %v4359_v41 = vsel %vm1222_vm8, %v4358_v37, %v13299_v34  ;;  %v4473_v23 = vsel %vm1222_vm8, %v4441_v29, %v19201_v22  ;;  %v4371_v48 = vsel %vm1222_vm8, %v4370_v54, %v13286_v6  ;;  %v13901_v34 = vperm.slane %v4471_v56, %v12080_v28  ;;  %v19266_v54 = vld [vmem:[#allocation94_spill] sm:$0xff] }
 0x351   : > { %v13895_v12 = vperm.slane %v4359_v41, %v12080_v28  ;;  %v4412_v63 = vrot.slane %v4369_v27, 4  ;;  %v5094_v47 = vpack.c.b16 %v5087_v5, %v5086_v43  ;;  %v4377_v2 = vperm.slane %v4371_v48, %v12080_v28 }
 0x352   : > { %v4420_v60 = vrot.slane %v4381_v33, 4  ;;  %v19202_v10 = vrot.slane %v13470_v1, 4  ;;  %v19203_v29 = vrot.slane %v13484_v25, 4  ;;  %v19204_v6 = vrot.slane %v13477_v0, 4 }
 0x353   : > { %v4481_v43 = vperm.slane %v4473_v23, %v12080_v28  ;;  %10433 = vmatmul.msk.bf16.vlgmr.msrb.gmra.mxu1 %vm5108_vm9, %v5094_v47  ;;  %v13922_v56 = vsel %vm1222_vm8, %v13484_v25, %v4412_v63  ;;  %v4416_v41 = vrot.slane %v4377_v2, 4  ;;  %v4483_v22 = vsel %vm1222_vm8, %v4482_v46, %v13270_v51 }
 0x354   : > { %v13907_v37 = vsel %vm1222_vm8, %v19202_v10, %v13895_v12  ;;  %v13912_v16 = vsel %vm1222_vm8, %v19203_v29, %v4369_v27  ;;  %v4419_v5 = vsel %vm1222_vm8, %v19204_v6, %v4381_v33  ;;  %19205 = vst [vmem:[#allocation31_spill] sm:$0xff] %v13922_v56  ;;  %v19206_v27 = vrot.slane %v13449_v24, 4 }
 0x355   : > { %v13931_v33 = vsel %vm1222_vm8, %v13477_v0, %v4420_v60  ;;  %v19207_v23 = vrot.slane %v13270_v51, 4  ;;  %v4489_v10 = vperm.slane %v4483_v22, %v12080_v28  ;;  %v19208_v63 = vrot.slane %v13454_v32, 4 }
 0x356   : > { %v4415_v48 = vsel %vm1222_vm8, %v19206_v27, %v4377_v2  ;;  %v4524_v29 = vrot.slane %v4481_v43, 4  ;;  %v13947_v0 = vsel %vm1222_vm8, %v13449_v24, %v4416_v41  ;;  %v19210_v51 = vrot.slane %v13460_v14, 4 }
 0x357   : > { %v4485_v47 = vsel %vm1222_vm8, %v4445_v36, %v19207_v23  ;;  %v13942_v46 = vsel %vm1222_vm8, %v19208_v63, %v13901_v34  ;;  %v19212_v60 = vrot.slane %v13480_v53, 4  ;;  %v4528_v22 = vrot.slane %v4489_v10, 4 }
 0x358   : > { %v4493_v25 = vperm.slane %v4485_v47, %v12080_v28  ;;  %19209 = vst [vmem:[#allocation23_spill] sm:$0xff] %v13942_v46  ;;  %v13952_v36 = vsel %vm1222_vm8, %v19210_v51, %v4481_v43  ;;  %v13961_v27 = vsel %vm1222_vm8, %v13460_v14, %v4524_v29  ;;  %v19214_v41 = vrot.slane %v13493_v7, 4 }
 0x359   : > { %19211 = vst [vmem:[#allocation28_spill] sm:$0xff] %v13952_v36  ;;  %v13957_v6 = vsel %vm1222_vm8, %v19212_v60, %v4489_v10  ;;  %v4782_v51 = vrot.slane %v4419_v5, 4  ;;  %v4784_v60 = vrot.slane %v4415_v48, 4  ;;  %v13973_v10 = vsel %vm1222_vm8, %v13480_v53, %v4528_v22 }
 0x35a   : > { %19213 = vst [vmem:[#allocation27_spill] sm:$0xff] %v13961_v27  ;;  %v4532_v23 = vrot.slane %v4493_v25, 4  ;;  %v13968_v43 = vsel %vm1222_vm8, %v19214_v41, %v4493_v25  ;;  %v4796_v24 = vrot.slane %v13947_v0, 4  ;;  %v4908_v41 = vrot.slane %v13973_v10, 4 }
 0x35b   : > { %v13982_v47 = vsel %vm1222_vm8, %v4782_v51, %v4415_v48  ;;  %v13985_v25 = vsel %vm1222_vm8, %v4419_v5, %v4784_v60  ;;  %v4894_v22 = vrot.slane %v13968_v43, 4  ;;  %v19217_v51 = vrot.slane %v13585_v42, 4 }
 0x35c   : > { %v13977_v14 = vsel %vm1222_vm8, %v13493_v7, %v4532_v23  ;;  %19215 = vst [vmem:[#allocation35_spill] sm:$0xff] %v13985_v25  ;;  %v13991_v53 = vsel %vm1222_vm8, %v13931_v33, %v4796_v24  ;;  %v4896_v23 = vrot.slane %v13957_v6, 4  ;;  %v19218_v60 = vrot.slane %v13642_v3, 4 }
 0x35d   : > { %19216 = vst [vmem:[#allocation37_spill] sm:$0xff] %v13991_v53  ;;  %v3649_v5 = vsel %vm1222_vm8, %v13607_v52, %v19217_v51  ;;  %v2168_v24 = vrot.slane %v13777_v35, 4  ;;  %v2192_v52 = vrot.slane %v13797_v62, 4  ;;  %v2280_v3 = vrot.slane %v13810_v31, 4 }
 0x35e   : > { %v3761_v63 = vsel %vm1222_vm8, %v13645_v59, %v19218_v60  ;;  %v14008_v7 = vsel %vm1222_vm8, %v13968_v43, %v4896_v23  ;;  %v5050_v29 = vpack.c.bf16 %v3649_v5, %v3649_v5  ;;  %v2304_v51 = vrot.slane %v13833_v18, 4 }
 0x35f   : > { %19219 = vst [vmem:[#allocation33_spill] sm:$0xff] %v14008_v7  ;;  %v5051_v48 = vpack.c.bf16 %v3761_v63, %v3761_v63  ;;  %v2169_v42 = vsel %vm1222_vm8, %v13785_v19, %v2168_v24  ;;  %v19220_v43 = vrot.slane %v13502_v17, 4  ;;  %v2193_v63 = vsel %vm1222_vm8, %v13793_v50, %v2192_v52 }
 0x360   : > { %v5180_v59 = vunpack.c.l.b16 %v5050_v29  ;;  %v14017_v35 = vperm.slane %v2169_v42, %v12080_v28  ;;  %v2281_v19 = vsel %vm1222_vm8, %v13830_v20, %v2280_v3  ;;  %v2305_v62 = vsel %vm1222_vm8, %v13823_v13, %v2304_v51  ;;  %v19224_v42 = vld [vmem:[#allocation22_spill] sm:$0xff]  ;;  %v19226_v3 = vld [vmem:[#allocation36_spill] sm:$0xff] }
 0x361   : > { %v5181_v60 = vunpack.c.l.b16 %v5051_v48  ;;  %v3553_v23 = vsel %vm1222_vm8, %v13508_v57, %v19220_v43  ;;  %v14033_v29 = vperm.slane %v2193_v63, %v12080_v28  ;;  %v14036_v17 = vperm.slane %v2281_v19, %v12080_v28  ;;  %v19228_v43 = vld [vmem:[#allocation38_spill] sm:$0xff] }
 0x362   : > { %v14030_v31 = vperm.slane %v3553_v23, %v12049_v21  ;;  %v14039_v57 = vperm.slane %v2305_v62, %v12080_v28  ;;  %v19221_v50 = vrot.slane %v13515_v40, 4  ;;  %v19222_v13 = vrot.slane %v13521_v45, 4 }
 0x363   : > { %v5184_v18 = vpack.c.b16 %v5181_v60, %v5180_v59  ;;  %v19223_v5 = vrot.slane %v19146_v11, 4  ;;  %v19225_v52 = vrot.slane %v19224_v42, 4  ;;  %v2218_v59 = vrot.slane %v14033_v29, 4 }
 0x364   : > { %v3565_v20 = vsel %vm1222_vm8, %v19122_v26, %v19221_v50  ;;  %v3577_v48 = vsel %vm1222_vm8, %v19145_v9, %v19222_v13  ;;  %v2330_v26 = vrot.slane %v14039_v57, 4  ;;  %v19227_v60 = vrot.slane %v13539_v49, 4 }
 0x365   : > { %v3589_v24 = vsel %vm1222_vm8, %v19147_v30, %v19223_v5  ;;  %v3665_v51 = vsel %vm1222_vm8, %v19226_v3, %v19225_v52  ;;  %v5199_v40 = vsel %vm5108_vm9, %v5184_v18, 0  ;;  %v14061_v45 = vperm.slane %v3565_v20, %v12049_v21  ;;  %v19231_v52 = vld [vmem:[#allocation40_spill] sm:$0xff] }
 0x366   : > { %5211 = vmatpush.bf16.xpose.msra.mxu1 %v5199_v40  ;;  %v14064_v11 = vperm.slane %v3577_v48, %v12049_v21  ;;  %v14067_v9 = vperm.slane %v3589_v24, %v12049_v21  ;;  %v14070_v30 = vperm.slane %v3665_v51, %v12049_v21  ;;  %v3677_v23 = vsel %vm1222_vm8, %v19228_v43, %v19227_v60  ;;  %v19230_v48 = vld [vmem:[#allocation42_spill] sm:$0xff]  ;;  %v19233_v51 = vld [vmem:[#allocation39_spill] sm:$0xff] }
 0x367   : > { %v2219_v63 = vsel %vm1222_vm8, %v2218_v59, %v14017_v35  ;;  %v2331_v19 = vsel %vm1222_vm8, %v2330_v26, %v14036_v17  ;;  %v3610_v62 = vrot.slane %v14061_v45, 4  ;;  %v14082_v18 = vperm.slane %v3677_v23, %v12049_v21 }
 0x368   : > { %v4998_v50 = vpack.c.bf16 %v2219_v63, %v2219_v63  ;;  %v4999_v20 = vpack.c.bf16 %v2331_v19, %v2331_v19  ;;  %v3634_v13 = vrot.slane %v14067_v9, 4  ;;  %v19229_v49 = vrot.slane %v13548_v58, 4 }
 0x369   : > { %v14091_v24 = vsel %vm1222_vm8, %v4894_v22, %v13957_v6  ;;  %v3611_v42 = vsel %vm1222_vm8, %v3610_v62, %v14030_v31  ;;  %v19232_v3 = vrot.slane %v19231_v52, 4  ;;  %v3722_v59 = vrot.slane %v14082_v18, 4  ;;  %v11062_v6 = vpop.permute.xlu2 %11061 }
 0x36a   : > { %v3689_v5 = vsel %vm1222_vm8, %v19230_v48, %v19229_v49  ;;  %v5241_v26 = vunpack.c.l.b16 %v4998_v50  ;;  %v5242_v60 = vunpack.c.l.b16 %v4999_v20  ;;  %v3635_v58 = vsel %vm1222_vm8, %v3634_v13, %v14064_v11 }
 0x36b   : > { %v3701_v40 = vsel %vm1222_vm8, %v19233_v51, %v19232_v3  ;;  %v14103_v43 = vperm.slane %v3689_v5, %v12049_v21  ;;  %v14106_v22 = vperm.slane %v3635_v58, %v12080_v28  ;;  %v3723_v63 = vsel %vm1222_vm8, %v3722_v59, %v14070_v30 }
 0x36c   : > { %v14109_v23 = vperm.slane %v3701_v40, %v12049_v21  ;;  %v19234_v19 = vrot.slane %v13682_v4, 4  ;;  %v5249_v50 = vpack.c.b16 %v5242_v60, %v5241_v26  ;;  %v14118_v20 = vperm.slane %v3611_v42, %v12080_v28 }
 0x36d   : > { %v19235_v13 = vrot.slane %v13710_v38, 4  ;;  %v3654_v5 = vrot.slane %v14106_v22, 4  ;;  %v11064_v51 = vunpack.i.h.bf16 %v11062_v6  ;;  %v2220_v40 = vrot.slane %v14017_v35, 4 }
 0x36e   : > { %v3881_v62 = vsel %vm1222_vm8, %v13696_v44, %v19234_v19  ;;  %v3746_v52 = vrot.slane %v14109_v23, 4  ;;  %10441 = vmatmul.msk.bf16.vlgmr.msrb.gmra.mxu2 %vm5108_vm9, %v5249_v50  ;;  %v11063_v44 = vunpack.i.l.bf16 %v11062_v6  ;;  %v2332_v42 = vrot.slane %v14036_v17, 4 }
 0x36f   : > { %v3993_v49 = vsel %vm1222_vm8, %v13716_v55, %v19235_v13  ;;  %v5068_v48 = vpack.c.bf16 %v3881_v62, %v3881_v62  ;;  %v3655_v38 = vsel %vm1222_vm8, %v3654_v5, %v14118_v20  ;;  %v1818_v26 = vrot.slane %v11064_v51, 4 }
 0x370   : > { %v5069_v3 = vpack.c.bf16 %v3993_v49, %v3993_v49  ;;  %v3747_v55 = vsel %vm1222_vm8, %v3746_v52, %v14103_v43  ;;  %v5062_v58 = vpack.c.bf16 %v3655_v38, %v3655_v38  ;;  %v1706_v19 = vrot.slane %v11063_v44, 4  ;;  %v19238_v52 = vld [vmem:[#allocation30_spill] sm:$0xff] }
 0x371   : > { %v5490_v4 = vunpack.c.l.b16 %v5068_v48  ;;  %v14134_v60 = vperm.slane %v3747_v55, %v12080_v28  ;;  %v1709_v6 = vsel %vm1222_vm8, %v11063_v44, %v13805_v61  ;;  %v14139_v35 = vperm.slane %v3723_v63, %v12080_v28 }
 0x372   : > { %v5491_v59 = vunpack.c.l.b16 %v5069_v3  ;;  %v14142_v62 = vperm.slane %v1709_v6, %v12049_v21  ;;  %v19236_v50 = vunpack.i.h.bf16 %v13721_v15  ;;  %v19237_v48 = vunpack.i.l.bf16 %v13721_v15 }
 0x373   : > { %v3766_v49 = vrot.slane %v14134_v60, 4  ;;  %v1821_v61 = vsel %vm1222_vm8, %v11064_v51, %v19238_v52  ;;  %v14160_v3 = vsel %vm1222_vm8, %v13977_v14, %v4908_v41  ;;  %v2221_v55 = vsel %vm1222_vm8, %v14033_v29, %v2220_v40  ;;  %v19269_v51 = vld [vmem:[#allocation101_spill] sm:$0xff]  ;;  %v19274_v29 = vld [vmem:[#allocation103_spill] sm:$0xff] }
 0x374   : > { %v5493_v17 = vpack.c.b16 %v5491_v59, %v5490_v4  ;;  %v1819_v13 = vsel %vm1222_vm8, %v1818_v26, %v19236_v50  ;;  %v1707_v5 = vsel %vm1222_vm8, %v1706_v19, %v19237_v48  ;;  %19239 = vst [vmem:[#allocation34_spill] sm:$0xff] %v14160_v3  ;;  %v5411_v4 = vunpack.c.l.b16 %v5062_v58 }
 0x375   : > { %v14154_v63 = vperm.slane %v1819_v13, %v12049_v21  ;;  %v14164_v38 = vperm.slane %v1707_v5, %v12049_v21  ;;  %v3767_v15 = vsel %vm1222_vm8, %v3766_v49, %v14139_v35  ;;  %v2333_v59 = vsel %vm1222_vm8, %v14039_v57, %v2332_v42 }
 0x376   : > { %v5510_v44 = vsel %vm5108_vm9, %v5493_v17, 0  ;;  %v5063_v41 = vpack.c.bf16 %v3767_v15, %v3767_v15  ;;  %v14174_v26 = vperm.slane %v1821_v61, %v12049_v21  ;;  %v5006_v19 = vpack.c.bf16 %v2221_v55, %v2221_v55  ;;  %v19240_v61 = vld [vmem:[#allocation87_spill] sm:$0xff] }
 0x377   : > { %5518 = vmatpush.bf16.xpose.msrb.mxu1 %v5510_v44  ;;  %v5007_v6 = vpack.c.bf16 %v2333_v59, %v2333_v59  ;;  %v3612_v17 = vrot.slane %v14030_v31, 4  ;;  %v3636_v50 = vrot.slane %v14064_v11, 4  ;;  %v3724_v13 = vrot.slane %v14070_v30, 4  ;;  %v19241_v44 = vld [vmem:[#allocation93_spill] sm:$0xff] }
 0x378   : > { %v5412_v49 = vunpack.c.l.b16 %v5063_v41  ;;  %v5318_v40 = vunpack.c.l.b16 %v5006_v19  ;;  %v3748_v57 = vrot.slane %v14103_v43, 4  ;;  %v19242_v15 = vrot.slane %v19241_v44, 4 }
 0x379   : > { %v5319_v42 = vunpack.c.l.b16 %v5007_v6  ;;  %v3613_v48 = vsel %vm1222_vm8, %v14061_v45, %v3612_v17  ;;  %v3637_v5 = vsel %vm1222_vm8, %v14067_v9, %v3636_v50  ;;  %v3725_v31 = vsel %vm1222_vm8, %v14082_v18, %v3724_v13  ;;  %v19246_v6 = vld [vmem:[#allocation86_spill] sm:$0xff]  ;;  %v19247_v17 = vld [vmem:[#allocation91_spill] sm:$0xff] }
 0x37a   : > { %v5415_v52 = vpack.c.b16 %v5412_v49, %v5411_v4  ;;  %v3645_v30 = vperm.slane %v3637_v5, %v12080_v28  ;;  %v14194_v43 = vsel %vm1222_vm8, %v19242_v15, %v19240_v61  ;;  %v3621_v45 = vperm.slane %v3613_v48, %v12080_v28  ;;  %v19250_v49 = vld [vmem:[#allocation88_spill] sm:$0xff] }
 0x37b   : > { %19243 = vst [vmem:[#allocation47_spill] sm:$0xff] %v14194_v43  ;;  %v5326_v55 = vpack.c.b16 %v5319_v42, %v5318_v40  ;;  %v3749_v9 = vsel %vm1222_vm8, %v14109_v23, %v3748_v57  ;;  %v19244_v59 = vrot.slane %v19240_v61, 4  ;;  %v19248_v50 = vrot.slane %v19247_v17, 4  ;;  %v19251_v40 = vld [vmem:[#allocation97_spill] sm:$0xff] }
 0x37c   : > { %v5430_v4 = vsel %vm5108_vm9, %v5415_v52, 0  ;;  %v3658_v41 = vrot.slane %v3645_v30, 4  ;;  %v3757_v19 = vperm.slane %v3749_v9, %v12080_v28  ;;  %v3733_v23 = vperm.slane %v3725_v31, %v12080_v28  ;;  %v19256_v52 = vld [vmem:[#allocation98_spill] sm:$0xff]  ;;  %v19258_v9 = vld [vmem:[#allocation92_spill] sm:$0xff] }
 0x37d   : > { %v14203_v18 = vsel %vm1222_vm8, %v19241_v44, %v19244_v59  ;;  %v14211_v13 = vsel %vm1222_vm8, %v19248_v50, %v19246_v6  ;;  %5442 = vmatpush.bf16.xpose.msrb.mxu3 %v5430_v4  ;;  %10445 = vmatmul.msk.bf16.vlgmr.msrb.gmra.mxu0 %vm5108_vm9, %v5326_v55  ;;  %v19252_v57 = vrot.slane %v19251_v40, 4  ;;  %v19254_v48 = vrot.slane %v19250_v49, 4  ;;  %v19257_v55 = vld [vmem:[#allocation90_spill] sm:$0xff]  ;;  %v19261_v4 = vld [vmem:[#allocation95_spill] sm:$0xff] }
 0x37e   : > { %19245 = vst [vmem:[#allocation51_spill] sm:$0xff] %v14203_v18  ;;  %v2342_v61 = vrot.slane %v19256_v52, 4  ;;  %v3659_v44 = vsel %vm1222_vm8, %v3658_v41, %v3621_v45  ;;  %v3770_v15 = vrot.slane %v3757_v19, 4  ;;  %v19259_v31 = vrot.slane %v19258_v9, 4  ;;  %v19263_v41 = vld [vmem:[#allocation99_spill] sm:$0xff]  ;;  %v19268_v9 = vld [vmem:[#allocation100_spill] sm:$0xff] }
 0x37f   : > { %19249 = vst [vmem:[#allocation46_spill] sm:$0xff] %v14211_v13  ;;  %v14219_v42 = vsel %vm1222_vm8, %v19252_v57, %v19250_v49  ;;  %v14225_v5 = vsel %vm1222_vm8, %v19251_v40, %v19254_v48  ;;  %v19262_v6 = vrot.slane %v19261_v4, 4  ;;  %v5070_v50 = vpack.c.bf16 %v3659_v44, %v3659_v44 }
 0x380   : > { %19253 = vst [vmem:[#allocation50_spill] sm:$0xff] %v14219_v42  ;;  %v14233_v59 = vsel %vm1222_vm8, %v19259_v31, %v19257_v55  ;;  %v2343_v49 = vsel %vm1222_vm8, %v2342_v61, %v14194_v43  ;;  %v19264_v57 = vrot.slane %v19263_v41, 4  ;;  %v3771_v55 = vsel %vm1222_vm8, %v3770_v15, %v3733_v23  ;;  %v19265_v61 = vld [vmem:[#allocation96_spill] sm:$0xff]  ;;  %v19277_v43 = vld [vmem:[#allocation26_spill] sm:$0xff] }
 0x381   : > { %19255 = vst [vmem:[#allocation62_spill] sm:$0xff] %v14225_v5  ;;  %v2355_v17 = vsel %vm1222_vm8, %v19262_v6, %v14203_v18  ;;  %v14251_v31 = vperm.slane %v2343_v49, %v12049_v21  ;;  %v5071_v6 = vpack.c.bf16 %v3771_v55, %v3771_v55  ;;  %v5565_v2 = vunpack.c.l.b16 %v5070_v50 }
 0x382   : > { %19260 = vst [vmem:[#allocation64_spill] sm:$0xff] %v14233_v59  ;;  %v14242_v40 = vperm.slane %v2355_v17, %v12049_v21  ;;  %v2367_v48 = vsel %vm1222_vm8, %v19264_v57, %v14211_v13  ;;  %v19267_v17 = vrot.slane %v19266_v54, 4  ;;  %v2454_v49 = vrot.slane %v19268_v9, 4  ;;  %v19273_v9 = vld [vmem:[#allocation102_spill] sm:$0xff] }
 0x383   : > { %v14260_v57 = vperm.slane %v2367_v48, %v12049_v21  ;;  %v19270_v44 = vrot.slane %v19269_v51, 4  ;;  %v5566_v55 = vunpack.c.l.b16 %v5071_v6  ;;  %v19272_v51 = vrot.slane %v19271_v8, 4 }
 0x384   : > { %v2379_v11 = vsel %vm1222_vm8, %v19267_v17, %v19265_v61  ;;  %v2390_v58 = vrot.slane %v14242_v40, 4 }
 0x385   : > { %v14263_v15 = vperm.slane %v2379_v11, %v12049_v21  ;;  %v2467_v50 = vsel %vm1222_vm8, %v19270_v44, %v14225_v5  ;;  %v2455_v11 = vsel %vm1222_vm8, %v2454_v49, %v14219_v42  ;;  %v2479_v44 = vsel %vm1222_vm8, %v19272_v51, %v14233_v59 }
 0x386   : > { %v2391_v61 = vsel %vm1222_vm8, %v2390_v58, %v14251_v31  ;;  %v14274_v17 = vperm.slane %v2467_v50, %v12049_v21  ;;  %v5569_v6 = vpack.c.b16 %v5566_v55, %v5565_v2  ;;  %v14288_v58 = vperm.slane %v2455_v11, %v12049_v21 }
 0x387   : > { %v2414_v48 = vrot.slane %v14263_v15, 4  ;;  %v14285_v54 = vperm.slane %v2391_v61, %v12080_v28  ;;  %v14291_v50 = vperm.slane %v2479_v44, %v12049_v21  ;;  %v19275_v42 = vrot.slane %v19274_v29, 4 }
 0x388   : > { %v2502_v51 = vrot.slane %v14274_v17, 4  ;;  %v3660_v2 = vrot.slane %v3621_v45, 4  ;;  %v5584_v55 = vsel %vm5108_vm9, %v5569_v6, 0  ;;  %v3772_v44 = vrot.slane %v3733_v23, 4 }
 0x389   : > { %v2415_v49 = vsel %vm1222_vm8, %v2414_v48, %v14260_v57  ;;  %v2491_v8 = vsel %vm1222_vm8, %v19275_v42, %v19273_v9  ;;  %5596 = vmatpush.bf16.xpose.msra.mxu2 %v5584_v55  ;;  %v3656_v42 = vrot.slane %v14118_v20, 4  ;;  %v3768_v9 = vrot.slane %v14139_v35, 4  ;;  %v11042_v20 = vpop.permute.xlu0 %11041 }
 0x38a   : > { %v14302_v61 = vperm.slane %v2415_v49, %v12080_v28  ;;  %v14305_v11 = vperm.slane %v2491_v8, %v12049_v21  ;;  %v2503_v48 = vsel %vm1222_vm8, %v2502_v51, %v14288_v58  ;;  %v3661_v29 = vsel %vm1222_vm8, %v3645_v30, %v3660_v2 }
 0x38b   : > { %v14314_v6 = vperm.slane %v2503_v48, %v12080_v28  ;;  %v3773_v8 = vsel %vm1222_vm8, %v3757_v19, %v3772_v44  ;;  %v5074_v23 = vpack.c.bf16 %v3661_v29, %v3661_v29  ;;  %v3657_v51 = vsel %vm1222_vm8, %v14106_v22, %v3656_v42 }
 0x38c   : > { %v2438_v45 = vrot.slane %v14302_v61, 4  ;;  %v2526_v49 = vrot.slane %v14305_v11, 4  ;;  %v5075_v55 = vpack.c.bf16 %v3773_v8, %v3773_v8  ;;  %v3769_v30 = vsel %vm1222_vm8, %v14134_v60, %v3768_v9  ;;  %v14329_v8 = vpop.permute.xlu1 %11036  ;;  %v19276_v60 = vld [vmem:[#allocation19_spill] sm:$0xff] }
 0x38d   : > { %v5066_v48 = vpack.c.bf16 %v3657_v51, %v3657_v51  ;;  %v5067_v41 = vpack.c.bf16 %v3769_v30, %v3769_v30  ;;  %v5642_v44 = vunpack.c.l.b16 %v5074_v23  ;;  %v1672_v9 = vrot.slane %v19276_v60, 4 }
 0x38e   : > { %v2439_v35 = vsel %vm1222_vm8, %v2438_v45, %v14285_v54  ;;  %v2527_v2 = vsel %vm1222_vm8, %v2526_v49, %v14291_v50  ;;  %v5643_v29 = vunpack.c.l.b16 %v5075_v55  ;;  %v11044_v4 = vunpack.i.h.bf16 %v11042_v20 }
 0x38f   : > { %v14327_v13 = vperm.slane %v2527_v2, %v12080_v28  ;;  %v4984_v19 = vpack.c.bf16 %v2439_v35, %v2439_v35  ;;  %v5488_v22 = vunpack.c.l.b16 %v5066_v48  ;;  %v5489_v42 = vunpack.c.l.b16 %v5067_v41 }
 0x390   : > { %v5646_v52 = vpack.c.b16 %v5643_v29, %v5642_v44  ;;  %v11043_v49 = vunpack.i.l.bf16 %v11042_v20  ;;  %v1782_v30 = vrot.slane %v11044_v4, 4  ;;  %v1784_v2 = vrot.slane %v19277_v43, 4 }
 0x391   : > { %v2550_v45 = vrot.slane %v14327_v13, 4  ;;  %v5088_v18 = vunpack.c.l.b16 %v4984_v19  ;;  %v5492_v51 = vpack.c.b16 %v5489_v42, %v5488_v22  ;;  %v18811_v35 = vunpack.i.h.bf16 %v14329_v8 }
 0x392   : > { %v5661_v55 = vsel %vm5108_vm9, %v5646_v52, 0  ;;  %v1670_v41 = vrot.slane %v11043_v49, 4  ;;  %v1673_v48 = vsel %vm1222_vm8, %v11043_v49, %v1672_v9  ;;  %v1783_v20 = vsel %vm1222_vm8, %v1782_v30, %v19277_v43  ;;  %v11077_v9 = vpop.permute.xlu2 %11076 }
 0x393   : > { %v2551_v23 = vsel %vm1222_vm8, %v2550_v45, %v14314_v6  ;;  %5673 = vmatpush.bf16.xpose.msra.mxu0 %v5661_v55  ;;  %v5507_v19 = vsel %vm5108_vm9, %v5492_v51, 0  ;;  %v14343_v44 = vperm.slane %v1673_v48, %v12049_v21  ;;  %v14347_v22 = vperm.slane %v1783_v20, %v12049_v21  ;;  %v19279_v48 = vld [vmem:[#allocation45_spill] sm:$0xff]  ;;  %v19280_v45 = vld [vmem:[#allocation20_spill] sm:$0xff] }
 0x394   : > { %v4985_v3 = vpack.c.bf16 %v2551_v23, %v2551_v23  ;;  %5519 = vmatpush.bf16.xpose.msrb.mxu1 %v5507_v19  ;;  %v1671_v52 = vsel %vm1222_vm8, %v1670_v41, %v19276_v60  ;;  %v1785_v42 = vsel %vm1222_vm8, %v11044_v4, %v1784_v2  ;;  %v1796_v51 = vrot.slane %v18811_v35, 4  ;;  %v19278_v2 = vld [vmem:[#allocation43_spill] sm:$0xff]  ;;  %v19282_v35 = vld [vmem:[#allocation29_spill] sm:$0xff] }
 0x395   : > { %v14354_v43 = vperm.slane %v1671_v52, %v12049_v21  ;;  %v14361_v55 = vperm.slane %v1785_v42, %v12049_v21  ;;  %v11038_v60 = vunpack.i.l.bf16 %v14329_v8  ;;  %v1896_v41 = vrot.slane %v19278_v2, 4  ;;  %v19284_v42 = vld [vmem:[#allocation25_spill] sm:$0xff] }
 0x396   : > { %v5089_v49 = vunpack.c.l.b16 %v4985_v3  ;;  %v2008_v3 = vrot.slane %v19279_v48, 4  ;;  %v11079_v19 = vunpack.i.h.bf16 %v11077_v9  ;;  %v11078_v52 = vunpack.i.l.bf16 %v11077_v9 }
 0x397   : > { %v19281_v29 = vrot.slane %v19280_v45, 4  ;;  %v19283_v23 = vrot.slane %v13859_v39, 4 }
 0x398   : > { %v5095_v4 = vpack.c.b16 %v5089_v49, %v5088_v18  ;;  %v2006_v18 = vrot.slane %v11079_v19, 4  ;;  %v2009_v49 = vsel %vm1222_vm8, %v11079_v19, %v2008_v3  ;;  %v1894_v9 = vrot.slane %v11078_v52, 4 }
 0x399   : > { %v2217_v30 = vsel %vm1222_vm8, %v19282_v35, %v19281_v29  ;;  %v2329_v59 = vsel %vm1222_vm8, %v19284_v42, %v19283_v23  ;;  %v14378_v20 = vperm.slane %v2009_v49, %v12049_v21  ;;  %v1897_v45 = vsel %vm1222_vm8, %v11078_v52, %v1896_v41 }
 0x39a   : > { %10434 = vmatmul.msk.bf16.vlgmr.msra.gmra.mxu3 %vm5108_vm9, %v5095_v4  ;;  %v4990_v5 = vpack.c.bf16 %v2217_v30, %v2217_v30  ;;  %v4991_v7 = vpack.c.bf16 %v2329_v59, %v2329_v59  ;;  %v2392_v35 = vrot.slane %v14251_v31, 4  ;;  %v2007_v39 = vsel %vm1222_vm8, %v2006_v18, %v19279_v48  ;;  %v11057_v31 = vpop.permute.xlu0 %11056 }
 0x39b   : > { %v14385_v29 = vperm.slane %v1897_v45, %v12049_v21  ;;  %v1844_v3 = vrot.slane %v14361_v55, 4  ;;  %v14389_v59 = vperm.slane %v2007_v39, %v12049_v21  ;;  %v1895_v30 = vsel %vm1222_vm8, %v1894_v9, %v19278_v2 }
 0x39c   : > { %v5164_v23 = vunpack.c.l.b16 %v4990_v5  ;;  %v5165_v4 = vunpack.c.l.b16 %v4991_v7  ;;  %v2393_v41 = vsel %vm1222_vm8, %v14242_v40, %v2392_v35  ;;  %v1684_v19 = vrot.slane %v11038_v60, 4  ;;  %v14399_v7 = vpop.permute.xlu1 %11051 }
 0x39d   : > { %v14397_v52 = vperm.slane %v1895_v30, %v12049_v21  ;;  %v2416_v18 = vrot.slane %v14260_v57, 4  ;;  %v2504_v49 = vrot.slane %v14288_v58, 4  ;;  %v2528_v2 = vrot.slane %v14291_v50, 4 }
 0x39e   : > { %v5172_v5 = vpack.c.b16 %v5165_v4, %v5164_v23  ;;  %v14408_v9 = vperm.slane %v2393_v41, %v12080_v28  ;;  %v11059_v45 = vunpack.i.h.bf16 %v11057_v31  ;;  %v11058_v35 = vunpack.i.l.bf16 %v11057_v31 }
 0x39f   : > { %v2417_v39 = vsel %vm1222_vm8, %v14263_v15, %v2416_v18  ;;  %v2505_v23 = vsel %vm1222_vm8, %v14274_v17, %v2504_v49  ;;  %v2529_v57 = vsel %vm1222_vm8, %v14305_v11, %v2528_v2  ;;  %v11053_v58 = vunpack.i.l.bf16 %v14399_v7 }
 0x3a0   : > { %10437 = vmatmul.msk.bf16.vlgmr.msra.gmra.mxu1 %vm5108_vm9, %v5172_v5  ;;  %v14418_v50 = vperm.slane %v2417_v39, %v12080_v28  ;;  %v14421_v4 = vperm.slane %v2505_v23, %v12080_v28  ;;  %v14424_v30 = vperm.slane %v2529_v57, %v12080_v28  ;;  %v1794_v41 = vrot.slane %v11059_v45, 4 }
 0x3a1   : > { %v1682_v31 = vrot.slane %v11058_v35, 4  ;;  %v1685_v15 = vsel %vm1222_vm8, %v11058_v35, %v1684_v19  ;;  %v1797_v17 = vsel %vm1222_vm8, %v11059_v45, %v1796_v51  ;;  %v11054_v5 = vunpack.i.h.bf16 %v14399_v7 }
 0x3a2   : > { %v2442_v11 = vrot.slane %v14418_v50, 4  ;;  %v2554_v18 = vrot.slane %v14424_v30, 4  ;;  %v1693_v49 = vperm.slane %v1685_v15, %v12049_v21  ;;  %v19285_v2 = vunpack.i.h.bf16 %v14329_v8 }
 0x3a3   : > { %v1683_v23 = vsel %vm1222_vm8, %v1682_v31, %v11038_v60  ;;  %v1805_v19 = vperm.slane %v1797_v17, %v12049_v21  ;;  %v1694_v35 = vrot.slane %v11053_v58, 4  ;;  %v19287_v17 = vrot.slane %v14354_v43, 4 }
 0x3a4   : > { %v1795_v39 = vsel %vm1222_vm8, %v1794_v41, %v19285_v2  ;;  %v2443_v51 = vsel %vm1222_vm8, %v2442_v11, %v14408_v9  ;;  %v2555_v7 = vsel %vm1222_vm8, %v2554_v18, %v14421_v4  ;;  %v1689_v45 = vperm.slane %v1683_v23, %v12049_v21 }
 0x3a5   : > { %v1801_v57 = vperm.slane %v1795_v39, %v12049_v21  ;;  %v1730_v15 = vrot.slane %v1693_v49, 4  ;;  %v5000_v48 = vpack.c.bf16 %v2443_v51, %v2443_v51  ;;  %v5001_v8 = vpack.c.bf16 %v2555_v7, %v2555_v7 }
 0x3a6   : > { %v19286_v41 = vrot.slane %v14343_v44, 4  ;;  %v1718_v2 = vrot.slane %v1689_v45, 4  ;;  %v1721_v39 = vsel %vm1222_vm8, %v1689_v45, %v19287_v17  ;;  %v1806_v17 = vrot.slane %v11054_v5, 4 }
 0x3a7   : > { %v1830_v31 = vrot.slane %v1801_v57, 4  ;;  %v1731_v11 = vsel %vm1222_vm8, %v1730_v15, %v14343_v44  ;;  %v5243_v23 = vunpack.c.l.b16 %v5000_v48  ;;  %v5244_v42 = vunpack.c.l.b16 %v5001_v8 }
 0x3a8   : > { %v1733_v60 = vsel %vm1222_vm8, %v1693_v49, %v19286_v41  ;;  %v14455_v51 = vperm.slane %v1721_v39, %v12080_v28  ;;  %v1737_v7 = vperm.slane %v1731_v11, %v12080_v28  ;;  %v1719_v41 = vsel %vm1222_vm8, %v1718_v2, %v14354_v43 }
 0x3a9   : > { %v14452_v18 = vperm.slane %v1733_v60, %v12080_v28  ;;  %v1831_v45 = vsel %vm1222_vm8, %v1830_v31, %v14347_v22  ;;  %v19288_v44 = vrot.slane %v14347_v22, 4  ;;  %v5250_v60 = vpack.c.b16 %v5244_v42, %v5243_v23 }
 0x3aa   : > { %v14467_v48 = vperm.slane %v1719_v41, %v12080_v28  ;;  %v1772_v39 = vrot.slane %v14455_v51, 4  ;;  %v14472_v11 = vperm.slane %v1831_v45, %v12080_v28  ;;  %v1842_v43 = vrot.slane %v1805_v19, 4  ;;  %v19292_v41 = vld [vmem:[#allocation83_spill] sm:$0xff] }
 0x3ab   : > { %v1833_v15 = vsel %vm1222_vm8, %v1801_v57, %v19288_v44  ;;  %v1780_v8 = vrot.slane %v14452_v18, 4  ;;  %v1845_v31 = vsel %vm1222_vm8, %v1805_v19, %v1844_v3  ;;  %10442 = vmatmul.msk.bf16.gmra.mxu2 %vm5108_vm9, %v5250_v60  ;;  %v1776_v22 = vrot.slane %v1737_v7, 4  ;;  %v19290_v57 = vld [vmem:[#allocation107_spill] sm:$0xff] }
 0x3ac   : > { %19289 = vst [vmem:[#allocation85_spill] sm:$0xff] %v14472_v11  ;;  %v14479_v42 = vperm.slane %v1833_v15, %v12080_v28  ;;  %v19291_v2 = vunpack.i.l.bf16 %v19290_v57  ;;  %v1697_v44 = vsel %vm1222_vm8, %v11053_v58, %v19292_v41  ;;  %v1768_v45 = vrot.slane %v14467_v48, 4 }
 0x3ad   : > { %v1843_v49 = vsel %vm1222_vm8, %v1842_v43, %v14361_v55  ;;  %v14490_v3 = vperm.slane %v1845_v31, %v12080_v28  ;;  %v1880_v60 = vrot.slane %v14472_v11, 4  ;;  %v1705_v40 = vperm.slane %v1697_v44, %v12049_v21  ;;  %v19295_v43 = vld [vmem:[#allocation82_spill] sm:$0xff] }
 0x3ae   : > { %v1695_v23 = vsel %vm1222_vm8, %v1694_v35, %v19291_v2  ;;  %v1849_v15 = vperm.slane %v1843_v49, %v12080_v28  ;;  %v19293_v35 = vunpack.i.h.bf16 %v19290_v57  ;;  %v19294_v2 = vrot.slane %v14164_v38, 4 }
 0x3af   : > { %v1701_v19 = vperm.slane %v1695_v23, %v12049_v21  ;;  %v1809_v31 = vsel %vm1222_vm8, %v11054_v5, %v19295_v43  ;;  %v1884_v49 = vrot.slane %v14479_v42, 4  ;;  %v19296_v44 = vrot.slane %v14142_v62, 4 }
 0x3b0   : > { %v1807_v58 = vsel %vm1222_vm8, %v1806_v17, %v19293_v35  ;;  %v1756_v17 = vrot.slane %v1705_v40, 4  ;;  %v19297_v5 = vrot.slane %v14154_v63, 4  ;;  %v1888_v43 = vrot.slane %v1849_v15, 4 }
 0x3b1   : > { %v1743_v41 = vsel %vm1222_vm8, %v19294_v2, %v1701_v19  ;;  %v1744_v55 = vrot.slane %v1701_v19, 4  ;;  %v1813_v23 = vperm.slane %v1807_v58, %v12049_v21  ;;  %v1755_v57 = vsel %vm1222_vm8, %v19296_v44, %v1705_v40 }
 0x3b2   : > { %v14507_v53 = vperm.slane %v1743_v41, %v12080_v28  ;;  %v1761_v19 = vperm.slane %v1755_v57, %v12080_v28  ;;  %v1817_v2 = vperm.slane %v1809_v31, %v12049_v21  ;;  %v1892_v41 = vrot.slane %v14490_v3, 4 }
 0x3b3   : > { %v1745_v35 = vsel %vm1222_vm8, %v14164_v38, %v1744_v55  ;;  %v1855_v58 = vsel %vm1222_vm8, %v19297_v5, %v1813_v23  ;;  %v1757_v40 = vsel %vm1222_vm8, %v14142_v62, %v1756_v17  ;;  %v1856_v57 = vrot.slane %v1813_v23, 4 }
 0x3b4   : > { %v14521_v25 = vperm.slane %v1745_v35, %v12080_v28  ;;  %v1765_v44 = vperm.slane %v1757_v40, %v12080_v28  ;;  %v1774_v55 = vrot.slane %v1761_v19, 4  ;;  %v14529_v31 = vsel %vm1222_vm8, %v14507_v53, %v1768_v45 }
 0x3b5   : > { %v14532_v5 = vsel %vm1222_vm8, %v1761_v19, %v1776_v22  ;;  %v14535_v11 = vperm.slane %v1855_v58, %v12080_v28  ;;  %v19299_v35 = vrot.slane %v14174_v26, 4  ;;  %v1857_v45 = vsel %vm1222_vm8, %v14154_v63, %v1856_v57 }
 0x3b6   : > { %19298 = vst [vmem:[#allocation84_spill] sm:$0xff] %v14532_v5  ;;  %v14543_v40 = vsel %vm1222_vm8, %v14521_v25, %v1772_v39  ;;  %v1778_v23 = vrot.slane %v1765_v44, 4  ;;  %v14548_v22 = vsel %vm1222_vm8, %v1774_v55, %v1737_v7  ;;  %v14551_v19 = vperm.slane %v1857_v45, %v12080_v28 }
 0x3b7   : > { %v1867_v62 = vsel %vm1222_vm8, %v19299_v35, %v1817_v2  ;;  %v1868_v58 = vrot.slane %v1817_v2, 4  ;;  %v14559_v39 = vsel %vm1222_vm8, %v1765_v44, %v1780_v8  ;;  %v14564_v63 = vsel %vm1222_vm8, %v14535_v11, %v1880_v60 }
 0x3b8   : > { %v1873_v38 = vperm.slane %v1867_v62, %v12080_v28  ;;  %v14556_v35 = vsel %vm1222_vm8, %v1778_v23, %v14452_v18  ;;  %19300 = vst [vmem:[#allocation89_spill] sm:$0xff] %v14559_v39  ;;  %v14570_v2 = vsel %vm1222_vm8, %v14551_v19, %v1884_v49  ;;  %v11092_v62 = vpop.permute.xlu2 %11091  ;;  %v2602_v45 = vrot.slane %v14559_v39, 4 }
 0x3b9   : > { %19301 = vst [vmem:[#allocation22_spill] sm:$0xff] %v14564_v63  ;;  %v1869_v7 = vsel %vm1222_vm8, %v14174_v26, %v1868_v58  ;;  %v11094_v49 = vunpack.i.h.bf16 %v11092_v62  ;;  %v11093_v18 = vunpack.i.l.bf16 %v11092_v62 }
 0x3ba   : > { %19302 = vst [vmem:[#allocation36_spill] sm:$0xff] %v14570_v2  ;;  %v1886_v55 = vrot.slane %v1873_v38, 4  ;;  %v1877_v57 = vperm.slane %v1869_v7, %v12080_v28  ;;  %v14576_v44 = vsel %vm1222_vm8, %v1873_v38, %v1888_v43  ;;  %v11072_v38 = vpop.permute.xlu0 %11071  ;;  %v14592_v60 = vsel %vm1222_vm8, %v2602_v45, %v14532_v5 }
 0x3bb   : > { %19303 = vst [vmem:[#allocation38_spill] sm:$0xff] %v14576_v44  ;;  %v2018_v45 = vrot.slane %v11094_v49, 4  ;;  %v11074_v8 = vunpack.i.h.bf16 %v11072_v38  ;;  %v1906_v39 = vrot.slane %v11093_v18, 4  ;;  %v11073_v62 = vunpack.i.l.bf16 %v11072_v38 }
 0x3bc   : > { %v14580_v23 = vsel %vm1222_vm8, %v1886_v55, %v1849_v15  ;;  %v1890_v58 = vrot.slane %v1877_v57, 4  ;;  %v14586_v7 = vsel %vm1222_vm8, %v1877_v57, %v1892_v41  ;;  %v2444_v41 = vrot.slane %v14408_v9, 4 }
 0x3bd   : > { %19304 = vst [vmem:[#allocation42_spill] sm:$0xff] %v14580_v23  ;;  %v2714_v26 = vrot.slane %v14586_v7, 4  ;;  %v2556_v57 = vrot.slane %v14421_v4, 4  ;;  %v2020_v5 = vrot.slane %v11074_v8, 4  ;;  %v2019_v4 = vsel %vm1222_vm8, %v2018_v45, %v11074_v8 }
 0x3be   : > { %19305 = vst [vmem:[#allocation40_spill] sm:$0xff] %v14586_v7  ;;  %v14601_v17 = vsel %vm1222_vm8, %v1890_v58, %v14490_v3  ;;  %v2445_v55 = vsel %vm1222_vm8, %v14418_v50, %v2444_v41  ;;  %v1907_v58 = vsel %vm1222_vm8, %v1906_v39, %v11073_v62  ;;  %v1908_v43 = vrot.slane %v11073_v62, 4 }
 0x3bf   : > { %v2557_v15 = vsel %vm1222_vm8, %v14424_v30, %v2556_v57  ;;  %v5008_v7 = vpack.c.bf16 %v2445_v55, %v2445_v55  ;;  %v2025_v23 = vperm.slane %v2019_v4, %v12049_v21  ;;  %v1913_v50 = vperm.slane %v1907_v58, %v12049_v21 }
 0x3c0   : > { %v5009_v9 = vpack.c.bf16 %v2557_v15, %v2557_v15  ;;  %v2021_v41 = vsel %vm1222_vm8, %v11094_v49, %v2020_v5  ;;  %v1909_v30 = vsel %vm1222_vm8, %v11093_v18, %v1908_v43  ;;  %v19306_v8 = vrot.slane %v14389_v59, 4 }
 0x3c1   : > { %v5320_v2 = vunpack.c.l.b16 %v5008_v7  ;;  %v2029_v38 = vperm.slane %v2021_v41, %v12049_v21  ;;  %v2054_v15 = vrot.slane %v2025_v23, 4  ;;  %v1917_v39 = vperm.slane %v1909_v30, %v12049_v21 }
 0x3c2   : > { %v5321_v63 = vunpack.c.l.b16 %v5009_v9  ;;  %v2057_v55 = vsel %vm1222_vm8, %v2025_v23, %v19306_v8  ;;  %v1942_v45 = vrot.slane %v1913_v50, 4  ;;  %v19307_v7 = vrot.slane %v14397_v52, 4  ;;  %v14623_v9 = vpop.permute.xlu1 %11066 }
 0x3c3   : > { %v2055_v18 = vsel %vm1222_vm8, %v2054_v15, %v14389_v59  ;;  %v14631_v49 = vperm.slane %v2057_v55, %v12080_v28  ;;  %v2066_v23 = vrot.slane %v2029_v38, 4  ;;  %v19308_v43 = vrot.slane %v14385_v29, 4 }
 0x3c4   : > { %v5327_v57 = vpack.c.b16 %v5321_v63, %v5320_v2  ;;  %v1945_v62 = vsel %vm1222_vm8, %v1913_v50, %v19307_v7  ;;  %v1943_v63 = vsel %vm1222_vm8, %v1942_v45, %v14397_v52  ;;  %v1954_v2 = vrot.slane %v1917_v39, 4 }
 0x3c5   : > { %v14626_v5 = vperm.slane %v1945_v62, %v12080_v28  ;;  %v1957_v4 = vsel %vm1222_vm8, %v1917_v39, %v19308_v43  ;;  %v14640_v58 = vperm.slane %v2055_v18, %v12080_v28  ;;  %v14643_v50 = vperm.slane %v1943_v63, %v12080_v28 }
 0x3c6   : > { %10446 = vmatmul.msk.bf16.gmra.mxu0 %vm5108_vm9, %v5327_v57  ;;  %v14646_v59 = vperm.slane %v1957_v4, %v12080_v28  ;;  %v2067_v41 = vsel %vm1222_vm8, %v2066_v23, %v14378_v20  ;;  %v18824_v30 = vunpack.i.h.bf16 %v14623_v9  ;;  %v14653_v52 = vsel %vm1222_vm8, %v2714_v26, %v14576_v44 }
 0x3c7   : > { %v1955_v15 = vsel %vm1222_vm8, %v1954_v2, %v14385_v29  ;;  %v19309_v8 = vrot.slane %v14378_v20, 4  ;;  %v14661_v57 = vperm.slane %v2067_v41, %v12080_v28  ;;  %v19310_v63 = vrot.slane %v13895_v12, 4 }
 0x3c8   : > { %v14664_v39 = vperm.slane %v1955_v15, %v12080_v28  ;;  %v14678_v23 = vrot.slane %v18824_v30, 4  ;;  %v19311_v43 = vrot.slane %v13901_v34, 4  ;;  %v19314_v12 = vrot.slane %v13922_v56, 4 }
 0x3c9   : > { %v2069_v55 = vsel %vm1222_vm8, %v2029_v38, %v19309_v8  ;;  %v18825_v38 = vunpack.i.l.bf16 %v14623_v9  ;;  %v14684_v2 = vsel %vm1222_vm8, %v13470_v1, %v19310_v63  ;;  %v19313_v8 = vrot.slane %v13912_v16, 4 }
 0x3ca   : > { %v14668_v7 = vperm.slane %v2069_v55, %v12080_v28  ;;  %v14690_v4 = vsel %vm1222_vm8, %v13454_v32, %v19311_v43  ;;  %v4771_v1 = vsel %vm1222_vm8, %v19314_v12, %v14684_v2  ;;  %v4789_v32 = vperm.slane %v13982_v47, %v12049_v21 }
 0x3cb   : > { %19312 = vst [vmem:[#allocation39_spill] sm:$0xff] %v14690_v4  ;;  %v4759_v55 = vsel %vm1222_vm8, %v19313_v8, %v13907_v37  ;;  %v4777_v63 = vperm.slane %v4771_v1, %v12049_v21  ;;  %v19315_v43 = vrot.slane %v13931_v33, 4  ;;  %v14712_v8 = vrot.slane %v18825_v38, 4 }
 0x3cc   : > { %v4765_v34 = vperm.slane %v4759_v55, %v12049_v21  ;;  %v19316_v12 = vrot.slane %v13952_v36, 4  ;;  %v19317_v1 = vrot.slane %v13961_v27, 4  ;;  %v4832_v33 = vrot.slane %v4789_v32, 4 }
 0x3cd   : > { %v4795_v26 = vsel %vm1222_vm8, %v19315_v43, %v13947_v0  ;;  %v4901_v15 = vperm.slane %v14091_v24, %v12049_v21  ;;  %v2552_v20 = vrot.slane %v14314_v6, 4 }
 0x3ce   : > { %v4801_v62 = vperm.slane %v4795_v26, %v12049_v21  ;;  %v4871_v55 = vsel %vm1222_vm8, %v19316_v12, %v13942_v46  ;;  %v4883_v47 = vsel %vm1222_vm8, %v19317_v1, %v14690_v4  ;;  %v4808_v3 = vrot.slane %v4765_v34, 4 }
 0x3cf   : > { %v4877_v0 = vperm.slane %v4871_v55, %v12049_v21  ;;  %v4889_v43 = vperm.slane %v4883_v47, %v12049_v21  ;;  %v19318_v26 = vrot.slane %v13977_v14, 4  ;;  %v2440_v12 = vrot.slane %v14285_v54, 4 }
 0x3d0   : > { %v4809_v1 = vsel %vm1222_vm8, %v4777_v63, %v4808_v3  ;;  %v4833_v41 = vsel %vm1222_vm8, %v4801_v62, %v4832_v33  ;;  %v4944_v29 = vrot.slane %v4901_v15, 4  ;;  %v2553_v54 = vsel %vm1222_vm8, %v14327_v13, %v2552_v20 }
 0x3d1   : > { %v4907_v18 = vsel %vm1222_vm8, %v19318_v26, %v13973_v10  ;;  %v4920_v45 = vrot.slane %v4877_v0, 4  ;;  %v4817_v47 = vperm.slane %v4809_v1, %v12080_v28  ;;  %v4841_v24 = vperm.slane %v4833_v41, %v12080_v28 }
 0x3d2   : > { %v4913_v55 = vperm.slane %v4907_v18, %v12049_v21  ;;  %v2441_v14 = vsel %vm1222_vm8, %v14302_v61, %v2440_v12  ;;  %v4806_v3 = vrot.slane %v4777_v63, 4  ;;  %v4993_v30 = vpack.c.bf16 %v2553_v54, %v2553_v54 }
 0x3d3   : > { %v4921_v10 = vsel %vm1222_vm8, %v4889_v43, %v4920_v45  ;;  %v4992_v6 = vpack.c.bf16 %v2441_v14, %v2441_v14  ;;  %v4858_v26 = vrot.slane %v4841_v24, 4  ;;  %v4830_v44 = vrot.slane %v4801_v62, 4 }
 0x3d4   : > { %v4929_v33 = vperm.slane %v4921_v10, %v12080_v28  ;;  %v4945_v18 = vsel %vm1222_vm8, %v4913_v55, %v4944_v29  ;;  %v4807_v38 = vsel %vm1222_vm8, %v4806_v3, %v4765_v34  ;;  %v5167_v45 = vunpack.c.l.b16 %v4993_v30 }
 0x3d5   : > { %v4953_v1 = vperm.slane %v4945_v18, %v12080_v28  ;;  %v5166_v41 = vunpack.c.l.b16 %v4992_v6  ;;  %v4859_v61 = vsel %vm1222_vm8, %v4858_v26, %v4817_v47  ;;  %v4813_v12 = vperm.slane %v4807_v38, %v12080_v28 }
 0x3d6   : > { %v4918_v13 = vrot.slane %v4889_v43, 4  ;;  %v6543_v63 = vpack.c.bf16 %v4859_v61, %v4859_v61  ;;  %v4831_v14 = vsel %vm1222_vm8, %v4830_v44, %v4789_v32  ;;  %v4942_v10 = vrot.slane %v4913_v55, 4 }
 0x3d7   : > { %v4970_v20 = vrot.slane %v4953_v1, 4  ;;  %v5173_v27 = vpack.c.b16 %v5167_v45, %v5166_v41  ;;  %v4837_v29 = vperm.slane %v4831_v14, %v12080_v28  ;;  %v4860_v6 = vrot.slane %v4817_v47, 4  ;;  %v19319_v45 = vld [vmem:[#allocation48_spill] sm:$0xff] }
 0x3d8   : > { %v4919_v54 = vsel %vm1222_vm8, %v4918_v13, %v4877_v0  ;;  %v6737_v62 = vunpack.c.l.b16 %v6543_v63  ;;  %v4943_v30 = vsel %vm1222_vm8, %v4942_v10, %v4901_v15  ;;  %v4972_v55 = vrot.slane %v4929_v33, 4  ;;  %v19320_v13 = vld [vmem:[#allocation66_spill] sm:$0xff] }
 0x3d9   : > { %v4971_v34 = vsel %vm1222_vm8, %v4970_v20, %v4929_v33  ;;  %v4925_v3 = vperm.slane %v4919_v54, %v12080_v28  ;;  %10438 = vmatmul.msk.bf16.gmra.mxu1 %vm5108_vm9, %v5173_v27  ;;  %v4854_v43 = vrot.slane %v4837_v29, 4  ;;  %v4949_v44 = vperm.slane %v4943_v30, %v12080_v28 }
 0x3da   : > { %v6544_v38 = vpack.c.bf16 %v4971_v34, %v4971_v34  ;;  %v4861_v32 = vsel %vm1222_vm8, %v4841_v24, %v4860_v6  ;;  %v4856_v18 = vrot.slane %v4813_v12, 4  ;;  %v19321_v20 = vrot.slane %v19320_v13, 4 }
 0x3db   : > { %v6547_v26 = vpack.c.bf16 %v4861_v32, %v4861_v32  ;;  %v4968_v0 = vrot.slane %v4925_v3, 4  ;;  %v4855_v41 = vsel %vm1222_vm8, %v4854_v43, %v4813_v12  ;;  %v4966_v61 = vrot.slane %v4949_v44, 4  ;;  %v19347_v43 = vld [vmem:[#allocation75_spill] sm:$0xff] }
 0x3dc   : > { %v6738_v47 = vunpack.c.l.b16 %v6544_v38  ;;  %v14763_v15 = vsel %vm1222_vm8, %v19321_v20, %v19319_v45  ;;  %v6535_v27 = vpack.c.bf16 %v4855_v41, %v4855_v41  ;;  %v4973_v63 = vsel %vm1222_vm8, %v4953_v1, %v4972_v55 }
 0x3dd   : > { %19322 = vst [vmem:[#allocation30_spill] sm:$0xff] %v14763_v15  ;;  %v6810_v14 = vunpack.c.l.b16 %v6547_v26  ;;  %v4857_v24 = vsel %vm1222_vm8, %v4837_v29, %v4856_v18  ;;  %v4967_v10 = vsel %vm1222_vm8, %v4966_v61, %v4925_v3  ;;  %v6548_v54 = vpack.c.bf16 %v4973_v63, %v4973_v63  ;;  %v19325_v29 = vld [vmem:[#allocation49_spill] sm:$0xff]  ;;  %v19332_v63 = vld [vmem:[#allocation67_spill] sm:$0xff] }
 0x3de   : > { %v6740_v33 = vpack.c.b16 %v6738_v47, %v6737_v62  ;;  %v4969_v6 = vsel %vm1222_vm8, %v4949_v44, %v4968_v0  ;;  %v6536_v12 = vpack.c.bf16 %v4967_v10, %v4967_v10  ;;  %v6591_v34 = vunpack.c.l.b16 %v6535_v27  ;;  %v19326_v62 = vld [vmem:[#allocation69_spill] sm:$0xff]  ;;  %v19329_v0 = vld [vmem:[#allocation70_spill] sm:$0xff] }
 0x3df   : > { %v6539_v30 = vpack.c.bf16 %v4857_v24, %v4857_v24  ;;  %v6540_v38 = vpack.c.bf16 %v4969_v6, %v4969_v6  ;;  %v6811_v32 = vunpack.c.l.b16 %v6548_v54  ;;  %v19323_v41 = vrot.slane %v19319_v45, 4 }
 0x3e0   : > { %6761 = vmatpush.bf16.msrb.mxu2 %v6740_v33  ;;  %v19327_v3 = vrot.slane %v19326_v62, 4  ;;  %v6592_v44 = vunpack.c.l.b16 %v6536_v12  ;;  %v19330_v47 = vrot.slane %v19329_v0, 4  ;;  %v19331_v45 = vrot.slane %v19325_v29, 4  ;;  %v19335_v12 = vld [vmem:[#allocation72_spill] sm:$0xff] }
 0x3e1   : > { %v14774_v1 = vsel %vm1222_vm8, %v19320_v13, %v19323_v41  ;;  %v6664_v26 = vunpack.c.l.b16 %v6539_v30  ;;  %v6665_v18 = vunpack.c.l.b16 %v6540_v38  ;;  %v6813_v20 = vpack.c.b16 %v6811_v32, %v6810_v14  ;;  %v19334_v14 = vld [vmem:[#allocation73_spill] sm:$0xff]  ;;  %v19337_v41 = vld [vmem:[#allocation71_spill] sm:$0xff] }
 0x3e2   : > { %19324 = vst [vmem:[#allocation87_spill] sm:$0xff] %v14774_v1  ;;  %v14780_v55 = vsel %vm1222_vm8, %v19327_v3, %v19325_v29  ;;  %v4535_v61 = vsel %vm1222_vm8, %v19330_v47, %v14763_v15  ;;  %v14790_v13 = vsel %vm1222_vm8, %v19326_v62, %v19331_v45  ;;  %v19333_v24 = vrot.slane %v19332_v63, 4  ;;  %v19338_v29 = vld [vmem:[#allocation68_spill] sm:$0xff]  ;;  %v19342_v45 = vld [vmem:[#allocation74_spill] sm:$0xff] }
 0x3e3   : > { %19328 = vst [vmem:[#allocation93_spill] sm:$0xff] %v14780_v55  ;;  %v14793_v27 = vperm.slane %v4535_v61, %v12049_v21  ;;  %v6594_v10 = vpack.c.b16 %v6592_v44, %v6591_v34  ;;  %v6667_v54 = vpack.c.b16 %v6665_v18, %v6664_v26  ;;  %v19336_v30 = vrot.slane %v19335_v12, 4  ;;  %6834 = vmatpush.bf16.msrb.mxu0 %v6813_v20  ;;  %v19340_v34 = vld [vmem:[#allocation76_spill] sm:$0xff] }
 0x3e4   : > { %v4547_v33 = vsel %vm1222_vm8, %v19333_v24, %v14774_v1  ;;  %v19339_v62 = vrot.slane %v19338_v29, 4  ;;  %v19341_v44 = vrot.slane %v19340_v34, 4  ;;  %v19343_v24 = vrot.slane %v19342_v45, 4 }
 0x3e5   : > { %v14800_v6 = vperm.slane %v4547_v33, %v12049_v21  ;;  %v4559_v38 = vsel %vm1222_vm8, %v19336_v30, %v19334_v14  ;;  %v4584_v47 = vrot.slane %v14793_v27, 4  ;;  %6615 = vmatpush.bf16.msra.mxu3 %v6594_v10  ;;  %6688 = vmatpush.bf16.msra.mxu1 %v6667_v54  ;;  %v11087_v30 = vpop.permute.xlu0 %11086 }
 0x3e6   : > { %v4565_v32 = vperm.slane %v4559_v38, %v12049_v21  ;;  %v4571_v3 = vsel %vm1222_vm8, %v19339_v62, %v19337_v41  ;;  %v4647_v26 = vsel %vm1222_vm8, %v19341_v44, %v14780_v55  ;;  %v4659_v33 = vsel %vm1222_vm8, %v19343_v24, %v14790_v13  ;;  %v19344_v62 = vld [vmem:[#allocation77_spill] sm:$0xff]  ;;  %v19345_v44 = vld [vmem:[#allocation79_spill] sm:$0xff]  ;;  %v19348_v24 = vld [vmem:[#allocation78_spill] sm:$0xff] }
 0x3e7   : > { %v4577_v61 = vperm.slane %v4571_v3, %v12049_v21  ;;  %v4653_v20 = vperm.slane %v4647_v26, %v12049_v21  ;;  %v4585_v38 = vsel %vm1222_vm8, %v14800_v6, %v4584_v47  ;;  %v4665_v29 = vperm.slane %v4659_v33, %v12049_v21  ;;  %v14830_v3 = vpop.permute.xlu1 %11081 }
 0x3e8   : > { %v4608_v41 = vrot.slane %v4565_v32, 4  ;;  %v19346_v10 = vrot.slane %v19345_v44, 4  ;;  %v4593_v26 = vperm.slane %v4585_v38, %v12080_v28  ;;  %v19349_v34 = vrot.slane %v19348_v24, 4 }
 0x3e9   : > { %v4696_v47 = vrot.slane %v4653_v20, 4  ;;  %v11089_v0 = vunpack.i.h.bf16 %v11087_v30  ;;  %v11088_v44 = vunpack.i.l.bf16 %v11087_v30  ;;  %v19351_v38 = vunpack.i.h.bf16 %v14623_v9 }
 0x3ea   : > { %v4671_v54 = vsel %vm1222_vm8, %v19346_v10, %v19344_v62  ;;  %v4683_v45 = vsel %vm1222_vm8, %v19349_v34, %v19347_v43  ;;  %v4609_v55 = vsel %vm1222_vm8, %v4577_v61, %v4608_v41  ;;  %v4694_v1 = vrot.slane %v4665_v29, 4 }
 0x3eb   : > { %v4677_v18 = vperm.slane %v4671_v54, %v12049_v21  ;;  %v4689_v33 = vperm.slane %v4683_v45, %v12049_v21  ;;  %v4617_v10 = vperm.slane %v4609_v55, %v12080_v28  ;;  %v4697_v62 = vsel %vm1222_vm8, %v4665_v29, %v4696_v47 }
 0x3ec   : > { %v4705_v54 = vperm.slane %v4697_v62, %v12080_v28  ;;  %v2030_v14 = vrot.slane %v11089_v0, 4  ;;  %v1918_v24 = vrot.slane %v11088_v44, 4  ;;  %v1921_v43 = vsel %vm1222_vm8, %v11088_v44, %v14712_v8 }
 0x3ed   : > { %v4720_v12 = vrot.slane %v4677_v18, 4  ;;  %v4634_v34 = vrot.slane %v4617_v10, 4  ;;  %v14848_v45 = vperm.slane %v1921_v43, %v12049_v21  ;;  %v2033_v55 = vsel %vm1222_vm8, %v11089_v0, %v14678_v23 }
 0x3ee   : > { %v19350_v47 = vunpack.i.l.bf16 %v14623_v9  ;;  %v2031_v63 = vsel %vm1222_vm8, %v2030_v14, %v19351_v38  ;;  %v14860_v8 = vperm.slane %v2033_v55, %v12049_v21  ;;  %v19352_v38 = vunpack.i.h.bf16 %v14830_v3 }
 0x3ef   : > { %v4721_v41 = vsel %vm1222_vm8, %v4689_v33, %v4720_v12  ;;  %v4635_v44 = vsel %vm1222_vm8, %v4634_v34, %v4593_v26  ;;  %v4582_v34 = vrot.slane %v14800_v6, 4  ;;  %v4606_v23 = vrot.slane %v4577_v61, 4  ;;  %v11097_v29 = vpop.permute.xlu1 %11096 }
 0x3f0   : > { %v4729_v30 = vperm.slane %v4721_v41, %v12080_v28  ;;  %v1919_v62 = vsel %vm1222_vm8, %v1918_v24, %v19350_v47  ;;  %v6541_v41 = vpack.c.bf16 %v4635_v44, %v4635_v44  ;;  %v14869_v24 = vperm.slane %v2031_v63, %v12049_v21 }
 0x3f1   : > { %v14865_v43 = vperm.slane %v1919_v62, %v12049_v21  ;;  %v2044_v55 = vrot.slane %v19352_v38, 4  ;;  %v11083_v47 = vunpack.i.l.bf16 %v14830_v3  ;;  %v4583_v63 = vsel %vm1222_vm8, %v4582_v34, %v14793_v27 }
 0x3f2   : > { %v4746_v0 = vrot.slane %v4729_v30, 4  ;;  %v6735_v12 = vunpack.c.l.b16 %v6541_v41  ;;  %v4718_v9 = vrot.slane %v4689_v33, 4  ;;  %v4589_v14 = vperm.slane %v4583_v63, %v12080_v28 }
 0x3f3   : > { %v1932_v15 = vrot.slane %v11083_v47, 4  ;;  %v4607_v4 = vsel %vm1222_vm8, %v4606_v23, %v4565_v32  ;;  %v4695_v38 = vsel %vm1222_vm8, %v4694_v1, %v4653_v20  ;;  %v4636_v36 = vrot.slane %v4593_v26, 4 }
 0x3f4   : > { %v4747_v62 = vsel %vm1222_vm8, %v4746_v0, %v4705_v54  ;;  %v4613_v6 = vperm.slane %v4607_v4, %v12080_v28  ;;  %v4701_v0 = vperm.slane %v4695_v38, %v12080_v28  ;;  %v4719_v61 = vsel %vm1222_vm8, %v4718_v9, %v4677_v18 }
 0x3f5   : > { %v6542_v44 = vpack.c.bf16 %v4747_v62, %v4747_v62  ;;  %v4725_v41 = vperm.slane %v4719_v61, %v12080_v28  ;;  %v4637_v27 = vsel %vm1222_vm8, %v4617_v10, %v4636_v36  ;;  %v4748_v33 = vrot.slane %v4705_v54, 4 }
 0x3f6   : > { %v4632_v34 = vrot.slane %v4589_v14, 4  ;;  %v4630_v63 = vrot.slane %v4613_v6, 4  ;;  %v6545_v32 = vpack.c.bf16 %v4637_v27, %v4637_v27  ;;  %v4744_v23 = vrot.slane %v4701_v0, 4 }
 0x3f7   : > { %v6736_v46 = vunpack.c.l.b16 %v6542_v44  ;;  %v4742_v1 = vrot.slane %v4725_v41, 4  ;;  %v4749_v20 = vsel %vm1222_vm8, %v4729_v30, %v4748_v33  ;;  %v11099_v26 = vunpack.i.h.bf16 %v11097_v29 }
 0x3f8   : > { %v4633_v4 = vsel %vm1222_vm8, %v4613_v6, %v4632_v34  ;;  %v4631_v18 = vsel %vm1222_vm8, %v4630_v63, %v4589_v14  ;;  %v6546_v9 = vpack.c.bf16 %v4749_v20, %v4749_v20  ;;  %v6808_v44 = vunpack.c.l.b16 %v6545_v32 }
 0x3f9   : > { %v6739_v62 = vpack.c.b16 %v6736_v46, %v6735_v12  ;;  %v4745_v38 = vsel %vm1222_vm8, %v4725_v41, %v4744_v23  ;;  %v4743_v36 = vsel %vm1222_vm8, %v4742_v1, %v4701_v0  ;;  %v6533_v10 = vpack.c.bf16 %v4631_v18, %v4631_v18 }
 0x3fa   : > { %v6537_v46 = vpack.c.bf16 %v4633_v4, %v4633_v4  ;;  %v6538_v54 = vpack.c.bf16 %v4745_v38, %v4745_v38  ;;  %v6534_v12 = vpack.c.bf16 %v4743_v36, %v4743_v36  ;;  %v6809_v61 = vunpack.c.l.b16 %v6546_v9 }
 0x3fb   : > { %6762 = vmatpush.bf16.msrb.mxu2 %v6739_v62  ;;  %v2042_v27 = vrot.slane %v11099_v26, 4  ;;  %v11098_v56 = vunpack.i.l.bf16 %v11097_v29  ;;  %v6589_v30 = vunpack.c.l.b16 %v6533_v10  ;;  %v2045_v34 = vsel %vm1222_vm8, %v11099_v26, %v2044_v55 }
 0x3fc   : > { %v6662_v33 = vunpack.c.l.b16 %v6537_v46  ;;  %v6663_v6 = vunpack.c.l.b16 %v6538_v54  ;;  %v6590_v62 = vunpack.c.l.b16 %v6534_v12  ;;  %v6812_v14 = vpack.c.b16 %v6809_v61, %v6808_v44 }
 0x3fd   : > { %v1930_v63 = vrot.slane %v11098_v56, 4  ;;  %v1933_v32 = vsel %vm1222_vm8, %v11098_v56, %v1932_v15  ;;  %v19353_v23 = vunpack.i.h.bf16 %v14830_v3  ;;  %v2053_v20 = vperm.slane %v2045_v34, %v12049_v21 }
 0x3fe   : > { %v6666_v41 = vpack.c.b16 %v6663_v6, %v6662_v33  ;;  %v1941_v0 = vperm.slane %v1933_v32, %v12049_v21  ;;  %v2080_v29 = vrot.slane %v14869_v24, 4  ;;  %v6593_v4 = vpack.c.b16 %v6590_v62, %v6589_v30  ;;  %6835 = vmatpush.bf16.msrb.mxu0 %v6812_v14 }
 0x3ff   : > { %v2043_v1 = vsel %vm1222_vm8, %v2042_v27, %v19353_v23  ;;  %v1931_v55 = vsel %vm1222_vm8, %v1930_v63, %v11083_v47  ;;  %v19354_v18 = vrot.slane %v14848_v45, 4  ;;  %v2090_v9 = vrot.slane %v2053_v20, 4 }
 0x400   : > { %v2049_v26 = vperm.slane %v2043_v1, %v12049_v21  ;;  %6689 = vmatpush.bf16.msra.mxu1 %v6666_v41  ;;  %v1937_v56 = vperm.slane %v1931_v55, %v12049_v21  ;;  %v1978_v15 = vrot.slane %v1941_v0, 4  ;;  %6616 = vmatpush.bf16.msra.mxu3 %v6593_v4  ;;  %v19355_v10 = vrot.slane %v14860_v8, 4 }
 0x401   : > { %v1981_v3 = vsel %vm1222_vm8, %v1941_v0, %v19354_v18  ;;  %v19356_v12 = vrot.slane %v14865_v43, 4  ;;  %v2091_v63 = vsel %vm1222_vm8, %v2090_v9, %v14860_v8  ;;  %v19357_v0 = vrot.slane %v14646_v59, 4 }
 0x402   : > { %v1989_v44 = vperm.slane %v1981_v3, %v12080_v28  ;;  %v2078_v38 = vrot.slane %v2049_v26, 4  ;;  %v2081_v36 = vsel %vm1222_vm8, %v2049_v26, %v2080_v29  ;;  %v2093_v47 = vsel %vm1222_vm8, %v2053_v20, %v19355_v10 }
 0x403   : > { %v1966_v54 = vrot.slane %v1937_v56, 4  ;;  %v1969_v61 = vsel %vm1222_vm8, %v1937_v56, %v19356_v12  ;;  %v1979_v27 = vsel %vm1222_vm8, %v1978_v15, %v14848_v45  ;;  %v2089_v34 = vperm.slane %v2081_v36, %v12080_v28 }
 0x404   : > { %v1977_v30 = vperm.slane %v1969_v61, %v12080_v28  ;;  %v14920_v33 = vperm.slane %v1979_v27, %v12080_v28  ;;  %v2002_v6 = vrot.slane %v1989_v44, 4  ;;  %v2079_v14 = vsel %vm1222_vm8, %v2078_v38, %v14869_v24 }
 0x405   : > { %v1967_v62 = vsel %vm1222_vm8, %v1966_v54, %v14865_v43  ;;  %v2101_v32 = vperm.slane %v2093_v47, %v12080_v28  ;;  %v14936_v23 = vsel %vm1222_vm8, %v1989_v44, %v19357_v0  ;;  %v19358_v43 = vrot.slane %v14507_v53, 4 }
 0x406   : > { %v14931_v45 = vperm.slane %v1967_v62, %v12080_v28  ;;  %v1994_v41 = vrot.slane %v1977_v30, 4  ;;  %v19359_v24 = vrot.slane %v14626_v5, 4  ;;  %v14951_v29 = vperm.slane %v2079_v14, %v12080_v28 }
 0x407   : > { %v14942_v1 = vsel %vm1222_vm8, %v19358_v43, %v14467_v48  ;;  %v14954_v4 = vperm.slane %v2091_v63, %v12080_v28  ;;  %v19360_v53 = vrot.slane %v14664_v39, 4  ;;  %v14965_v26 = vsel %vm1222_vm8, %v2002_v6, %v14646_v59 }
 0x408   : > { %v14947_v8 = vsel %vm1222_vm8, %v1977_v30, %v19359_v24  ;;  %v2106_v56 = vrot.slane %v2089_v34, 4  ;;  %v14969_v15 = vsel %vm1222_vm8, %v1994_v41, %v14626_v5  ;;  %v19361_v18 = vrot.slane %v14631_v49, 4 }
 0x409   : > { %v14961_v48 = vsel %vm1222_vm8, %v14920_v33, %v19360_v53  ;;  %v19362_v9 = vrot.slane %v14661_v57, 4  ;;  %v2114_v38 = vrot.slane %v2101_v32, 4  ;;  %v19363_v10 = vrot.slane %v14668_v7, 4 }
 0x40a   : > { %v14974_v3 = vsel %vm1222_vm8, %v2089_v34, %v19361_v18  ;;  %v14985_v36 = vsel %vm1222_vm8, %v2106_v56, %v14631_v49  ;;  %v2828_v27 = vrot.slane %v14961_v48, 4  ;;  %v19365_v34 = vrot.slane %v14521_v25, 4 }
 0x40b   : > { %v14980_v44 = vsel %vm1222_vm8, %v14954_v4, %v19362_v9  ;;  %v14991_v47 = vsel %vm1222_vm8, %v2101_v32, %v19363_v10  ;;  %v14995_v54 = vsel %vm1222_vm8, %v2114_v38, %v14668_v7  ;;  %v19366_v63 = vrot.slane %v14551_v19, 4  ;;  %v19370_v9 = vld [vmem:[#allocation85_spill] sm:$0xff] }
 0x40c   : > { %19364 = vst [vmem:[#allocation86_spill] sm:$0xff] %v14995_v54  ;;  %v2940_v6 = vrot.slane %v14980_v44, 4  ;;  %v15007_v62 = vsel %vm1222_vm8, %v19365_v34, %v14455_v51  ;;  %v15011_v7 = vsel %vm1222_vm8, %v14936_v23, %v2828_v27  ;;  %v19368_v51 = vrot.slane %v14543_v40, 4  ;;  %v19372_v34 = vld [vmem:[#allocation22_spill] sm:$0xff] }
 0x40d   : > { %v15018_v32 = vsel %vm1222_vm8, %v19366_v63, %v14479_v42  ;;  %v2566_v41 = vrot.slane %v15007_v62, 4  ;;  %v19369_v24 = vrot.slane %v14556_v35, 4  ;;  %v2609_v18 = vperm.slane %v14592_v60, %v12049_v21  ;;  %v19373_v63 = vld [vmem:[#allocation36_spill] sm:$0xff]  ;;  %v19375_v60 = vld [vmem:[#allocation42_spill] sm:$0xff] }
 0x40e   : > { %v15024_v25 = vsel %vm1222_vm8, %v14991_v47, %v2940_v6  ;;  %v2579_v43 = vsel %vm1222_vm8, %v19368_v51, %v14529_v31  ;;  %v19371_v38 = vrot.slane %v14535_v11, 4  ;;  %v2678_v6 = vrot.slane %v15018_v32, 4 }
 0x40f   : > { %19367 = vst [vmem:[#allocation91_spill] sm:$0xff] %v15024_v25  ;;  %v2591_v19 = vsel %vm1222_vm8, %v19369_v24, %v14548_v22  ;;  %v2567_v42 = vsel %vm1222_vm8, %v2566_v41, %v14942_v1  ;;  %v2585_v53 = vperm.slane %v2579_v43, %v12049_v21  ;;  %v19374_v41 = vrot.slane %v19373_v63, 4 }
 0x410   : > { %v2597_v56 = vperm.slane %v2591_v19, %v12049_v21  ;;  %v15044_v10 = vsel %vm1222_vm8, %v19371_v38, %v19370_v9  ;;  %v2573_v27 = vperm.slane %v2567_v42, %v12049_v21  ;;  %v2638_v24 = vrot.slane %v2609_v18, 4 }
 0x411   : > { %v2691_v51 = vsel %vm1222_vm8, %v19374_v41, %v19372_v34  ;;  %v2614_v43 = vrot.slane %v2585_v53, 4  ;;  %v19376_v46 = vrot.slane %v14601_v17, 4  ;;  %v2679_v9 = vsel %vm1222_vm8, %v2678_v6, %v15044_v10 }
 0x412   : > { %v2697_v19 = vperm.slane %v2691_v51, %v12049_v21  ;;  %v2721_v38 = vperm.slane %v14653_v52, %v12049_v21  ;;  %v2616_v0 = vrot.slane %v2573_v27, 4  ;;  %v2639_v14 = vsel %vm1222_vm8, %v2638_v24, %v2597_v56 }
 0x413   : > { %v2703_v11 = vsel %vm1222_vm8, %v19376_v46, %v19375_v60  ;;  %v2615_v41 = vsel %vm1222_vm8, %v2614_v43, %v2573_v27  ;;  %v2685_v51 = vperm.slane %v2679_v9, %v12049_v21  ;;  %v2645_v46 = vperm.slane %v2639_v14, %v12080_v28 }
 0x414   : > { %v2709_v42 = vperm.slane %v2703_v11, %v12049_v21  ;;  %v2726_v30 = vrot.slane %v2697_v19, 4  ;;  %v2621_v49 = vperm.slane %v2615_v41, %v12080_v28  ;;  %v2750_v61 = vrot.slane %v2721_v38, 4 }
 0x415   : > { %v2617_v6 = vsel %vm1222_vm8, %v2585_v53, %v2616_v0  ;;  %v2640_v52 = vrot.slane %v2597_v56, 4  ;;  %v2728_v12 = vrot.slane %v2685_v51, 4  ;;  %v2662_v59 = vrot.slane %v2645_v46, 4 }
 0x416   : > { %v2727_v11 = vsel %vm1222_vm8, %v2726_v30, %v2685_v51  ;;  %v2625_v5 = vperm.slane %v2617_v6, %v12080_v28  ;;  %v2751_v43 = vsel %vm1222_vm8, %v2750_v61, %v2709_v42  ;;  %v2664_v24 = vrot.slane %v2621_v49, 4 }
 0x417   : > { %v2733_v27 = vperm.slane %v2727_v11, %v12080_v28  ;;  %v2757_v9 = vperm.slane %v2751_v43, %v12080_v28  ;;  %v2641_v41 = vsel %vm1222_vm8, %v2609_v18, %v2640_v52  ;;  %v2729_v14 = vsel %vm1222_vm8, %v2697_v19, %v2728_v12 }
 0x418   : > { %v2752_v55 = vrot.slane %v2709_v42, 4  ;;  %v2663_v0 = vsel %vm1222_vm8, %v2662_v59, %v2621_v49  ;;  %v2665_v30 = vsel %vm1222_vm8, %v2645_v46, %v2664_v24  ;;  %v2649_v56 = vperm.slane %v2641_v41, %v12080_v28 }
 0x419   : > { %v2776_v53 = vrot.slane %v2733_v27, 4  ;;  %v2774_v51 = vrot.slane %v2757_v9, 4  ;;  %v4986_v6 = vpack.c.bf16 %v2663_v0, %v2663_v0  ;;  %v4994_v11 = vpack.c.bf16 %v2665_v30, %v2665_v30 }
 0x41a   : > { %v2737_v61 = vperm.slane %v2729_v14, %v12080_v28  ;;  %v2666_v43 = vrot.slane %v2649_v56, 4  ;;  %v2753_v18 = vsel %vm1222_vm8, %v2721_v38, %v2752_v55  ;;  %v2668_v52 = vrot.slane %v2625_v5, 4 }
 0x41b   : > { %v2777_v20 = vsel %vm1222_vm8, %v2757_v9, %v2776_v53  ;;  %v2775_v12 = vsel %vm1222_vm8, %v2774_v51, %v2733_v27  ;;  %v5090_v19 = vunpack.c.l.b16 %v4986_v6  ;;  %v5168_v49 = vunpack.c.l.b16 %v4994_v11 }
 0x41c   : > { %v4995_v59 = vpack.c.bf16 %v2777_v20, %v2777_v20  ;;  %v4987_v42 = vpack.c.bf16 %v2775_v12, %v2775_v12  ;;  %v2667_v46 = vsel %vm1222_vm8, %v2666_v43, %v2625_v5  ;;  %v2761_v24 = vperm.slane %v2753_v18, %v12080_v28 }
 0x41d   : > { %v2669_v41 = vsel %vm1222_vm8, %v2649_v56, %v2668_v52  ;;  %v5002_v14 = vpack.c.bf16 %v2667_v46, %v2667_v46  ;;  %v2780_v30 = vrot.slane %v2737_v61, 4  ;;  %v19377_v5 = vrot.slane %v14643_v50, 4 }
 0x41e   : > { %v5169_v0 = vunpack.c.l.b16 %v4995_v59  ;;  %v5010_v9 = vpack.c.bf16 %v2669_v41, %v2669_v41  ;;  %v5091_v38 = vunpack.c.l.b16 %v4987_v42  ;;  %v2778_v27 = vrot.slane %v2761_v24, 4 }
 0x41f   : > { %v2781_v20 = vsel %vm1222_vm8, %v2761_v24, %v2780_v30  ;;  %v15092_v11 = vsel %vm1222_vm8, %v14931_v45, %v19377_v5  ;;  %v19378_v52 = vrot.slane %v14920_v33, 4  ;;  %v19379_v42 = vrot.slane %v14931_v45, 4 }
 0x420   : > { %v5174_v51 = vpack.c.b16 %v5169_v0, %v5168_v49  ;;  %v5322_v6 = vunpack.c.l.b16 %v5010_v9  ;;  %v5096_v56 = vpack.c.b16 %v5091_v38, %v5090_v19  ;;  %v2779_v43 = vsel %vm1222_vm8, %v2778_v27, %v2737_v61 }
 0x421   : > { %v5011_v18 = vpack.c.bf16 %v2781_v20, %v2781_v20  ;;  %v15099_v12 = vsel %vm1222_vm8, %v19378_v52, %v14664_v39  ;;  %v5003_v59 = vpack.c.bf16 %v2779_v43, %v2779_v43  ;;  %v5245_v49 = vunpack.c.l.b16 %v5002_v14 }
 0x422   : > { %10439 = vmatmul.msk.bf16.gmra.mxu1 %vm5108_vm9, %v5174_v51  ;;  %v15106_v46 = vsel %vm1222_vm8, %v19379_v42, %v14643_v50  ;;  %v19380_v61 = vrot.slane %v14951_v29, 4  ;;  %10435 = vmatmul.msk.bf16.gmra.mxu3 %vm5108_vm9, %v5096_v56  ;;  %v19381_v33 = vrot.slane %v14640_v58, 4  ;;  %v2790_v45 = vrot.slane %v14969_v15, 4 }
 0x423   : > { %v5323_v39 = vunpack.c.l.b16 %v5011_v18  ;;  %v19382_v50 = vrot.slane %v14947_v8, 4  ;;  %v5246_v0 = vunpack.c.l.b16 %v5003_v59  ;;  %v19383_v14 = vrot.slane %v14954_v4, 4 }
 0x424   : > { %v15112_v19 = vsel %vm1222_vm8, %v19380_v61, %v14640_v58  ;;  %v15119_v24 = vsel %vm1222_vm8, %v14951_v29, %v19381_v33  ;;  %v19384_v29 = vrot.slane %v14965_v26, 4  ;;  %v2791_v27 = vsel %vm1222_vm8, %v2790_v45, %v15106_v46 }
 0x425   : > { %v2803_v41 = vsel %vm1222_vm8, %v19382_v50, %v15092_v11  ;;  %v15130_v30 = vsel %vm1222_vm8, %v19383_v14, %v14661_v57  ;;  %v5328_v38 = vpack.c.b16 %v5323_v39, %v5322_v6  ;;  %v5251_v5 = vpack.c.b16 %v5246_v0, %v5245_v49 }
 0x426   : > { %v2809_v58 = vperm.slane %v2803_v41, %v12049_v21  ;;  %v2815_v9 = vsel %vm1222_vm8, %v19384_v29, %v15099_v12  ;;  %v2797_v4 = vperm.slane %v2791_v27, %v12049_v21  ;;  %v19385_v57 = vrot.slane %v14936_v23, 4  ;;  %v19391_v41 = vld [vmem:[#allocation54_spill] sm:$0xff] }
 0x427   : > { %10447 = vmatmul.msk.bf16.gmra.mxu0 %vm5108_vm9, %v5328_v38  ;;  %v2821_v6 = vperm.slane %v2815_v9, %v12049_v21  ;;  %v2902_v52 = vrot.slane %v14985_v36, 4  ;;  %v19386_v59 = vrot.slane %v14974_v3, 4  ;;  %10443 = vmatmul.msk.bf16.gmra.mxu2 %vm5108_vm9, %v5251_v5  ;;  %v19387_v61 = vrot.slane %v14995_v54, 4 }
 0x428   : > { %v2827_v56 = vsel %vm1222_vm8, %v19385_v57, %v14961_v48  ;;  %v2838_v43 = vrot.slane %v2809_v58, 4  ;;  %v19388_v29 = vrot.slane %v14991_v47, 4 }
 0x429   : > { %v2833_v18 = vperm.slane %v2827_v56, %v12049_v21  ;;  %v2915_v49 = vsel %vm1222_vm8, %v19386_v59, %v15119_v24  ;;  %v2927_v39 = vsel %vm1222_vm8, %v19387_v61, %v15130_v30  ;;  %v2903_v50 = vsel %vm1222_vm8, %v2902_v52, %v15112_v19 }
 0x42a   : > { %v2839_v48 = vsel %vm1222_vm8, %v2838_v43, %v2797_v4  ;;  %v2921_v42 = vperm.slane %v2915_v49, %v12049_v21  ;;  %v2909_v0 = vperm.slane %v2903_v50, %v12049_v21  ;;  %v2933_v14 = vperm.slane %v2927_v39, %v12049_v21 }
 0x42b   : > { %v2845_v33 = vperm.slane %v2839_v48, %v12080_v28  ;;  %v2862_v45 = vrot.slane %v2833_v18, 4  ;;  %v2939_v9 = vsel %vm1222_vm8, %v19388_v29, %v14980_v44  ;;  %v2840_v56 = vrot.slane %v2797_v4, 4 }
 0x42c   : > { %v2950_v38 = vrot.slane %v2921_v42, 4  ;;  %v2945_v5 = vperm.slane %v2939_v9, %v12049_v21  ;;  %v2864_v59 = vrot.slane %v2821_v6, 4  ;;  %v2952_v49 = vrot.slane %v2909_v0, 4 }
 0x42d   : > { %v2863_v27 = vsel %vm1222_vm8, %v2862_v45, %v2821_v6  ;;  %v2888_v57 = vrot.slane %v2845_v33, 4  ;;  %v2841_v47 = vsel %vm1222_vm8, %v2809_v58, %v2840_v56  ;;  %v2976_v39 = vrot.slane %v2933_v14, 4 }
 0x42e   : > { %v2869_v43 = vperm.slane %v2863_v27, %v12080_v28  ;;  %v2951_v52 = vsel %vm1222_vm8, %v2950_v38, %v2909_v0  ;;  %v2974_v61 = vrot.slane %v2945_v5, 4  ;;  %v2849_v45 = vperm.slane %v2841_v47, %v12080_v28 }
 0x42f   : > { %v2957_v48 = vperm.slane %v2951_v52, %v12080_v28  ;;  %v2865_v29 = vsel %vm1222_vm8, %v2833_v18, %v2864_v59  ;;  %v2953_v58 = vsel %vm1222_vm8, %v2921_v42, %v2952_v49  ;;  %v2977_v56 = vsel %vm1222_vm8, %v2945_v5, %v2976_v39 }
 0x430   : > { %v2886_v44 = vrot.slane %v2869_v43, 4  ;;  %v2889_v50 = vsel %vm1222_vm8, %v2869_v43, %v2888_v57  ;;  %v2975_v4 = vsel %vm1222_vm8, %v2974_v61, %v2933_v14  ;;  %v2873_v6 = vperm.slane %v2865_v29, %v12080_v28 }
 0x431   : > { %v3000_v9 = vrot.slane %v2957_v48, 4  ;;  %v4996_v27 = vpack.c.bf16 %v2889_v50, %v2889_v50  ;;  %v2981_v38 = vperm.slane %v2975_v4, %v12080_v28  ;;  %v2961_v47 = vperm.slane %v2953_v58, %v12080_v28 }
 0x432   : > { %v2887_v0 = vsel %vm1222_vm8, %v2886_v44, %v2845_v33  ;;  %v2890_v43 = vrot.slane %v2873_v6, 4  ;;  %v2985_v59 = vperm.slane %v2977_v56, %v12080_v28  ;;  %v2892_v61 = vrot.slane %v2849_v45, 4 }
 0x433   : > { %v4988_v52 = vpack.c.bf16 %v2887_v0, %v2887_v0  ;;  %v5170_v57 = vunpack.c.l.b16 %v4996_v27  ;;  %v2998_v18 = vrot.slane %v2981_v38, 4  ;;  %v3001_v14 = vsel %vm1222_vm8, %v2981_v38, %v3000_v9 }
 0x434   : > { %v4997_v29 = vpack.c.bf16 %v3001_v14, %v3001_v14  ;;  %v2891_v33 = vsel %vm1222_vm8, %v2890_v43, %v2849_v45  ;;  %v3004_v44 = vrot.slane %v2961_v47, 4  ;;  %v3002_v49 = vrot.slane %v2985_v59, 4 }
 0x435   : > { %v5092_v50 = vunpack.c.l.b16 %v4988_v52  ;;  %v2999_v42 = vsel %vm1222_vm8, %v2998_v18, %v2957_v48  ;;  %v5004_v5 = vpack.c.bf16 %v2891_v33, %v2891_v33  ;;  %v2893_v39 = vsel %vm1222_vm8, %v2873_v6, %v2892_v61  ;;  %v19389_v52 = vld [vmem:[#allocation24_spill] sm:$0xff] }
 0x436   : > { %v4989_v4 = vpack.c.bf16 %v2999_v42, %v2999_v42  ;;  %v5171_v27 = vunpack.c.l.b16 %v4997_v29  ;;  %v3005_v0 = vsel %vm1222_vm8, %v2985_v59, %v3004_v44  ;;  %v5012_v58 = vpack.c.bf16 %v2893_v39, %v2893_v39  ;;  %v19392_v61 = vld [vmem:[#allocation52_spill] sm:$0xff]  ;;  %v19394_v29 = vld [vmem:[#allocation53_spill] sm:$0xff] }
 0x437   : > { %v3003_v9 = vsel %vm1222_vm8, %v3002_v49, %v2961_v47  ;;  %v5247_v38 = vunpack.c.l.b16 %v5004_v5  ;;  %v5013_v56 = vpack.c.bf16 %v3005_v0, %v3005_v0  ;;  %v19390_v14 = vrot.slane %v19389_v52, 4  ;;  %v19395_v44 = vld [vmem:[#allocation57_spill] sm:$0xff]  ;;  %v19397_v49 = vld [vmem:[#allocation55_spill] sm:$0xff] }
 0x438   : > { %v5093_v43 = vunpack.c.l.b16 %v4989_v4  ;;  %v5175_v48 = vpack.c.b16 %v5171_v27, %v5170_v57  ;;  %v5005_v18 = vpack.c.bf16 %v3003_v9, %v3003_v9  ;;  %v5324_v33 = vunpack.c.l.b16 %v5012_v58  ;;  %v19398_v58 = vld [vmem:[#allocation63_spill] sm:$0xff] }
 0x439   : > { %v2121_v45 = vsel %vm1222_vm8, %v19391_v41, %v19390_v14  ;;  %v5325_v23 = vunpack.c.l.b16 %v5013_v56  ;;  %v19393_v59 = vrot.slane %v19392_v61, 4  ;;  %v19396_v42 = vrot.slane %v19395_v44, 4  ;;  %v19399_v56 = vld [vmem:[#allocation32_spill] sm:$0xff]  ;;  %v19401_v14 = vld [vmem:[#allocation59_spill] sm:$0xff] }
 0x43a   : > { %v15200_v6 = vperm.slane %v2121_v45, %v12049_v21  ;;  %v5097_v39 = vpack.c.b16 %v5093_v43, %v5092_v50  ;;  %10440 = vmatmul.msk.bf16.gmra.mxu1 %vm5108_vm9, %v5175_v48  ;;  %v5248_v41 = vunpack.c.l.b16 %v5005_v18  ;;  %v2202_v9 = vrot.slane %v19398_v58, 4 }
 0x43b   : > { %v2133_v47 = vsel %vm1222_vm8, %v19394_v29, %v19393_v59  ;;  %v2145_v5 = vsel %vm1222_vm8, %v19397_v49, %v19396_v42  ;;  %v5329_v27 = vpack.c.b16 %v5325_v23, %v5324_v33  ;;  %v19400_v52 = vrot.slane %v19399_v56, 4  ;;  %v19402_v33 = vld [vmem:[#allocation56_spill] sm:$0xff]  ;;  %v19404_v59 = vld [vmem:[#allocation58_spill] sm:$0xff]  ;;  %v19407_v42 = vld [vmem:[#allocation61_spill] sm:$0xff] }
 0x43c   : > { %v2141_v57 = vperm.slane %v2133_v47, %v12049_v21  ;;  %v15213_v4 = vperm.slane %v2145_v5, %v12049_v21  ;;  %v2180_v0 = vrot.slane %v15200_v6, 4  ;;  %10436 = vmatmul.msk.bf16.gmra.mxu3 %vm5108_vm9, %v5097_v39  ;;  %v5252_v50 = vpack.c.b16 %v5248_v41, %v5247_v38  ;;  %v19405_v47 = vld [vmem:[#allocation60_spill] sm:$0xff]  ;;  %v19408_v49 = vld [vmem:[#allocation65_spill] sm:$0xff] }
 0x43d   : > { %v2233_v45 = vsel %vm1222_vm8, %v19401_v14, %v19400_v52  ;;  %10448 = vmatmul.msk.bf16.gmra.mxu0 %vm5108_vm9, %v5329_v27  ;;  %v19403_v61 = vrot.slane %v19402_v33, 4  ;;  %v19406_v44 = vrot.slane %v19405_v47, 4  ;;  %v2314_v5 = vrot.slane %v19408_v49, 4 }
 0x43e   : > { %v2178_v43 = vrot.slane %v2141_v57, 4  ;;  %v2204_v48 = vrot.slane %v15213_v4, 4  ;;  %v15224_v18 = vperm.slane %v2233_v45, %v12049_v21  ;;  %v2203_v23 = vsel %vm1222_vm8, %v2202_v9, %v15213_v4  ;;  %10444 = vmatmul.msk.bf16.gmra.mxu2 %vm5108_vm9, %v5252_v50  ;;  %v19411_v50 = vld [vmem:[#allocation31_spill] sm:$0xff] }
 0x43f   : > { %v2245_v29 = vsel %vm1222_vm8, %v19404_v59, %v19403_v61  ;;  %v2257_v38 = vsel %vm1222_vm8, %v19407_v42, %v19406_v44  ;;  %v2209_v41 = vperm.slane %v2203_v23, %v12080_v28  ;;  %v19409_v52 = vrot.slane %v13907_v37, 4  ;;  %v19412_v44 = vld [vmem:[#allocation35_spill] sm:$0xff] }
 0x440   : > { %v2179_v39 = vsel %vm1222_vm8, %v2178_v43, %v15200_v6  ;;  %v2253_v4 = vperm.slane %v2245_v29, %v12049_v21  ;;  %v2265_v27 = vperm.slane %v2257_v38, %v12049_v21  ;;  %v2292_v56 = vrot.slane %v15224_v18, 4  ;;  %v19413_v38 = vld [vmem:[#allocation37_spill] sm:$0xff] }
 0x441   : > { %v2185_v9 = vperm.slane %v2179_v39, %v12080_v28  ;;  %v4761_v14 = vsel %vm1222_vm8, %v13912_v16, %v19409_v52  ;;  %v19410_v45 = vrot.slane %v14684_v2, 4  ;;  %v2222_v43 = vrot.slane %v2209_v41, 4 }
 0x442   : > { %v2290_v23 = vrot.slane %v2253_v4, 4  ;;  %v2315_v33 = vsel %vm1222_vm8, %v2314_v5, %v2265_v27  ;;  %v2316_v61 = vrot.slane %v2265_v27, 4  ;;  %v15257_v47 = vperm.slane %v4761_v14, %v12049_v21 }
 0x443   : > { %v4773_v6 = vsel %vm1222_vm8, %v19411_v50, %v19410_v45  ;;  %v2224_v59 = vrot.slane %v2185_v9, 4  ;;  %v2321_v29 = vperm.slane %v2315_v33, %v12080_v28  ;;  %v2223_v16 = vsel %vm1222_vm8, %v2222_v43, %v2185_v9  ;;  %v19414_v9 = vld [vmem:[#allocation23_spill] sm:$0xff] }
 0x444   : > { %v15260_v37 = vperm.slane %v4773_v6, %v12049_v21  ;;  %v2291_v2 = vsel %vm1222_vm8, %v2290_v23, %v15224_v18  ;;  %v15267_v42 = vperm.slane %v19412_v44, %v12049_v21  ;;  %v15271_v5 = vperm.slane %v19413_v38, %v12049_v21  ;;  %v19416_v6 = vld [vmem:[#allocation28_spill] sm:$0xff]  ;;  %v19417_v43 = vld [vmem:[#allocation39_spill] sm:$0xff]  ;;  %v19420_v38 = vld [vmem:[#allocation33_spill] sm:$0xff] }
 0x445   : > { %v2297_v39 = vperm.slane %v2291_v2, %v12080_v28  ;;  %v2334_v27 = vrot.slane %v2321_v29, 4  ;;  %v5014_v52 = vpack.c.bf16 %v2223_v16, %v2223_v16  ;;  %v19415_v50 = vrot.slane %v19414_v9, 4  ;;  %v19419_v33 = vld [vmem:[#allocation27_spill] sm:$0xff] }
 0x446   : > { %v4818_v14 = vrot.slane %v15260_v37, 4  ;;  %v4842_v45 = vrot.slane %v15271_v5, 4  ;;  %v19418_v23 = vrot.slane %v19417_v43, 4  ;;  %v15286_v20 = vperm.slane %v19420_v38, %v12049_v21 }
 0x447   : > { %v4873_v18 = vsel %vm1222_vm8, %v19416_v6, %v19415_v50  ;;  %v2335_v16 = vsel %vm1222_vm8, %v2334_v27, %v2297_v39  ;;  %v2336_v2 = vrot.slane %v2297_v39, 4  ;;  %v5395_v51 = vunpack.c.l.b16 %v5014_v52  ;;  %v19421_v39 = vld [vmem:[#allocation34_spill] sm:$0xff] }
 0x448   : > { %v4885_v44 = vsel %vm1222_vm8, %v19419_v33, %v19418_v23  ;;  %v4819_v55 = vsel %vm1222_vm8, %v4818_v14, %v15257_v47  ;;  %v5015_v9 = vpack.c.bf16 %v2335_v16, %v2335_v16  ;;  %v4843_v50 = vsel %vm1222_vm8, %v4842_v45, %v15267_v42 }
 0x449   : > { %v4825_v53 = vperm.slane %v4819_v55, %v12080_v28  ;;  %v15295_v6 = vperm.slane %v4873_v18, %v12049_v21  ;;  %v4849_v43 = vperm.slane %v4843_v50, %v12080_v28  ;;  %v15299_v23 = vperm.slane %v4885_v44, %v12049_v21 }
 0x44a   : > { %v15303_v27 = vperm.slane %v19421_v39, %v12049_v21  ;;  %v2225_v52 = vsel %vm1222_vm8, %v2209_v41, %v2224_v59  ;;  %v5396_v14 = vunpack.c.l.b16 %v5015_v9  ;;  %v2337_v55 = vsel %vm1222_vm8, %v2321_v29, %v2336_v2 }
 0x44b   : > { %v5022_v33 = vpack.c.bf16 %v2225_v52, %v2225_v52  ;;  %v2181_v45 = vsel %vm1222_vm8, %v2141_v57, %v2180_v0  ;;  %v4862_v38 = vrot.slane %v4849_v43, 4  ;;  %v4930_v18 = vrot.slane %v15299_v23, 4 }
 0x44c   : > { %v4954_v16 = vrot.slane %v15303_v27, 4  ;;  %v5023_v50 = vpack.c.bf16 %v2337_v55, %v2337_v55  ;;  %v5403_v44 = vpack.c.b16 %v5396_v14, %v5395_v51  ;;  %v2189_v54 = vperm.slane %v2181_v45, %v12080_v28 }
 0x44d   : > { %v5472_v25 = vunpack.c.l.b16 %v5022_v33  ;;  %v2205_v39 = vsel %vm1222_vm8, %v19398_v58, %v2204_v48  ;;  %v4863_v41 = vsel %vm1222_vm8, %v4862_v38, %v4825_v53  ;;  %v4931_v59 = vsel %vm1222_vm8, %v4930_v18, %v15295_v6 }
 0x44e   : > { %v4955_v57 = vsel %vm1222_vm8, %v4954_v16, %v15286_v20  ;;  %v5473_v0 = vunpack.c.l.b16 %v5023_v50  ;;  %10449 = vmatmul.msk.bf16.vlgmr.msrb.gmra.mxu3 %vm5108_vm9, %v5403_v44  ;;  %v4937_v29 = vperm.slane %v4931_v59, %v12080_v28  ;;  %v6551_v2 = vpack.c.bf16 %v4863_v41, %v4863_v41 }
 0x44f   : > { %v4961_v51 = vperm.slane %v4955_v57, %v12080_v28  ;;  %v2213_v9 = vperm.slane %v2205_v39, %v12080_v28  ;;  %v2293_v58 = vsel %vm1222_vm8, %v2253_v4, %v2292_v56  ;;  %v2317_v48 = vsel %vm1222_vm8, %v19408_v49, %v2316_v61 }
 0x450   : > { %v5480_v52 = vpack.c.b16 %v5473_v0, %v5472_v25  ;;  %v4864_v14 = vrot.slane %v4825_v53, 4  ;;  %v6883_v33 = vunpack.c.l.b16 %v6551_v2  ;;  %v2301_v38 = vperm.slane %v2293_v58, %v12080_v28 }
 0x451   : > { %v4974_v55 = vrot.slane %v4961_v51, 4  ;;  %v2226_v45 = vrot.slane %v2213_v9, 4  ;;  %v2325_v18 = vperm.slane %v2317_v48, %v12080_v28  ;;  %v4976_v50 = vrot.slane %v4937_v29, 4 }
 0x452   : > { %10453 = vmatmul.msk.bf16.vlgmr.msrb.gmra.mxu1 %vm5108_vm9, %v5480_v52  ;;  %v4865_v16 = vsel %vm1222_vm8, %v4849_v43, %v4864_v14  ;;  %v4820_v25 = vrot.slane %v15257_v47, 4  ;;  %v4844_v53 = vrot.slane %v15267_v42, 4 }
 0x453   : > { %v4975_v4 = vsel %vm1222_vm8, %v4974_v55, %v4937_v29  ;;  %v2227_v56 = vsel %vm1222_vm8, %v2226_v45, %v2189_v54  ;;  %v6555_v49 = vpack.c.bf16 %v4865_v16, %v4865_v16  ;;  %v2338_v44 = vrot.slane %v2325_v18, 4 }
 0x454   : > { %v6552_v61 = vpack.c.bf16 %v4975_v4, %v4975_v4  ;;  %v5030_v39 = vpack.c.bf16 %v2227_v56, %v2227_v56  ;;  %v4977_v41 = vsel %vm1222_vm8, %v4961_v51, %v4976_v50  ;;  %v4821_v43 = vsel %vm1222_vm8, %v15260_v37, %v4820_v25 }
 0x455   : > { %v6556_v59 = vpack.c.bf16 %v4977_v41, %v4977_v41  ;;  %v6956_v57 = vunpack.c.l.b16 %v6555_v49  ;;  %v4845_v47 = vsel %vm1222_vm8, %v15271_v5, %v4844_v53  ;;  %v2339_v29 = vsel %vm1222_vm8, %v2338_v44, %v2301_v38 }
 0x456   : > { %v6884_v0 = vunpack.c.l.b16 %v6552_v61  ;;  %v5549_v2 = vunpack.c.l.b16 %v5030_v39  ;;  %v15340_v52 = vperm.slane %v4821_v43, %v12080_v28  ;;  %v5031_v42 = vpack.c.bf16 %v2339_v29, %v2339_v29  ;;  %v19422_v61 = vld [vmem:[#allocation30_spill] sm:$0xff]  ;;  %v19423_v39 = vld [vmem:[#allocation87_spill] sm:$0xff]  ;;  %v19426_v43 = vld [vmem:[#allocation73_spill] sm:$0xff] }
 0x457   : > { %v6957_v58 = vunpack.c.l.b16 %v6556_v59  ;;  %v15343_v48 = vperm.slane %v4845_v47, %v12080_v28  ;;  %v4932_v51 = vrot.slane %v15295_v6, 4  ;;  %v4956_v37 = vrot.slane %v15286_v20, 4  ;;  %v19425_v59 = vld [vmem:[#allocation67_spill] sm:$0xff] }
 0x458   : > { %v6886_v14 = vpack.c.b16 %v6884_v0, %v6883_v33  ;;  %v2228_v55 = vrot.slane %v2189_v54, 4  ;;  %v2340_v45 = vrot.slane %v2301_v38, 4  ;;  %v5550_v5 = vunpack.c.l.b16 %v5031_v42  ;;  %v19428_v0 = vld [vmem:[#allocation72_spill] sm:$0xff] }
 0x459   : > { %v6959_v16 = vpack.c.b16 %v6957_v58, %v6956_v57  ;;  %v4866_v50 = vrot.slane %v15343_v48, 4  ;;  %v4933_v25 = vsel %vm1222_vm8, %v15299_v23, %v4932_v51  ;;  %v4957_v56 = vsel %vm1222_vm8, %v15303_v27, %v4956_v37  ;;  %v19429_v58 = vld [vmem:[#allocation70_spill] sm:$0xff] }
 0x45a   : > { %6907 = vmatpush.bf16.msrb.mxu3 %v6886_v14  ;;  %v4941_v4 = vperm.slane %v4933_v25, %v12080_v28  ;;  %v2229_v6 = vsel %vm1222_vm8, %v2213_v9, %v2228_v55  ;;  %v2341_v33 = vsel %vm1222_vm8, %v2325_v18, %v2340_v45  ;;  %v5557_v20 = vpack.c.b16 %v5550_v5, %v5549_v2  ;;  %v19430_v45 = vld [vmem:[#allocation80_spill] sm:$0xff] }
 0x45b   : > { %6980 = vmatpush.bf16.msrb.mxu1 %v6959_v16  ;;  %v4867_v54 = vsel %vm1222_vm8, %v4866_v50, %v15340_v52  ;;  %v4965_v38 = vperm.slane %v4957_v56, %v12080_v28  ;;  %v5038_v49 = vpack.c.bf16 %v2229_v6, %v2229_v6  ;;  %v5039_v23 = vpack.c.bf16 %v2341_v33, %v2341_v33  ;;  %v19431_v56 = vld [vmem:[#allocation93_spill] sm:$0xff] }
 0x45c   : > { %v6559_v53 = vpack.c.bf16 %v4867_v54, %v4867_v54  ;;  %v4536_v44 = vrot.slane %v19422_v61, 4  ;;  %v19424_v41 = vrot.slane %v19423_v39, 4  ;;  %10457 = vmatmul.msk.bf16.vlgmr.msra.gmra.mxu2 %vm5108_vm9, %v5557_v20  ;;  %v19427_v47 = vrot.slane %v19426_v43, 4  ;;  %v19433_v20 = vld [vmem:[#allocation74_spill] sm:$0xff]  ;;  %v19434_v61 = vld [vmem:[#allocation77_spill] sm:$0xff]  ;;  %v19436_v39 = vld [vmem:[#allocation79_spill] sm:$0xff] }
 0x45d   : > { %v4978_v9 = vrot.slane %v4965_v38, 4  ;;  %v5626_v18 = vunpack.c.l.b16 %v5038_v49  ;;  %v5627_v42 = vunpack.c.l.b16 %v5039_v23  ;;  %v4581_v5 = vperm.slane %v19430_v45, %v12049_v21 }
 0x45e   : > { %v4549_v27 = vsel %vm1222_vm8, %v19425_v59, %v19424_v41  ;;  %v4561_v29 = vsel %vm1222_vm8, %v19428_v0, %v19427_v47  ;;  %v7029_v2 = vunpack.c.l.b16 %v6559_v53  ;;  %v4537_v51 = vsel %vm1222_vm8, %v19429_v58, %v4536_v44  ;;  %v19438_v0 = vld [vmem:[#allocation81_spill] sm:$0xff] }
 0x45f   : > { %v4557_v57 = vperm.slane %v4549_v27, %v12049_v21  ;;  %v15372_v14 = vperm.slane %v4561_v29, %v12049_v21  ;;  %v4979_v37 = vsel %vm1222_vm8, %v4978_v9, %v4941_v4  ;;  %v4545_v55 = vperm.slane %v4537_v51, %v12049_v21  ;;  %v19437_v9 = vld [vmem:[#allocation76_spill] sm:$0xff] }
 0x460   : > { %v6560_v50 = vpack.c.bf16 %v4979_v37, %v4979_v37  ;;  %v5634_v25 = vpack.c.b16 %v5627_v42, %v5626_v18  ;;  %v4648_v6 = vrot.slane %v19431_v56, 4  ;;  %v19432_v33 = vrot.slane %v14790_v13, 4 }
 0x461   : > { %v4594_v16 = vrot.slane %v4557_v57, 4  ;;  %v4618_v53 = vrot.slane %v4581_v5, 4  ;;  %v19435_v44 = vrot.slane %v19434_v61, 4  ;;  %v4693_v29 = vperm.slane %v19438_v0, %v12049_v21 }
 0x462   : > { %v4661_v54 = vsel %vm1222_vm8, %v19433_v20, %v19432_v33  ;;  %v7030_v59 = vunpack.c.l.b16 %v6560_v50  ;;  %10461 = vmatmul.msk.bf16.vlgmr.msra.gmra.mxu0 %vm5108_vm9, %v5634_v25  ;;  %v4649_v13 = vsel %vm1222_vm8, %v19437_v9, %v4648_v6  ;;  %v4868_v37 = vrot.slane %v15340_v52, 4 }
 0x463   : > { %v4595_v49 = vsel %vm1222_vm8, %v4594_v16, %v4545_v55  ;;  %v4669_v23 = vperm.slane %v4661_v54, %v12049_v21  ;;  %v4673_v41 = vsel %vm1222_vm8, %v19436_v39, %v19435_v44  ;;  %v4619_v43 = vsel %vm1222_vm8, %v4618_v53, %v15372_v14 }
 0x464   : > { %v4601_v27 = vperm.slane %v4595_v49, %v12080_v28  ;;  %v4681_v18 = vperm.slane %v4673_v41, %v12049_v21  ;;  %v4657_v47 = vperm.slane %v4649_v13, %v12049_v21  ;;  %v7032_v58 = vpack.c.b16 %v7030_v59, %v7029_v2 }
 0x465   : > { %v4706_v42 = vrot.slane %v4669_v23, 4  ;;  %v4625_v51 = vperm.slane %v4619_v43, %v12080_v28  ;;  %v4980_v45 = vrot.slane %v4941_v4, 4  ;;  %v4730_v50 = vrot.slane %v4693_v29, 4 }
 0x466   : > { %v4640_v25 = vrot.slane %v4601_v27, 4  ;;  %v4596_v56 = vrot.slane %v4545_v55, 4  ;;  %7053 = vmatpush.bf16.msra.mxu2 %v7032_v58  ;;  %v4869_v20 = vsel %vm1222_vm8, %v15343_v48, %v4868_v37  ;;  %v4708_v37 = vrot.slane %v4657_v47, 4 }
 0x467   : > { %v4707_v16 = vsel %vm1222_vm8, %v4706_v42, %v4657_v47  ;;  %v4638_v6 = vrot.slane %v4625_v51, 4  ;;  %v4981_v54 = vsel %vm1222_vm8, %v4965_v38, %v4980_v45  ;;  %v4731_v2 = vsel %vm1222_vm8, %v4730_v50, %v4681_v18 }
 0x468   : > { %v4713_v33 = vperm.slane %v4707_v16, %v12080_v28  ;;  %v6563_v49 = vpack.c.bf16 %v4869_v20, %v4869_v20  ;;  %v6564_v53 = vpack.c.bf16 %v4981_v54, %v4981_v54  ;;  %v4641_v52 = vsel %vm1222_vm8, %v4625_v51, %v4640_v25  ;;  %v19441_v20 = vld [vmem:[#allocation98_spill] sm:$0xff] }
 0x469   : > { %v4639_v4 = vsel %vm1222_vm8, %v4638_v6, %v4601_v27  ;;  %v4737_v61 = vperm.slane %v4731_v2, %v12080_v28  ;;  %v6553_v44 = vpack.c.bf16 %v4641_v52, %v4641_v52  ;;  %v4597_v9 = vsel %vm1222_vm8, %v4557_v57, %v4596_v56  ;;  %v19439_v56 = vld [vmem:[#allocation47_spill] sm:$0xff] }
 0x46a   : > { %v4752_v55 = vrot.slane %v4713_v33, 4  ;;  %v6549_v39 = vpack.c.bf16 %v4639_v4, %v4639_v4  ;;  %v7102_v41 = vunpack.c.l.b16 %v6563_v49  ;;  %v7103_v59 = vunpack.c.l.b16 %v6564_v53 }
 0x46b   : > { %v4750_v48 = vrot.slane %v4737_v61, 4  ;;  %v6954_v13 = vunpack.c.l.b16 %v6553_v44  ;;  %v4605_v43 = vperm.slane %v4597_v9, %v12080_v28  ;;  %v4620_v27 = vrot.slane %v15372_v14, 4  ;;  %v19444_v44 = vld [vmem:[#allocation95_spill] sm:$0xff] }
 0x46c   : > { %v4753_v38 = vsel %vm1222_vm8, %v4737_v61, %v4752_v55  ;;  %v6881_v0 = vunpack.c.l.b16 %v6549_v39  ;;  %v7105_v42 = vpack.c.b16 %v7103_v59, %v7102_v41  ;;  %v4732_v45 = vrot.slane %v4681_v18, 4  ;;  %v19442_v61 = vld [vmem:[#allocation51_spill] sm:$0xff]  ;;  %v19445_v41 = vld [vmem:[#allocation46_spill] sm:$0xff] }
 0x46d   : > { %v6554_v58 = vpack.c.bf16 %v4753_v38, %v4753_v38  ;;  %v4751_v51 = vsel %vm1222_vm8, %v4750_v48, %v4713_v33  ;;  %v4644_v16 = vrot.slane %v4605_v43, 4  ;;  %v4621_v57 = vsel %vm1222_vm8, %v4581_v5, %v4620_v27  ;;  %v19447_v59 = vld [vmem:[#allocation99_spill] sm:$0xff] }
 0x46e   : > { %v6550_v50 = vpack.c.bf16 %v4751_v51, %v4751_v51  ;;  %7126 = vmatpush.bf16.msra.mxu0 %v7105_v42  ;;  %v19440_v6 = vrot.slane %v19439_v56, 4  ;;  %v4629_v2 = vperm.slane %v4621_v57, %v12080_v28  ;;  %v4709_v49 = vsel %vm1222_vm8, %v4669_v23, %v4708_v37  ;;  %v19448_v51 = vld [vmem:[#allocation105_spill] sm:$0xff] }
 0x46f   : > { %v6955_v25 = vunpack.c.l.b16 %v6554_v58  ;;  %v4733_v14 = vsel %vm1222_vm8, %v4693_v29, %v4732_v45  ;;  %v4717_v53 = vperm.slane %v4709_v49, %v12080_v28  ;;  %v19443_v55 = vrot.slane %v19442_v61, 4  ;;  %v19457_v61 = vld [vmem:[#allocation104_spill] sm:$0xff] }
 0x470   : > { %v2345_v54 = vsel %vm1222_vm8, %v19441_v20, %v19440_v6  ;;  %v6882_v18 = vunpack.c.l.b16 %v6550_v50  ;;  %v4741_v52 = vperm.slane %v4733_v14, %v12080_v28  ;;  %v4642_v5 = vrot.slane %v4629_v2, 4  ;;  %v19452_v14 = vld [vmem:[#allocation62_spill] sm:$0xff] }
 0x471   : > { %v2353_v47 = vperm.slane %v2345_v54, %v12049_v21  ;;  %v6958_v33 = vpack.c.b16 %v6955_v25, %v6954_v13  ;;  %v4645_v4 = vsel %vm1222_vm8, %v4629_v2, %v4644_v16  ;;  %v2357_v39 = vsel %vm1222_vm8, %v19444_v44, %v19443_v55  ;;  %v19451_v2 = vld [vmem:[#allocation100_spill] sm:$0xff] }
 0x472   : > { %v19446_v23 = vrot.slane %v19445_v41, 4  ;;  %v6885_v9 = vpack.c.b16 %v6882_v18, %v6881_v0  ;;  %v4754_v48 = vrot.slane %v4741_v52, 4  ;;  %v4756_v38 = vrot.slane %v4717_v53, 4 }
 0x473   : > { %6981 = vmatpush.bf16.msrb.mxu1 %v6958_v33  ;;  %v6561_v13 = vpack.c.bf16 %v4645_v4, %v4645_v4  ;;  %v4643_v42 = vsel %vm1222_vm8, %v4642_v5, %v4605_v43  ;;  %v2365_v58 = vperm.slane %v2357_v39, %v12049_v21  ;;  %v2389_v37 = vperm.slane %v19448_v51, %v12049_v21  ;;  %v19449_v43 = vld [vmem:[#allocation50_spill] sm:$0xff]  ;;  %v19454_v33 = vld [vmem:[#allocation101_spill] sm:$0xff] }
 0x474   : > { %v2369_v29 = vsel %vm1222_vm8, %v19447_v59, %v19446_v23  ;;  %6908 = vmatpush.bf16.msrb.mxu3 %v6885_v9  ;;  %v4755_v45 = vsel %vm1222_vm8, %v4754_v48, %v4717_v53  ;;  %v6557_v16 = vpack.c.bf16 %v4643_v42, %v4643_v42  ;;  %v4757_v50 = vsel %vm1222_vm8, %v4741_v52, %v4756_v38  ;;  %v19455_v53 = vld [vmem:[#allocation64_spill] sm:$0xff]  ;;  %v19458_v42 = vld [vmem:[#allocation106_spill] sm:$0xff] }
 0x475   : > { %v2377_v27 = vperm.slane %v2369_v29, %v12049_v21  ;;  %v7100_v0 = vunpack.c.l.b16 %v6561_v13  ;;  %v6558_v25 = vpack.c.bf16 %v4755_v45, %v4755_v45  ;;  %v6562_v57 = vpack.c.bf16 %v4757_v50, %v4757_v50 }
 0x476   : > { %v2402_v56 = vrot.slane %v2365_v58, 4  ;;  %v2426_v6 = vrot.slane %v2389_v37, 4  ;;  %v7027_v20 = vunpack.c.l.b16 %v6557_v16  ;;  %v19450_v54 = vrot.slane %v19449_v43, 4 }
 0x477   : > { %v19453_v18 = vrot.slane %v19452_v14, 4  ;;  %v19456_v4 = vrot.slane %v19455_v53, 4  ;;  %v7028_v55 = vunpack.c.l.b16 %v6558_v25  ;;  %v7101_v44 = vunpack.c.l.b16 %v6562_v57 }
 0x478   : > { %v2457_v49 = vsel %vm1222_vm8, %v19451_v2, %v19450_v54  ;;  %v2403_v39 = vsel %vm1222_vm8, %v2402_v56, %v2353_v47  ;;  %v2427_v41 = vsel %vm1222_vm8, %v2426_v6, %v2377_v27  ;;  %v2501_v51 = vperm.slane %v19458_v42, %v12049_v21 }
 0x479   : > { %v2469_v5 = vsel %vm1222_vm8, %v19454_v33, %v19453_v18  ;;  %v2481_v52 = vsel %vm1222_vm8, %v19457_v61, %v19456_v4  ;;  %v2409_v23 = vperm.slane %v2403_v39, %v12080_v28  ;;  %v2433_v59 = vperm.slane %v2427_v41, %v12080_v28 }
 0x47a   : > { %v2465_v29 = vperm.slane %v2457_v49, %v12049_v21  ;;  %v2477_v9 = vperm.slane %v2469_v5, %v12049_v21  ;;  %v7031_v48 = vpack.c.b16 %v7028_v55, %v7027_v20  ;;  %v7104_v38 = vpack.c.b16 %v7101_v44, %v7100_v0 }
 0x47b   : > { %v2489_v13 = vperm.slane %v2481_v52, %v12049_v21  ;;  %v2446_v45 = vrot.slane %v2433_v59, 4  ;;  %v2448_v50 = vrot.slane %v2409_v23, 4  ;;  %v2404_v25 = vrot.slane %v2353_v47, 4 }
 0x47c   : > { %v2514_v16 = vrot.slane %v2477_v9, 4  ;;  %7054 = vmatpush.bf16.msra.mxu2 %v7031_v48  ;;  %7127 = vmatpush.bf16.msra.mxu0 %v7104_v38  ;;  %v2538_v57 = vrot.slane %v2501_v51, 4  ;;  %v2428_v56 = vrot.slane %v2377_v27, 4  ;;  %v2516_v6 = vrot.slane %v2465_v29, 4 }
 0x47d   : > { %v2540_v43 = vrot.slane %v2489_v13, 4  ;;  %v2447_v54 = vsel %vm1222_vm8, %v2446_v45, %v2409_v23  ;;  %v2449_v0 = vsel %vm1222_vm8, %v2433_v59, %v2448_v50  ;;  %v2405_v2 = vsel %vm1222_vm8, %v2365_v58, %v2404_v25 }
 0x47e   : > { %v2515_v20 = vsel %vm1222_vm8, %v2514_v16, %v2465_v29  ;;  %v2539_v14 = vsel %vm1222_vm8, %v2538_v57, %v2489_v13  ;;  %v5016_v18 = vpack.c.bf16 %v2447_v54, %v2447_v54  ;;  %v5024_v47 = vpack.c.bf16 %v2449_v0, %v2449_v0 }
 0x47f   : > { %v2521_v49 = vperm.slane %v2515_v20, %v12080_v28  ;;  %v2545_v33 = vperm.slane %v2539_v14, %v12080_v28  ;;  %v2413_v27 = vperm.slane %v2405_v2, %v12080_v28  ;;  %v2429_v5 = vsel %vm1222_vm8, %v2389_v37, %v2428_v56 }
 0x480   : > { %v2517_v53 = vsel %vm1222_vm8, %v2477_v9, %v2516_v6  ;;  %v5397_v4 = vunpack.c.l.b16 %v5016_v18  ;;  %v5474_v52 = vunpack.c.l.b16 %v5024_v47  ;;  %v2437_v55 = vperm.slane %v2429_v5, %v12080_v28 }
 0x481   : > { %v2560_v61 = vrot.slane %v2521_v49, 4  ;;  %v2558_v58 = vrot.slane %v2545_v33, 4  ;;  %v2525_v44 = vperm.slane %v2517_v53, %v12080_v28  ;;  %v2541_v39 = vsel %vm1222_vm8, %v2501_v51, %v2540_v43 }
 0x482   : > { %v2452_v41 = vrot.slane %v2413_v27, 4  ;;  %v2450_v59 = vrot.slane %v2437_v55, 4  ;;  %v2549_v29 = vperm.slane %v2541_v39, %v12080_v28  ;;  %v19459_v37 = vrot.slane %v14942_v1, 4 }
 0x483   : > { %v2561_v23 = vsel %vm1222_vm8, %v2545_v33, %v2560_v61  ;;  %v2559_v48 = vsel %vm1222_vm8, %v2558_v58, %v2521_v49  ;;  %v2564_v42 = vrot.slane %v2525_v44, 4  ;;  %v19460_v49 = vrot.slane %v14529_v31, 4  ;;  %v19464_v31 = vld [vmem:[#allocation89_spill] sm:$0xff] }
 0x484   : > { %v2569_v9 = vsel %vm1222_vm8, %v15007_v62, %v19459_v37  ;;  %v5025_v38 = vpack.c.bf16 %v2561_v23, %v2561_v23  ;;  %v2453_v13 = vsel %vm1222_vm8, %v2437_v55, %v2452_v41  ;;  %v5017_v45 = vpack.c.bf16 %v2559_v48, %v2559_v48 }
 0x485   : > { %v2451_v51 = vsel %vm1222_vm8, %v2450_v59, %v2413_v27  ;;  %v2562_v16 = vrot.slane %v2549_v29, 4  ;;  %v5040_v50 = vpack.c.bf16 %v2453_v13, %v2453_v13  ;;  %v2565_v56 = vsel %vm1222_vm8, %v2549_v29, %v2564_v42 }
 0x486   : > { %v5475_v25 = vunpack.c.l.b16 %v5025_v38  ;;  %v5032_v57 = vpack.c.bf16 %v2451_v51, %v2451_v51  ;;  %v2577_v1 = vperm.slane %v2569_v9, %v12049_v21  ;;  %v5398_v6 = vunpack.c.l.b16 %v5017_v45  ;;  %v19470_v9 = vld [vmem:[#allocation40_spill] sm:$0xff] }
 0x487   : > { %v2563_v62 = vsel %vm1222_vm8, %v2562_v16, %v2525_v44  ;;  %v5041_v43 = vpack.c.bf16 %v2565_v56, %v2565_v56  ;;  %v5628_v54 = vunpack.c.l.b16 %v5040_v50  ;;  %v2581_v14 = vsel %vm1222_vm8, %v14543_v40, %v19460_v49 }
 0x488   : > { %v5481_v20 = vpack.c.b16 %v5475_v25, %v5474_v52  ;;  %v5033_v0 = vpack.c.bf16 %v2563_v62, %v2563_v62  ;;  %v5551_v2 = vunpack.c.l.b16 %v5032_v57  ;;  %v5404_v18 = vpack.c.b16 %v5398_v6, %v5397_v4  ;;  %v19462_v52 = vld [vmem:[#allocation84_spill] sm:$0xff] }
 0x489   : > { %v5629_v47 = vunpack.c.l.b16 %v5041_v43  ;;  %v2589_v33 = vperm.slane %v2581_v14, %v12049_v21  ;;  %v19461_v27 = vrot.slane %v14548_v22, 4  ;;  %v19463_v55 = vrot.slane %v19462_v52, 4  ;;  %v5136_v43 = vpop.f32.mrf.mxu1 }
 0x48a   : > { %10454 = vmatmul.msk.bf16.gmra.mxu1 %vm5108_vm9, %v5481_v20  ;;  %v5552_v53 = vunpack.c.l.b16 %v5033_v0  ;;  %v19465_v40 = vrot.slane %v15044_v10, 4  ;;  %10450 = vmatmul.msk.bf16.gmra.mxu3 %vm5108_vm9, %v5404_v18  ;;  %v19466_v23 = vrot.slane %v19372_v34, 4  ;;  %v19467_v29 = vrot.slane %v19375_v60, 4 }
 0x48b   : > { %v2593_v5 = vsel %vm1222_vm8, %v14556_v35, %v19461_v27  ;;  %v2605_v58 = vsel %vm1222_vm8, %v19464_v31, %v19463_v55  ;;  %v5635_v22 = vpack.c.b16 %v5629_v47, %v5628_v54  ;;  %v2626_v44 = vrot.slane %v2589_v33, 4  ;;  %v19471_v55 = vld [vmem:[#allocation16_spill] sm:$0xff] }
 0x48c   : > { %v2601_v61 = vperm.slane %v2593_v5, %v12049_v21  ;;  %v2681_v4 = vsel %vm1222_vm8, %v15018_v32, %v19465_v40  ;;  %v2613_v35 = vperm.slane %v2605_v58, %v12049_v21  ;;  %v5558_v41 = vpack.c.b16 %v5552_v53, %v5551_v2  ;;  %v19468_v32 = vld [vmem:[#allocation38_spill] sm:$0xff] }
 0x48d   : > { %v2689_v39 = vperm.slane %v2681_v4, %v12049_v21  ;;  %v2693_v59 = vsel %vm1222_vm8, %v19373_v63, %v19466_v23  ;;  %v2705_v10 = vsel %vm1222_vm8, %v14601_v17, %v19467_v29  ;;  %v19469_v37 = vrot.slane %v19468_v32, 4  ;;  %10462 = vmatmul.msk.bf16.gmra.mxu0 %vm5108_vm9, %v5635_v22 }
 0x48e   : > { %v2627_v38 = vsel %vm1222_vm8, %v2626_v44, %v2577_v1  ;;  %v2650_v13 = vrot.slane %v2613_v35, 4  ;;  %v2701_v34 = vperm.slane %v2693_v59, %v12049_v21  ;;  %v2713_v42 = vperm.slane %v2705_v10, %v12049_v21  ;;  %10458 = vmatmul.msk.bf16.gmra.mxu2 %vm5108_vm9, %v5558_v41 }
 0x48f   : > { %v2717_v48 = vsel %vm1222_vm8, %v19470_v9, %v19469_v37  ;;  %v2633_v63 = vperm.slane %v2627_v38, %v12080_v28  ;;  %v2628_v60 = vrot.slane %v2577_v1, 4  ;;  %v2652_v45 = vrot.slane %v2601_v61, 4 }
 0x490   : > { %v2725_v17 = vperm.slane %v2717_v48, %v12049_v21  ;;  %v2651_v51 = vsel %vm1222_vm8, %v2650_v13, %v2601_v61  ;;  %v2738_v16 = vrot.slane %v2701_v34, 4  ;;  %v2740_v50 = vrot.slane %v2689_v39, 4 }
 0x491   : > { %v2764_v25 = vrot.slane %v2713_v42, 4  ;;  %v2657_v57 = vperm.slane %v2651_v51, %v12080_v28  ;;  %v2672_v6 = vrot.slane %v2633_v63, 4  ;;  %v2629_v62 = vsel %vm1222_vm8, %v2589_v33, %v2628_v60 }
 0x492   : > { %v2762_v56 = vrot.slane %v2725_v17, 4  ;;  %v2739_v54 = vsel %vm1222_vm8, %v2738_v16, %v2689_v39  ;;  %v2637_v20 = vperm.slane %v2629_v62, %v12080_v28  ;;  %v2653_v0 = vsel %vm1222_vm8, %v2613_v35, %v2652_v45  ;;  %v5138_v16 = vpop.f32.mrf.mxu1 }
 0x493   : > { %v2741_v1 = vsel %vm1222_vm8, %v2701_v34, %v2740_v50  ;;  %v2670_v2 = vrot.slane %v2657_v57, 4  ;;  %v2745_v49 = vperm.slane %v2739_v54, %v12080_v28  ;;  %v2673_v18 = vsel %vm1222_vm8, %v2657_v57, %v2672_v6  ;;  %v5141_v50 = vpop.f32.mrf.mxu3 }
 0x494   : > { %v2763_v14 = vsel %vm1222_vm8, %v2762_v56, %v2713_v42  ;;  %v5026_v27 = vpack.c.bf16 %v2673_v18, %v2673_v18  ;;  %v2661_v33 = vperm.slane %v2653_v0, %v12080_v28  ;;  %v2749_v5 = vperm.slane %v2741_v1, %v12080_v28 }
 0x495   : > { %v2769_v47 = vperm.slane %v2763_v14, %v12080_v28  ;;  %v2671_v53 = vsel %vm1222_vm8, %v2670_v2, %v2633_v63  ;;  %v2784_v61 = vrot.slane %v2745_v49, 4  ;;  %v2765_v52 = vsel %vm1222_vm8, %v2725_v17, %v2764_v25  ;;  %v5367_v63 = vpop.f32.mrf.mxu0 }
 0x496   : > { %v15545_v31 = vsub.f32 %v5136_v43, %v19471_v55  ;;  %v5018_v40 = vpack.c.bf16 %v2671_v53, %v2671_v53  ;;  %v5476_v4 = vunpack.c.l.b16 %v5026_v27  ;;  %v2674_v22 = vrot.slane %v2661_v33, 4 }
 0x497   : > { %v2782_v58 = vrot.slane %v2769_v47, 4  ;;  %v2785_v35 = vsel %vm1222_vm8, %v2769_v47, %v2784_v61  ;;  %v2773_v44 = vperm.slane %v2765_v52, %v12080_v28  ;;  %v2676_v39 = vrot.slane %v2637_v20, 4  ;;  %v15587_v61 = vpop.f32.mrf.mxu2 }
 0x498   : > { %v2788_v41 = vrot.slane %v2749_v5, 4  ;;  %v5399_v59 = vunpack.c.l.b16 %v5018_v40  ;;  %v5027_v29 = vpack.c.bf16 %v2785_v35, %v2785_v35  ;;  %v2675_v10 = vsel %vm1222_vm8, %v2674_v22, %v2637_v20 }
 0x499   : > { %v2783_v23 = vsel %vm1222_vm8, %v2782_v58, %v2745_v49  ;;  %v2786_v37 = vrot.slane %v2773_v44, 4  ;;  %v5034_v9 = vpack.c.bf16 %v2675_v10, %v2675_v10  ;;  %v2677_v48 = vsel %vm1222_vm8, %v2661_v33, %v2676_v39  ;;  %v19477_v58 = vld [vmem:[#allocation91_spill] sm:$0xff] }
 0x49a   : > { %v5019_v32 = vpack.c.bf16 %v2783_v23, %v2783_v23  ;;  %v2916_v38 = vrot.slane %v15119_v24, 4  ;;  %v5477_v13 = vunpack.c.l.b16 %v5027_v29  ;;  %v2789_v34 = vsel %vm1222_vm8, %v2773_v44, %v2788_v41 }
 0x49b   : > { %v5042_v42 = vpack.c.bf16 %v2677_v48, %v2677_v48  ;;  %v2787_v60 = vsel %vm1222_vm8, %v2786_v37, %v2749_v5  ;;  %v5553_v45 = vunpack.c.l.b16 %v5034_v9  ;;  %v5043_v51 = vpack.c.bf16 %v2789_v34, %v2789_v34 }
 0x49c   : > { %v5400_v17 = vunpack.c.l.b16 %v5019_v32  ;;  %v5482_v25 = vpack.c.b16 %v5477_v13, %v5476_v4  ;;  %v5035_v57 = vpack.c.bf16 %v2787_v60, %v2787_v60  ;;  %v5765_v6 = vsel %vm596_vm0, %v15545_v31, -inf }
 0x49d   : > { %v5630_v56 = vunpack.c.l.b16 %v5042_v42  ;;  %v2928_v24 = vrot.slane %v15130_v30, 4  ;;  %v5631_v43 = vunpack.c.l.b16 %v5043_v51  ;;  %v15559_v54 = vsub.f32 %v5367_v63, %v19471_v55  ;;  %5766 = vmax.xlane.f32.xlu0 %v5765_v6  ;;  %v5369_v60 = vpop.f32.mrf.mxu0 }
 0x49e   : > { %v5405_v62 = vpack.c.b16 %v5400_v17, %v5399_v59  ;;  %10455 = vmatmul.msk.bf16.gmra.mxu1 %vm5108_vm9, %v5482_v25  ;;  %v5554_v20 = vunpack.c.l.b16 %v5035_v57  ;;  %v15563_v0 = vsub.f32 %v5138_v16, %v19471_v55  ;;  %v15566_v1 = vsub.f32 %v5141_v50, %v19471_v55 }
 0x49f   : > { %v19472_v2 = vrot.slane %v15106_v46, 4  ;;  %v5636_v49 = vpack.c.b16 %v5631_v43, %v5630_v56  ;;  %v19473_v18 = vrot.slane %v15092_v11, 4  ;;  %v19474_v27 = vrot.slane %v15099_v12, 4  ;;  %v19476_v12 = vld [vmem:[#allocation86_spill] sm:$0xff] }
 0x4a0   : > { %10451 = vmatmul.msk.bf16.gmra.mxu3 %vm5108_vm9, %v5405_v62  ;;  %v5559_v5 = vpack.c.b16 %v5554_v20, %v5553_v45  ;;  %v2837_v53 = vperm.slane %v15011_v7, %v12049_v21  ;;  %v19475_v11 = vrot.slane %v15112_v19, 4  ;;  %v2929_v52 = vsel %vm1222_vm8, %v19476_v12, %v2928_v24 }
 0x4a1   : > { %v2793_v30 = vsel %vm1222_vm8, %v14969_v15, %v19472_v2  ;;  %v2805_v47 = vsel %vm1222_vm8, %v14947_v8, %v19473_v18  ;;  %v2817_v33 = vsel %vm1222_vm8, %v14965_v26, %v19474_v27  ;;  %10463 = vmatmul.msk.bf16.gmra.mxu0 %vm5108_vm9, %v5636_v49  ;;  %v2917_v26 = vsel %vm1222_vm8, %v14974_v3, %v2916_v38  ;;  %v5213_v2 = vpop.f32.mrf.mxu1 }
 0x4a2   : > { %v2801_v14 = vperm.slane %v2793_v30, %v12049_v21  ;;  %v2813_v46 = vperm.slane %v2805_v47, %v12049_v21  ;;  %v2825_v15 = vperm.slane %v2817_v33, %v12049_v21  ;;  %v2905_v8 = vsel %vm1222_vm8, %v14985_v36, %v19475_v11  ;;  %10459 = vmatmul.msk.bf16.gmra.mxu2 %vm5108_vm9, %v5559_v5  ;;  %v5292_v47 = vpop.f32.mrf.mxu2 }
 0x4a3   : > { %v2949_v40 = vperm.slane %v19477_v58, %v12049_v21  ;;  %v2874_v4 = vrot.slane %v2837_v53, 4  ;;  %v2913_v22 = vperm.slane %v2905_v8, %v12049_v21  ;;  %v2925_v19 = vperm.slane %v2917_v26, %v12049_v21 }
 0x4a4   : > { %v2850_v7 = vrot.slane %v2813_v46, 4  ;;  %v2937_v35 = vperm.slane %v2929_v52, %v12049_v21  ;;  %v5837_v3 = vsel %vm596_vm0, %v15559_v54, -inf  ;;  %v5768_v44 = vsel %vm596_vm0, %v15563_v0, -inf }
 0x4a5   : > { %v2986_v36 = vrot.slane %v2949_v40, 4  ;;  %v2875_v41 = vsel %vm1222_vm8, %v2874_v4, %v2825_v15  ;;  %v2962_v23 = vrot.slane %v2925_v19, 4  ;;  %5769 = vmax.xlane.f32.xlu2 %v5768_v44  ;;  %v2852_v59 = vrot.slane %v2801_v14, 4  ;;  %5838 = vmax.xlane.f32.xlu0 %v5837_v3 }
 0x4a6   : > { %v2851_v39 = vsel %vm1222_vm8, %v2850_v7, %v2801_v14  ;;  %v2881_v10 = vperm.slane %v2875_v41, %v12080_v28  ;;  %v2876_v37 = vrot.slane %v2825_v15, 4  ;;  %v2964_v13 = vrot.slane %v2913_v22, 4  ;;  %v5143_v7 = vpop.f32.mrf.mxu3 }
 0x4a7   : > { %v2857_v29 = vperm.slane %v2851_v39, %v12080_v28  ;;  %v2987_v32 = vsel %vm1222_vm8, %v2986_v36, %v2937_v35  ;;  %v2963_v9 = vsel %vm1222_vm8, %v2962_v23, %v2913_v22  ;;  %v2853_v38 = vsel %vm1222_vm8, %v2813_v46, %v2852_v59 }
 0x4a8   : > { %v2993_v48 = vperm.slane %v2987_v32, %v12080_v28  ;;  %v2894_v34 = vrot.slane %v2881_v10, 4  ;;  %v2969_v42 = vperm.slane %v2963_v9, %v12080_v28  ;;  %v2861_v17 = vperm.slane %v2853_v38, %v12080_v28 }
 0x4a9   : > { %v2896_v63 = vrot.slane %v2857_v29, 4  ;;  %v2877_v51 = vsel %vm1222_vm8, %v2837_v53, %v2876_v37  ;;  %v2965_v16 = vsel %vm1222_vm8, %v2925_v19, %v2964_v13  ;;  %v2988_v50 = vrot.slane %v2937_v35, 4  ;;  %v5215_v38 = vpop.f32.mrf.mxu1 }
 0x4aa   : > { %v3006_v45 = vrot.slane %v2993_v48, 4  ;;  %v2895_v25 = vsel %vm1222_vm8, %v2894_v34, %v2857_v29  ;;  %v3008_v56 = vrot.slane %v2969_v42, 4  ;;  %v2885_v6 = vperm.slane %v2877_v51, %v12080_v28  ;;  %v5372_v29 = vpop.f32.mrf.mxu0 }
 0x4ab   : > { %v2897_v57 = vsel %vm1222_vm8, %v2881_v10, %v2896_v63  ;;  %v5020_v62 = vpack.c.bf16 %v2895_v25, %v2895_v25  ;;  %v2973_v20 = vperm.slane %v2965_v16, %v12080_v28  ;;  %v2989_v18 = vsel %vm1222_vm8, %v2949_v40, %v2988_v50 }
 0x4ac   : > { %v3007_v24 = vsel %vm1222_vm8, %v3006_v45, %v2969_v42  ;;  %v5028_v43 = vpack.c.bf16 %v2897_v57, %v2897_v57  ;;  %v3009_v49 = vsel %vm1222_vm8, %v2993_v48, %v3008_v56  ;;  %v2898_v14 = vrot.slane %v2885_v6, 4  ;;  %v5295_v42 = vpop.f32.mrf.mxu2 }
 0x4ad   : > { %v5021_v30 = vpack.c.bf16 %v3007_v24, %v3007_v24  ;;  %v5401_v27 = vunpack.c.l.b16 %v5020_v62  ;;  %v5029_v33 = vpack.c.bf16 %v3009_v49, %v3009_v49  ;;  %v2997_v46 = vperm.slane %v2989_v18, %v12080_v28 }
 0x4ae   : > { %v5478_v5 = vunpack.c.l.b16 %v5028_v43  ;;  %v15628_v15 = vsub.f32 %v5369_v60, %v19471_v55  ;;  %v2899_v11 = vsel %vm1222_vm8, %v2898_v14, %v2861_v17  ;;  %v2900_v8 = vrot.slane %v2861_v17, 4  ;;  %v5146_v60 = vpop.f32.mrf.mxu3 }
 0x4af   : > { %v5402_v53 = vunpack.c.l.b16 %v5021_v30  ;;  %v5479_v26 = vunpack.c.l.b16 %v5029_v33  ;;  %v3010_v12 = vrot.slane %v2997_v46, 4  ;;  %v5036_v52 = vpack.c.bf16 %v2899_v11, %v2899_v11 }
 0x4b0   : > { %v3012_v58 = vrot.slane %v2973_v20, 4  ;;  %v2901_v40 = vsel %vm1222_vm8, %v2885_v6, %v2900_v8  ;;  %v5771_v22 = vsel %vm596_vm0, %v15566_v1, -inf  ;;  %v15638_v23 = vsub.f32 %v5143_v7, %v19471_v55 }
 0x4b1   : > { %v5406_v4 = vpack.c.b16 %v5402_v53, %v5401_v27  ;;  %v5483_v19 = vpack.c.b16 %v5479_v26, %v5478_v5  ;;  %v3011_v35 = vsel %vm1222_vm8, %v3010_v12, %v2973_v20  ;;  %v5555_v36 = vunpack.c.l.b16 %v5036_v52  ;;  %5772 = vmax.xlane.f32.xlu1 %v5771_v22  ;;  %v5218_v57 = vpop.f32.mrf.mxu1 }
 0x4b2   : > { %v3013_v3 = vsel %vm1222_vm8, %v2997_v46, %v3012_v58  ;;  %v5037_v44 = vpack.c.bf16 %v3011_v35, %v3011_v35  ;;  %v5044_v39 = vpack.c.bf16 %v2901_v40, %v2901_v40  ;;  %v15642_v59 = vsub.f32 %v15587_v61, %v19471_v55  ;;  %v5374_v50 = vpop.f32.mrf.mxu0 }
 0x4b3   : > { %10452 = vmatmul.msk.bf16.gmra.mxu3 %vm5108_vm9, %v5406_v4  ;;  %v5045_v41 = vpack.c.bf16 %v3013_v3, %v3013_v3  ;;  %10456 = vmatmul.msk.bf16.gmra.mxu1 %vm5108_vm9, %v5483_v19  ;;  %v5840_v10 = vsel %vm596_vm0, %v15628_v15, -inf  ;;  %v5774_v48 = vsel %vm596_vm0, %v15638_v23, -inf  ;;  %v15650_v61 = vsub.f32 %v5213_v2, %v19471_v55 }
 0x4b4   : > { %v5556_v32 = vunpack.c.l.b16 %v5037_v44  ;;  %v5632_v37 = vunpack.c.l.b16 %v5044_v39  ;;  %5841 = vmax.xlane.f32.xlu2 %v5840_v10  ;;  %5775 = vmax.xlane.f32.xlu0 %v5774_v48  ;;  %v15654_v63 = vsub.f32 %v5292_v47, %v19471_v55  ;;  %v5813_v17 = vsel %vm596_vm0, %v15642_v59, -inf  ;;  %v5297_v6 = vpop.f32.mrf.mxu2 }
 0x4b5   : > { %v5633_v9 = vunpack.c.l.b16 %v5045_v41  ;;  %v5789_v45 = vsel %vm596_vm0, %v15650_v61, -inf  ;;  %v15662_v51 = vsub.f32 %v5372_v29, %v19471_v55  ;;  %v15667_v25 = vsub.f32 %v5295_v42, %v19471_v55 }
 0x4b6   : > { %v5560_v13 = vpack.c.b16 %v5556_v32, %v5555_v36  ;;  %v5816_v16 = vsel %vm596_vm0, %v15654_v63, -inf  ;;  %v15670_v56 = vsub.f32 %v5374_v50, %v19471_v55  ;;  %v15675_v62 = vsub.f32 %v5146_v60, %v19471_v55  ;;  %v5148_v43 = vpop.f32.mrf.mxu3 }
 0x4b7   : > { %v5637_v34 = vpack.c.b16 %v5633_v9, %v5632_v37  ;;  %v5843_v24 = vsel %vm596_vm0, %v15662_v51, -inf  ;;  %v5819_v20 = vsel %vm596_vm0, %v15667_v25, -inf  ;;  %v15682_v30 = vsub.f32 %v5148_v43, %v19471_v55 }
 0x4b8   : > { %10460 = vmatmul.msk.bf16.gmra.mxu2 %vm5108_vm9, %v5560_v13  ;;  %v5846_v2 = vsel %vm596_vm0, %v15670_v56, -inf  ;;  %v5777_v49 = vsel %vm596_vm0, %v15675_v62, -inf  ;;  %v15687_v14 = vsub.f32 %v5218_v57, %v19471_v55  ;;  %v15692_v46 = vsub.f32 %v5215_v38, %v19471_v55 }
 0x4b9   : > { %10464 = vmatmul.msk.bf16.gmra.mxu0 %vm5108_vm9, %v5637_v34  ;;  %5814 = vmax.xlane.f32.xlu1 %v5813_v17  ;;  %v5220_v47 = vpop.f32.mrf.mxu1  ;;  %v5780_v27 = vsel %vm596_vm0, %v15682_v30, -inf  ;;  %v15709_v4 = vsub.f32 %v5297_v6, %v19471_v55 }
 0x4ba   : > { %v5377_v5 = vpop.f32.mrf.mxu0  ;;  %v5795_v53 = vsel %vm596_vm0, %v15687_v14, -inf  ;;  %v5792_v26 = vsel %vm596_vm0, %v15692_v46, -inf  ;;  %v15712_v22 = vsub.f32 %v5220_v47, %v19471_v55 }
 0x4bb   : > { %v5822_v35 = vsel %vm596_vm0, %v15709_v4, -inf  ;;  %v15722_v39 = vsub.f32 %v5377_v5, %v19471_v55 }
 0x4bc   : > { %5790 = vmax.xlane.f32.xlu2 %v5789_v45  ;;  %5817 = vmax.xlane.f32.xlu0 %v5816_v16  ;;  %v5300_v18 = vpop.f32.mrf.mxu2  ;;  %v5798_v44 = vsel %vm596_vm0, %v15712_v22, -inf }
 0x4bd   : > { %v15700_v8 = vsub.f32 %v5300_v18, %v19471_v55  ;;  %v5849_v37 = vsel %vm596_vm0, %v15722_v39, -inf }
 0x4bf   : > { %v5151_v33 = vpop.f32.mrf.mxu3  ;;  %v5825_v58 = vsel %vm596_vm0, %v15700_v8, -inf }
 0x4c0   : > { %v15697_v11 = vsub.f32 %v5151_v33, %v19471_v55 }
 0x4c1   : > { %5844 = vmax.xlane.f32.xlu1 %v5843_v24  ;;  %v5223_v12 = vpop.f32.mrf.mxu1 }
 0x4c2   : > { %v5783_v52 = vsel %vm596_vm0, %v15697_v11, -inf  ;;  %v5379_v40 = vpop.f32.mrf.mxu0  ;;  %v15730_v32 = vsub.f32 %v5223_v12, %v19471_v55 }
 0x4c3   : > { %v15715_v19 = vsub.f32 %v5379_v40, %v19471_v55 }
 0x4c4   : > { %5820 = vmax.xlane.f32.xlu2 %v5819_v20  ;;  %5847 = vmax.xlane.f32.xlu0 %v5846_v2  ;;  %v5302_v7 = vpop.f32.mrf.mxu2  ;;  %v5801_v13 = vsel %vm596_vm0, %v15730_v32, -inf }
 0x4c5   : > { %v5852_v41 = vsel %vm596_vm0, %v15715_v19, -inf  ;;  %v15752_v57 = vsub.f32 %v5302_v7, %v19471_v55 }
 0x4c7   : > { %v5153_v10 = vpop.f32.mrf.mxu3 }
 0x4c8   : > { %v15739_v34 = vsub.f32 %v5153_v10, %v19471_v55 }
 0x4c9   : > { %5778 = vmax.xlane.f32.xlu1 %v5777_v49  ;;  %v5225_v3 = vpop.f32.mrf.mxu1  ;;  %v5828_v49 = vsel %vm596_vm0, %v15752_v57, -inf }
 0x4ca   : > { %v15727_v29 = vsub.f32 %v5225_v3, %v19471_v55  ;;  %v5382_v48 = vpop.f32.mrf.mxu0  ;;  %v5786_v45 = vsel %vm596_vm0, %v15739_v34, -inf }
 0x4cb   : > { %v15765_v47 = vsub.f32 %v5382_v48, %v19471_v55 }
 0x4cc   : > { %5781 = vmax.xlane.f32.xlu2 %v5780_v27  ;;  %5796 = vmax.xlane.f32.xlu0 %v5795_v53  ;;  %v5305_v36 = vpop.f32.mrf.mxu2  ;;  %v5804_v38 = vsel %vm596_vm0, %v15727_v29, -inf }
 0x4cd   : > { %v15745_v60 = vsub.f32 %v5305_v36, %v19471_v55 }
 0x4cf   : > { %v5831_v6 = vsel %vm596_vm0, %v15745_v60, -inf }
 0x4d1   : > { %5793 = vmax.xlane.f32.xlu1 %v5792_v26  ;;  %v5228_v9 = vpop.f32.mrf.mxu1  ;;  %v5444_v16 = vpop.f32.mrf.mxu3 }
 0x4d2   : > { %v5384_v43 = vpop.f32.mrf.mxu0  ;;  %v15782_v7 = vsub.f32 %v5444_v16, %v19471_v55  ;;  %v15787_v36 = vsub.f32 %v5228_v9, %v19471_v55 }
 0x4d3   : > { %v15760_v2 = vsub.f32 %v5384_v43, %v19471_v55 }
 0x4d4   : > { %5784 = vmax.xlane.f32.xlu2 %v5783_v52  ;;  %5826 = vmax.xlane.f32.xlu0 %v5825_v58  ;;  %v5307_v42 = vpop.f32.mrf.mxu2  ;;  %v5855_v52 = vsel %vm596_vm0, %v15765_v47, -inf  ;;  %19478 = vst [vmem:[#allocation88_spill] sm:$0xff] %v15787_v36  ;;  %v5861_v3 = vsel %vm596_vm0, %v15782_v7, -inf }
 0x4d5   : > { %v15742_v17 = vsub.f32 %v5307_v42, %v19471_v55  ;;  %v5858_v27 = vsel %vm596_vm0, %v15760_v2, -inf }
 0x4d7   : > { %v5834_v50 = vsel %vm596_vm0, %v15742_v17, -inf }
 0x4d9   : > { %5823 = vmax.xlane.f32.xlu1 %v5822_v35  ;;  %v5230_v24 = vpop.f32.mrf.mxu1  ;;  %v5446_v18 = vpop.f32.mrf.mxu3 }
 0x4da   : > { %v15757_v20 = vsub.f32 %v5230_v24, %v19471_v55  ;;  %v15772_v53 = vsub.f32 %v5446_v18, %v19471_v55 }
 0x4dc   : > { %5799 = vmax.xlane.f32.xlu2 %v5798_v44  ;;  %5853 = vmax.xlane.f32.xlu0 %v5852_v41  ;;  %v5810_v33 = vsel %vm596_vm0, %v15757_v20, -inf  ;;  %v5864_v58 = vsel %vm596_vm0, %v15772_v53, -inf }
 0x4df   : > { %v5598_v5 = vpop.f32.mrf.mxu2  ;;  %v5675_v26 = vpop.f32.mrf.mxu0 }
 0x4e0   : > { %v15775_v12 = vsub.f32 %v5598_v5, %v19471_v55 }
 0x4e1   : > { %5850 = vmax.xlane.f32.xlu1 %v5849_v37  ;;  %v5521_v35 = vpop.f32.mrf.mxu1  ;;  %v5807_v37 = vsel %vm596_vm0, %v15787_v36, -inf }
 0x4e2   : > { %v5909_v40 = vsel %vm596_vm0, %v15775_v12, -inf }
 0x4e4   : > { %5805 = vmax.xlane.f32.xlu2 %v5804_v38  ;;  %5802 = vmax.xlane.f32.xlu0 %v5801_v13  ;;  %v15800_v38 = vsub.f32 %v5675_v26, %v19471_v55 }
 0x4e6   : > { %19481 = vst [vmem:[#allocation92_spill] sm:$0xff] %v15800_v38  ;;  %v5933_v16 = vsel %vm596_vm0, %v15800_v38, -inf }
 0x4e7   : > { %v5600_v44 = vpop.f32.mrf.mxu2  ;;  %v5677_v41 = vpop.f32.mrf.mxu0 }
 0x4e8   : > { %v15792_v10 = vsub.f32 %v5600_v44, %v19471_v55  ;;  %v15797_v48 = vsub.f32 %v5677_v41, %v19471_v55 }
 0x4e9   : > { %5787 = vmax.xlane.f32.xlu1 %v5786_v45  ;;  %v5523_v13 = vpop.f32.mrf.mxu1 }
 0x4ea   : > { %19479 = vst [vmem:[#allocation97_spill] sm:$0xff] %v15792_v10  ;;  %v5912_v9 = vsel %vm596_vm0, %v15792_v10, -inf  ;;  %v5936_v42 = vsel %vm596_vm0, %v15797_v48, -inf  ;;  %v15807_v45 = vsub.f32 %v5523_v13, %v19471_v55 }
 0x4eb   : > { %19480 = vst [vmem:[#allocation90_spill] sm:$0xff] %v15797_v48 }
 0x4ec   : > { %5835 = vmax.xlane.f32.xlu2 %v5834_v50  ;;  %5832 = vmax.xlane.f32.xlu0 %v5831_v6  ;;  %19482 = vst [vmem:[#allocation96_spill] sm:$0xff] %v15807_v45  ;;  %v5888_v24 = vsel %vm596_vm0, %v15807_v45, -inf }
 0x4f1   : > { %5829 = vmax.xlane.f32.xlu1 %v5828_v49 }
 0x4f4   : > { %5859 = vmax.xlane.f32.xlu0 %v5858_v27  ;;  %5811 = vmax.xlane.f32.xlu2 %v5810_v33 }
 0x4f9   : > { %5856 = vmax.xlane.f32.xlu1 %v5855_v52 }
 0x4fc   : > { %5865 = vmax.xlane.f32.xlu0 %v5864_v58  ;;  %5910 = vmax.xlane.f32.xlu2 %v5909_v40 }
 0x501   : > { %5862 = vmax.xlane.f32.xlu1 %v5861_v3 }
 0x504   : > { %5808 = vmax.xlane.f32.xlu0 %v5807_v37  ;;  %5937 = vmax.xlane.f32.xlu2 %v5936_v42  ;;  %v15841_v42 = vsub.f32 %v5521_v35, %v19471_v55 }
 0x506   : > { %19487 = vst [vmem:[#allocation26_spill] sm:$0xff] %v15841_v42 }
 0x507   : > { %v5526_v33 = vpop.f32.mrf.mxu1 }
 0x509   : > { %5913 = vmax.xlane.f32.xlu1 %v5912_v9 }
 0x50a   : > { %v5680_v50 = vpop.f32.mrf.mxu0 }
 0x50c   : > { %5934 = vmax.xlane.f32.xlu0 %v5933_v16 }
 0x50d   : > { %v5449_v6 = vpop.f32.mrf.mxu3 }
 0x50e   : > { %v15814_v43 = vsub.f32 %v5449_v6, %v19471_v55 }
 0x50f   : > { %v5528_v16 = vpop.f32.mrf.mxu1 }
 0x510   : > { %v5867_v27 = vsel %vm596_vm0, %v15814_v43, -inf  ;;  %v15821_v5 = vpop.xlane.xlu0 %5766 }
 0x511   : > { %5889 = vmax.xlane.f32.xlu1 %v5888_v24  ;;  %v5603_v49 = vpop.f32.mrf.mxu2 }
 0x512   : > { %v15817_v18 = vsub.f32 %v5603_v49, %v19471_v55  ;;  %v5682_v58 = vpop.f32.mrf.mxu0  ;;  %v15848_v49 = vsub.f32 %v5528_v16, %v19471_v55 }
 0x513   : > { %v15831_v41 = vsub.f32 %v5682_v58, %v19471_v55 }
 0x514   : > { %19483 = vst [vmem:[#allocation94_spill] sm:$0xff] %v15817_v18  ;;  %5868 = vmax.xlane.f32.xlu0 %v5867_v27  ;;  %v5915_v52 = vsel %vm596_vm0, %v15817_v18, -inf  ;;  %v5894_v58 = vsel %vm596_vm0, %v15848_v49, -inf }
 0x515   : > { %v5451_v26 = vpop.f32.mrf.mxu3  ;;  %19485 = vst [vmem:[#allocation103_spill] sm:$0xff] %v15831_v41  ;;  %v5942_v24 = vsel %vm596_vm0, %v15831_v41, -inf }
 0x516   : > { %v15826_v40 = vsub.f32 %v5451_v26, %v19471_v55  ;;  %19488 = vst [vmem:[#allocation43_spill] sm:$0xff] %v15848_v49  ;;  %v5885_v26 = vsel %vm596_vm0, %v15841_v42, -inf }
 0x518   : > { %19484 = vst [vmem:[#allocation102_spill] sm:$0xff] %v15826_v40  ;;  %v5870_v44 = vsel %vm596_vm0, %v15826_v40, -inf  ;;  %v15836_v9 = vpop.xlane.xlu2 %5769  ;;  %v15843_v6 = vpop.xlane.xlu0 %5838 }
 0x519   : > { %5916 = vmax.xlane.f32.xlu1 %v5915_v52  ;;  %v5605_v3 = vpop.f32.mrf.mxu2  ;;  %5871 = vmax.xlane.f32.xlu2 %v5870_v44 }
 0x51a   : > { %v15834_v37 = vsub.f32 %v5605_v3, %v19471_v55  ;;  %v15857_v3 = vsub.f32 %v5680_v50, %v19471_v55 }
 0x51c   : > { %19486 = vst [vmem:[#allocation19_spill] sm:$0xff] %v15834_v37  ;;  %v5918_v13 = vsel %vm596_vm0, %v15834_v37, -inf }
 0x51d   : > { %5919 = vmax.xlane.f32.xlu0 %v5918_v13  ;;  %19489 = vst [vmem:[#allocation45_spill] sm:$0xff] %v15857_v3 }
 0x51e   : > { %v5685_v35 = vpop.f32.mrf.mxu0 }
 0x521   : > { %5943 = vmax.xlane.f32.xlu1 %v5942_v24  ;;  %5886 = vmax.xlane.f32.xlu2 %v5885_v26  ;;  %v5939_v26 = vsel %vm596_vm0, %v15857_v3, -inf }
 0x523   : > { %v5454_v27 = vpop.f32.mrf.mxu3 }
 0x524   : > { %v15852_v52 = vpop.xlane.xlu1 %5772  ;;  %v15878_v18 = vsub.f32 %v5454_v27, %v19471_v55 }
 0x525   : > { %v5608_v44 = vpop.f32.mrf.mxu2  ;;  %5895 = vmax.xlane.f32.xlu0 %v5894_v58 }
 0x526   : > { %v15864_v24 = vsub.f32 %v5608_v44, %v19471_v55  ;;  %19492 = vst [vmem:[#allocation25_spill] sm:$0xff] %v15878_v18  ;;  %v5687_v44 = vpop.f32.mrf.mxu0 }
 0x527   : > { %v15859_v13 = vpop.xlane.xlu2 %5841  ;;  %v15861_v16 = vpop.xlane.xlu0 %5775  ;;  %v15888_v40 = vsub.f32 %v5687_v44, %v19471_v55 }
 0x528   : > { %19490 = vst [vmem:[#allocation20_spill] sm:$0xff] %v15864_v24  ;;  %v5921_v50 = vsel %vm596_vm0, %v15864_v24, -inf  ;;  %v5873_v24 = vsel %vm596_vm0, %v15878_v18, -inf  ;;  %v15906_v18 = vsub.f32 %v5685_v35, %v19471_v55 }
 0x529   : > { %5940 = vmax.xlane.f32.xlu2 %v5939_v26  ;;  %v5531_v26 = vpop.f32.mrf.mxu1  ;;  %19494 = vst [vmem:[#allocation83_spill] sm:$0xff] %v15888_v40 }
 0x52a   : > { %19496 = vst [vmem:[#allocation48_spill] sm:$0xff] %v15906_v18 }
 0x52b   : > { %v5456_v28 = vpop.f32.mrf.mxu3 }
 0x52c   : > { %v15869_v21 = vsub.f32 %v5456_v28, %v19471_v55  ;;  %v15871_v49 = vpop.xlane.xlu1 %5814  ;;  %v15885_v28 = vsub.f32 %v5526_v33, %v19471_v55 }
 0x52d   : > { %5922 = vmax.xlane.f32.xlu0 %v5921_v50  ;;  %v5948_v50 = vsel %vm596_vm0, %v15888_v40, -inf }
 0x52e   : > { %19491 = vst [vmem:[#allocation29_spill] sm:$0xff] %v15869_v21  ;;  %v5876_v58 = vsel %vm596_vm0, %v15869_v21, -inf  ;;  %v5610_v21 = vpop.f32.mrf.mxu2 }
 0x52f   : > { %v15880_v41 = vpop.xlane.xlu2 %5790  ;;  %5877 = vmax.xlane.f32.xlu1 %v5876_v58  ;;  %v15882_v37 = vpop.xlane.xlu0 %5817  ;;  %19493 = vst [vmem:[#allocation107_spill] sm:$0xff] %v15885_v28  ;;  %v5891_v58 = vsel %vm596_vm0, %v15885_v28, -inf  ;;  %v15899_v33 = vsub.f32 %v5610_v21, %v19471_v55  ;;  %v5957_v21 = vsub.f32 %v15545_v31, %v15821_v5 }
 0x531   : > { %5874 = vmax.xlane.f32.xlu2 %v5873_v24  ;;  %19495 = vst [vmem:[#allocation82_spill] sm:$0xff] %v15899_v33  ;;  %v5924_v24 = vsel %vm596_vm0, %v15899_v33, -inf  ;;  %v5533_v38 = vpop.f32.mrf.mxu1  ;;  %v6021_v33 = vmul.f32 1.442695, %v5957_v21 }
 0x532   : > { %v15920_v35 = vsub.f32 %v5533_v38, %v19471_v55  ;;  %v15934_v38 = vsub.f32 %v5531_v26, %v19471_v55 }
 0x533   : > { %11134 = vpow2.f32 %v6021_v33 }
 0x534   : > { %v15892_v27 = vpop.xlane.xlu1 %5844  ;;  %19498 = vst [vmem:[#allocation49_spill] sm:$0xff] %v15920_v35  ;;  %v5897_v26 = vsel %vm596_vm0, %v15934_v38, -inf }
 0x535   : > { %5949 = vmax.xlane.f32.xlu0 %v5948_v50  ;;  %19500 = vst [vmem:[#allocation71_spill] sm:$0xff] %v15934_v38 }
 0x536   : > { %v5459_v45 = vpop.f32.mrf.mxu3  ;;  %v5690_v31 = vpop.f32.mrf.mxu0 }
 0x537   : > { %5892 = vmax.xlane.f32.xlu1 %v5891_v58  ;;  %v15901_v44 = vpop.xlane.xlu0 %5847  ;;  %v15903_v42 = vpop.xlane.xlu2 %5820  ;;  %v5945_v58 = vsel %vm596_vm0, %v15906_v18, -inf  ;;  %v15929_v5 = vsub.f32 %v5459_v45, %v19471_v55 }
 0x539   : > { %5925 = vmax.xlane.f32.xlu2 %v5924_v24  ;;  %19499 = vst [vmem:[#allocation69_spill] sm:$0xff] %v15929_v5  ;;  %v5879_v21 = vsel %vm596_vm0, %v15929_v5, -inf }
 0x53c   : > { %v15910_v40 = vpop.xlane.xlu1 %5778 }
 0x53e   : > { %v5461_v28 = vpop.f32.mrf.mxu3 }
 0x53f   : > { %v15915_v50 = vsub.f32 %v5461_v28, %v19471_v55  ;;  %5946 = vmax.xlane.f32.xlu1 %v5945_v58  ;;  %v15922_v3 = vpop.xlane.xlu0 %5796  ;;  %v15926_v48 = vpop.xlane.xlu2 %5781  ;;  %v5900_v28 = vsel %vm596_vm0, %v15920_v35, -inf }
 0x540   : > { %v5613_v58 = vpop.f32.mrf.mxu2  ;;  %v15951_v35 = vpop.eup %11134 }
 0x541   : > { %19497 = vst [vmem:[#allocation66_spill] sm:$0xff] %v15915_v50  ;;  %v5882_v24 = vsel %vm596_vm0, %v15915_v50, -inf  ;;  %5901 = vmax.xlane.f32.xlu2 %v5900_v28  ;;  %v15943_v45 = vsub.f32 %v5613_v58, %v19471_v55  ;;  %v6149_v36 = vsel %vm596_vm0, %v15951_v35, 0.0 }
 0x542   : > { %5883 = vmax.xlane.f32.xlu0 %v5882_v24  ;;  %v5981_v24 = vsub.f32 %v15559_v54, %v15843_v6  ;;  %19502 = vst [vmem:[#allocation75_spill] sm:$0xff] %v15951_v35  ;;  %v15956_v54 = vsub.f32 %v5690_v31, %v19471_v55  ;;  %v5692_v6 = vpop.f32.mrf.mxu0 }
 0x543   : > { %19501 = vst [vmem:[#allocation68_spill] sm:$0xff] %v15943_v45  ;;  %v5927_v5 = vsel %vm596_vm0, %v15943_v45, -inf  ;;  %v15963_v38 = vsub.f32 %v5692_v6, %v19471_v55 }
 0x544   : > { %v15936_v18 = vpop.xlane.xlu1 %5793  ;;  %v6069_v33 = vmul.f32 1.442695, %v5981_v24  ;;  %19503 = vst [vmem:[#allocation78_spill] sm:$0xff] %v15956_v54  ;;  %v5951_v31 = vsel %vm596_vm0, %v15956_v54, -inf  ;;  %v5974_v54 = vsub.f32 %v15654_v63, %v15882_v37  ;;  %v5982_v63 = vsub.f32 %v15628_v15, %v15859_v13 }
 0x545   : > { %19504 = vst [vmem:[#allocation85_spill] sm:$0xff] %v15963_v38 }
 0x546   : > { %11136 = vpow2.f32 %v6069_v33  ;;  %v6055_v10 = vmul.f32 1.442695, %v5974_v54  ;;  %v6071_v15 = vmul.f32 1.442695, %v5982_v63  ;;  %v5975_v63 = vsub.f32 %v15667_v25, %v15903_v42 }
 0x547   : > { %5880 = vmax.xlane.f32.xlu1 %v5879_v21  ;;  %v15945_v50 = vpop.xlane.xlu0 %5826  ;;  %v15949_v28 = vpop.xlane.xlu2 %5784  ;;  %v5965_v25 = vsub.f32 %v15650_v61, %v15880_v41 }
 0x548   : > { %v5536_v21 = vpop.f32.mrf.mxu1  ;;  %v5615_v24 = vpop.f32.mrf.mxu2  ;;  %v5977_v61 = vsub.f32 %v15700_v8, %v15945_v50 }
 0x549   : > { %5928 = vmax.xlane.f32.xlu2 %v5927_v5  ;;  %v5973_v5 = vsub.f32 %v15642_v59, %v15871_v49  ;;  %v15972_v35 = vsub.f32 %v5615_v24, %v19471_v55  ;;  %v5958_v49 = vsub.f32 %v15563_v0, %v15836_v9 }
 0x54a   : > { %5898 = vmax.xlane.f32.xlu0 %v5897_v26  ;;  %v5959_v26 = vsub.f32 %v15566_v1, %v15852_v52  ;;  %v5954_v1 = vsel %vm596_vm0, %v15963_v38, -inf  ;;  %v6061_v8 = vmul.f32 1.442695, %v5977_v61 }
 0x54b   : > { %v5930_v59 = vsel %vm596_vm0, %v15972_v35, -inf  ;;  %v6023_v0 = vmul.f32 1.442695, %v5958_v49 }
 0x54c   : > { %v5824_v58 = vpop.xlane.xlu1 %5823  ;;  %v6025_v33 = vmul.f32 1.442695, %v5959_v26  ;;  %v15987_v26 = vsub.f32 %v5536_v21, %v19471_v55 }
 0x54d   : > { %v5976_v13 = vsub.f32 %v15709_v4, %v5824_v58 }
 0x54e   : > { %11138 = vpow2.f32 %v6025_v33  ;;  %v5903_v9 = vsel %vm596_vm0, %v15987_v26, -inf }
 0x54f   : > { %6150 = vadd.xlane.f32.xlu1 %v6149_v36  ;;  %v15965_v45 = vpop.xlane.xlu0 %5853  ;;  %v5800_v52 = vpop.xlane.xlu2 %5799  ;;  %v6059_v49 = vmul.f32 1.442695, %v5976_v13  ;;  %v6057_v13 = vmul.f32 1.442695, %v5975_v63 }
 0x550   : > { %v15978_v36 = vpop.eup %11136  ;;  %v5538_v24 = vpop.f32.mrf.mxu1 }
 0x551   : > { %5955 = vmax.xlane.f32.xlu2 %v5954_v1  ;;  %v6221_v38 = vsel %vm596_vm0, %v15978_v36, 0.0  ;;  %v15996_v37 = vsub.f32 %v5538_v24, %v19471_v55 }
 0x552   : > { %5952 = vmax.xlane.f32.xlu0 %v5951_v31  ;;  %v6053_v31 = vmul.f32 1.442695, %v5973_v5 }
 0x553   : > { %v5906_v55 = vsel %vm596_vm0, %v15996_v37, -inf }
 0x554   : > { %v15976_v6 = vpop.xlane.xlu1 %5850  ;;  %11140 = vpow2.f32 %v6053_v31  ;;  %v16002_v5 = vpop.eup %11138 }
 0x555   : > { %11142 = vpow2.f32 %v6055_v10  ;;  %v6155_v10 = vsel %vm596_vm0, %v16002_v5, 0.0 }
 0x556   : > { %11144 = vpow2.f32 %v6023_v0 }
 0x557   : > { %5931 = vmax.xlane.f32.xlu1 %v5930_v59  ;;  %v15989_v1 = vpop.xlane.xlu0 %5802  ;;  %v16006_v54 = vpop.xlane.xlu2 %5805  ;;  %11146 = vpow2.f32 %v6071_v15 }
 0x559   : > { %5904 = vmax.xlane.f32.xlu2 %v5903_v9 }
 0x55a   : > { %6222 = vadd.xlane.f32.xlu0 %v6221_v38  ;;  %v5966_v38 = vsub.f32 %v15692_v46, %v15936_v18  ;;  %v16011_v33 = vpop.eup %11140  ;;  %v5960_v46 = vsub.f32 %v15638_v23, %v15861_v16  ;;  %v5968_v23 = vsub.f32 %v15712_v22, %v5800_v52 }
 0x55b   : > { %v16019_v18 = vpop.eup %11142  ;;  %v6197_v4 = vsel %vm596_vm0, %v16011_v33, 0.0 }
 0x55c   : > { %v16000_v21 = vpop.xlane.xlu1 %5787  ;;  %v6039_v59 = vmul.f32 1.442695, %v5966_v38  ;;  %v16025_v24 = vpop.eup %11144  ;;  %v6027_v0 = vmul.f32 1.442695, %v5960_v46  ;;  %v6200_v9 = vsel %vm596_vm0, %v16019_v18, 0.0  ;;  %v5984_v46 = vsub.f32 %v15670_v56, %v15901_v44 }
 0x55d   : > { %v16034_v38 = vpop.eup %11146  ;;  %v5983_v56 = vsub.f32 %v15662_v51, %v15892_v27  ;;  %v5986_v51 = vsub.f32 %v15715_v19, %v15965_v45 }
 0x55e   : > { %11148 = vpow2.f32 %v6039_v59  ;;  %v6224_v22 = vsel %vm596_vm0, %v16034_v38, 0.0 }
 0x55f   : > { %5907 = vmax.xlane.f32.xlu1 %v5906_v55  ;;  %v16013_v31 = vpop.xlane.xlu0 %5832  ;;  %11150 = vpow2.f32 %v6059_v49  ;;  %v16032_v16 = vpop.xlane.xlu2 %5835  ;;  %v6152_v55 = vsel %vm596_vm0, %v16025_v24, 0.0  ;;  %v6037_v49 = vmul.f32 1.442695, %v5965_v25  ;;  %v5962_v25 = vsub.f32 %v15682_v30, %v15926_v48 }
 0x560   : > { %11152 = vpow2.f32 %v6027_v0  ;;  %v5961_v30 = vsub.f32 %v15675_v62, %v15910_v40  ;;  %v6079_v61 = vmul.f32 1.442695, %v5986_v51  ;;  %v5964_v40 = vsub.f32 %v15739_v34, %v16000_v21 }
 0x561   : > { %6198 = vadd.xlane.f32.xlu2 %v6197_v4  ;;  %11154 = vpow2.f32 %v6057_v13 }
 0x562   : > { %6156 = vadd.xlane.f32.xlu0 %v6155_v10  ;;  %v6043_v10 = vmul.f32 1.442695, %v5968_v23  ;;  %v6035_v51 = vmul.f32 1.442695, %v5964_v40 }
 0x564   : > { %v16023_v58 = vpop.xlane.xlu1 %5829  ;;  %v16042_v42 = vpop.eup %11148  ;;  %11156 = vpow2.f32 %v6043_v10  ;;  %v6073_v10 = vmul.f32 1.442695, %v5983_v56  ;;  %v5967_v56 = vsub.f32 %v15687_v14, %v15922_v3 }
 0x565   : > { %v16048_v59 = vpop.eup %11150  ;;  %v6176_v4 = vsel %vm596_vm0, %v16042_v42, 0.0  ;;  %11158 = vpow2.f32 %v6037_v49  ;;  %v5978_v14 = vsub.f32 %v15752_v57, %v16023_v58  ;;  %v5969_v58 = vsub.f32 %v15730_v32, %v15989_v1 }
 0x566   : > { %v16056_v41 = vpop.eup %11152  ;;  %v6206_v63 = vsel %vm596_vm0, %v16048_v59, 0.0 }
 0x567   : > { %6201 = vadd.xlane.f32.xlu1 %v6200_v9  ;;  %v16036_v15 = vpop.xlane.xlu0 %5859  ;;  %v6075_v9 = vmul.f32 1.442695, %v5984_v46  ;;  %v16062_v23 = vpop.xlane.xlu2 %5811  ;;  %v6158_v50 = vsel %vm596_vm0, %v16056_v41, 0.0  ;;  %v6045_v40 = vmul.f32 1.442695, %v5969_v58 }
 0x568   : > { %v16066_v44 = vpop.eup %11154 }
 0x569   : > { %6225 = vadd.xlane.f32.xlu2 %v6224_v22  ;;  %11160 = vpow2.f32 %v6075_v9  ;;  %v6203_v22 = vsel %vm596_vm0, %v16066_v44, 0.0 }
 0x56a   : > { %6153 = vadd.xlane.f32.xlu0 %v6152_v55  ;;  %v16072_v13 = vpop.eup %11156  ;;  %11162 = vpow2.f32 %v6061_v8  ;;  %v6029_v8 = vmul.f32 1.442695, %v5961_v30 }
 0x56b   : > { %v16080_v27 = vpop.eup %11158  ;;  %v6182_v46 = vsel %vm596_vm0, %v16072_v13, 0.0  ;;  %11164 = vpow2.f32 %v6073_v10 }
 0x56c   : > { %v16046_v52 = vpop.xlane.xlu1 %5856  ;;  %v6173_v19 = vsel %vm596_vm0, %v16080_v27, 0.0 }
 0x56f   : > { %6177 = vadd.xlane.f32.xlu1 %v6176_v4  ;;  %v16060_v0 = vpop.xlane.xlu0 %5865  ;;  %v6031_v4 = vmul.f32 1.442695, %v5962_v25  ;;  %v16088_v48 = vpop.eup %11160 }
 0x570   : > { %v16092_v45 = vpop.xlane.xlu2 %5910  ;;  %v16096_v9 = vpop.eup %11162  ;;  %v6230_v62 = vsel %vm596_vm0, %v16088_v48, 0.0 }
 0x571   : > { %6159 = vadd.xlane.f32.xlu2 %v6158_v50  ;;  %11166 = vpow2.f32 %v6031_v4  ;;  %v16104_v50 = vpop.eup %11164  ;;  %v6209_v25 = vsel %vm596_vm0, %v16096_v9, 0.0  ;;  %v5985_v4 = vsub.f32 %v15722_v39, %v15976_v6  ;;  %v5970_v39 = vsub.f32 %v15727_v29, %v16006_v54 }
 0x572   : > { %6207 = vadd.xlane.f32.xlu0 %v6206_v63  ;;  %11168 = vpow2.f32 %v6079_v61  ;;  %v6227_v34 = vsel %vm596_vm0, %v16104_v50, 0.0  ;;  %v6063_v61 = vmul.f32 1.442695, %v5978_v14  ;;  %v5987_v29 = vsub.f32 %v15765_v47, %v16046_v52 }
 0x573   : > { %11170 = vpow2.f32 %v6029_v8 }
 0x574   : > { %v16070_v55 = vpop.xlane.xlu1 %5862  ;;  %v6081_v58 = vmul.f32 1.442695, %v5987_v29 }
 0x577   : > { %6204 = vadd.xlane.f32.xlu1 %v6203_v22  ;;  %v16084_v49 = vpop.xlane.xlu0 %5808  ;;  %v6041_v22 = vmul.f32 1.442695, %v5967_v56  ;;  %v16112_v3 = vpop.eup %11166 }
 0x578   : > { %v16122_v30 = vpop.xlane.xlu2 %5937  ;;  %v6164_v57 = vsel %vm596_vm0, %v16112_v3, 0.0 }
 0x579   : > { %6174 = vadd.xlane.f32.xlu2 %v6173_v19  ;;  %11172 = vpow2.f32 %v6041_v22  ;;  %v6047_v22 = vmul.f32 1.442695, %v5970_v39 }
 0x57a   : > { %6183 = vadd.xlane.f32.xlu0 %v6182_v46  ;;  %v16118_v46 = vpop.eup %11168  ;;  %11174 = vpow2.f32 %v6035_v51 }
 0x57b   : > { %v16128_v19 = vpop.eup %11170  ;;  %v6236_v56 = vsel %vm596_vm0, %v16118_v46, 0.0  ;;  %11176 = vpow2.f32 %v6063_v61 }
 0x57c   : > { %v16094_v63 = vpop.xlane.xlu1 %5913  ;;  %v6161_v32 = vsel %vm596_vm0, %v16128_v19, 0.0 }
 0x57f   : > { %6231 = vadd.xlane.f32.xlu1 %v6230_v62  ;;  %v16108_v10 = vpop.xlane.xlu0 %5934  ;;  %v6077_v62 = vmul.f32 1.442695, %v5985_v4  ;;  %v16136_v6 = vpop.eup %11172 }
 0x580   : > { %v16140_v1 = vpop.eup %11174  ;;  %v6179_v14 = vsel %vm596_vm0, %v16136_v6, 0.0 }
 0x581   : > { %6228 = vadd.xlane.f32.xlu2 %v6227_v34  ;;  %11178 = vpow2.f32 %v6077_v62  ;;  %v16152_v34 = vpop.eup %11176  ;;  %v6170_v4 = vsel %vm596_vm0, %v16140_v1, 0.0 }
 0x582   : > { %6210 = vadd.xlane.f32.xlu0 %v6209_v25  ;;  %v5963_v25 = vsub.f32 %v15697_v11, %v15949_v28  ;;  %11180 = vpow2.f32 %v6045_v40  ;;  %v5979_v28 = vsub.f32 %v15745_v60, %v16013_v31  ;;  %v6212_v47 = vsel %vm596_vm0, %v16152_v34, 0.0 }
 0x583   : > { %11182 = vpow2.f32 %v6047_v22  ;;  %v5989_v31 = vsub.f32 %v15782_v7, %v16070_v55 }
 0x584   : > { %v16116_v21 = vpop.xlane.xlu1 %5889  ;;  %v6033_v11 = vmul.f32 1.442695, %v5963_v25  ;;  %v6065_v62 = vmul.f32 1.442695, %v5979_v28 }
 0x585   : > { %v6085_v7 = vmul.f32 1.442695, %v5989_v31 }
 0x586   : > { %11184 = vpow2.f32 %v6033_v11 }
 0x587   : > { %6165 = vadd.xlane.f32.xlu1 %v6164_v57  ;;  %v16132_v8 = vpop.xlane.xlu0 %5868  ;;  %v16160_v57 = vpop.eup %11178  ;;  %11186 = vpow2.f32 %v6081_v58 }
 0x588   : > { %v16164_v52 = vpop.eup %11180  ;;  %v6233_v60 = vsel %vm596_vm0, %v16160_v57, 0.0  ;;  %11188 = vpow2.f32 %v6065_v62 }
 0x589   : > { %6162 = vadd.xlane.f32.xlu2 %v6161_v32  ;;  %v16174_v40 = vpop.eup %11182  ;;  %v6185_v32 = vsel %vm596_vm0, %v16164_v52, 0.0 }
 0x58a   : > { %6237 = vadd.xlane.f32.xlu0 %v6236_v56  ;;  %v5980_v56 = vsub.f32 %v15742_v17, %v16032_v16  ;;  %v5988_v17 = vsub.f32 %v15760_v2, %v16036_v15  ;;  %v6188_v55 = vsel %vm596_vm0, %v16174_v40, 0.0  ;;  %v5991_v2 = vsub.f32 %v15814_v43, %v16132_v8 }
 0x58c   : > { %v16146_v51 = vpop.xlane.xlu1 %5916  ;;  %v16150_v54 = vpop.xlane.xlu2 %5871  ;;  %v6067_v22 = vmul.f32 1.442695, %v5980_v56  ;;  %v6083_v11 = vmul.f32 1.442695, %v5988_v17  ;;  %v6089_v43 = vmul.f32 1.442695, %v5991_v2 }
 0x58e   : > { %11190 = vpow2.f32 %v6067_v22 }
 0x58f   : > { %6180 = vadd.xlane.f32.xlu1 %v6179_v14  ;;  %v16184_v14 = vpop.eup %11184  ;;  %11192 = vpow2.f32 %v6085_v7 }
 0x590   : > { %v16158_v61 = vpop.xlane.xlu0 %5919  ;;  %v16188_v29 = vpop.eup %11186  ;;  %v6167_v28 = vsel %vm596_vm0, %v16184_v14, 0.0  ;;  %11194 = vpow2.f32 %v6083_v11 }
 0x591   : > { %6213 = vadd.xlane.f32.xlu2 %v6212_v47  ;;  %v16196_v58 = vpop.eup %11188  ;;  %v6239_v47 = vsel %vm596_vm0, %v16188_v29, 0.0 }
 0x592   : > { %6171 = vadd.xlane.f32.xlu0 %v6170_v4  ;;  %v5972_v4 = vsub.f32 %v15757_v20, %v16062_v23  ;;  %v5990_v20 = vsub.f32 %v15772_v53, %v16060_v0  ;;  %v6215_v8 = vsel %vm596_vm0, %v16196_v58, 0.0  ;;  %v19505_v0 = vld [vmem:[#allocation97_spill] sm:$0xff] }
 0x593   : > { %v6006_v17 = vsub.f32 %v19505_v0, %v16094_v63 }
 0x594   : > { %v16172_v39 = vpop.xlane.xlu2 %5886  ;;  %v16178_v25 = vpop.xlane.xlu1 %5943  ;;  %v6051_v56 = vmul.f32 1.442695, %v5972_v4  ;;  %v6087_v22 = vmul.f32 1.442695, %v5990_v20 }
 0x596   : > { %11196 = vpow2.f32 %v6051_v56 }
 0x597   : > { %6234 = vadd.xlane.f32.xlu1 %v6233_v60  ;;  %v16206_v60 = vpop.eup %11190  ;;  %11198 = vpow2.f32 %v6089_v43  ;;  %v19509_v43 = vld [vmem:[#allocation90_spill] sm:$0xff] }
 0x598   : > { %v16182_v16 = vpop.xlane.xlu0 %5895  ;;  %v16210_v31 = vpop.eup %11192  ;;  %v6218_v53 = vsel %vm596_vm0, %v16206_v60, 0.0  ;;  %11200 = vpow2.f32 %v6087_v22  ;;  %v19510_v22 = vld [vmem:[#allocation45_spill] sm:$0xff] }
 0x599   : > { %6189 = vadd.xlane.f32.xlu2 %v6188_v55  ;;  %v16220_v55 = vpop.eup %11194  ;;  %v6245_v4 = vsel %vm596_vm0, %v16210_v31, 0.0 }
 0x59a   : > { %6186 = vadd.xlane.f32.xlu0 %v6185_v32  ;;  %v6005_v32 = vsub.f32 %v15775_v12, %v16092_v45  ;;  %v19506_v12 = vld [vmem:[#allocation88_spill] sm:$0xff]  ;;  %v6242_v56 = vsel %vm596_vm0, %v16220_v55, 0.0 }
 0x59b   : > { %v5971_v45 = vsub.f32 %v19506_v12, %v16084_v49 }
 0x59c   : > { %v5941_v15 = vpop.xlane.xlu2 %5940  ;;  %v6117_v11 = vmul.f32 1.442695, %v6005_v32  ;;  %v16230_v63 = vpop.eup %11196 }
 0x59d   : > { %19507 = vst [vmem:[#allocation22_spill] sm:$0xff] %v16230_v63  ;;  %v16234_v20 = vpop.eup %11198  ;;  %v6049_v32 = vmul.f32 1.442695, %v5971_v45  ;;  %v6194_v49 = vsel %vm596_vm0, %v16230_v63, 0.0 }
 0x59e   : > { %19508 = vst [vmem:[#allocation36_spill] sm:$0xff] %v16234_v20  ;;  %11202 = vpow2.f32 %v6117_v11 }
 0x59f   : > { %6168 = vadd.xlane.f32.xlu1 %v6167_v28 }
 0x5a0   : > { %v16202_v23 = vpop.xlane.xlu0 %5922 }
 0x5a1   : > { %6216 = vadd.xlane.f32.xlu2 %v6215_v8  ;;  %v6014_v8 = vsub.f32 %v19509_v43, %v16122_v30  ;;  %v19511_v30 = vld [vmem:[#allocation92_spill] sm:$0xff] }
 0x5a2   : > { %6240 = vadd.xlane.f32.xlu0 %v6239_v47  ;;  %v16204_v62 = vpop.xlane.xlu1 %5877  ;;  %v6119_v47 = vmul.f32 1.442695, %v6006_v17  ;;  %v16243_v17 = vpop.eup %11200  ;;  %v6013_v11 = vsub.f32 %v19511_v30, %v16108_v10 }
 0x5a3   : > { %v6135_v12 = vmul.f32 1.442695, %v6014_v8  ;;  %v19514_v8 = vld [vmem:[#allocation26_spill] sm:$0xff] }
 0x5a4   : > { %v16218_v7 = vpop.xlane.xlu2 %5874  ;;  %11204 = vpow2.f32 %v6119_v47 }
 0x5a5   : > { %11206 = vpow2.f32 %v6049_v32  ;;  %v5997_v32 = vsub.f32 %v19514_v8, %v16172_v39  ;;  %v19517_v39 = vld [vmem:[#allocation102_spill] sm:$0xff] }
 0x5a6   : > { %11208 = vpow2.f32 %v6135_v12 }
 0x5a7   : > { %6219 = vadd.xlane.f32.xlu1 %v6218_v53  ;;  %v6015_v53 = vsub.f32 %v19510_v22, %v5941_v15  ;;  %v6248_v15 = vsel %vm596_vm0, %v16243_v17, 0.0  ;;  %v6133_v22 = vmul.f32 1.442695, %v6013_v11  ;;  %v6101_v12 = vmul.f32 1.442695, %v5997_v32  ;;  %v19520_v32 = vld [vmem:[#allocation25_spill] sm:$0xff] }
 0x5a8   : > { %v16226_v28 = vpop.xlane.xlu0 %5949  ;;  %v5992_v11 = vsub.f32 %v19517_v39, %v16150_v54  ;;  %v19521_v39 = vld [vmem:[#allocation19_spill] sm:$0xff] }
 0x5a9   : > { %6243 = vadd.xlane.f32.xlu2 %v6242_v56  ;;  %v16251_v56 = vpop.eup %11202  ;;  %v6137_v47 = vmul.f32 1.442695, %v6015_v53 }
 0x5aa   : > { %6246 = vadd.xlane.f32.xlu0 %v6245_v4  ;;  %v16228_v2 = vpop.xlane.xlu1 %5892  ;;  %v6251_v4 = vsel %vm596_vm0, %v16234_v20, 0.0  ;;  %19512 = vst [vmem:[#allocation42_spill] sm:$0xff] %v16251_v56  ;;  %v6293_v10 = vsel %vm596_vm0, %v16251_v56, 0.0 }
 0x5ab   : > { %11210 = vpow2.f32 %v6137_v47 }
 0x5ac   : > { %v16241_v0 = vpop.xlane.xlu2 %5925  ;;  %11212 = vpow2.f32 %v6133_v22  ;;  %v5993_v22 = vsub.f32 %v19520_v32, %v16218_v7  ;;  %v19523_v7 = vld [vmem:[#allocation103_spill] sm:$0xff] }
 0x5ad   : > { %11214 = vpow2.f32 %v6101_v12 }
 0x5ae   : > { %v6093_v12 = vmul.f32 1.442695, %v5993_v22 }
 0x5af   : > { %6195 = vadd.xlane.f32.xlu1 %v6194_v49  ;;  %v16257_v49 = vpop.eup %11204 }
 0x5b0   : > { %19513 = vst [vmem:[#allocation24_spill] sm:$0xff] %v16257_v49  ;;  %v16267_v20 = vpop.eup %11206 }
 0x5b1   : > { %6249 = vadd.xlane.f32.xlu2 %v6248_v15  ;;  %19516 = vst [vmem:[#allocation54_spill] sm:$0xff] %v16267_v20  ;;  %v6296_v15 = vsel %vm596_vm0, %v16257_v49, 0.0  ;;  %v16275_v63 = vpop.eup %11208  ;;  %v6191_v47 = vsel %vm596_vm0, %v16267_v20, 0.0 }
 0x5b2   : > { %6252 = vadd.xlane.f32.xlu0 %v6251_v4  ;;  %v16249_v45 = vpop.xlane.xlu1 %5946  ;;  %v19515_v4 = vld [vmem:[#allocation96_spill] sm:$0xff]  ;;  %19518 = vst [vmem:[#allocation52_spill] sm:$0xff] %v16275_v63  ;;  %v6320_v54 = vsel %vm596_vm0, %v16275_v63, 0.0 }
 0x5b3   : > { %v5998_v30 = vsub.f32 %v19515_v4, %v16116_v21  ;;  %v16281_v4 = vpop.eup %11210 }
 0x5b4   : > { %v16265_v53 = vpop.xlane.xlu2 %5901  ;;  %19519 = vst [vmem:[#allocation53_spill] sm:$0xff] %v16281_v4  ;;  %v16291_v20 = vpop.eup %11212 }
 0x5b5   : > { %v16255_v43 = vpop.xlane.xlu0 %5883  ;;  %v6103_v21 = vmul.f32 1.442695, %v5998_v30  ;;  %v6008_v30 = vsub.f32 %v19521_v39, %v16158_v61  ;;  %19522 = vst [vmem:[#allocation57_spill] sm:$0xff] %v16291_v20  ;;  %v16297_v63 = vpop.eup %11214  ;;  %v6317_v61 = vsel %vm596_vm0, %v16291_v20, 0.0 }
 0x5b6   : > { %19524 = vst [vmem:[#allocation55_spill] sm:$0xff] %v16297_v63 }
 0x5b7   : > { %6294 = vadd.xlane.f32.xlu1 %v6293_v10  ;;  %11216 = vpow2.f32 %v6103_v21  ;;  %v6123_v21 = vmul.f32 1.442695, %v6008_v30 }
 0x5b9   : > { %6192 = vadd.xlane.f32.xlu2 %v6191_v47  ;;  %v6323_v47 = vsel %vm596_vm0, %v16281_v4, 0.0  ;;  %v19526_v4 = vld [vmem:[#allocation94_spill] sm:$0xff] }
 0x5ba   : > { %6297 = vadd.xlane.f32.xlu0 %v6296_v15  ;;  %v16273_v8 = vpop.xlane.xlu1 %5880  ;;  %v6091_v15 = vmul.f32 1.442695, %v5992_v11  ;;  %v6016_v11 = vsub.f32 %v19523_v7, %v16178_v25  ;;  %v6007_v22 = vsub.f32 %v19526_v4, %v16146_v51  ;;  %v6269_v25 = vsel %vm596_vm0, %v16297_v63, 0.0  ;;  %v19529_v51 = vld [vmem:[#allocation107_spill] sm:$0xff]  ;;  %v19535_v63 = vld [vmem:[#allocation20_spill] sm:$0xff] }
 0x5bb   : > { %v5999_v4 = vsub.f32 %v19529_v51, %v16228_v2  ;;  %v19533_v51 = vld [vmem:[#allocation83_spill] sm:$0xff] }
 0x5bc   : > { %v16289_v49 = vpop.xlane.xlu2 %5928  ;;  %11218 = vpow2.f32 %v6091_v15  ;;  %v6139_v15 = vmul.f32 1.442695, %v6016_v11  ;;  %v6121_v56 = vmul.f32 1.442695, %v6007_v22  ;;  %v19532_v22 = vld [vmem:[#allocation43_spill] sm:$0xff] }
 0x5bd   : > { %v16279_v10 = vpop.xlane.xlu0 %5898  ;;  %v16303_v39 = vpop.eup %11216  ;;  %11220 = vpow2.f32 %v6093_v12 }
 0x5be   : > { %19525 = vst [vmem:[#allocation63_spill] sm:$0xff] %v16303_v39  ;;  %11222 = vpow2.f32 %v6123_v21 }
 0x5bf   : > { %6321 = vadd.xlane.f32.xlu1 %v6320_v54  ;;  %11224 = vpow2.f32 %v6139_v15  ;;  %v6105_v15 = vmul.f32 1.442695, %v5999_v4 }
 0x5c0   : > { %11226 = vpow2.f32 %v6121_v56 }
 0x5c1   : > { %6318 = vadd.xlane.f32.xlu2 %v6317_v61  ;;  %v6272_v61 = vsel %vm596_vm0, %v16303_v39, 0.0  ;;  %v6018_v39 = vsub.f32 %v19533_v51, %v16226_v28 }
 0x5c2   : > { %6324 = vadd.xlane.f32.xlu0 %v6323_v47  ;;  %v6151_v32 = vpop.xlane.xlu1 %6150  ;;  %v19527_v47 = vld [vmem:[#allocation29_spill] sm:$0xff]  ;;  %v16313_v20 = vpop.eup %11218 }
 0x5c3   : > { %v5994_v30 = vsub.f32 %v19527_v47, %v16204_v62  ;;  %19528 = vst [vmem:[#allocation32_spill] sm:$0xff] %v16313_v20  ;;  %v16321_v11 = vpop.eup %11220  ;;  %v6254_v62 = vsel %vm596_vm0, %v16313_v20, 0.0 }
 0x5c4   : > { %v16311_v7 = vpop.xlane.xlu2 %5955  ;;  %19530 = vst [vmem:[#allocation59_spill] sm:$0xff] %v16321_v11  ;;  %v16325_v47 = vpop.eup %11222  ;;  %v6257_v2 = vsel %vm596_vm0, %v16321_v11, 0.0 }
 0x5c5   : > { %v16301_v54 = vpop.xlane.xlu0 %5952  ;;  %v6095_v21 = vmul.f32 1.442695, %v5994_v30  ;;  %19531 = vst [vmem:[#allocation56_spill] sm:$0xff] %v16325_v47  ;;  %v16335_v20 = vpop.eup %11224 }
 0x5c6   : > { %19534 = vst [vmem:[#allocation58_spill] sm:$0xff] %v16335_v20  ;;  %v6326_v28 = vsel %vm596_vm0, %v16335_v20, 0.0 }
 0x5c7   : > { %6270 = vadd.xlane.f32.xlu1 %v6269_v25  ;;  %11228 = vpow2.f32 %v6095_v21  ;;  %v16343_v21 = vpop.eup %11226 }
 0x5c8   : > { %11230 = vpow2.f32 %v6105_v15 }
 0x5c9   : > { %6255 = vadd.xlane.f32.xlu2 %v6254_v62  ;;  %v6302_v62 = vsel %vm596_vm0, %v16325_v47, 0.0 }
 0x5ca   : > { %6273 = vadd.xlane.f32.xlu0 %v6272_v61  ;;  %v16319_v12 = vpop.xlane.xlu1 %5931  ;;  %v6000_v61 = vsub.f32 %v19532_v22, %v16182_v16  ;;  %v6009_v16 = vsub.f32 %v19535_v63, %v16202_v23  ;;  %v6143_v22 = vmul.f32 1.442695, %v6018_v39  ;;  %v6299_v23 = vsel %vm596_vm0, %v16343_v21, 0.0  ;;  %v19537_v63 = vld [vmem:[#allocation71_spill] sm:$0xff] }
 0x5cb   : > { %v6001_v39 = vsub.f32 %v19537_v63, %v16279_v10 }
 0x5cc   : > { %v16333_v30 = vpop.xlane.xlu2 %5904  ;;  %v6107_v56 = vmul.f32 1.442695, %v6000_v61  ;;  %v6125_v61 = vmul.f32 1.442695, %v6009_v16  ;;  %v19540_v16 = vld [vmem:[#allocation49_spill] sm:$0xff] }
 0x5cd   : > { %v6223_v25 = vpop.xlane.xlu0 %6222  ;;  %v16349_v47 = vpop.eup %11228 }
 0x5ce   : > { %11232 = vpow2.f32 %v6107_v56  ;;  %v19539_v56 = vld [vmem:[#allocation82_spill] sm:$0xff] }
 0x5cf   : > { %6258 = vadd.xlane.f32.xlu1 %v6257_v2  ;;  %v19536_v2 = vld [vmem:[#allocation48_spill] sm:$0xff]  ;;  %11234 = vrcp.f32 %v6151_v32  ;;  %v6010_v32 = vsub.f32 %v19539_v56, %v16241_v0 }
 0x5d0   : > { %v6017_v51 = vsub.f32 %v19536_v2, %v16249_v45  ;;  %11236 = vpow2.f32 %v6143_v22  ;;  %v6260_v45 = vsel %vm596_vm0, %v16349_v47, 0.0  ;;  %v6002_v22 = vsub.f32 %v19540_v16, %v16265_v53  ;;  %v19544_v16 = vld [vmem:[#allocation75_spill] sm:$0xff] }
 0x5d1   : > { %6327 = vadd.xlane.f32.xlu2 %v6326_v28  ;;  %v6109_v2 = vmul.f32 1.442695, %v6001_v39  ;;  %v6127_v0 = vmul.f32 1.442695, %v6010_v32  ;;  %v19543_v39 = vld [vmem:[#allocation68_spill] sm:$0xff] }
 0x5d2   : > { %6303 = vadd.xlane.f32.xlu0 %v6302_v62  ;;  %v16341_v4 = vpop.xlane.xlu1 %5907  ;;  %v16355_v62 = vpop.eup %11230  ;;  %v6141_v20 = vmul.f32 1.442695, %v6017_v51  ;;  %v6011_v56 = vsub.f32 %v19543_v39, %v16289_v49 }
 0x5d3   : > { %19538 = vst [vmem:[#allocation60_spill] sm:$0xff] %v16355_v62  ;;  %v6275_v51 = vsel %vm596_vm0, %v16355_v62, 0.0 }
 0x5d4   : > { %v6199_v15 = vpop.xlane.xlu2 %6198  ;;  %v16363_v10 = vpop.eup %11232 }
 0x5d5   : > { %v6157_v11 = vpop.xlane.xlu0 %6156  ;;  %11238 = vrcp.f32 %v6199_v15  ;;  %19541 = vst [vmem:[#allocation61_spill] sm:$0xff] %v16363_v10  ;;  %v6278_v53 = vsel %vm596_vm0, %v16363_v10, 0.0 }
 0x5d6   : > { %11240 = vpow2.f32 %v6125_v61 }
 0x5d7   : > { %6300 = vadd.xlane.f32.xlu1 %v6299_v23  ;;  %11242 = vrcp.f32 %v6223_v25  ;;  %v11235_v23 = vpop.eup %11234 }
 0x5d8   : > { %v16367_v61 = vpop.eup %11236 }
 0x5d9   : > { %6276 = vadd.xlane.f32.xlu2 %v6275_v51  ;;  %v6332_v32 = vsel %vm596_vm0, %v16367_v61, 0.0 }
 0x5da   : > { %6261 = vadd.xlane.f32.xlu0 %v6260_v45  ;;  %v6202_v28 = vpop.xlane.xlu1 %6201  ;;  %v6111_v45 = vmul.f32 1.442695, %v6002_v22 }
 0x5db   : > { %11244 = vrcp.f32 %v6202_v28  ;;  %v11239_v15 = vpop.eup %11238  ;;  %v6405_v28 = vmul.f32 %v11235_v23, %v19544_v16 }
 0x5dc   : > { %11246 = vpow2.f32 %v6141_v20  ;;  %v16371_v25 = vpop.eup %11240  ;;  %v6421_v20 = vmul.f32 %v11239_v15, %v16011_v33  ;;  %v6226_v51 = vpop.xlane.xlu2 %6225 }
 0x5dd   : > { %v6154_v63 = vpop.xlane.xlu0 %6153  ;;  %19542 = vst [vmem:[#allocation65_spill] sm:$0xff] %v16371_v25  ;;  %v11243_v62 = vpop.eup %11242  ;;  %v6469_v39 = vpack.c.bf16 %v6405_v28, %v6405_v28 }
 0x5de   : > { %11248 = vrcp.f32 %v6154_v63  ;;  %v19545_v63 = vld [vmem:[#allocation69_spill] sm:$0xff]  ;;  %v6485_v49 = vpack.c.bf16 %v6421_v20, %v6421_v20  ;;  %v6429_v16 = vmul.f32 %v11243_v62, %v15978_v36  ;;  %v6004_v62 = vsub.f32 %v15996_v37, %v16341_v4 }
 0x5df   : > { %11250 = vpow2.f32 %v6109_v2  ;;  %6279 = vadd.xlane.f32.xlu1 %v6278_v53  ;;  %v5995_v10 = vsub.f32 %v19545_v63, %v16273_v8  ;;  %v6129_v53 = vmul.f32 1.442695, %v6011_v56  ;;  %v6012_v4 = vsub.f32 %v15972_v35, %v16319_v12 }
 0x5e0   : > { %11252 = vrcp.f32 %v6226_v51  ;;  %v6305_v51 = vsel %vm596_vm0, %v16371_v25, 0.0  ;;  %v6719_v28 = vunpack.c.l.b16 %v6485_v49 }
 0x5e1   : > { %v11245_v22 = vpop.eup %11244  ;;  %11254 = vpow2.f32 %v6127_v0  ;;  %6306 = vadd.xlane.f32.xlu2 %v6305_v51  ;;  %v6097_v20 = vmul.f32 1.442695, %v5995_v10  ;;  %v6131_v12 = vmul.f32 1.442695, %v6012_v4 }
 0x5e2   : > { %6333 = vadd.xlane.f32.xlu0 %v6332_v32  ;;  %v16381_v2 = vpop.eup %11246  ;;  %11256 = vpow2.f32 %v6111_v45  ;;  %v6422_v23 = vmul.f32 %v11245_v22, %v16019_v18  ;;  %v6178_v33 = vpop.xlane.xlu1 %6177  ;;  %v19546_v45 = vld [vmem:[#allocation66_spill] sm:$0xff] }
 0x5e3   : > { %11258 = vrcp.f32 %v6157_v11  ;;  %v5996_v18 = vsub.f32 %v19546_v45, %v16255_v43  ;;  %v6329_v56 = vsel %vm596_vm0, %v16381_v2, 0.0 }
 0x5e4   : > { %v11249_v15 = vpop.eup %11248  ;;  %v6486_v8 = vpack.c.bf16 %v6422_v23, %v6422_v23  ;;  %v6573_v23 = vunpack.c.l.b16 %v6469_v39  ;;  %v6160_v43 = vpop.xlane.xlu2 %6159  ;;  %v6115_v39 = vmul.f32 1.442695, %v6004_v62 }
 0x5e5   : > { %v6406_v0 = vmul.f32 %v11249_v15, %v16025_v24  ;;  %v6208_v32 = vpop.xlane.xlu0 %6207  ;;  %v16388_v63 = vpop.eup %11250  ;;  %v6493_v15 = vpack.c.bf16 %v6429_v16, %v6429_v16  ;;  %v6099_v37 = vmul.f32 1.442695, %v5996_v18 }
 0x5e6   : > { %11260 = vrcp.f32 %v6208_v32  ;;  %v11253_v36 = vpop.eup %11252  ;;  %v6720_v24 = vunpack.c.l.b16 %v6486_v8  ;;  %v6281_v25 = vsel %vm596_vm0, %v16388_v63, 0.0 }
 0x5e7   : > { %v6470_v11 = vpack.c.bf16 %v6406_v0, %v6406_v0  ;;  %v16396_v22 = vpop.eup %11254  ;;  %11262 = vpow2.f32 %v6129_v53  ;;  %v6430_v51 = vmul.f32 %v11253_v36, %v16034_v38  ;;  %6330 = vadd.xlane.f32.xlu1 %v6329_v56  ;;  %v6792_v8 = vunpack.c.l.b16 %v6493_v15 }
 0x5e8   : > { %v16399_v10 = vpop.eup %11256  ;;  %v6727_v45 = vpack.c.b16 %v6720_v24, %v6719_v28  ;;  %11264 = vrcp.f32 %v6160_v43  ;;  %v6308_v62 = vsel %vm596_vm0, %v16396_v22, 0.0  ;;  %v19547_v43 = vld [vmem:[#allocation78_spill] sm:$0xff] }
 0x5e9   : > { %v6574_v32 = vunpack.c.l.b16 %v6470_v11  ;;  %11266 = vpow2.f32 %v6097_v20  ;;  %v6494_v49 = vpack.c.bf16 %v6430_v51, %v6430_v51  ;;  %v11259_v53 = vpop.eup %11258  ;;  %v6284_v18 = vsel %vm596_vm0, %v16399_v10, 0.0 }
 0x5ea   : > { %6282 = vadd.xlane.f32.xlu0 %v6281_v25  ;;  %11268 = vrcp.f32 %v6178_v33  ;;  %10473 = vmatmul.msk.bf16.vlgmr.msrb.gmra.mxu2 %vm596_vm0, %v6727_v45  ;;  %v6205_v16 = vpop.xlane.xlu1 %6204  ;;  %v6003_v25 = vsub.f32 %v15987_v26, %v16333_v30  ;;  %v6407_v11 = vmul.f32 %v11259_v53, %v16002_v5  ;;  %v6019_v5 = vsub.f32 %v19547_v43, %v16301_v54 }
 0x5eb   : > { %v6581_v38 = vpack.c.b16 %v6574_v32, %v6573_v23  ;;  %v6793_v56 = vunpack.c.l.b16 %v6494_v49  ;;  %11270 = vrcp.f32 %v6205_v16  ;;  %6285 = vadd.xlane.f32.xlu2 %v6284_v18 }
 0x5ec   : > { %v11261_v0 = vpop.eup %11260  ;;  %11272 = vpow2.f32 %v6099_v37  ;;  %v6175_v23 = vpop.xlane.xlu2 %6174  ;;  %v6471_v37 = vpack.c.bf16 %v6407_v11, %v6407_v11  ;;  %v6145_v18 = vmul.f32 1.442695, %v6019_v5 }
 0x5ed   : > { %10465 = vmatmul.msk.bf16.vlgmr.msra.gmra.mxu3 %vm596_vm0, %v6581_v38  ;;  %v16409_v20 = vpop.xlane.xlu0 %6183  ;;  %v16411_v35 = vpop.eup %11262  ;;  %v6800_v33 = vpack.c.b16 %v6793_v56, %v6792_v8  ;;  %v6424_v28 = vmul.f32 %v11261_v0, %v16048_v59  ;;  %11274 = vpow2.f32 %v6115_v39  ;;  %v6113_v59 = vmul.f32 1.442695, %v6003_v25 }
 0x5ee   : > { %v11265_v36 = vpop.eup %11264  ;;  %v6311_v26 = vsel %vm596_vm0, %v16411_v35, 0.0  ;;  %11276 = vrcp.f32 %v6175_v23  ;;  %v6575_v25 = vunpack.c.l.b16 %v6471_v37 }
 0x5ef   : > { %v16419_v24 = vpop.eup %11266  ;;  %6309 = vadd.xlane.f32.xlu1 %v6308_v62  ;;  %10477 = vmatmul.msk.bf16.vlgmr.msrb.gmra.mxu0 %vm596_vm0, %v6800_v33  ;;  %v6408_v15 = vmul.f32 %v11265_v36, %v16056_v41  ;;  %11278 = vpow2.f32 %v6131_v12  ;;  %v6488_v49 = vpack.c.bf16 %v6424_v28, %v6424_v28  ;;  %v19548_v41 = vld [vmem:[#allocation85_spill] sm:$0xff] }
 0x5f0   : > { %v11269_v51 = vpop.eup %11268  ;;  %v6020_v39 = vsub.f32 %v19548_v41, %v16311_v7  ;;  %v6263_v54 = vsel %vm596_vm0, %v16419_v24, 0.0 }
 0x5f1   : > { %v11271_v30 = vpop.eup %11270  ;;  %v6472_v32 = vpack.c.bf16 %v6408_v15, %v6408_v15  ;;  %v6414_v38 = vmul.f32 %v11269_v51, %v16042_v42  ;;  %v6722_v33 = vunpack.c.l.b16 %v6488_v49 }
 0x5f2   : > { %6312 = vadd.xlane.f32.xlu0 %v6311_v26  ;;  %v6232_v45 = vpop.xlane.xlu1 %6231  ;;  %v6423_v4 = vmul.f32 %v11271_v30, %v16066_v44  ;;  %v16428_v53 = vpop.eup %11272  ;;  %v6147_v36 = vmul.f32 1.442695, %v6020_v39 }
 0x5f3   : > { %11280 = vrcp.f32 %v6232_v45  ;;  %6264 = vadd.xlane.f32.xlu2 %v6263_v54  ;;  %v6576_v0 = vunpack.c.l.b16 %v6472_v32  ;;  %v16435_v56 = vpop.eup %11274  ;;  %v6266_v12 = vsel %vm596_vm0, %v16428_v53, 0.0  ;;  %v6478_v62 = vpack.c.bf16 %v6414_v38, %v6414_v38 }
 0x5f4   : > { %v6487_v8 = vpack.c.bf16 %v6423_v4, %v6423_v4  ;;  %11282 = vpow2.f32 %v6113_v59  ;;  %v11277_v44 = vpop.eup %11276  ;;  %v6229_v28 = vpop.xlane.xlu2 %6228  ;;  %v6290_v23 = vsel %vm596_vm0, %v16435_v56, 0.0 }
 0x5f5   : > { %v6211_v16 = vpop.xlane.xlu0 %6210  ;;  %v16439_v42 = vpop.eup %11278  ;;  %v6413_v11 = vmul.f32 %v11277_v44, %v16080_v27  ;;  %v6582_v15 = vpack.c.b16 %v6576_v0, %v6575_v25  ;;  %11284 = vrcp.f32 %v6229_v28  ;;  %v6647_v27 = vunpack.c.l.b16 %v6478_v62 }
 0x5f6   : > { %v6721_v7 = vunpack.c.l.b16 %v6487_v8  ;;  %11286 = vpow2.f32 %v6145_v18  ;;  %v6314_v5 = vsel %vm596_vm0, %v16439_v42, 0.0 }
 0x5f7   : > { %6267 = vadd.xlane.f32.xlu1 %v6266_v12  ;;  %v6477_v30 = vpack.c.bf16 %v6413_v11, %v6413_v11 }
 0x5f8   : > { %v6728_v51 = vpack.c.b16 %v6722_v33, %v6721_v7 }
 0x5f9   : > { %v11281_v26 = vpop.eup %11280  ;;  %v6646_v32 = vunpack.c.l.b16 %v6477_v30 }
 0x5fa   : > { %6291 = vadd.xlane.f32.xlu0 %v6290_v23  ;;  %10474 = vmatmul.msk.bf16.gmra.mxu2 %vm596_vm0, %v6728_v51  ;;  %v6166_v43 = vpop.xlane.xlu1 %6165  ;;  %v16447_v59 = vpop.eup %11282  ;;  %v6432_v45 = vmul.f32 %v11281_v26, %v16088_v48 }
 0x5fb   : > { %11288 = vrcp.f32 %v6166_v43  ;;  %6315 = vadd.xlane.f32.xlu2 %v6314_v5  ;;  %v6654_v4 = vpack.c.b16 %v6647_v27, %v6646_v32  ;;  %v11285_v49 = vpop.eup %11284  ;;  %v6287_v41 = vsel %vm596_vm0, %v16447_v59, 0.0 }
 0x5fc   : > { %11290 = vpow2.f32 %v6147_v36  ;;  %v16454_v39 = vpop.eup %11286  ;;  %v6496_v38 = vpack.c.bf16 %v6432_v45, %v6432_v45  ;;  %v6431_v54 = vmul.f32 %v11285_v49, %v16104_v50  ;;  %v6163_v48 = vpop.xlane.xlu2 %6162 }
 0x5fd   : > { %v6238_v37 = vpop.xlane.xlu0 %6237  ;;  %10466 = vmatmul.msk.bf16.gmra.mxu3 %vm596_vm0, %v6582_v15  ;;  %11292 = vrcp.f32 %v16409_v20  ;;  %10469 = vmatmul.msk.bf16.vlgmr.msra.gmra.mxu1 %vm596_vm0, %v6654_v4  ;;  %v6335_v44 = vsel %vm596_vm0, %v16454_v39, 0.0 }
 0x5fe   : > { %11294 = vrcp.f32 %v6163_v48  ;;  %v6495_v8 = vpack.c.bf16 %v6431_v54, %v6431_v54  ;;  %v6795_v25 = vunpack.c.l.b16 %v6496_v38 }
 0x5ff   : > { %6288 = vadd.xlane.f32.xlu1 %v6287_v41  ;;  %11296 = vrcp.f32 %v6211_v16 }
 0x600   : > { %v6794_v7 = vunpack.c.l.b16 %v6495_v8 }
 0x601   : > { %v11289_v0 = vpop.eup %11288 }
 0x602   : > { %v16458_v18 = vpop.eup %11290  ;;  %v6181_v20 = vpop.xlane.xlu1 %6180  ;;  %v6410_v50 = vmul.f32 %v11289_v0, %v16112_v3  ;;  %v6801_v36 = vpack.c.b16 %v6795_v25, %v6794_v7 }
 0x603   : > { %v11293_v12 = vpop.eup %11292  ;;  %11298 = vrcp.f32 %v6181_v20  ;;  %6336 = vadd.xlane.f32.xlu2 %v6335_v44  ;;  %v6338_v16 = vsel %vm596_vm0, %v16458_v18, 0.0 }
 0x604   : > { %11300 = vrcp.f32 %v6238_v37  ;;  %v11295_v62 = vpop.eup %11294  ;;  %v6416_v11 = vmul.f32 %v11293_v12, %v16072_v13  ;;  %v6214_v28 = vpop.xlane.xlu2 %6213  ;;  %10478 = vmatmul.msk.bf16.gmra.mxu0 %vm596_vm0, %v6801_v36  ;;  %v6474_v15 = vpack.c.bf16 %v6410_v50, %v6410_v50 }
 0x605   : > { %v6172_v33 = vpop.xlane.xlu0 %6171  ;;  %v6409_v23 = vmul.f32 %v11295_v62, %v16128_v19  ;;  %v11297_v51 = vpop.eup %11296  ;;  %11302 = vrcp.f32 %v6214_v28 }
 0x606   : > { %v6480_v30 = vpack.c.bf16 %v6416_v11, %v6416_v11  ;;  %v6425_v13 = vmul.f32 %v11297_v51, %v16096_v9  ;;  %v6578_v45 = vunpack.c.l.b16 %v6474_v15 }
 0x607   : > { %6339 = vadd.xlane.f32.xlu1 %v6338_v16  ;;  %v6473_v26 = vpack.c.bf16 %v6409_v23, %v6409_v23 }
 0x608   : > { %v6649_v41 = vunpack.c.l.b16 %v6480_v30  ;;  %v6489_v48 = vpack.c.bf16 %v6425_v13, %v6425_v13 }
 0x609   : > { %v11299_v3 = vpop.eup %11298  ;;  %v6577_v32 = vunpack.c.l.b16 %v6473_v26 }
 0x60a   : > { %v6415_v43 = vmul.f32 %v11299_v3, %v16136_v6  ;;  %v6235_v5 = vpop.xlane.xlu1 %6234  ;;  %v11301_v27 = vpop.eup %11300 }
 0x60b   : > { %11304 = vrcp.f32 %v6235_v5  ;;  %v6583_v19 = vpack.c.b16 %v6578_v45, %v6577_v32  ;;  %v11303_v49 = vpop.eup %11302  ;;  %v6434_v38 = vmul.f32 %v11301_v27, %v16118_v46  ;;  %v6723_v46 = vunpack.c.l.b16 %v6489_v48 }
 0x60c   : > { %11306 = vrcp.f32 %v6172_v33  ;;  %v6479_v37 = vpack.c.bf16 %v6415_v43, %v6415_v43  ;;  %v6426_v6 = vmul.f32 %v11303_v49, %v16152_v34  ;;  %v6190_v0 = vpop.xlane.xlu2 %6189 }
 0x60d   : > { %v6187_v4 = vpop.xlane.xlu0 %6186  ;;  %10467 = vmatmul.msk.bf16.gmra.mxu3 %vm596_vm0, %v6583_v19  ;;  %v6498_v12 = vpack.c.bf16 %v6434_v38, %v6434_v38 }
 0x60e   : > { %11308 = vrcp.f32 %v6187_v4  ;;  %v6648_v54 = vunpack.c.l.b16 %v6479_v37  ;;  %v6490_v20 = vpack.c.bf16 %v6426_v6, %v6426_v6 }
 0x60f   : > { %11310 = vrcp.f32 %v6190_v0  ;;  %v6797_v16 = vunpack.c.l.b16 %v6498_v12 }
 0x610   : > { %v6655_v9 = vpack.c.b16 %v6649_v41, %v6648_v54  ;;  %v6724_v33 = vunpack.c.l.b16 %v6490_v20 }
 0x611   : > { %v11305_v8 = vpop.eup %11304 }
 0x612   : > { %v11307_v44 = vpop.eup %11306  ;;  %v6433_v25 = vmul.f32 %v11305_v8, %v16160_v57  ;;  %10470 = vmatmul.msk.bf16.gmra.mxu1 %vm596_vm0, %v6655_v9  ;;  %v6169_v7 = vpop.xlane.xlu1 %6168  ;;  %v6729_v62 = vpack.c.b16 %v6724_v33, %v6723_v46 }
 0x613   : > { %11312 = vrcp.f32 %v6169_v7  ;;  %v6412_v15 = vmul.f32 %v11307_v44, %v16140_v1 }
 0x614   : > { %v11309_v50 = vpop.eup %11308  ;;  %v6497_v36 = vpack.c.bf16 %v6433_v25, %v6433_v25  ;;  %v6217_v57 = vpop.xlane.xlu2 %6216  ;;  %10475 = vmatmul.msk.bf16.gmra.mxu2 %vm596_vm0, %v6729_v62 }
 0x615   : > { %v6241_v34 = vpop.xlane.xlu0 %6240  ;;  %v11311_v11 = vpop.eup %11310  ;;  %v6417_v28 = vmul.f32 %v11309_v50, %v16164_v52  ;;  %11314 = vrcp.f32 %v6217_v57  ;;  %v6476_v52 = vpack.c.bf16 %v6412_v15, %v6412_v15 }
 0x616   : > { %v6796_v23 = vunpack.c.l.b16 %v6497_v36  ;;  %v6418_v51 = vmul.f32 %v11311_v11, %v16174_v40  ;;  %11316 = vrcp.f32 %v6241_v34 }
 0x617   : > { %v6481_v43 = vpack.c.bf16 %v6417_v28, %v6417_v28  ;;  %v6580_v4 = vunpack.c.l.b16 %v6476_v52 }
 0x618   : > { %v6802_v3 = vpack.c.b16 %v6797_v16, %v6796_v23  ;;  %v6482_v30 = vpack.c.bf16 %v6418_v51, %v6418_v51 }
 0x619   : > { %v11313_v26 = vpop.eup %11312  ;;  %v6650_v45 = vunpack.c.l.b16 %v6481_v43 }
 0x61a   : > { %10479 = vmatmul.msk.bf16.gmra.mxu0 %vm596_vm0, %v6802_v3  ;;  %v6220_v5 = vpop.xlane.xlu1 %6219  ;;  %v6411_v27 = vmul.f32 %v11313_v26, %v16184_v14  ;;  %v6651_v13 = vunpack.c.l.b16 %v6482_v30  ;;  %v19549_v26 = vld [vmem:[#allocation42_spill] sm:$0xff] }
 0x61b   : > { %11318 = vrcp.f32 %v6220_v5  ;;  %v11315_v40 = vpop.eup %11314 }
 0x61c   : > { %v6475_v32 = vpack.c.bf16 %v6411_v27, %v6411_v27  ;;  %v6427_v19 = vmul.f32 %v11315_v40, %v16196_v58  ;;  %v6244_v49 = vpop.xlane.xlu2 %6243  ;;  %v11317_v41 = vpop.eup %11316  ;;  %v6656_v54 = vpack.c.b16 %v6651_v13, %v6650_v45  ;;  %v19550_v27 = vld [vmem:[#allocation22_spill] sm:$0xff] }
 0x61d   : > { %v6247_v1 = vpop.xlane.xlu0 %6246  ;;  %11320 = vrcp.f32 %v6244_v49  ;;  %v6435_v9 = vmul.f32 %v11317_v41, %v16188_v29  ;;  %v19552_v41 = vld [vmem:[#allocation54_spill] sm:$0xff] }
 0x61e   : > { %v6579_v37 = vunpack.c.l.b16 %v6475_v32  ;;  %11322 = vrcp.f32 %v6247_v1  ;;  %v6491_v6 = vpack.c.bf16 %v6427_v19, %v6427_v19  ;;  %v19551_v1 = vld [vmem:[#allocation24_spill] sm:$0xff] }
 0x61f   : > { %v6499_v25 = vpack.c.bf16 %v6435_v9, %v6435_v9 }
 0x620   : > { %v6584_v38 = vpack.c.b16 %v6580_v4, %v6579_v37  ;;  %v6725_v44 = vunpack.c.l.b16 %v6491_v6 }
 0x621   : > { %v11319_v48 = vpop.eup %11318  ;;  %v6798_v34 = vunpack.c.l.b16 %v6499_v25 }
 0x622   : > { %v6428_v14 = vmul.f32 %v11319_v48, %v16206_v60  ;;  %10468 = vmatmul.msk.bf16.gmra.mxu3 %vm596_vm0, %v6584_v38  ;;  %10471 = vmatmul.msk.bf16.gmra.mxu1 %vm596_vm0, %v6656_v54  ;;  %v6196_v0 = vpop.xlane.xlu1 %6195 }
 0x623   : > { %v11321_v58 = vpop.eup %11320 }
 0x624   : > { %v6492_v8 = vpack.c.bf16 %v6428_v14, %v6428_v14  ;;  %v6436_v7 = vmul.f32 %v11321_v58, %v16220_v55  ;;  %v6250_v50 = vpop.xlane.xlu2 %6249  ;;  %v11323_v46 = vpop.eup %11322 }
 0x625   : > { %v6253_v20 = vpop.xlane.xlu0 %6252  ;;  %11324 = vrcp.f32 %v6250_v50  ;;  %v6437_v29 = vmul.f32 %v11323_v46, %v16210_v31 }
 0x626   : > { %v6726_v12 = vunpack.c.l.b16 %v6492_v8  ;;  %v6500_v60 = vpack.c.bf16 %v6436_v7, %v6436_v7  ;;  %11326 = vrcp.f32 %v6196_v0 }
 0x627   : > { %v6501_v23 = vpack.c.bf16 %v6437_v29, %v6437_v29 }
 0x628   : > { %v6730_v33 = vpack.c.b16 %v6726_v12, %v6725_v44  ;;  %v6799_v62 = vunpack.c.l.b16 %v6500_v60  ;;  %v19553_v44 = vld [vmem:[#allocation52_spill] sm:$0xff]  ;;  %v19554_v60 = vld [vmem:[#allocation57_spill] sm:$0xff] }
 0x629   : > { %v6865_v5 = vunpack.c.l.b16 %v6501_v23 }
 0x62a   : > { %10476 = vmatmul.msk.bf16.gmra.mxu2 %vm596_vm0, %v6730_v33  ;;  %v6295_v36 = vpop.xlane.xlu1 %6294  ;;  %v6803_v16 = vpack.c.b16 %v6799_v62, %v6798_v34  ;;  %v19555_v62 = vld [vmem:[#allocation36_spill] sm:$0xff] }
 0x62b   : > { %11328 = vrcp.f32 %v6295_v36  ;;  %v11325_v28 = vpop.eup %11324 }
 0x62c   : > { %v6438_v55 = vmul.f32 %v11325_v28, %v16243_v17  ;;  %v6193_v15 = vpop.xlane.xlu2 %6192  ;;  %10480 = vmatmul.msk.bf16.gmra.mxu0 %vm596_vm0, %v6803_v16  ;;  %v11327_v51 = vpop.eup %11326  ;;  %v19556_v16 = vld [vmem:[#allocation55_spill] sm:$0xff] }
 0x62d   : > { %v6298_v11 = vpop.xlane.xlu0 %6297  ;;  %v6420_v52 = vmul.f32 %v11327_v51, %v19550_v27 }
 0x62e   : > { %11330 = vrcp.f32 %v6298_v11  ;;  %v6502_v3 = vpack.c.bf16 %v6438_v55, %v6438_v55 }
 0x62f   : > { %11332 = vrcp.f32 %v6193_v15  ;;  %v6484_v49 = vpack.c.bf16 %v6420_v52, %v6420_v52  ;;  %v19558_v52 = vld [vmem:[#allocation32_spill] sm:$0xff] }
 0x630   : > { %v6866_v13 = vunpack.c.l.b16 %v6502_v3 }
 0x631   : > { %v11329_v57 = vpop.eup %11328  ;;  %v6653_v8 = vunpack.c.l.b16 %v6484_v49 }
 0x632   : > { %v6453_v30 = vmul.f32 %v11329_v57, %v19549_v26  ;;  %v6322_v43 = vpop.xlane.xlu1 %6321  ;;  %v6873_v45 = vpack.c.b16 %v6866_v13, %v6865_v5  ;;  %v19557_v57 = vld [vmem:[#allocation63_spill] sm:$0xff] }
 0x633   : > { %11334 = vrcp.f32 %v6322_v43 }
 0x634   : > { %v11331_v31 = vpop.eup %11330  ;;  %v6517_v40 = vpack.c.bf16 %v6453_v30, %v6453_v30  ;;  %v6319_v54 = vpop.xlane.xlu2 %6318  ;;  %10481 = vmatmul.msk.bf16.vlgmr.msrb.gmra.mxu3 %vm596_vm0, %v6873_v45 }
 0x635   : > { %v6454_v32 = vmul.f32 %v11331_v31, %v19551_v1  ;;  %v6325_v17 = vpop.xlane.xlu0 %6324  ;;  %v11333_v37 = vpop.eup %11332  ;;  %11336 = vrcp.f32 %v6319_v54 }
 0x636   : > { %v7011_v19 = vunpack.c.l.b16 %v6517_v40  ;;  %v6419_v38 = vmul.f32 %v11333_v37, %v19552_v41  ;;  %11338 = vrcp.f32 %v6253_v20 }
 0x637   : > { %v6518_v4 = vpack.c.bf16 %v6454_v32, %v6454_v32 }
 0x638   : > { %v6483_v14 = vpack.c.bf16 %v6419_v38, %v6419_v38 }
 0x639   : > { %v7012_v48 = vunpack.c.l.b16 %v6518_v4  ;;  %v11335_v6 = vpop.eup %11334 }
 0x63a   : > { %v6271_v9 = vpop.xlane.xlu1 %6270  ;;  %v6652_v58 = vunpack.c.l.b16 %v6483_v14  ;;  %v6462_v12 = vmul.f32 %v11335_v6, %v19553_v44 }
 0x63b   : > { %v7019_v0 = vpack.c.b16 %v7012_v48, %v7011_v19  ;;  %11340 = vrcp.f32 %v6271_v9  ;;  %v11337_v50 = vpop.eup %11336  ;;  %v19559_v19 = vld [vmem:[#allocation53_spill] sm:$0xff] }
 0x63c   : > { %v6657_v7 = vpack.c.b16 %v6653_v8, %v6652_v58  ;;  %v11339_v46 = vpop.eup %11338  ;;  %v6526_v33 = vpack.c.bf16 %v6462_v12, %v6462_v12  ;;  %v6461_v36 = vmul.f32 %v11337_v50, %v19554_v60  ;;  %v6256_v34 = vpop.xlane.xlu2 %6255  ;;  %v19561_v58 = vld [vmem:[#allocation58_spill] sm:$0xff] }
 0x63d   : > { %v6274_v25 = vpop.xlane.xlu0 %6273  ;;  %10489 = vmatmul.msk.bf16.vlgmr.msra.gmra.mxu2 %vm596_vm0, %v7019_v0  ;;  %v6439_v11 = vmul.f32 %v11339_v46, %v19555_v62  ;;  %v19560_v0 = vld [vmem:[#allocation56_spill] sm:$0xff] }
 0x63e   : > { %11342 = vrcp.f32 %v6274_v25  ;;  %10472 = vmatmul.msk.bf16.gmra.mxu1 %vm596_vm0, %v6657_v7  ;;  %v6525_v29 = vpack.c.bf16 %v6461_v36, %v6461_v36  ;;  %v7085_v15 = vunpack.c.l.b16 %v6526_v33 }
 0x63f   : > { %11344 = vrcp.f32 %v6256_v34  ;;  %v6503_v5 = vpack.c.bf16 %v6439_v11, %v6439_v11 }
 0x640   : > { %11346 = vrcp.f32 %v6325_v17  ;;  %v7084_v51 = vunpack.c.l.b16 %v6525_v29 }
 0x641   : > { %v11341_v20 = vpop.eup %11340  ;;  %v6867_v45 = vunpack.c.l.b16 %v6503_v5 }
 0x642   : > { %v6445_v28 = vmul.f32 %v11341_v20, %v19556_v16  ;;  %v6259_v23 = vpop.xlane.xlu1 %6258  ;;  %v7092_v30 = vpack.c.b16 %v7085_v15, %v7084_v51  ;;  %v19562_v20 = vld [vmem:[#allocation59_spill] sm:$0xff] }
 0x644   : > { %v11343_v55 = vpop.eup %11342  ;;  %v6509_v43 = vpack.c.bf16 %v6445_v28, %v6445_v28  ;;  %v6328_v1 = vpop.xlane.xlu2 %6327  ;;  %10493 = vmatmul.msk.bf16.vlgmr.msra.gmra.mxu0 %vm596_vm0, %v7092_v30 }
 0x645   : > { %v6446_v3 = vmul.f32 %v11343_v55, %v19557_v57  ;;  %v6304_v26 = vpop.xlane.xlu0 %6303  ;;  %v11345_v31 = vpop.eup %11344 }
 0x646   : > { %11348 = vrcp.f32 %v6304_v26  ;;  %v6440_v13 = vmul.f32 %v11345_v31, %v19558_v52  ;;  %v11347_v32 = vpop.eup %11346  ;;  %v6938_v40 = vunpack.c.l.b16 %v6509_v43  ;;  %v19563_v26 = vld [vmem:[#allocation60_spill] sm:$0xff]  ;;  %v19564_v52 = vld [vmem:[#allocation61_spill] sm:$0xff] }
 0x647   : > { %v6510_v27 = vpack.c.bf16 %v6446_v3, %v6446_v3  ;;  %11350 = vrcp.f32 %v6328_v1  ;;  %v6463_v49 = vmul.f32 %v11347_v32, %v19559_v19 }
 0x648   : > { %v6504_v17 = vpack.c.bf16 %v6440_v13, %v6440_v13  ;;  %11352 = vrcp.f32 %v6259_v23 }
 0x649   : > { %v6939_v41 = vunpack.c.l.b16 %v6510_v27  ;;  %v6527_v8 = vpack.c.bf16 %v6463_v49, %v6463_v49 }
 0x64a   : > { %v6301_v37 = vpop.xlane.xlu1 %6300  ;;  %v6868_v38 = vunpack.c.l.b16 %v6504_v17 }
 0x64b   : > { %11354 = vrcp.f32 %v6301_v37  ;;  %v6946_v48 = vpack.c.b16 %v6939_v41, %v6938_v40  ;;  %v7086_v34 = vunpack.c.l.b16 %v6527_v8 }
 0x64c   : > { %v11349_v4 = vpop.eup %11348  ;;  %v6874_v6 = vpack.c.b16 %v6868_v38, %v6867_v45  ;;  %v6277_v12 = vpop.xlane.xlu2 %6276 }
 0x64d   : > { %v6262_v54 = vpop.xlane.xlu0 %6261  ;;  %v11351_v14 = vpop.eup %11350  ;;  %v6456_v9 = vmul.f32 %v11349_v4, %v19560_v0 }
 0x64e   : > { %11356 = vrcp.f32 %v6262_v54  ;;  %v6464_v44 = vmul.f32 %v11351_v14, %v19561_v58  ;;  %10482 = vmatmul.msk.bf16.gmra.mxu3 %vm596_vm0, %v6874_v6  ;;  %10485 = vmatmul.msk.bf16.vlgmr.msrb.gmra.mxu1 %vm596_vm0, %v6946_v48  ;;  %v11353_v25 = vpop.eup %11352 }
 0x64f   : > { %11358 = vrcp.f32 %v6277_v12  ;;  %v6520_v46 = vpack.c.bf16 %v6456_v9, %v6456_v9  ;;  %v6441_v29 = vmul.f32 %v11353_v25, %v19562_v20  ;;  %v19565_v25 = vld [vmem:[#allocation65_spill] sm:$0xff] }
 0x650   : > { %v6528_v50 = vpack.c.bf16 %v6464_v44, %v6464_v44 }
 0x651   : > { %v11355_v7 = vpop.eup %11354  ;;  %v7014_v15 = vunpack.c.l.b16 %v6520_v46  ;;  %v6505_v3 = vpack.c.bf16 %v6441_v29, %v6441_v29 }
 0x652   : > { %v6455_v33 = vmul.f32 %v11355_v7, %v16343_v21  ;;  %v6280_v60 = vpop.xlane.xlu1 %6279  ;;  %v7087_v62 = vunpack.c.l.b16 %v6528_v50 }
 0x653   : > { %11360 = vrcp.f32 %v6280_v60  ;;  %v6869_v32 = vunpack.c.l.b16 %v6505_v3 }
 0x654   : > { %v11357_v36 = vpop.eup %11356  ;;  %v6519_v16 = vpack.c.bf16 %v6455_v33, %v6455_v33  ;;  %v7093_v23 = vpack.c.b16 %v7087_v62, %v7086_v34  ;;  %v6307_v30 = vpop.xlane.xlu2 %6306 }
 0x655   : > { %v6442_v11 = vmul.f32 %v11357_v36, %v16349_v47  ;;  %v6334_v28 = vpop.xlane.xlu0 %6333  ;;  %v11359_v55 = vpop.eup %11358 }
 0x656   : > { %11362 = vrcp.f32 %v6334_v28  ;;  %v7013_v57 = vunpack.c.l.b16 %v6519_v16  ;;  %v6447_v21 = vmul.f32 %v11359_v55, %v19563_v26  ;;  %10494 = vmatmul.msk.bf16.gmra.mxu0 %vm596_vm0, %v7093_v23 }
 0x657   : > { %v6506_v51 = vpack.c.bf16 %v6442_v11, %v6442_v11 }
 0x658   : > { %v7020_v43 = vpack.c.b16 %v7014_v15, %v7013_v57  ;;  %v6511_v27 = vpack.c.bf16 %v6447_v21, %v6447_v21 }
 0x659   : > { %v11361_v31 = vpop.eup %11360  ;;  %v6870_v5 = vunpack.c.l.b16 %v6506_v51 }
 0x65a   : > { %v6448_v47 = vmul.f32 %v11361_v31, %v19564_v52  ;;  %10490 = vmatmul.msk.bf16.gmra.mxu2 %vm596_vm0, %v7020_v43  ;;  %v6331_v13 = vpop.xlane.xlu1 %6330  ;;  %v6940_v4 = vunpack.c.l.b16 %v6511_v27 }
 0x65b   : > { %11364 = vrcp.f32 %v6331_v13  ;;  %v6875_v45 = vpack.c.b16 %v6870_v5, %v6869_v32 }
 0x65c   : > { %v11363_v1 = vpop.eup %11362  ;;  %v6512_v40 = vpack.c.bf16 %v6448_v47, %v6448_v47 }
 0x65d   : > { %v6283_v17 = vpop.xlane.xlu0 %6282  ;;  %v6466_v37 = vmul.f32 %v11363_v1, %v16367_v61 }
 0x65e   : > { %11366 = vrcp.f32 %v6283_v17  ;;  %v6941_v19 = vunpack.c.l.b16 %v6512_v40  ;;  %v6286_v49 = vpop.xlane.xlu2 %6285  ;;  %10483 = vmatmul.msk.bf16.gmra.mxu3 %vm596_vm0, %v6875_v45 }
 0x65f   : > { %11368 = vrcp.f32 %v6307_v30  ;;  %v6530_v54 = vpack.c.bf16 %v6466_v37, %v6466_v37 }
 0x660   : > { %11370 = vrcp.f32 %v6286_v49  ;;  %v6947_v41 = vpack.c.b16 %v6941_v19, %v6940_v4 }
 0x661   : > { %v11365_v38 = vpop.eup %11364  ;;  %v7089_v58 = vunpack.c.l.b16 %v6530_v54 }
 0x662   : > { %v6465_v48 = vmul.f32 %v11365_v38, %v16381_v2  ;;  %10486 = vmatmul.msk.bf16.gmra.mxu1 %vm596_vm0, %v6947_v41  ;;  %v6310_v6 = vpop.xlane.xlu1 %6309 }
 0x663   : > { %11372 = vrcp.f32 %v6310_v6 }
 0x664   : > { %v11367_v14 = vpop.eup %11366  ;;  %v6529_v9 = vpack.c.bf16 %v6465_v48, %v6465_v48 }
 0x665   : > { %v11369_v0 = vpop.eup %11368  ;;  %v6313_v61 = vpop.xlane.xlu0 %6312  ;;  %v6449_v44 = vmul.f32 %v11367_v14, %v16388_v63 }
 0x666   : > { %v11371_v8 = vpop.eup %11370  ;;  %v7088_v12 = vunpack.c.l.b16 %v6529_v9  ;;  %v6457_v7 = vmul.f32 %v11369_v0, %v19565_v25  ;;  %v6265_v46 = vpop.xlane.xlu2 %6264 }
 0x667   : > { %v6450_v50 = vmul.f32 %v11371_v8, %v16399_v10  ;;  %11374 = vrcp.f32 %v6265_v46  ;;  %v6513_v36 = vpack.c.bf16 %v6449_v44, %v6449_v44 }
 0x668   : > { %v7094_v2 = vpack.c.b16 %v7089_v58, %v7088_v12  ;;  %v6521_v29 = vpack.c.bf16 %v6457_v7, %v6457_v7 }
 0x669   : > { %v11373_v33 = vpop.eup %11372  ;;  %v6514_v60 = vpack.c.bf16 %v6450_v50, %v6450_v50  ;;  %v6942_v28 = vunpack.c.l.b16 %v6513_v36 }
 0x66a   : > { %v6458_v34 = vmul.f32 %v11373_v33, %v16396_v22  ;;  %10495 = vmatmul.msk.bf16.gmra.mxu0 %vm596_vm0, %v7094_v2  ;;  %v6268_v20 = vpop.xlane.xlu1 %6267  ;;  %v7015_v55 = vunpack.c.l.b16 %v6521_v29 }
 0x66b   : > { %11376 = vrcp.f32 %v6268_v20  ;;  %v6943_v62 = vunpack.c.l.b16 %v6514_v60 }
 0x66c   : > { %v6522_v63 = vpack.c.bf16 %v6458_v34, %v6458_v34  ;;  %11378 = vrcp.f32 %v6313_v61  ;;  %v16537_v1 = vpop.f32.mrf.mxu0 }
 0x66d   : > { %v6292_v11 = vpop.xlane.xlu0 %6291  ;;  %v16526_v16 = vpop.f32.mrf.mxu2  ;;  %v6948_v57 = vpack.c.b16 %v6943_v62, %v6942_v28 }
 0x66e   : > { %v11375_v10 = vpop.eup %11374  ;;  %v7016_v23 = vunpack.c.l.b16 %v6522_v63  ;;  %11380 = vrcp.f32 %v6292_v11  ;;  %v6316_v22 = vpop.xlane.xlu2 %6315 }
 0x66f   : > { %v6443_v15 = vmul.f32 %v11375_v10, %v16419_v24  ;;  %11382 = vrcp.f32 %v6316_v22 }
 0x670   : > { %v16529_v51 = vpop.f32.mrf.mxu3  ;;  %v7021_v26 = vpack.c.b16 %v7016_v23, %v7015_v55 }
 0x671   : > { %v11377_v3 = vpop.eup %11376  ;;  %v6507_v31 = vpack.c.bf16 %v6443_v15, %v6443_v15  ;;  %v7151_v24 = vrot.slane %v16529_v51, 4 }
 0x672   : > { %v6444_v21 = vmul.f32 %v11377_v3, %v16428_v53  ;;  %10487 = vmatmul.msk.bf16.gmra.mxu1 %vm596_vm0, %v6948_v57  ;;  %v6289_v30 = vpop.xlane.xlu1 %6288  ;;  %v11379_v43 = vpop.eup %11378  ;;  %10491 = vmatmul.msk.bf16.gmra.mxu2 %vm596_vm0, %v7021_v26 }
 0x673   : > { %11384 = vrcp.f32 %v6289_v30  ;;  %v6459_v53 = vmul.f32 %v11379_v43, %v16411_v35  ;;  %v6871_v32 = vunpack.c.l.b16 %v6507_v31  ;;  %v7152_v19 = vsel %vm1222_vm8, %v16526_v16, %v7151_v24 }
 0x674   : > { %v11381_v5 = vpop.eup %11380  ;;  %v6508_v27 = vpack.c.bf16 %v6444_v21, %v6444_v21  ;;  %v16556_v36 = vpop.f32.mrf.mxu0 }
 0x675   : > { %v16535_v52 = vpop.f32.mrf.mxu2  ;;  %v11383_v47 = vpop.eup %11382  ;;  %v6452_v40 = vmul.f32 %v11381_v5, %v16435_v56  ;;  %v6523_v48 = vpack.c.bf16 %v6459_v53, %v6459_v53  ;;  %v19566_v56 = vld [vmem:[#allocation15_spill] sm:$0xff] }
 0x676   : > { %v6872_v13 = vunpack.c.l.b16 %v6508_v27  ;;  %v6460_v17 = vmul.f32 %v11383_v47, %v16439_v42  ;;  %v6337_v37 = vpop.xlane.xlu2 %6336  ;;  %v7160_v42 = vperm.slane %v7152_v19, %v19566_v56 }
 0x677   : > { %11386 = vrcp.f32 %v6337_v37  ;;  %v6516_v35 = vpack.c.bf16 %v6452_v40, %v6452_v40  ;;  %v7017_v12 = vunpack.c.l.b16 %v6523_v48 }
 0x678   : > { %v16542_v45 = vpop.f32.mrf.mxu3  ;;  %v6524_v49 = vpack.c.bf16 %v6460_v17, %v6460_v17  ;;  %v6876_v41 = vpack.c.b16 %v6872_v13, %v6871_v32  ;;  %v7211_v46 = vrot.slane %v7160_v42, 4 }
 0x679   : > { %v11385_v4 = vpop.eup %11384 }
 0x67a   : > { %v6451_v38 = vmul.f32 %v11385_v4, %v16447_v59  ;;  %v6340_v54 = vpop.xlane.xlu1 %6339  ;;  %10484 = vmatmul.msk.bf16.gmra.mxu3 %vm596_vm0, %v6876_v41  ;;  %v16549_v14 = vpop.f32.mrf.mxu1  ;;  %v7018_v0 = vunpack.c.l.b16 %v6524_v49  ;;  %v6945_v59 = vunpack.c.l.b16 %v6516_v35 }
 0x67b   : > { %11388 = vrcp.f32 %v6340_v54  ;;  %v7163_v9 = vrot.slane %v16549_v14, 4 }
 0x67c   : > { %v6515_v6 = vpack.c.bf16 %v6451_v38, %v6451_v38  ;;  %v7022_v29 = vpack.c.b16 %v7018_v0, %v7017_v12 }
 0x67d   : > { %v6769_v61 = vpop.f32.mrf.mxu2  ;;  %v11387_v8 = vpop.eup %11386  ;;  %v7164_v50 = vsel %vm1222_vm8, %v16537_v1, %v7163_v9  ;;  %v7149_v9 = vrot.slane %v16526_v16, 4 }
 0x67e   : > { %v6944_v58 = vunpack.c.l.b16 %v6515_v6  ;;  %v7373_v44 = vrot.slane %v6769_v61, 4  ;;  %v6467_v25 = vmul.f32 %v11387_v8, %v16454_v39  ;;  %v7172_v33 = vperm.slane %v7164_v50, %v19566_v56 }
 0x67f   : > { %v7261_v50 = vrot.slane %v16535_v52, 4 }
 0x680   : > { %v6623_v7 = vpop.f32.mrf.mxu3  ;;  %v6949_v20 = vpack.c.b16 %v6945_v59, %v6944_v58  ;;  %v6531_v62 = vpack.c.bf16 %v6467_v25, %v6467_v25  ;;  %v7209_v11 = vrot.slane %v7172_v33, 4  ;;  %v16561_v39 = vsel %vm1222_vm8, %v7172_v33, %v7211_v46 }
 0x681   : > { %v7375_v2 = vrot.slane %v6623_v7, 4  ;;  %v11389_v60 = vpop.eup %11388  ;;  %v7374_v34 = vsel %vm1222_vm8, %v7373_v44, %v6623_v7  ;;  %v6842_v3 = vpop.f32.mrf.mxu0  ;;  %v7161_v44 = vrot.slane %v16537_v1, 4  ;;  %v7150_v7 = vsel %vm1222_vm8, %v7149_v9, %v16529_v51  ;;  %v19567_v9 = vld [vmem:[#allocation18_spill] sm:$0xff] }
 0x682   : > { %v6468_v63 = vmul.f32 %v11389_v60, %v16458_v18  ;;  %10488 = vmatmul.msk.bf16.gmra.mxu1 %vm596_vm0, %v6949_v20  ;;  %10492 = vmatmul.msk.bf16.gmra.mxu2 %vm596_vm0, %v7022_v29  ;;  %v16566_v28 = vsel %vm1222_vm8, %v7209_v11, %v7160_v42  ;;  %v7090_v55 = vunpack.c.l.b16 %v6531_v62  ;;  %v6693_v22 = vpop.f32.mrf.mxu1  ;;  %v7380_v18 = vperm.slane %v7374_v34, %v19566_v56 }
 0x683   : > { %v7376_v23 = vsel %vm1222_vm8, %v6769_v61, %v7375_v2  ;;  %v7385_v26 = vrot.slane %v6842_v3, 4  ;;  %v7162_v2 = vsel %vm1222_vm8, %v7161_v44, %v16549_v14  ;;  %v7275_v33 = vrot.slane %v6693_v22, 4 }
 0x684   : > { %v6532_v10 = vpack.c.bf16 %v6468_v63, %v6468_v63  ;;  %v7384_v21 = vperm.slane %v7376_v23, %v19566_v56  ;;  %v7423_v27 = vrot.slane %v7380_v18, 4  ;;  %v7263_v34 = vrot.slane %v16542_v45, 4 }
 0x685   : > { %v16576_v47 = vpop.f32.mrf.mxu2  ;;  %v7273_v20 = vrot.slane %v16556_v36, 4  ;;  %v7156_v51 = vperm.slane %v7150_v7, %v19566_v56  ;;  %v7262_v14 = vsel %vm1222_vm8, %v7261_v50, %v16542_v45  ;;  %v7168_v23 = vperm.slane %v7162_v2, %v19566_v56 }
 0x686   : > { %v7091_v15 = vunpack.c.l.b16 %v6532_v10  ;;  %v7435_v53 = vrot.slane %v7384_v21, 4  ;;  %v7268_v45 = vperm.slane %v7262_v14, %v19566_v56 }
 0x688   : > { %v7095_v57 = vpack.c.b16 %v7091_v15, %v7090_v55  ;;  %v16572_v30 = vpop.f32.mrf.mxu3  ;;  %v7274_v55 = vsel %vm1222_vm8, %v7273_v20, %v6693_v22 }
 0x689   : > { %v16579_v32 = vpop.f32.mrf.mxu0 }
 0x68a   : > { %10496 = vmatmul.msk.bf16.gmra.mxu0 %vm596_vm0, %v7095_v57 }
 0x68f   : > { %v6696_v43 = vpop.f32.mrf.mxu1 }
 0x690   : > { %v7386_v31 = vsel %vm1222_vm8, %v7385_v26, %v6696_v43  ;;  %v7387_v5 = vrot.slane %v6696_v43, 4  ;;  %v6628_v38 = vpop.f32.mrf.mxu3  ;;  %v7280_v43 = vperm.slane %v7274_v55, %v19566_v56 }
 0x691   : > { %v7392_v24 = vperm.slane %v7386_v31, %v19566_v56  ;;  %v7599_v48 = vrot.slane %v6628_v38, 4  ;;  %v7199_v31 = vrot.slane %v7156_v51, 4 }
 0x692   : > { %v7388_v13 = vsel %vm1222_vm8, %v6842_v3, %v7387_v5  ;;  %v7276_v3 = vsel %vm1222_vm8, %v16556_v36, %v7275_v33  ;;  %v7197_v5 = vrot.slane %v7168_v23, 4 }
 0x693   : > { %v7396_v40 = vperm.slane %v7388_v13, %v19566_v56  ;;  %v7421_v17 = vrot.slane %v7392_v24, 4  ;;  %v16583_v37 = vsel %vm1222_vm8, %v7392_v24, %v7423_v27  ;;  %v7284_v27 = vperm.slane %v7276_v3, %v19566_v56 }
 0x694   : > { %v7485_v24 = vrot.slane %v16576_v47, 4 }
 0x695   : > { %v16586_v4 = vsel %vm1222_vm8, %v7421_v17, %v7380_v18  ;;  %v7433_v19 = vrot.slane %v7396_v40, 4  ;;  %v16589_v49 = vsel %vm1222_vm8, %v7396_v40, %v7435_v53  ;;  %v7200_v53 = vsel %vm1222_vm8, %v7168_v23, %v7199_v31 }
 0x696   : > { %v7311_v40 = vrot.slane %v7268_v45, 4  ;;  %v7309_v17 = vrot.slane %v7280_v43, 4 }
 0x697   : > { %v16592_v41 = vsel %vm1222_vm8, %v7433_v19, %v7384_v21  ;;  %v16594_v54 = vpop.f32.mrf.mxu1  ;;  %v6774_v35 = vpop.f32.mrf.mxu2  ;;  %v7264_v21 = vsel %vm1222_vm8, %v16535_v52, %v7263_v34  ;;  %v7487_v52 = vrot.slane %v16572_v30, 4 }
 0x698   : > { %v6847_v42 = vpop.f32.mrf.mxu0  ;;  %v7597_v6 = vrot.slane %v6774_v35, 4  ;;  %v7600_v0 = vsel %vm1222_vm8, %v6774_v35, %v7599_v48  ;;  %v16609_v60 = vpop.f32.mrf.mxu3  ;;  %v7272_v36 = vperm.slane %v7264_v21, %v19566_v56  ;;  %v7321_v48 = vrot.slane %v7284_v27, 4 }
 0x699   : > { %v7609_v61 = vrot.slane %v6847_v42, 4  ;;  %v7608_v59 = vperm.slane %v7600_v0, %v19566_v56  ;;  %v7497_v35 = vrot.slane %v16579_v32, 4  ;;  %v7310_v50 = vsel %vm1222_vm8, %v7309_v17, %v7268_v45 }
 0x69a   : > { %v7598_v8 = vsel %vm1222_vm8, %v7597_v6, %v6628_v38  ;;  %v7198_v38 = vsel %vm1222_vm8, %v7197_v5, %v7156_v51  ;;  %v7323_v0 = vrot.slane %v7272_v36, 4  ;;  %v7322_v2 = vsel %vm1222_vm8, %v7321_v48, %v7272_v36 }
 0x69b   : > { %v7604_v12 = vperm.slane %v7598_v8, %v19566_v56  ;;  %v7659_v63 = vrot.slane %v7608_v59, 4  ;;  %v7312_v8 = vsel %vm1222_vm8, %v7280_v43, %v7311_v40  ;;  %v7498_v44 = vsel %vm1222_vm8, %v7497_v35, %v16594_v54 }
 0x69c   : > { %v16660_v7 = vperm.slane %v7198_v38, %v19567_v9  ;;  %v7504_v20 = vperm.slane %v7498_v44, %v19566_v56  ;;  %v16692_v51 = vperm.slane %v7322_v2, %v19567_v9  ;;  %v7711_v48 = vrot.slane %v16609_v60, 4 }
 0x69d   : > { %v7647_v1 = vrot.slane %v7604_v12, 4 }
 0x69e   : > { %v7247_v23 = vrot.slane %v16660_v7, 4  ;;  %v7533_v45 = vrot.slane %v7504_v20, 4 }
 0x69f   : > { %v6701_v58 = vpop.f32.mrf.mxu1  ;;  %v16626_v57 = vpop.f32.mrf.mxu2 }
 0x6a0   : > { %v7610_v25 = vsel %vm1222_vm8, %v7609_v61, %v6701_v58  ;;  %v7611_v46 = vrot.slane %v6701_v58, 4  ;;  %v16645_v19 = vpop.f32.mrf.mxu0  ;;  %v16650_v61 = vperm.slane %v7200_v53, %v19567_v9  ;;  %v7486_v58 = vsel %vm1222_vm8, %v7485_v24, %v16572_v30 }
 0x6a1   : > { %v7616_v16 = vperm.slane %v7610_v25, %v19566_v56  ;;  %v16668_v30 = vperm.slane %v16566_v28, %v19567_v9  ;;  %v7492_v34 = vperm.slane %v7486_v58, %v19566_v56  ;;  %v7721_v43 = vrot.slane %v16645_v19, 4 }
 0x6a2   : > { %v7612_v29 = vsel %vm1222_vm8, %v6847_v42, %v7611_v46  ;;  %v7324_v46 = vsel %vm1222_vm8, %v7284_v27, %v7323_v0 }
 0x6a3   : > { %v7645_v62 = vrot.slane %v7616_v16, 4  ;;  %v7620_v11 = vperm.slane %v7612_v29, %v19566_v56  ;;  %v16617_v10 = vsel %vm1222_vm8, %v7616_v16, %v7647_v1  ;;  %v7488_v16 = vsel %vm1222_vm8, %v16576_v47, %v7487_v52 }
 0x6a4   : > { %v16677_v1 = vperm.slane %v7312_v8, %v19567_v9  ;;  %v16682_v47 = vperm.slane %v7310_v50, %v19567_v9  ;;  %v16685_v28 = vperm.slane %v7324_v46, %v19567_v9  ;;  %v7255_v55 = vrot.slane %v16668_v30, 4 }
 0x6a5   : > { %v16624_v15 = vsel %vm1222_vm8, %v7645_v62, %v7604_v12  ;;  %v7657_v18 = vrot.slane %v7620_v11, 4  ;;  %v16631_v26 = vsel %vm1222_vm8, %v7620_v11, %v7659_v63  ;;  %v6633_v13 = vpop.f32.mrf.mxu3  ;;  %v7499_v12 = vrot.slane %v16594_v54, 4 }
 0x6a6   : > { %v7823_v42 = vrot.slane %v6633_v13, 4  ;;  %v16672_v54 = vperm.slane %v16561_v39, %v19567_v9  ;;  %v7496_v39 = vperm.slane %v7488_v16, %v19566_v56  ;;  %v7251_v62 = vrot.slane %v16650_v61, 4 }
 0x6a7   : > { %v16638_v22 = vsel %vm1222_vm8, %v7657_v18, %v7608_v59  ;;  %v7500_v29 = vsel %vm1222_vm8, %v16579_v32, %v7499_v12  ;;  %v7709_v63 = vrot.slane %v16626_v57, 4  ;;  %v6703_v11 = vpop.f32.mrf.mxu1  ;;  %v16700_v18 = vperm.slane %v16583_v37, %v19567_v9 }
 0x6a8   : > { %v7259_v3 = vrot.slane %v16672_v54, 4  ;;  %v7508_v21 = vperm.slane %v7500_v29, %v19566_v56  ;;  %v7535_v27 = vrot.slane %v7492_v34, 4  ;;  %v7547_v36 = vrot.slane %v7496_v39, 4 }
 0x6a9   : > { %v6852_v14 = vpop.f32.mrf.mxu0  ;;  %v16712_v37 = vperm.slane %v16586_v4, %v19567_v9  ;;  %v7710_v53 = vsel %vm1222_vm8, %v7709_v63, %v16609_v60  ;;  %v7722_v40 = vsel %vm1222_vm8, %v7721_v43, %v6703_v11  ;;  %v16719_v52 = vperm.slane %v16589_v49, %v19567_v9 }
 0x6aa   : > { %v7536_v38 = vsel %vm1222_vm8, %v7504_v20, %v7535_v27  ;;  %v7534_v35 = vsel %vm1222_vm8, %v7533_v45, %v7492_v34  ;;  %v7723_v4 = vrot.slane %v6703_v11, 4  ;;  %v16730_v8 = vperm.slane %v16592_v41, %v19567_v9 }
 0x6ab   : > { %v7716_v49 = vperm.slane %v7710_v53, %v19566_v56  ;;  %v7728_v58 = vperm.slane %v7722_v40, %v19566_v56  ;;  %v7833_v44 = vrot.slane %v6852_v14, 4  ;;  %v16736_v60 = vperm.slane %v7536_v38, %v19567_v9 }
 0x6ac   : > { %v16742_v16 = vperm.slane %v7534_v35, %v19567_v9  ;;  %v7548_v41 = vsel %vm1222_vm8, %v7508_v21, %v7547_v36  ;;  %v7724_v20 = vsel %vm1222_vm8, %v16645_v19, %v7723_v4 }
 0x6ad   : > { %v6779_v6 = vpop.f32.mrf.mxu2  ;;  %v7759_v11 = vrot.slane %v7716_v49, 4  ;;  %v7757_v45 = vrot.slane %v7728_v58, 4  ;;  %v7732_v38 = vperm.slane %v7724_v20, %v19566_v56  ;;  %v16761_v35 = vperm.slane %v7548_v41, %v19567_v9 }
 0x6ae   : > { %v7821_v59 = vrot.slane %v6779_v6, 4  ;;  %v7824_v25 = vsel %vm1222_vm8, %v6779_v6, %v7823_v42  ;;  %v7545_v42 = vrot.slane %v7508_v21, 4  ;;  %v16725_v6 = vpop.f32.mrf.mxu3 }
 0x6af   : > { %v7832_v50 = vperm.slane %v7824_v25, %v19566_v56  ;;  %v7758_v20 = vsel %vm1222_vm8, %v7757_v45, %v7716_v49  ;;  %v16792_v49 = vperm.slane %v16638_v22, %v19567_v9 }
 0x6b0   : > { %v7822_v33 = vsel %vm1222_vm8, %v7821_v59, %v6633_v13  ;;  %v7712_v59 = vsel %vm1222_vm8, %v16626_v57, %v7711_v48  ;;  %v7546_v34 = vsel %vm1222_vm8, %v7545_v42, %v7496_v39 }
 0x6b1   : > { %v7828_v0 = vperm.slane %v7822_v33, %v19566_v56  ;;  %v16749_v63 = vpop.f32.mrf.mxu0  ;;  %v7720_v25 = vperm.slane %v7712_v59, %v19566_v56  ;;  %v7883_v21 = vrot.slane %v7832_v50, 4  ;;  %v16768_v59 = vperm.slane %v7546_v34, %v19567_v9 }
 0x6b2   : > { %v16782_v34 = vperm.slane %v16624_v15, %v19567_v9  ;;  %v7945_v22 = vrot.slane %v16749_v63, 4 }
 0x6b3   : > { %v7871_v29 = vrot.slane %v7828_v0, 4  ;;  %19568 = vst [vmem:[#allocation31_spill] sm:$0xff] %v16768_v59 }
 0x6b5   : > { %v16707_v24 = vpop.f32.mrf.mxu2 }
 0x6b7   : > { %v6910_v42 = vpop.f32.mrf.mxu3 }
 0x6b8   : > { %v7175_v45 = vrot.slane %v6910_v42, 4 }
 0x6bb   : > { %v6706_v46 = vpop.f32.mrf.mxu1 }
 0x6bc   : > { %v7834_v2 = vsel %vm1222_vm8, %v7833_v44, %v6706_v46  ;;  %v7835_v33 = vrot.slane %v6706_v46, 4  ;;  %v16772_v46 = vperm.slane %v16617_v10, %v19567_v9  ;;  %v16786_v10 = vperm.slane %v16631_v26, %v19567_v9 }
 0x6bd   : > { %v7840_v57 = vperm.slane %v7834_v2, %v19566_v56  ;;  %v7771_v2 = vrot.slane %v7720_v25, 4  ;;  %v16800_v26 = vperm.slane %v7758_v20, %v19567_v9 }
 0x6be   : > { %v7836_v43 = vsel %vm1222_vm8, %v6852_v14, %v7835_v33  ;;  %v7760_v33 = vsel %vm1222_vm8, %v7728_v58, %v7759_v11 }
 0x6bf   : > { %v7844_v27 = vperm.slane %v7836_v43, %v19566_v56  ;;  %v7869_v36 = vrot.slane %v7840_v57, 4  ;;  %v7872_v39 = vsel %vm1222_vm8, %v7840_v57, %v7871_v29  ;;  %v7769_v43 = vrot.slane %v7732_v38, 4  ;;  %v6912_v20 = vpop.f32.mrf.mxu3 }
 0x6c0   : > { %v7056_v48 = vpop.f32.mrf.mxu2  ;;  %v7772_v58 = vsel %vm1222_vm8, %v7732_v38, %v7771_v2 }
 0x6c1   : > { %v7870_v14 = vsel %vm1222_vm8, %v7869_v36, %v7828_v0  ;;  %v7881_v4 = vrot.slane %v7844_v27, 4  ;;  %v16765_v44 = vsel %vm1222_vm8, %v7844_v27, %v7883_v21  ;;  %v7173_v29 = vrot.slane %v7056_v48, 4  ;;  %v7129_v21 = vpop.f32.mrf.mxu0 }
 0x6c2   : > { %v7933_v36 = vrot.slane %v16707_v24, 4  ;;  %v16804_v38 = vperm.slane %v7772_v58, %v19567_v9  ;;  %v7770_v15 = vsel %vm1222_vm8, %v7769_v43, %v7720_v25  ;;  %v7935_v27 = vrot.slane %v16725_v6, 4 }
 0x6c3   : > { %v16778_v0 = vsel %vm1222_vm8, %v7881_v4, %v7832_v50  ;;  %v6708_v57 = vpop.f32.mrf.mxu1  ;;  %v16795_v50 = vperm.slane %v7760_v33, %v19567_v9  ;;  %v7174_v4 = vsel %vm1222_vm8, %v7173_v29, %v6910_v42  ;;  %v7176_v58 = vsel %vm1222_vm8, %v7056_v48, %v7175_v45 }
 0x6c4   : > { %v7947_v2 = vrot.slane %v6708_v57, 4  ;;  %v7946_v40 = vsel %vm1222_vm8, %v7945_v22, %v6708_v57  ;;  %v7934_v42 = vsel %vm1222_vm8, %v7933_v36, %v16725_v6  ;;  %v7936_v29 = vsel %vm1222_vm8, %v16707_v24, %v7935_v27 }
 0x6c5   : > { %19569 = vst [vmem:[#allocation35_spill] sm:$0xff] %v16795_v50  ;;  %v7180_v33 = vperm.slane %v7174_v4, %v19566_v56  ;;  %v7185_v53 = vrot.slane %v7129_v21, 4  ;;  %v16822_v25 = vperm.slane %v7770_v15, %v19567_v9  ;;  %v7184_v6 = vperm.slane %v7176_v58, %v19566_v56 }
 0x6c6   : > { %v7948_v48 = vsel %vm1222_vm8, %v16749_v63, %v7947_v2  ;;  %v7952_v45 = vperm.slane %v7946_v40, %v19566_v56  ;;  %v7940_v15 = vperm.slane %v7934_v42, %v19566_v56  ;;  %v7944_v22 = vperm.slane %v7936_v29, %v19566_v56 }
 0x6c7   : > { %v16834_v4 = vperm.slane %v7872_v39, %v19567_v9  ;;  %v7223_v43 = vrot.slane %v7180_v33, 4  ;;  %v7287_v63 = vrot.slane %v6912_v20, 4  ;;  %v7956_v2 = vperm.slane %v7948_v48, %v19566_v56 }
 0x6c8   : > { %v7058_v24 = vpop.f32.mrf.mxu2  ;;  %v16840_v40 = vperm.slane %v7870_v14, %v19567_v9  ;;  %v16845_v39 = vperm.slane %v16765_v44, %v19567_v9  ;;  %v7235_v29 = vrot.slane %v7184_v6, 4  ;;  %v7983_v19 = vrot.slane %v7940_v15, 4 }
 0x6c9   : > { %19570 = vst [vmem:[#allocation37_spill] sm:$0xff] %v16834_v4  ;;  %v7131_v41 = vpop.f32.mrf.mxu0  ;;  %v7995_v48 = vrot.slane %v7944_v22, 4  ;;  %v7993_v17 = vrot.slane %v7956_v2, 4 }
 0x6ca   : > { %19571 = vst [vmem:[#allocation23_spill] sm:$0xff] %v16840_v40  ;;  %v7984_v12 = vsel %vm1222_vm8, %v7952_v45, %v7983_v19 }
 0x6cb   : > { %v6983_v57 = vpop.f32.mrf.mxu1  ;;  %19572 = vst [vmem:[#allocation28_spill] sm:$0xff] %v16845_v39 }
 0x6cc   : > { %v7186_v27 = vsel %vm1222_vm8, %v7185_v53, %v6983_v57  ;;  %v7187_v36 = vrot.slane %v6983_v57, 4  ;;  %v7285_v53 = vrot.slane %v7058_v24, 4 }
 0x6cd   : > { %v7192_v11 = vperm.slane %v7186_v27, %v19566_v56  ;;  %v7981_v27 = vrot.slane %v7952_v45, 4  ;;  %v7297_v45 = vrot.slane %v7131_v41, 4 }
 0x6ce   : > { %v7188_v58 = vsel %vm1222_vm8, %v7129_v21, %v7187_v36  ;;  %v7286_v44 = vsel %vm1222_vm8, %v7285_v53, %v6912_v20 }
 0x6cf   : > { %v7196_v57 = vperm.slane %v7188_v58, %v19566_v56  ;;  %v7221_v42 = vrot.slane %v7192_v11, 4  ;;  %v7224_v13 = vsel %vm1222_vm8, %v7192_v11, %v7223_v43  ;;  %v7288_v58 = vsel %vm1222_vm8, %v7058_v24, %v7287_v63 }
 0x6d0   : > { %v7232_v11 = vperm.slane %v7224_v13, %v19567_v9  ;;  %v16858_v43 = vperm.slane %v16778_v0, %v19567_v9  ;;  %v7982_v24 = vsel %vm1222_vm8, %v7981_v27, %v7940_v15  ;;  %v16867_v13 = vperm.slane %v7984_v12, %v19567_v9 }
 0x6d1   : > { %v7222_v21 = vsel %vm1222_vm8, %v7221_v42, %v7180_v33  ;;  %v7233_v36 = vrot.slane %v7196_v57, 4  ;;  %v7236_v5 = vsel %vm1222_vm8, %v7196_v57, %v7235_v29  ;;  %v7996_v57 = vsel %vm1222_vm8, %v7956_v2, %v7995_v48 }
 0x6d2   : > { %v7228_v31 = vperm.slane %v7222_v21, %v19567_v9  ;;  %v7244_v20 = vperm.slane %v7236_v5, %v19567_v9  ;;  %19573 = vst [vmem:[#allocation39_spill] sm:$0xff] %v16867_v13  ;;  %v7994_v0 = vsel %vm1222_vm8, %v7993_v17, %v7944_v22  ;;  %v7292_v53 = vperm.slane %v7286_v44, %v19566_v56  ;;  %v16874_v21 = vpop.f32.mrf.mxu3 }
 0x6d3   : > { %v6985_v63 = vpop.f32.mrf.mxu1  ;;  %v7234_v19 = vsel %vm1222_vm8, %v7233_v36, %v7184_v6  ;;  %v16872_v29 = vperm.slane %v7288_v58, %v19566_v56  ;;  %v7249_v6 = vrot.slane %v7232_v11, 4  ;;  %v16881_v12 = vperm.slane %v7982_v24, %v19567_v9  ;;  %v16892_v44 = vpop.f32.mrf.mxu0 }
 0x6d4   : > { %v7248_v15 = vsel %vm1222_vm8, %v7228_v31, %v7247_v23  ;;  %v7298_v5 = vsel %vm1222_vm8, %v7297_v45, %v6985_v63  ;;  %v7299_v2 = vrot.slane %v6985_v63, 4  ;;  %v16884_v17 = vperm.slane %v7996_v57, %v19567_v9 }
 0x6d5   : > { %19574 = vst [vmem:[#allocation27_spill] sm:$0xff] %v16881_v12  ;;  %v7240_v22 = vperm.slane %v7234_v19, %v19567_v9  ;;  %v7252_v27 = vsel %vm1222_vm8, %v7232_v11, %v7251_v62  ;;  %v7245_v36 = vrot.slane %v7228_v31, 4  ;;  %v7257_v23 = vrot.slane %v7244_v20, 4 }
 0x6d6   : > { %19575 = vst [vmem:[#allocation33_spill] sm:$0xff] %v16884_v17  ;;  %v7304_v58 = vperm.slane %v7298_v5, %v19566_v56  ;;  %v16895_v24 = vperm.slane %v7994_v0, %v19567_v9  ;;  %v8059_v57 = vrot.slane %v7248_v15, 4  ;;  %v7300_v19 = vsel %vm1222_vm8, %v7131_v41, %v7299_v2 }
 0x6d7   : > { %v7335_v45 = vrot.slane %v7292_v53, 4  ;;  %v7347_v33 = vrot.slane %v16872_v29, 4  ;;  %v16902_v62 = vsel %vm1222_vm8, %v7249_v6, %v16650_v61  ;;  %v8057_v31 = vrot.slane %v7252_v27, 4 }
 0x6d8   : > { %19576 = vst [vmem:[#allocation34_spill] sm:$0xff] %v16895_v24  ;;  %v7253_v14 = vrot.slane %v7240_v22, 4  ;;  %v16909_v0 = vsel %vm1222_vm8, %v7244_v20, %v7259_v3  ;;  %v16913_v41 = vsel %vm1222_vm8, %v7245_v36, %v16660_v7  ;;  %v16917_v61 = vsel %vm1222_vm8, %v7257_v23, %v16672_v54 }
 0x6d9   : > { %v7308_v6 = vperm.slane %v7300_v19, %v19566_v56  ;;  %v7333_v2 = vrot.slane %v7304_v58, 4  ;;  %v8045_v11 = vrot.slane %v16902_v62, 4  ;;  %v8060_v42 = vsel %vm1222_vm8, %v7252_v27, %v8059_v57 }
 0x6da   : > { %v8058_v20 = vsel %vm1222_vm8, %v8057_v31, %v7248_v15  ;;  %v8081_v48 = vrot.slane %v16909_v0, 4  ;;  %v7399_v7 = vrot.slane %v16874_v21, 4  ;;  %v7336_v36 = vsel %vm1222_vm8, %v7304_v58, %v7335_v45  ;;  %v16929_v19 = vpop.f32.mrf.mxu3 }
 0x6db   : > { %v7409_v23 = vrot.slane %v16892_v44, 4  ;;  %v16933_v32 = vsel %vm1222_vm8, %v7253_v14, %v16668_v30  ;;  %v8069_v27 = vrot.slane %v16917_v61, 4  ;;  %v16937_v15 = vperm.slane %v8060_v42, %v19566_v56 }
 0x6dc   : > { %v7334_v57 = vsel %vm1222_vm8, %v7333_v2, %v7292_v53  ;;  %v7345_v31 = vrot.slane %v7308_v6, 4  ;;  %v7344_v45 = vperm.slane %v7336_v36, %v19567_v9  ;;  %v16947_v14 = vsel %vm1222_vm8, %v7240_v22, %v7255_v55  ;;  %v16953_v2 = vpop.f32.mrf.mxu0 }
 0x6dd   : > { %v7061_v63 = vpop.f32.mrf.mxu2  ;;  %v8046_v24 = vsel %vm1222_vm8, %v8045_v11, %v16913_v41  ;;  %v7348_v42 = vsel %vm1222_vm8, %v7308_v6, %v7347_v33  ;;  %v7340_v36 = vperm.slane %v7334_v57, %v19567_v9  ;;  %v8070_v55 = vsel %vm1222_vm8, %v8069_v27, %v16933_v32 }
 0x6de   : > { %v7397_v3 = vrot.slane %v7061_v63, 4  ;;  %v7346_v22 = vsel %vm1222_vm8, %v7345_v31, %v16872_v29  ;;  %v8052_v11 = vperm.slane %v8046_v24, %v19566_v56  ;;  %v8082_v6 = vsel %vm1222_vm8, %v8081_v48, %v16947_v14 }
 0x6df   : > { %v6988_v5 = vpop.f32.mrf.mxu1  ;;  %v19577_v17 = vrot.slane %v16677_v1, 4  ;;  %v8088_v29 = vperm.slane %v8082_v6, %v19566_v56  ;;  %v16976_v24 = vperm.slane %v7346_v22, %v19567_v9  ;;  %v7357_v48 = vrot.slane %v7340_v36, 4 }
 0x6e0   : > { %v7398_v58 = vsel %vm1222_vm8, %v7397_v3, %v16874_v21  ;;  %v7410_v21 = vsel %vm1222_vm8, %v7409_v23, %v6988_v5  ;;  %v8064_v3 = vperm.slane %v8058_v20, %v19566_v56  ;;  %v7411_v33 = vrot.slane %v6988_v5, 4 }
 0x6e1   : > { %v7404_v54 = vperm.slane %v7398_v58, %v19566_v56  ;;  %v7416_v30 = vperm.slane %v7410_v21, %v19566_v56  ;;  %v7361_v23 = vrot.slane %v7344_v45, 4  ;;  %v7521_v20 = vrot.slane %v16953_v2, 4 }
 0x6e2   : > { %v7356_v21 = vperm.slane %v7348_v42, %v19567_v9  ;;  %v16972_v27 = vsel %vm1222_vm8, %v7344_v45, %v19577_v17  ;;  %v8093_v5 = vrot.slane %v8064_v3, 4  ;;  %v7400_v31 = vsel %vm1222_vm8, %v7061_v63, %v7399_v7 }
 0x6e3   : > { %v7447_v58 = vrot.slane %v7404_v54, 4  ;;  %v7445_v53 = vrot.slane %v7416_v30, 4  ;;  %v7412_v17 = vsel %vm1222_vm8, %v16892_v44, %v7411_v33  ;;  %v16995_v22 = vsel %vm1222_vm8, %v7361_v23, %v16677_v1 }
 0x6e4   : > { %v8076_v63 = vperm.slane %v8070_v55, %v19566_v56  ;;  %v8094_v7 = vsel %vm1222_vm8, %v8093_v5, %v8052_v11  ;;  %v7408_v44 = vperm.slane %v7400_v31, %v19566_v56  ;;  %v19580_v6 = vrot.slane %v16685_v28, 4 }
 0x6e5   : > { %v7448_v57 = vsel %vm1222_vm8, %v7416_v30, %v7447_v58  ;;  %v7446_v12 = vsel %vm1222_vm8, %v7445_v53, %v7404_v54  ;;  %v19578_v58 = vrot.slane %v16682_v47, 4  ;;  %v8117_v54 = vrot.slane %v8088_v29, 4 }
 0x6e6   : > { %v16988_v45 = vperm.slane %v7446_v12, %v19567_v9  ;;  %v16991_v30 = vperm.slane %v7448_v57, %v19567_v9  ;;  %v7369_v53 = vrot.slane %v7356_v21, 4  ;;  %v19579_v12 = vrot.slane %v16712_v37, 4 }
 0x6e7   : > { %v16983_v42 = vsel %vm1222_vm8, %v7340_v36, %v19578_v58  ;;  %v17010_v1 = vsel %vm1222_vm8, %v7356_v21, %v19580_v6  ;;  %v7420_v55 = vperm.slane %v7412_v17, %v19566_v56  ;;  %v8095_v57 = vrot.slane %v8052_v11, 4  ;;  %v7063_v21 = vpop.f32.mrf.mxu2  ;;  %v6990_v13 = vpop.f32.mrf.mxu1 }
 0x6e8   : > { %v17005_v33 = vsel %vm1222_vm8, %v16988_v45, %v19579_v12  ;;  %v8171_v31 = vrot.slane %v16983_v42, 4  ;;  %v19581_v58 = vrot.slane %v16700_v18, 4  ;;  %v17023_v36 = vperm.slane %v8094_v7, %v19567_v9 }
 0x6e9   : > { %v8283_v23 = vrot.slane %v17005_v33, 4  ;;  %v17027_v17 = vsel %vm1222_vm8, %v7357_v48, %v16682_v47  ;;  %v8118_v5 = vsel %vm1222_vm8, %v8117_v54, %v8076_v63  ;;  %v7459_v59 = vrot.slane %v7408_v44, 4 }
 0x6ea   : > { %v17020_v12 = vsel %vm1222_vm8, %v16991_v30, %v19581_v58  ;;  %19582 = vst [vmem:[#allocation30_spill] sm:$0xff] %v17023_v36  ;;  %v8071_v58 = vrot.slane %v16933_v32, 4  ;;  %v17037_v7 = vperm.slane %v8118_v5, %v19567_v9  ;;  %v8143_v40 = vrot.slane %v17023_v36, 4 }
 0x6eb   : > { %v17032_v6 = vsel %vm1222_vm8, %v17020_v12, %v8283_v23  ;;  %v7457_v4 = vrot.slane %v7420_v55, 4  ;;  %v8096_v47 = vsel %vm1222_vm8, %v8064_v3, %v8095_v57  ;;  %v8119_v48 = vrot.slane %v8076_v63, 4 }
 0x6ec   : > { %v7509_v11 = vrot.slane %v7063_v21, 4  ;;  %v7460_v39 = vsel %vm1222_vm8, %v7420_v55, %v7459_v59  ;;  %v8144_v23 = vsel %vm1222_vm8, %v17037_v7, %v8143_v40  ;;  %v8104_v54 = vperm.slane %v8096_v47, %v19567_v9 }
 0x6ed   : > { %v7522_v50 = vsel %vm1222_vm8, %v7521_v20, %v6990_v13  ;;  %v8083_v32 = vrot.slane %v16947_v14, 4  ;;  %8949 = vrot.lane.b32.xlu0 %v8144_v23, %s11485_s30  ;;  %v8120_v5 = vsel %vm1222_vm8, %v8088_v29, %v8119_v48  ;;  %v7523_v63 = vrot.slane %v6990_v13, 4 }
 0x6ee   : > { %v7510_v3 = vsel %vm1222_vm8, %v7509_v11, %v16929_v19  ;;  %v17053_v59 = vsel %vm1222_vm8, %v7369_v53, %v16685_v28  ;;  %v8193_v40 = vrot.slane %v17010_v1, 4  ;;  %v8128_v55 = vperm.slane %v8120_v5, %v19567_v9 }
 0x6ef   : > { %v8147_v57 = vrot.slane %v8104_v54, 4  ;;  %v7458_v20 = vsel %vm1222_vm8, %v7457_v4, %v7408_v44  ;;  %v7468_v14 = vperm.slane %v7460_v39, %v19567_v9  ;;  %v7473_v47 = vrot.slane %v16991_v30, 4 }
 0x6f0   : > { %v7528_v29 = vperm.slane %v7522_v50, %v19566_v56  ;;  %v7469_v11 = vrot.slane %v16988_v45, 4  ;;  %v7516_v28 = vperm.slane %v7510_v3, %v19566_v56  ;;  %v8145_v53 = vrot.slane %v8128_v55, 4 }
 0x6f1   : > { %v8148_v13 = vsel %vm1222_vm8, %v8128_v55, %v8147_v57  ;;  %v19583_v48 = vrot.slane %v16929_v19, 4  ;;  %v7524_v4 = vsel %vm1222_vm8, %v16953_v2, %v7523_v63  ;;  %v8072_v39 = vsel %vm1222_vm8, %v16917_v61, %v8071_v58  ;;  %v17091_v58 = vpop.f32.mrf.mxu3 }
 0x6f2   : > { %9013 = vrot.lane.b32.xlu2 %v8148_v13, %s11482_s22  ;;  %v8084_v50 = vsel %vm1222_vm8, %v16909_v0, %v8083_v32  ;;  %v8159_v45 = vrot.slane %v17027_v17, 4  ;;  %v17077_v30 = vsel %vm1222_vm8, %v16972_v27, %v8171_v31  ;;  %v8146_v44 = vsel %vm1222_vm8, %v8145_v53, %v8104_v54 }
 0x6f3   : > { %v7512_v23 = vsel %vm1222_vm8, %v7063_v21, %v19583_v48  ;;  %v19584_v19 = vrot.slane %v16913_v41, 4  ;;  %v17085_v2 = vperm.slane %v7458_v20, %v19567_v9  ;;  %v17089_v61 = vsel %vm1222_vm8, %v7473_v47, %v16700_v18  ;;  %8981 = vrot.lane.b32.xlu1 %v8146_v44, %s11483_s23  ;;  %v17111_v47 = vpop.f32.mrf.mxu0 }
 0x6f4   : > { %v7481_v0 = vrot.slane %v7468_v14, 4  ;;  %v7557_v31 = vrot.slane %v7528_v29, 4  ;;  %v19585_v54 = vrot.slane %v16719_v52, 4  ;;  %v7559_v32 = vrot.slane %v7516_v28, 4 }
 0x6f5   : > { %v8048_v21 = vsel %vm1222_vm8, %v16902_v62, %v19584_v19  ;;  %v7520_v62 = vperm.slane %v7512_v23, %v19566_v56  ;;  %v7532_v5 = vperm.slane %v7524_v4, %v19566_v56  ;;  %v8181_v3 = vrot.slane %v17053_v59, 4  ;;  %v6993_v23 = vpop.f32.mrf.mxu1 }
 0x6f6   : > { %v17097_v41 = vsel %vm1222_vm8, %v7468_v14, %v19585_v54  ;;  %v17104_v18 = vsel %vm1222_vm8, %v7469_v11, %v16712_v37  ;;  %v8056_v63 = vperm.slane %v8048_v21, %v19566_v56  ;;  %v8092_v55 = vperm.slane %v8084_v50, %v19566_v56 }
 0x6f7   : > { %v7623_v14 = vrot.slane %v17091_v58, 4  ;;  %v8080_v13 = vperm.slane %v8072_v39, %v19566_v56  ;;  %v17117_v37 = vsel %vm1222_vm8, %v7481_v0, %v16719_v52  ;;  %v7558_v48 = vsel %vm1222_vm8, %v7557_v31, %v7516_v28 }
 0x6f8   : > { %v7571_v50 = vrot.slane %v7520_v62, 4  ;;  %v7560_v44 = vsel %vm1222_vm8, %v7528_v29, %v7559_v32  ;;  %v7569_v19 = vrot.slane %v7532_v5, 4  ;;  %v7633_v21 = vrot.slane %v17111_v47, 4 }
 0x6f9   : > { %v8105_v39 = vrot.slane %v16937_v15, 4  ;;  %v8129_v54 = vrot.slane %v8092_v55, 4  ;;  %v8107_v20 = vrot.slane %v8056_v63, 4  ;;  %v17126_v52 = vperm.slane %v7558_v48, %v19567_v9 }
 0x6fa   : > { %v7572_v0 = vsel %vm1222_vm8, %v7532_v5, %v7571_v50  ;;  %v8131_v11 = vrot.slane %v8080_v13, 4  ;;  %v7635_v28 = vrot.slane %v6993_v23, 4  ;;  %v17130_v31 = vperm.slane %v7560_v44, %v19567_v9 }
 0x6fb   : > { %v8106_v4 = vsel %vm1222_vm8, %v8105_v39, %v8056_v63  ;;  %v8130_v29 = vsel %vm1222_vm8, %v8129_v54, %v8080_v13  ;;  %v8108_v32 = vsel %vm1222_vm8, %v16937_v15, %v8107_v20  ;;  %v7570_v57 = vsel %vm1222_vm8, %v7569_v19, %v7520_v62 }
 0x6fc   : > { %v8112_v53 = vperm.slane %v8106_v4, %v19567_v9  ;;  %v8136_v48 = vperm.slane %v8130_v29, %v19567_v9  ;;  %v8132_v5 = vsel %vm1222_vm8, %v8092_v55, %v8131_v11  ;;  %v17141_v50 = vperm.slane %v7572_v0, %v19567_v9  ;;  %v7066_v29 = vpop.f32.mrf.mxu2 }
 0x6fd   : > { %v8140_v44 = vperm.slane %v8132_v5, %v19567_v9  ;;  %v7636_v63 = vsel %vm1222_vm8, %v17111_v47, %v7635_v28  ;;  %v19586_v13 = vrot.slane %v16976_v24, 4  ;;  %v8116_v20 = vperm.slane %v8108_v32, %v19567_v9 }
 0x6fe   : > { %v8151_v62 = vrot.slane %v8112_v53, 4  ;;  %v8149_v4 = vrot.slane %v8136_v48, 4  ;;  %v19587_v55 = vrot.slane %v16692_v51, 4  ;;  %v19588_v47 = vrot.slane %v16995_v22, 4 }
 0x6ff   : > { %v17150_v15 = vsel %vm1222_vm8, %v19586_v13, %v16692_v51  ;;  %v8153_v19 = vrot.slane %v8140_v44, 4  ;;  %v19589_v54 = vrot.slane %v16972_v27, 4  ;;  %v7644_v32 = vperm.slane %v7636_v63, %v19566_v56 }
 0x700   : > { %v17157_v11 = vsel %vm1222_vm8, %v16976_v24, %v19587_v55  ;;  %v8158_v39 = vsel %vm1222_vm8, %v19588_v47, %v17027_v17  ;;  %v8182_v28 = vsel %vm1222_vm8, %v8181_v3, %v17150_v15  ;;  %v8152_v51 = vsel %vm1222_vm8, %v8136_v48, %v8151_v62 }
 0x701   : > { %v8170_v0 = vsel %vm1222_vm8, %v19589_v54, %v16983_v42  ;;  %v8150_v24 = vsel %vm1222_vm8, %v8149_v4, %v8112_v53  ;;  %v8164_v5 = vperm.slane %v8158_v39, %v19566_v56  ;;  %v7581_v13 = vrot.slane %v17126_v52, 4  ;;  %9077 = vrot.lane.b32.xlu0 %v8152_v51, %s18940_s21 }
 0x702   : > { %v8154_v27 = vsel %vm1222_vm8, %v8153_v19, %v8116_v20  ;;  %9045 = vrot.lane.b32.xlu1 %v8150_v24, %s11480_s19  ;;  %v8176_v42 = vperm.slane %v8170_v0, %v19566_v56  ;;  %v8188_v3 = vperm.slane %v8182_v28, %v19566_v56  ;;  %v8194_v53 = vsel %vm1222_vm8, %v8193_v40, %v17157_v11 }
 0x703   : > { %9109 = vrot.lane.b32.xlu2 %v8154_v27, %s11479_s0  ;;  %v8207_v48 = vrot.slane %v8164_v5, 4  ;;  %v7621_v63 = vrot.slane %v7066_v29, 4  ;;  %v7624_v62 = vsel %vm1222_vm8, %v7066_v29, %v7623_v14  ;;  %v8200_v4 = vperm.slane %v8194_v53, %v19566_v56 }
 0x704   : > { %v8231_v55 = vrot.slane %v8188_v3, 4  ;;  %v8205_v19 = vrot.slane %v8176_v42, 4  ;;  %v7632_v47 = vperm.slane %v7624_v62, %v19566_v56  ;;  %v17188_v39 = vperm.slane %v7570_v57, %v19567_v9 }
 0x705   : > { %v19590_v54 = vrot.slane %v16742_v16, 4  ;;  %v8208_v40 = vsel %vm1222_vm8, %v8176_v42, %v8207_v48  ;;  %v8155_v28 = vrot.slane %v8116_v20, 4  ;;  %v7681_v51 = vrot.slane %v7644_v32, 4 }
 0x706   : > { %v8232_v14 = vsel %vm1222_vm8, %v8200_v4, %v8231_v55  ;;  %v8206_v29 = vsel %vm1222_vm8, %v8205_v19, %v8164_v5  ;;  %v8229_v24 = vrot.slane %v8200_v4, 4  ;;  %v7634_v27 = vsel %vm1222_vm8, %v7633_v21, %v6993_v23 }
 0x707   : > { %v17194_v0 = vsel %vm1222_vm8, %v17126_v52, %v19590_v54  ;;  %v8240_v57 = vperm.slane %v8232_v14, %v19567_v9  ;;  %v17202_v53 = vperm.slane %v8206_v29, %v19567_v9  ;;  %v7622_v52 = vsel %vm1222_vm8, %v7621_v63, %v17091_v58 }
 0x708   : > { %v8216_v62 = vperm.slane %v8208_v40, %v19567_v9  ;;  %v8230_v20 = vsel %vm1222_vm8, %v8229_v24, %v8188_v3  ;;  %v7682_v42 = vsel %vm1222_vm8, %v7681_v51, %v7632_v47  ;;  %v7683_v48 = vrot.slane %v7632_v47, 4 }
 0x709   : > { %19591 = vst [vmem:[#allocation87_spill] sm:$0xff] %v17202_v53  ;;  %v8257_v55 = vrot.slane %v8240_v57, 4  ;;  %v17210_v5 = vperm.slane %v8230_v20, %v19567_v9  ;;  %v8255_v23 = vrot.slane %v17202_v53, 4  ;;  %v8156_v21 = vsel %vm1222_vm8, %v8140_v44, %v8155_v28 }
 0x70a   : > { %v7585_v4 = vrot.slane %v17130_v31, 4  ;;  %v19593_v19 = vrot.slane %v16736_v60, 4  ;;  %v7640_v3 = vperm.slane %v7634_v27, %v19566_v56  ;;  %v7684_v63 = vsel %vm1222_vm8, %v7644_v32, %v7683_v48  ;;  %9141 = vrot.lane.b32.xlu1 %v8156_v21, %s18907_s20 }
 0x70b   : > { %19592 = vst [vmem:[#allocation67_spill] sm:$0xff] %v17210_v5  ;;  %v8258_v47 = vsel %vm1222_vm8, %v8257_v55, %v8216_v62  ;;  %v8256_v54 = vsel %vm1222_vm8, %v17210_v5, %v8255_v23  ;;  %v17228_v44 = vperm.slane %v7682_v42, %v19567_v9  ;;  %v17231_v40 = vperm.slane %v7684_v63, %v19567_v9  ;;  %v7141_v42 = vpop.f32.mrf.mxu0  ;;  %v6995_v23 = vpop.f32.mrf.mxu1 }
 0x70c   : > { %v17219_v58 = vsel %vm1222_vm8, %v17130_v31, %v19593_v19  ;;  %v17235_v31 = vperm.slane %v17032_v6, %v19566_v56  ;;  %v17239_v32 = vsel %vm1222_vm8, %v7581_v13, %v16742_v16  ;;  %v8395_v28 = vrot.slane %v17194_v0, 4  ;;  %8983 = vrot.lane.b32.xlu0 %v8258_v47, %s11483_s23  ;;  %8951 = vrot.lane.b32.xlu2 %v8256_v54, %s11485_s30  ;;  %v6922_v16 = vpop.f32.mrf.mxu3 }
 0x70d   : > { %v7628_v51 = vperm.slane %v7622_v52, %v19566_v56  ;;  %v7593_v29 = vrot.slane %v17141_v50, 4  ;;  %v19594_v24 = vrot.slane %v16761_v35, 4  ;;  %v19595_v13 = vrot.slane %v16786_v10, 4 }
 0x70e   : > { %v8393_v20 = vrot.slane %v17219_v58, 4  ;;  %v7669_v52 = vrot.slane %v7640_v3, 4  ;;  %v8195_v48 = vrot.slane %v17157_v11, 4  ;;  %v19596_v63 = vrot.slane %v16792_v49, 4 }
 0x70f   : > { %v17251_v6 = vsel %vm1222_vm8, %v17141_v50, %v19594_v24  ;;  %v17257_v27 = vsel %vm1222_vm8, %v17231_v40, %v19595_v13  ;;  %v17264_v50 = vsel %vm1222_vm8, %v7585_v4, %v16736_v60  ;;  %v17276_v11 = vsel %vm1222_vm8, %v17219_v58, %v8395_v28 }
 0x710   : > { %v8529_v55 = vrot.slane %v17257_v27, 4  ;;  %v17272_v47 = vsel %vm1222_vm8, %v17228_v44, %v19596_v63  ;;  %v7670_v54 = vsel %vm1222_vm8, %v7669_v52, %v7628_v51  ;;  %v7671_v24 = vrot.slane %v7628_v51, 4  ;;  %v7068_v52 = vpop.f32.mrf.mxu2 }
 0x711   : > { %v7735_v4 = vrot.slane %v6922_v16, 4  ;;  %v7745_v13 = vrot.slane %v7141_v42, 4  ;;  %v7747_v19 = vrot.slane %v6995_v23, 4  ;;  %v8259_v21 = vrot.slane %v8216_v62, 4 }
 0x712   : > { %v17281_v60 = vsel %vm1222_vm8, %v8529_v55, %v17272_v47  ;;  %v8160_v63 = vsel %vm1222_vm8, %v16995_v22, %v8159_v45  ;;  %v8180_v58 = vperm.slane %v17077_v30, %v19566_v56  ;;  %v8183_v28 = vrot.slane %v17150_v15, 4 }
 0x713   : > { %v8196_v51 = vsel %vm1222_vm8, %v17010_v1, %v8195_v48  ;;  %v17293_v55 = vperm.slane %v7670_v54, %v19567_v9  ;;  %v8260_v14 = vsel %vm1222_vm8, %v8240_v57, %v8259_v21  ;;  %v8168_v62 = vperm.slane %v8160_v63, %v19566_v56 }
 0x714   : > { %v17298_v17 = vperm.slane %v8196_v51, %v19566_v56  ;;  %v7672_v22 = vsel %vm1222_vm8, %v7640_v3, %v7671_v24  ;;  %v7701_v45 = vrot.slane %v17228_v44, 4  ;;  %9015 = vrot.lane.b32.xlu0 %v8260_v14, %s11482_s22  ;;  %v8184_v1 = vsel %vm1222_vm8, %v17053_v59, %v8183_v28 }
 0x715   : > { %v8217_v30 = vrot.slane %v8180_v58, 4  ;;  %v7748_v15 = vsel %vm1222_vm8, %v7141_v42, %v7747_v19  ;;  %v8192_v48 = vperm.slane %v8184_v1, %v19566_v56  ;;  %v7733_v21 = vrot.slane %v7068_v52, 4 }
 0x716   : > { %v8241_v57 = vrot.slane %v17298_v17, 4  ;;  %v17310_v54 = vsel %vm1222_vm8, %v7593_v29, %v16761_v35  ;;  %v7746_v44 = vsel %vm1222_vm8, %v7745_v13, %v6995_v23  ;;  %v7680_v59 = vperm.slane %v7672_v22, %v19567_v9 }
 0x717   : > { %v8218_v14 = vsel %vm1222_vm8, %v8217_v30, %v8168_v62  ;;  %v7705_v24 = vrot.slane %v17231_v40, 4  ;;  %v7736_v19 = vsel %vm1222_vm8, %v7068_v52, %v7735_v4  ;;  %v17321_v63 = vsel %vm1222_vm8, %v8393_v20, %v17194_v0 }
 0x718   : > { %v8242_v42 = vsel %vm1222_vm8, %v8241_v57, %v8192_v48  ;;  %v7756_v35 = vperm.slane %v7748_v15, %v19566_v56  ;;  %v8224_v29 = vperm.slane %v8218_v14, %v19567_v9  ;;  %v19597_v28 = vrot.slane %v16782_v34, 4 }
 0x719   : > { %v8248_v23 = vperm.slane %v8242_v42, %v19567_v9  ;;  %v17335_v4 = vsel %vm1222_vm8, %v7701_v45, %v16792_v49  ;;  %v7734_v0 = vsel %vm1222_vm8, %v7733_v21, %v6922_v16  ;;  %v7752_v20 = vperm.slane %v7746_v44, %v19566_v56  ;;  %v6925_v21 = vpop.f32.mrf.mxu3 }
 0x71a   : > { %v17331_v40 = vsel %vm1222_vm8, %v17293_v55, %v19597_v28  ;;  %v7744_v52 = vperm.slane %v7736_v19, %v19566_v56  ;;  %v8219_v22 = vrot.slane %v8168_v62, 4  ;;  %v7697_v30 = vrot.slane %v7680_v59, 4  ;;  %v7071_v62 = vpop.f32.mrf.mxu2 }
 0x71b   : > { %v8261_v51 = vrot.slane %v8248_v23, 4  ;;  %v19598_v15 = vrot.slane %v16772_v46, 4  ;;  %v17348_v49 = vsel %vm1222_vm8, %v7705_v24, %v16786_v10  ;;  %v7793_v45 = vrot.slane %v7756_v35, 4 }
 0x71c   : > { %v7740_v44 = vperm.slane %v7734_v0, %v19566_v56  ;;  %v8263_v14 = vrot.slane %v8224_v29, 4  ;;  %v8243_v28 = vrot.slane %v8192_v48, 4  ;;  %v7781_v10 = vrot.slane %v7752_v20, 4 }
 0x71d   : > { %v17344_v57 = vsel %vm1222_vm8, %v7680_v59, %v19598_v15  ;;  %v8262_v16 = vsel %vm1222_vm8, %v8261_v51, %v8224_v29  ;;  %v17356_v59 = vpop.f32.mrf.mxu1  ;;  %v7794_v24 = vsel %vm1222_vm8, %v7793_v45, %v7744_v52  ;;  %v7795_v15 = vrot.slane %v7744_v52, 4 }
 0x71e   : > { %9047 = vrot.lane.b32.xlu2 %v8262_v16, %s11480_s19  ;;  %v8220_v51 = vsel %vm1222_vm8, %v8180_v58, %v8219_v22  ;;  %v17362_v29 = vsel %vm1222_vm8, %v7697_v30, %v16772_v46  ;;  %v7847_v19 = vrot.slane %v6925_v21, 4  ;;  %v7782_v16 = vsel %vm1222_vm8, %v7781_v10, %v7740_v44 }
 0x71f   : > { %v7815_v48 = vrot.slane %v16822_v25, 4  ;;  %v8264_v1 = vsel %vm1222_vm8, %v8248_v23, %v8263_v14  ;;  %v7859_v52 = vrot.slane %v17356_v59, 4  ;;  %v7783_v45 = vrot.slane %v7740_v44, 4 }
 0x720   : > { %v7800_v58 = vperm.slane %v7794_v24, %v19567_v9  ;;  %9079 = vrot.lane.b32.xlu1 %v8264_v1, %s18940_s21  ;;  %v8228_v46 = vperm.slane %v8220_v51, %v19567_v9  ;;  %v8244_v22 = vsel %vm1222_vm8, %v17298_v17, %v8243_v28  ;;  %v7796_v30 = vsel %vm1222_vm8, %v7756_v35, %v7795_v15 }
 0x721   : > { %v8252_v10 = vperm.slane %v8244_v22, %v19567_v9  ;;  %v7845_v42 = vrot.slane %v7071_v62, 4  ;;  %v7848_v0 = vsel %vm1222_vm8, %v7071_v62, %v7847_v19  ;;  %v19599_v44 = vrot.slane %v17085_v2, 4 }
 0x722   : > { %v8267_v23 = vrot.slane %v8228_v46, 4  ;;  %v19600_v1 = vrot.slane %v16730_v8, 4  ;;  %v19601_v17 = vrot.slane %v17089_v61, 4  ;;  %v7856_v62 = vperm.slane %v7848_v0, %v19566_v56 }
 0x723   : > { %v17382_v14 = vsel %vm1222_vm8, %v19599_v44, %v16730_v8  ;;  %v8265_v28 = vrot.slane %v8252_v10, 4  ;;  %v19602_v15 = vrot.slane %v17020_v12, 4  ;;  %v7784_v8 = vsel %vm1222_vm8, %v7752_v20, %v7783_v45 }
 0x724   : > { %v17388_v24 = vsel %vm1222_vm8, %v17085_v2, %v19600_v1  ;;  %v8270_v35 = vsel %vm1222_vm8, %v19601_v17, %v17104_v18  ;;  %v7788_v2 = vperm.slane %v7782_v16, %v19567_v9  ;;  %v8268_v22 = vsel %vm1222_vm8, %v8252_v10, %v8267_v23  ;;  %v7144_v1 = vpop.f32.mrf.mxu0 }
 0x725   : > { %v8276_v19 = vperm.slane %v8270_v35, %v19566_v56  ;;  %v8282_v51 = vsel %vm1222_vm8, %v19602_v15, %v17005_v33  ;;  %v7804_v17 = vperm.slane %v7796_v30, %v19567_v9  ;;  %v8266_v0 = vsel %vm1222_vm8, %v8265_v28, %v8228_v46  ;;  %v7000_v53 = vpop.f32.mrf.mxu1 }
 0x726   : > { %v8288_v44 = vperm.slane %v8282_v51, %v19566_v56  ;;  %9143 = vrot.lane.b32.xlu2 %v8268_v22, %s18907_s20  ;;  %v19603_v12 = vrot.slane %v17117_v37, 4  ;;  %v19604_v20 = vrot.slane %v17097_v41, 4  ;;  %v7813_v45 = vrot.slane %v7800_v58, 4  ;;  %9111 = vrot.lane.b32.xlu0 %v8266_v0, %s11479_s0 }
 0x727   : > { %v8319_v46 = vrot.slane %v8276_v19, 4  ;;  %v7846_v23 = vsel %vm1222_vm8, %v7845_v42, %v6925_v21  ;;  %v7907_v35 = vrot.slane %v7856_v62, 4  ;;  %v7860_v28 = vsel %vm1222_vm8, %v7144_v1, %v7859_v52 }
 0x728   : > { %v8294_v33 = vsel %vm1222_vm8, %v19603_v12, %v17382_v14  ;;  %v8306_v16 = vsel %vm1222_vm8, %v19604_v20, %v17388_v24  ;;  %v8317_v15 = vrot.slane %v8288_v44, 4  ;;  %v7868_v12 = vperm.slane %v7860_v28, %v19566_v56 }
 0x729   : > { %v8300_v10 = vperm.slane %v8294_v33, %v19566_v56  ;;  %v8312_v30 = vperm.slane %v8306_v16, %v19566_v56  ;;  %v8320_v51 = vsel %vm1222_vm8, %v8288_v44, %v8319_v46  ;;  %v7857_v0 = vrot.slane %v7144_v1, 4 }
 0x72a   : > { %v17423_v13 = vperm.slane %v8320_v51, %v19567_v9  ;;  %v8318_v33 = vsel %vm1222_vm8, %v8317_v15, %v8276_v19  ;;  %v19605_v16 = vrot.slane %v17104_v18, 4  ;;  %v17431_v42 = vperm.slane %v7784_v8, %v19567_v9 }
 0x72b   : > { %v8343_v22 = vrot.slane %v8300_v10, 4  ;;  %v8341_v20 = vrot.slane %v8312_v30, 4  ;;  %v7805_v52 = vrot.slane %v7788_v2, 4  ;;  %v7905_v46 = vrot.slane %v7868_v12, 4 }
 0x72c   : > { %v8272_v21 = vsel %vm1222_vm8, %v17089_v61, %v19605_v16  ;;  %v8371_v51 = vrot.slane %v17423_v13, 4  ;;  %v7908_v1 = vsel %vm1222_vm8, %v7868_v12, %v7907_v35  ;;  %v17440_v19 = vperm.slane %v8318_v33, %v19567_v9 }
 0x72d   : > { %v8344_v44 = vsel %vm1222_vm8, %v8312_v30, %v8343_v22  ;;  %v19607_v18 = vrot.slane %v16800_v26, 4  ;;  %v17448_v8 = vperm.slane %v7846_v23, %v19566_v56  ;;  %v7906_v30 = vsel %vm1222_vm8, %v7905_v46, %v7856_v62 }
 0x72e   : > { %v17435_v28 = vperm.slane %v8344_v44, %v19567_v9  ;;  %19606 = vst [vmem:[#allocation73_spill] sm:$0xff] %v17440_v19  ;;  %v8342_v15 = vsel %vm1222_vm8, %v8341_v20, %v8300_v10  ;;  %v7817_v22 = vrot.slane %v7804_v17, 4  ;;  %v7858_v35 = vsel %vm1222_vm8, %v7857_v0, %v17356_v59 }
 0x72f   : > { %v17445_v61 = vsel %vm1222_vm8, %v7788_v2, %v19607_v18  ;;  %v17457_v12 = vperm.slane %v7906_v30, %v19567_v9  ;;  %v17461_v2 = vsel %vm1222_vm8, %v7813_v45, %v16822_v25  ;;  %v17466_v62 = vsel %vm1222_vm8, %v7800_v58, %v7815_v48  ;;  %v7073_v18 = vpop.f32.mrf.mxu2 }
 0x730   : > { %v8372_v16 = vsel %vm1222_vm8, %v17435_v28, %v8371_v51  ;;  %v17470_v10 = vperm.slane %v7908_v1, %v19567_v9  ;;  %v8367_v23 = vrot.slane %v17440_v19, 4  ;;  %v17475_v59 = vsel %vm1222_vm8, %v7805_v52, %v16800_v26  ;;  %v19611_v52 = vld [vmem:[#allocation35_spill] sm:$0xff]  ;;  %v6927_v1 = vpop.f32.mrf.mxu3 }
 0x731   : > { %9017 = vrot.lane.b32.xlu1 %v8372_v16, %s11482_s22  ;;  %v19608_v20 = vrot.slane %v16804_v38, 4  ;;  %v8307_v48 = vrot.slane %v17388_v24, 4  ;;  %v7895_v58 = vrot.slane %v17448_v8, 4  ;;  %v7864_v0 = vperm.slane %v7858_v35, %v19566_v56  ;;  %v19613_v16 = vld [vmem:[#allocation28_spill] sm:$0xff] }
 0x732   : > { %v19609_v33 = vrot.slane %v16858_v43, 4  ;;  %v17493_v26 = vperm.slane %v8342_v15, %v19567_v9  ;;  %v19612_v46 = vrot.slane %v19611_v52, 4  ;;  %v17504_v51 = vsel %vm1222_vm8, %v7817_v22, %v16804_v38 }
 0x733   : > { %v17480_v45 = vsel %vm1222_vm8, %v7804_v17, %v19608_v20  ;;  %v7809_v17 = vrot.slane %v17431_v42, 4  ;;  %v19614_v15 = vrot.slane %v19613_v16, 4  ;;  %v8280_v38 = vperm.slane %v8272_v21, %v19566_v56 }
 0x734   : > { %v17490_v44 = vsel %vm1222_vm8, %v17457_v12, %v19609_v33  ;;  %19610 = vst [vmem:[#allocation72_spill] sm:$0xff] %v17493_v26  ;;  %v17500_v24 = vsel %vm1222_vm8, %v17431_v42, %v19612_v46  ;;  %v8368_v42 = vsel %vm1222_vm8, %v17493_v26, %v8367_v23  ;;  %v8295_v22 = vrot.slane %v17382_v14, 4 }
 0x735   : > { %v17512_v35 = vsel %vm1222_vm8, %v17470_v10, %v19614_v15  ;;  %v8755_v20 = vrot.slane %v17490_v44, 4  ;;  %8953 = vrot.lane.b32.xlu0 %v8368_v42, %s11485_s30  ;;  %v8308_v33 = vsel %vm1222_vm8, %v17097_v41, %v8307_v48  ;;  %v8329_v46 = vrot.slane %v17235_v31, 4  ;;  %v7146_v48 = vpop.f32.mrf.mxu0 }
 0x736   : > { %v7896_v15 = vsel %vm1222_vm8, %v7864_v0, %v7895_v58  ;;  %v8316_v23 = vperm.slane %v8308_v33, %v19566_v56  ;;  %v7957_v30 = vrot.slane %v7073_v18, 4  ;;  %v8296_v14 = vsel %vm1222_vm8, %v17117_v37, %v8295_v22 }
 0x737   : > { %v17526_v25 = vsel %vm1222_vm8, %v17512_v35, %v8755_v20  ;;  %v8330_v41 = vsel %vm1222_vm8, %v8329_v46, %v8280_v38  ;;  %v7893_v3 = vrot.slane %v7864_v0, 4  ;;  %v8304_v58 = vperm.slane %v8296_v14, %v19566_v56 }
 0x738   : > { %v8336_v19 = vperm.slane %v8330_v41, %v19567_v9  ;;  %v8353_v20 = vrot.slane %v8316_v23, 4  ;;  %v7959_v26 = vrot.slane %v6927_v1, 4  ;;  %v7904_v33 = vperm.slane %v7896_v15, %v19567_v9 }
 0x739   : > { %v7958_v42 = vsel %vm1222_vm8, %v7957_v30, %v6927_v1  ;;  %v8331_v5 = vrot.slane %v8280_v38, 4  ;;  %v8355_v37 = vrot.slane %v8304_v58, 4  ;;  %v7969_v22 = vrot.slane %v7146_v48, 4 }
 0x73a   : > { %v8354_v21 = vsel %vm1222_vm8, %v8353_v20, %v8304_v58  ;;  %v8375_v36 = vrot.slane %v8336_v19, 4  ;;  %v17541_v0 = vsel %vm1222_vm8, %v7809_v17, %v19611_v52  ;;  %v7960_v14 = vsel %vm1222_vm8, %v7073_v18, %v7959_v26 }
 0x73b   : > { %v8360_v46 = vperm.slane %v8354_v21, %v19567_v9  ;;  %v8332_v41 = vsel %vm1222_vm8, %v17235_v31, %v8331_v5  ;;  %v7971_v15 = vrot.slane %v7000_v53, 4  ;;  %v7894_v1 = vsel %vm1222_vm8, %v7893_v3, %v17448_v8 }
 0x73c   : > { %v17550_v30 = vperm.slane %v7958_v42, %v19566_v56  ;;  %v8356_v38 = vsel %vm1222_vm8, %v8316_v23, %v8355_v37  ;;  %v8369_v21 = vrot.slane %v17435_v28, 4  ;;  %v7921_v26 = vrot.slane %v7904_v33, 4 }
 0x73d   : > { %v8376_v58 = vsel %vm1222_vm8, %v8360_v46, %v8375_v36  ;;  %v8364_v17 = vperm.slane %v8356_v38, %v19567_v9  ;;  %v8373_v52 = vrot.slane %v8360_v46, 4  ;;  %v7929_v18 = vrot.slane %v17470_v10, 4  ;;  %v19615_v10 = vld [vmem:[#allocation37_spill] sm:$0xff] }
 0x73e   : > { %9081 = vrot.lane.b32.xlu2 %v8376_v58, %s18940_s21  ;;  %v17559_v5 = vperm.slane %v7960_v14, %v19566_v56  ;;  %v7970_v31 = vsel %vm1222_vm8, %v7969_v22, %v7000_v53  ;;  %v8340_v3 = vperm.slane %v8332_v41, %v19567_v9  ;;  %v7972_v36 = vsel %vm1222_vm8, %v7146_v48, %v7971_v15 }
 0x73f   : > { %v8377_v8 = vrot.slane %v8364_v17, 4  ;;  %v8374_v23 = vsel %vm1222_vm8, %v8373_v52, %v8336_v19  ;;  %v17567_v28 = vperm.slane %v7894_v1, %v19567_v9  ;;  %v19616_v20 = vrot.slane %v19615_v10, 4 }
 0x740   : > { %9049 = vrot.lane.b32.xlu0 %v8374_v23, %s11480_s19  ;;  %v8370_v53 = vsel %vm1222_vm8, %v8369_v21, %v17423_v13  ;;  %v8007_v48 = vrot.slane %v17550_v30, 4  ;;  %v17581_v46 = vperm.slane %v7970_v31, %v19566_v56  ;;  %v17590_v41 = vsel %vm1222_vm8, %v7929_v18, %v19613_v16  ;;  %v19617_v21 = vld [vmem:[#allocation23_spill] sm:$0xff] }
 0x741   : > { %v17572_v37 = vsel %vm1222_vm8, %v7904_v33, %v19616_v20  ;;  %v8378_v19 = vsel %vm1222_vm8, %v8377_v8, %v8340_v3  ;;  %v17586_v33 = vsel %vm1222_vm8, %v7921_v26, %v19615_v10  ;;  %v17594_v13 = vperm.slane %v7972_v36, %v19566_v56  ;;  %v19619_v18 = vld [vmem:[#allocation31_spill] sm:$0xff] }
 0x742   : > { %9113 = vrot.lane.b32.xlu1 %v8378_v19, %s11479_s0  ;;  %v8019_v58 = vrot.slane %v17559_v5, 4  ;;  %v19618_v26 = vrot.slane %v19617_v21, 4  ;;  %v19620_v31 = vrot.slane %v17188_v39, 4  ;;  %v19621_v36 = vrot.slane %v19619_v18, 4 }
 0x743   : > { %v19623_v10 = vrot.slane %v17251_v6, 4  ;;  %v8379_v22 = vrot.slane %v8340_v3, 4 }
 0x744   : > { %v17605_v16 = vsel %vm1222_vm8, %v17567_v28, %v19618_v26  ;;  %v7590_v8 = vsel %vm1222_vm8, %v19620_v31, %v19619_v18  ;;  %v7592_v23 = vsel %vm1222_vm8, %v17188_v39, %v19621_v36  ;;  %v17620_v26 = vsel %vm1222_vm8, %v17581_v46, %v8007_v48 }
 0x745   : > { %v19622_v18 = vrot.slane %v17264_v50, 4  ;;  %v8400_v39 = vperm.slane %v17321_v63, %v19566_v56  ;;  %v8405_v36 = vrot.slane %v17310_v54, 4  ;;  %v17633_v20 = vsel %vm1222_vm8, %v17594_v13, %v8019_v58 }
 0x746   : > { %8985 = vrot.lane.b32.xlu2 %v8370_v53, %s11483_s23  ;;  %v8407_v1 = vrot.slane %v7590_v8, 4  ;;  %v8418_v53 = vsel %vm1222_vm8, %v19623_v10, %v7592_v23  ;;  %v8419_v52 = vrot.slane %v7592_v23, 4  ;;  %v19624_v58 = vrot.slane %v17239_v32, 4 }
 0x747   : > { %v8382_v31 = vsel %vm1222_vm8, %v19622_v18, %v17239_v32  ;;  %v8406_v15 = vsel %vm1222_vm8, %v8405_v36, %v7590_v8  ;;  %v8424_v18 = vperm.slane %v8418_v53, %v19566_v56  ;;  %v8429_v38 = vrot.slane %v8400_v39, 4 }
 0x748   : > { %v8388_v48 = vperm.slane %v8382_v31, %v19566_v56  ;;  %v8412_v63 = vperm.slane %v8406_v15, %v19566_v56  ;;  %v8384_v31 = vsel %vm1222_vm8, %v17264_v50, %v19624_v58  ;;  %v8404_v8 = vperm.slane %v17276_v11, %v19566_v56 }
 0x749   : > { %v8453_v14 = vrot.slane %v8424_v18, 4  ;;  %v8392_v10 = vperm.slane %v8384_v31, %v19566_v56  ;;  %v8380_v15 = vsel %vm1222_vm8, %v8364_v17, %v8379_v22  ;;  %v8420_v11 = vsel %vm1222_vm8, %v17251_v6, %v8419_v52 }
 0x74a   : > { %v8431_v19 = vrot.slane %v8388_v48, 4  ;;  %v8430_v42 = vsel %vm1222_vm8, %v8429_v38, %v8388_v48  ;;  %v8455_v36 = vrot.slane %v8412_v63, 4  ;;  %9145 = vrot.lane.b32.xlu0 %v8380_v15, %s18907_s20  ;;  %v8408_v38 = vsel %vm1222_vm8, %v17310_v54, %v8407_v1 }
 0x74b   : > { %v17651_v23 = vperm.slane %v8430_v42, %v19567_v9  ;;  %v8454_v32 = vsel %vm1222_vm8, %v8453_v14, %v8412_v63  ;;  %v8428_v48 = vperm.slane %v8420_v11, %v19566_v56  ;;  %v8441_v53 = vrot.slane %v8404_v8, 4 }
 0x74c   : > { %v8432_v3 = vsel %vm1222_vm8, %v8400_v39, %v8431_v19  ;;  %v17663_v42 = vperm.slane %v8454_v32, %v19567_v9  ;;  %v8456_v22 = vsel %vm1222_vm8, %v8424_v18, %v8455_v36  ;;  %v8416_v19 = vperm.slane %v8408_v38, %v19566_v56 }
 0x74d   : > { %v8440_v50 = vperm.slane %v8432_v3, %v19567_v9  ;;  %v8479_v17 = vrot.slane %v17651_v23, 4  ;;  %v8464_v14 = vperm.slane %v8456_v22, %v19567_v9  ;;  %v8443_v1 = vrot.slane %v8392_v10, 4 }
 0x74e   : > { %v8467_v6 = vrot.slane %v8416_v19, 4  ;;  %v19625_v52 = vrot.slane %v17293_v55, 4  ;;  %v8442_v58 = vsel %vm1222_vm8, %v8441_v53, %v8392_v10  ;;  %v8465_v31 = vrot.slane %v8428_v48, 4 }
 0x74f   : > { %v8483_v39 = vrot.slane %v8440_v50, 4  ;;  %v8480_v54 = vsel %vm1222_vm8, %v17663_v42, %v8479_v17  ;;  %v8481_v15 = vrot.slane %v8464_v14, 4  ;;  %v8448_v3 = vperm.slane %v8442_v58, %v19567_v9 }
 0x750   : > { %v7694_v63 = vsel %vm1222_vm8, %v19625_v52, %v16782_v34  ;;  %8955 = vrot.lane.b32.xlu1 %v8480_v54, %s11485_s30  ;;  %v8444_v36 = vsel %vm1222_vm8, %v8404_v8, %v8443_v1  ;;  %v8468_v32 = vsel %vm1222_vm8, %v8428_v48, %v8467_v6  ;;  %v8493_v55 = vrot.slane %v17362_v29, 4 }
 0x751   : > { %v8484_v18 = vsel %vm1222_vm8, %v8464_v14, %v8483_v39  ;;  %v8466_v34 = vsel %vm1222_vm8, %v8465_v31, %v8416_v19  ;;  %v8452_v38 = vperm.slane %v8444_v36, %v19567_v9  ;;  %v8476_v11 = vperm.slane %v8468_v32, %v19567_v9 }
 0x752   : > { %9019 = vrot.lane.b32.xlu2 %v8484_v18, %s11482_s22  ;;  %v8482_v10 = vsel %vm1222_vm8, %v8481_v15, %v8440_v50  ;;  %v8472_v17 = vperm.slane %v8466_v34, %v19567_v9  ;;  %v8487_v22 = vrot.slane %v8448_v3, 4  ;;  %v8494_v14 = vsel %vm1222_vm8, %v8493_v55, %v7694_v63 }
 0x753   : > { %v8495_v39 = vrot.slane %v7694_v63, 4  ;;  %v8489_v53 = vrot.slane %v8476_v11, 4  ;;  %v8491_v8 = vrot.slane %v8452_v38, 4  ;;  %v8500_v48 = vperm.slane %v8494_v14, %v19566_v56 }
 0x754   : > { %v19626_v54 = vrot.slane %v17344_v57, 4  ;;  %v8485_v1 = vrot.slane %v8472_v17, 4  ;;  %v8488_v6 = vsel %vm1222_vm8, %v8472_v17, %v8487_v22  ;;  %v19627_v52 = vrot.slane %v17348_v49, 4 }
 0x755   : > { %9083 = vrot.lane.b32.xlu0 %v8488_v6, %s18940_s21  ;;  %v8490_v63 = vsel %vm1222_vm8, %v8489_v53, %v8452_v38  ;;  %v8492_v58 = vsel %vm1222_vm8, %v8476_v11, %v8491_v8  ;;  %v8536_v15 = vperm.slane %v17281_v60, %v19566_v56  ;;  %v8496_v55 = vsel %vm1222_vm8, %v17362_v29, %v8495_v39 }
 0x756   : > { %v8506_v19 = vsel %vm1222_vm8, %v19626_v54, %v17331_v40  ;;  %v8518_v18 = vsel %vm1222_vm8, %v19627_v52, %v17335_v4  ;;  %v8486_v36 = vsel %vm1222_vm8, %v8485_v1, %v8448_v3  ;;  %v19628_v34 = vrot.slane %v17331_v40, 4 }
 0x757   : > { %v8512_v50 = vperm.slane %v8506_v19, %v19566_v56  ;;  %v8524_v31 = vperm.slane %v8518_v18, %v19566_v56  ;;  %v8565_v38 = vrot.slane %v8536_v15, 4  ;;  %v8504_v11 = vperm.slane %v8496_v55, %v19566_v56 }
 0x758   : > { %v8508_v17 = vsel %vm1222_vm8, %v17344_v57, %v19628_v34  ;;  %9051 = vrot.lane.b32.xlu1 %v8486_v36, %s11480_s19  ;;  %v19629_v60 = vrot.slane %v17335_v4, 4  ;;  %v19630_v57 = vrot.slane %v17272_v47, 4  ;;  %v8543_v39 = vrot.slane %v8500_v48, 4 }
 0x759   : > { %v8541_v32 = vrot.slane %v8512_v50, 4  ;;  %v8516_v22 = vperm.slane %v8508_v17, %v19566_v56  ;;  %v8566_v4 = vsel %vm1222_vm8, %v8565_v38, %v8524_v31  ;;  %v8567_v1 = vrot.slane %v8524_v31, 4 }
 0x75a   : > { %v8520_v3 = vsel %vm1222_vm8, %v17348_v49, %v19629_v60  ;;  %9115 = vrot.lane.b32.xlu2 %v8490_v63, %s11479_s0  ;;  %v8532_v14 = vsel %vm1222_vm8, %v17257_v27, %v19630_v57  ;;  %v17734_v54 = vperm.slane %v8566_v4, %v19567_v9  ;;  %v8544_v19 = vsel %vm1222_vm8, %v8512_v50, %v8543_v39 }
 0x75b   : > { %v8542_v29 = vsel %vm1222_vm8, %v8541_v32, %v8500_v48  ;;  %v8528_v40 = vperm.slane %v8520_v3, %v19566_v56  ;;  %v8540_v8 = vperm.slane %v8532_v14, %v19566_v56  ;;  %v8553_v49 = vrot.slane %v8516_v22, 4 }
 0x75c   : > { %v17729_v53 = vperm.slane %v8542_v29, %v19567_v9  ;;  %v8555_v6 = vrot.slane %v8504_v11, 4  ;;  %v8552_v52 = vperm.slane %v8544_v19, %v19567_v9  ;;  %v8568_v63 = vsel %vm1222_vm8, %v8536_v15, %v8567_v1 }
 0x75d   : > { %v8554_v27 = vsel %vm1222_vm8, %v8553_v49, %v8504_v11  ;;  %v8577_v48 = vrot.slane %v8540_v8, 4  ;;  %v8579_v32 = vrot.slane %v8528_v40, 4  ;;  %8987 = vrot.lane.b32.xlu0 %v8482_v10, %s11483_s23  ;;  %v8576_v55 = vperm.slane %v8568_v63, %v19567_v9 }
 0x75e   : > { %v8591_v47 = vrot.slane %v17729_v53, 4  ;;  %v8560_v18 = vperm.slane %v8554_v27, %v19567_v9  ;;  %v8556_v36 = vsel %vm1222_vm8, %v8516_v22, %v8555_v6  ;;  %v8595_v34 = vrot.slane %v8552_v52, 4 }
 0x75f   : > { %v8578_v31 = vsel %vm1222_vm8, %v8577_v48, %v8528_v40  ;;  %v8564_v11 = vperm.slane %v8556_v36, %v19567_v9  ;;  %v8580_v15 = vsel %vm1222_vm8, %v8540_v8, %v8579_v32  ;;  %v8593_v10 = vrot.slane %v8576_v55, 4 }
 0x760   : > { %v8592_v50 = vsel %vm1222_vm8, %v17734_v54, %v8591_v47  ;;  %v8584_v17 = vperm.slane %v8578_v31, %v19567_v9  ;;  %v8599_v38 = vrot.slane %v8560_v18, 4  ;;  %9147 = vrot.lane.b32.xlu1 %v8492_v58, %s18907_s20  ;;  %v8596_v22 = vsel %vm1222_vm8, %v8576_v55, %v8595_v34 }
 0x761   : > { %v8588_v60 = vperm.slane %v8580_v15, %v19567_v9  ;;  %v19631_v3 = vrot.slane %v17541_v0, 4  ;;  %v8603_v14 = vrot.slane %v8564_v11, 4  ;;  %v17762_v58 = vsel %vm1222_vm8, %v8593_v10, %v8552_v52 }
 0x762   : > { %8957 = vrot.lane.b32.xlu2 %v8592_v50, %s11485_s30  ;;  %v8600_v40 = vsel %vm1222_vm8, %v8584_v17, %v8599_v38  ;;  %v8597_v57 = vrot.slane %v8584_v17, 4  ;;  %v19632_v8 = vrot.slane %v17500_v24, 4  ;;  %v19633_v19 = vrot.slane %v17504_v51, 4 }
 0x763   : > { %v8606_v29 = vsel %vm1222_vm8, %v19631_v3, %v17475_v59  ;;  %v8601_v4 = vrot.slane %v8588_v60, 4  ;;  %v17774_v47 = vsel %vm1222_vm8, %v8588_v60, %v8603_v14  ;;  %v19634_v52 = vrot.slane %v17581_v46, 4 }
 0x764   : > { %v8612_v39 = vperm.slane %v8606_v29, %v19566_v56  ;;  %v8618_v49 = vsel %vm1222_vm8, %v19632_v8, %v17445_v61  ;;  %v8630_v1 = vsel %vm1222_vm8, %v19633_v19, %v17461_v2  ;;  %v8598_v6 = vsel %vm1222_vm8, %v8597_v57, %v8560_v18 }
 0x765   : > { %v8624_v27 = vperm.slane %v8618_v49, %v19566_v56  ;;  %v8636_v48 = vperm.slane %v8630_v1, %v19566_v56  ;;  %v8006_v63 = vsel %vm1222_vm8, %v19634_v52, %v17550_v30  ;;  %v8602_v36 = vsel %vm1222_vm8, %v8601_v4, %v8564_v11  ;;  %9021 = vrot.lane.b32.xlu0 %v8596_v22, %s11482_s22  ;;  %v17793_v30 = vpop.permute.xlu2 %9013 }
 0x766   : > { %v19635_v32 = vrot.slane %v17480_v45, 4  ;;  %v8655_v18 = vrot.slane %v8612_v39, 4  ;;  %v19636_v17 = vrot.slane %v17475_v59, 4  ;;  %v19637_v11 = vrot.slane %v17445_v61, 4 }
 0x767   : > { %v8679_v55 = vrot.slane %v8636_v48, 4  ;;  %v8653_v34 = vrot.slane %v8624_v27, 4  ;;  %v19638_v10 = vrot.slane %v17461_v2, 4  ;;  %v19639_v59 = vrot.slane %v17466_v62, 4 }
 0x768   : > { %v8642_v50 = vsel %vm1222_vm8, %v19635_v32, %v17466_v62  ;;  %v8608_v38 = vsel %vm1222_vm8, %v17541_v0, %v19636_v17  ;;  %v8656_v46 = vsel %vm1222_vm8, %v8624_v27, %v8655_v18  ;;  %v8620_v15 = vsel %vm1222_vm8, %v17500_v24, %v19637_v11  ;;  %9085 = vrot.lane.b32.xlu1 %v8600_v40, %s18940_s21 }
 0x769   : > { %v8648_v31 = vperm.slane %v8642_v50, %v19566_v56  ;;  %v8632_v60 = vsel %vm1222_vm8, %v17504_v51, %v19638_v10  ;;  %v8644_v0 = vsel %vm1222_vm8, %v17480_v45, %v19639_v59  ;;  %v8731_v22 = vrot.slane %v17605_v16, 4 }
 0x76a   : > { %v17811_v3 = vperm.slane %v17620_v26, %v19567_v9  ;;  %v17815_v61 = vperm.slane %v17633_v20, %v19567_v9  ;;  %v8654_v2 = vsel %vm1222_vm8, %v8653_v34, %v8612_v39  ;;  %v19640_v24 = vrot.slane %v17594_v13, 4  ;;  %v10725_v20 = vld [vmem:[%s18641_s9 + $0x38] sm:$0xff]  ;;  %9053 = vrot.lane.b32.xlu2 %v8598_v6, %s11480_s19  ;;  %v19641_v6 = vld [vmem:[#allocation39_spill] sm:$0xff] }
 0x76b   : > { %v8616_v45 = vperm.slane %v8608_v38, %v19566_v56  ;;  %v8628_v51 = vperm.slane %v8620_v15, %v19566_v56  ;;  %v8640_v26 = vperm.slane %v8632_v60, %v19566_v56  ;;  %v17830_v29 = vperm.slane %v8006_v63, %v19567_v9  ;;  %9306 = vmatpush.bf16.msra.mxu3 %v10725_v20 }
 0x76c   : > { %v8018_v62 = vsel %vm1222_vm8, %v19640_v24, %v17559_v5  ;;  %v17834_v13 = vperm.slane %v8656_v46, %v19567_v9  ;;  %v8677_v5 = vrot.slane %v8648_v31, 4  ;;  %v8652_v40 = vperm.slane %v8644_v0, %v19566_v56  ;;  %v10724_v24 = vld [vmem:[%s18641_s9 + $0x30] sm:$0xff] }
 0x76d   : > { %v8680_v57 = vsel %vm1222_vm8, %v8648_v31, %v8679_v55  ;;  %v17839_v14 = vperm.slane %v8654_v2, %v19567_v9  ;;  %v8665_v39 = vrot.slane %v8628_v51, 4  ;;  %v8691_v4 = vrot.slane %v8640_v26, 4  ;;  %9117 = vrot.lane.b32.xlu0 %v8602_v36, %s11479_s0 }
 0x76e   : > { %v17843_v8 = vperm.slane %v17526_v25, %v19566_v56  ;;  %v17846_v49 = vperm.slane %v8018_v62, %v19567_v9  ;;  %v8033_v19 = vrot.slane %v17811_v3, 4  ;;  %v8689_v1 = vrot.slane %v8652_v40, 4  ;;  %v19647_v62 = vld [vmem:[#allocation27_spill] sm:$0xff] }
 0x76f   : > { %v19642_v27 = vrot.slane %v19641_v6, 4  ;;  %v8041_v63 = vrot.slane %v17815_v61, 4  ;;  %v8666_v32 = vsel %vm1222_vm8, %v8665_v39, %v8616_v45  ;;  %v8667_v50 = vrot.slane %v8616_v45, 4  ;;  %9307 = vmatpush.bf16.msra.mxu3 %v10724_v24  ;;  %v10723_v24 = vld [vmem:[%s18641_s9 + $0x28] sm:$0xff] }
 0x770   : > { %v8029_v25 = vrot.slane %v17830_v29, 4  ;;  %v17859_v18 = vperm.slane %v8680_v57, %v19567_v9  ;;  %v8707_v31 = vrot.slane %v17834_v13, 4  ;;  %v8678_v55 = vsel %vm1222_vm8, %v8677_v5, %v8636_v48  ;;  %8989 = vrot.lane.b32.xlu1 %v17762_v58, %s11483_s23 }
 0x771   : > { %v17853_v52 = vsel %vm1222_vm8, %v17811_v3, %v19642_v27  ;;  %v8703_v34 = vrot.slane %v17839_v14, 4  ;;  %v8692_v17 = vsel %vm1222_vm8, %v8652_v40, %v8691_v4  ;;  %v19643_v38 = vrot.slane %v17567_v28, 4 }
 0x772   : > { %v19644_v11 = vrot.slane %v17457_v12, 4  ;;  %v17875_v10 = vperm.slane %v8666_v32, %v19567_v9  ;;  %v8690_v48 = vsel %vm1222_vm8, %v8689_v1, %v8640_v26  ;;  %v19645_v36 = vrot.slane %v17586_v33, 4  ;;  %9149 = vrot.lane.b32.xlu2 %v17774_v47, %s18907_s20  ;;  %v17922_v1 = vpop.permute.xlu0 %8949 }
 0x773   : > { %v7918_v46 = vsel %vm1222_vm8, %v19643_v38, %v19617_v21  ;;  %v19646_v59 = vrot.slane %v17572_v37, 4  ;;  %v17888_v12 = vperm.slane %v8678_v55, %v19567_v9  ;;  %v8668_v21 = vsel %vm1222_vm8, %v8628_v51, %v8667_v50  ;;  %9308 = vmatpush.bf16.msra.mxu3 %v10723_v24 }
 0x774   : > { %v7926_v15 = vsel %vm1222_vm8, %v19644_v11, %v16858_v43  ;;  %v8718_v60 = vsel %vm1222_vm8, %v19645_v36, %v7918_v46  ;;  %v17890_v43 = vpop.permute.xlu2 %9109  ;;  %v19648_v45 = vrot.slane %v19647_v62, 4  ;;  %v8708_v51 = vsel %vm1222_vm8, %v17859_v18, %v8707_v31 }
 0x775   : > { %v8730_v28 = vsel %vm1222_vm8, %v19646_v59, %v17605_v16  ;;  %v8724_v0 = vperm.slane %v8718_v60, %v19566_v56  ;;  %v17909_v26 = vperm.slane %v8692_v17, %v19567_v9  ;;  %v19649_v20 = vrot.slane %v17590_v41, 4 }
 0x776   : > { %v8736_v2 = vperm.slane %v8730_v28, %v19566_v56  ;;  %v17902_v58 = vsel %vm1222_vm8, %v17830_v29, %v19648_v45  ;;  %v8704_v40 = vsel %vm1222_vm8, %v17888_v12, %v8703_v34  ;;  %v8696_v57 = vperm.slane %v8690_v48, %v19567_v9 }
 0x777   : > { %v8742_v5 = vsel %vm1222_vm8, %v19649_v20, %v7926_v15  ;;  %v19650_v47 = vrot.slane %v17512_v35, 4  ;;  %v8711_v27 = vrot.slane %v17875_v10, 4  ;;  %v17926_v32 = vperm.slane %v8668_v21, %v19567_v9  ;;  %8959 = vrot.lane.b32.xlu0 %v8704_v40, %s11485_s30 }
 0x778   : > { %v8748_v39 = vperm.slane %v8742_v5, %v19566_v56  ;;  %v8765_v31 = vrot.slane %v8736_v2, 4  ;;  %v8767_v55 = vrot.slane %v8724_v0, 4  ;;  %v8719_v17 = vrot.slane %v7918_v46, 4  ;;  %9023 = vrot.lane.b32.xlu1 %v8708_v51, %s11482_s22  ;;  %v17964_v5 = vpop.permute.xlu1 %8981 }
 0x779   : > { %v8754_v4 = vsel %vm1222_vm8, %v19650_v47, %v17490_v44  ;;  %v8732_v35 = vsel %vm1222_vm8, %v17572_v37, %v8731_v22  ;;  %v8713_v44 = vrot.slane %v17909_v26, 4  ;;  %v8743_v38 = vrot.slane %v7926_v15, 4 }
 0x77a   : > { %v8760_v50 = vperm.slane %v8754_v4, %v19566_v56  ;;  %v8791_v34 = vrot.slane %v8748_v39, 4  ;;  %v8766_v11 = vsel %vm1222_vm8, %v8765_v31, %v8724_v0  ;;  %v8709_v36 = vrot.slane %v8696_v57, 4 }
 0x77b   : > { %v17937_v60 = vperm.slane %v8766_v11, %v19567_v9  ;;  %v8768_v59 = vsel %vm1222_vm8, %v8736_v2, %v8767_v55  ;;  %v8712_v16 = vsel %vm1222_vm8, %v8696_v57, %v8711_v27  ;;  %v8720_v15 = vsel %vm1222_vm8, %v17586_v33, %v8719_v17  ;;  %v19651_v27 = vld [vmem:[#allocation33_spill] sm:$0xff] }
 0x77c   : > { %v8789_v48 = vrot.slane %v8760_v50, 4  ;;  %v8792_v46 = vsel %vm1222_vm8, %v8760_v50, %v8791_v34  ;;  %v17944_v22 = vperm.slane %v8768_v59, %v19567_v9  ;;  %v8728_v0 = vperm.slane %v8720_v15, %v19566_v56  ;;  %9087 = vrot.lane.b32.xlu2 %v8712_v16, %s18940_s21  ;;  %v17966_v40 = vpop.permute.xlu2 %8951 }
 0x77d   : > { %v8815_v21 = vrot.slane %v17937_v60, 4  ;;  %v8740_v2 = vperm.slane %v8732_v35, %v19566_v56  ;;  %v8800_v45 = vperm.slane %v8792_v46, %v19567_v9  ;;  %v8744_v51 = vsel %vm1222_vm8, %v17590_v41, %v8743_v38  ;;  %v17984_v38 = vpop.permute.xlu0 %9077 }
 0x77e   : > { %v8790_v37 = vsel %vm1222_vm8, %v8789_v48, %v8748_v39  ;;  %v8819_v33 = vrot.slane %v17944_v22, 4  ;;  %v8801_v20 = vrot.slane %v17843_v8, 4  ;;  %v8752_v39 = vperm.slane %v8744_v51, %v19566_v56 }
 0x77f   : > { %v17950_v28 = vperm.slane %v8790_v37, %v19567_v9  ;;  %v8777_v47 = vrot.slane %v8740_v2, 4  ;;  %v8779_v4 = vrot.slane %v8728_v0, 4  ;;  %v19652_v50 = vrot.slane %v19651_v27, 4 }
 0x780   : > { %v8843_v31 = vrot.slane %v17902_v58, 4  ;;  %v8705_v55 = vrot.slane %v17859_v18, 4  ;;  %v8820_v34 = vsel %vm1222_vm8, %v8800_v45, %v8819_v33  ;;  %v8802_v35 = vsel %vm1222_vm8, %v8801_v20, %v8752_v39 }
 0x781   : > { %v17970_v57 = vsel %vm1222_vm8, %v17950_v28, %v8815_v21  ;;  %v17977_v41 = vsel %vm1222_vm8, %v17815_v61, %v19652_v50  ;;  %v8778_v17 = vsel %vm1222_vm8, %v8777_v47, %v8728_v0  ;;  %v8780_v11 = vsel %vm1222_vm8, %v8740_v2, %v8779_v4  ;;  %v19653_v0 = vld [vmem:[#allocation34_spill] sm:$0xff]  ;;  %v9046_v50 = vpop.permute.xlu1 %9045 }
 0x782   : > { %v8803_v48 = vrot.slane %v8752_v39, 4  ;;  %v8030_v59 = vsel %vm1222_vm8, %v8029_v25, %v19647_v62  ;;  %v8710_v46 = vsel %vm1222_vm8, %v8709_v36, %v17875_v10  ;;  %v8784_v18 = vperm.slane %v8778_v17, %v19567_v9  ;;  %v10721_v39 = vld [vmem:[%s18641_s9 + $0x18] sm:$0xff] }
 0x783   : > { %v8808_v16 = vperm.slane %v8802_v35, %v19567_v9  ;;  %v8037_v37 = vrot.slane %v17846_v49, 4  ;;  %v8714_v15 = vsel %vm1222_vm8, %v8713_v44, %v17926_v32  ;;  %9055 = vrot.lane.b32.xlu0 %v8710_v46, %s11480_s19  ;;  %v8034_v29 = vsel %vm1222_vm8, %v8033_v19, %v19641_v6  ;;  %v10722_v6 = vld [vmem:[%s18641_s9 + $0x20] sm:$0xff] }
 0x784   : > { %v8804_v21 = vsel %vm1222_vm8, %v17843_v8, %v8803_v48  ;;  %v8823_v10 = vrot.slane %v8784_v18, 4  ;;  %v18006_v62 = vperm.slane %v8780_v11, %v19567_v9  ;;  %v19654_v44 = vrot.slane %v19653_v0, 4  ;;  %9119 = vrot.lane.b32.xlu1 %v8714_v15, %s11479_s0  ;;  %9309 = vmatpush.bf16.msra.mxu3 %v10722_v6 }
 0x785   : > { %v8821_v25 = vrot.slane %v8808_v16, 4  ;;  %v18009_v36 = vperm.slane %v8804_v21, %v19567_v9  ;;  %v8706_v3 = vsel %vm1222_vm8, %v8705_v55, %v17834_v13  ;;  %v8715_v8 = vrot.slane %v17926_v32, 4  ;;  %v18057_v48 = vpop.permute.xlu0 %8983 }
 0x786   : > { %v8040_v2 = vsel %vm1222_vm8, %v17846_v49, %v19654_v44  ;;  %v8831_v19 = vrot.slane %v8030_v59, 4  ;;  %8991 = vrot.lane.b32.xlu2 %v8706_v3, %s11483_s23  ;;  %v8824_v33 = vsel %vm1222_vm8, %v8808_v16, %v8823_v10  ;;  %v8844_v51 = vsel %vm1222_vm8, %v17853_v52, %v8843_v31 }
 0x787   : > { %v18024_v24 = vsel %vm1222_vm8, %v8821_v25, %v8784_v18  ;;  %v8825_v49 = vrot.slane %v18009_v36, 4  ;;  %v8042_v13 = vsel %vm1222_vm8, %v8041_v63, %v19651_v27  ;;  %v8841_v32 = vrot.slane %v17853_v52, 4  ;;  %v18043_v63 = vpop.permute.xlu2 %9047 }
 0x788   : > { %v8829_v20 = vrot.slane %v8034_v29, 4  ;;  %v8867_v47 = vrot.slane %v8040_v2, 4  ;;  %v8817_v55 = vrot.slane %v8800_v45, 4  ;;  %v8038_v31 = vsel %vm1222_vm8, %v8037_v37, %v19653_v0  ;;  %9310 = vmatpush.bf16.msra.mxu3 %v10721_v39  ;;  %v10719_v0 = vld [vmem:[%s18641_s9 + $0x8] sm:$0xff]  ;;  %v10718_v39 = vld [vmem:[%s18641_s9] sm:$0xff] }
 0x789   : > { %v8826_v4 = vsel %vm1222_vm8, %v8825_v49, %v18006_v62  ;;  %v8865_v61 = vrot.slane %v17977_v41, 4  ;;  %v18046_v52 = vperm.slane %v8844_v51, %v19566_v56  ;;  %v8853_v27 = vrot.slane %v8042_v13, 4  ;;  %v9142_v49 = vpop.permute.xlu1 %9141  ;;  %v19656_v51 = vld [vmem:[#allocation67_spill] sm:$0xff] }
 0x78a   : > { %v8716_v17 = vsel %vm1222_vm8, %v17909_v26, %v8715_v8  ;;  %v8832_v35 = vsel %vm1222_vm8, %v8034_v29, %v8831_v19  ;;  %v18053_v11 = vsel %vm1222_vm8, %v8817_v55, %v17944_v22  ;;  %v8141_v45 = vrot.slane %v17037_v7, 4  ;;  %v19655_v29 = vld [vmem:[#allocation30_spill] sm:$0xff] }
 0x78b   : > { %9151 = vrot.lane.b32.xlu0 %v8716_v17, %s18907_s20  ;;  %v8830_v46 = vsel %vm1222_vm8, %v8829_v20, %v8030_v59  ;;  %v8842_v18 = vsel %vm1222_vm8, %v8841_v32, %v17902_v58  ;;  %v8855_v16 = vrot.slane %v8038_v31, 4  ;;  %v8868_v26 = vsel %vm1222_vm8, %v17977_v41, %v8867_v47  ;;  %v10720_v58 = vld [vmem:[%s18641_s9 + $0x10] sm:$0xff]  ;;  %s10396_s20 = sshll.u32 %s565_s29, 6 }
 0x78c   : > { %v8848_v37 = vperm.slane %v8842_v18, %v19566_v56  ;;  %8961 = vrot.lane.b32.xlu1 %v17970_v57, %s11485_s30  ;;  %v18068_v22 = vperm.slane %v8832_v35, %v19566_v56  ;;  %v8889_v7 = vrot.slane %v18046_v52, 4  ;;  %v8866_v59 = vsel %vm1222_vm8, %v8865_v61, %v8040_v2  ;;  %9311 = vmatpush.bf16.msra.mxu3 %v10720_v58  ;;  %v19657_v35 = vld [vmem:[#allocation87_spill] sm:$0xff]  ;;  %s18574_s18 = scalar_lea.vmem [#allocation2], %s10396_s20 }
 0x78d   : > { %v8836_v41 = vperm.slane %v8830_v46, %v19566_v56  ;;  %v8854_v15 = vsel %vm1222_vm8, %v8853_v27, %v8038_v31  ;;  %v8142_v57 = vsel %vm1222_vm8, %v8141_v45, %v19655_v29  ;;  %v18081_v25 = vperm.slane %v8868_v26, %v19566_v56  ;;  %v9016_v27 = vpop.permute.xlu0 %9015 }
 0x78e   : > { %9025 = vrot.lane.b32.xlu2 %v8820_v34, %s11482_s22  ;;  %v8877_v21 = vrot.slane %v8848_v37, 4  ;;  %v8827_v10 = vrot.slane %v18006_v62, 4  ;;  %v9165_v34 = vsel %vm5108_vm9, %v8142_v57, %v17922_v1  ;;  %v8856_v44 = vsel %vm1222_vm8, %v8042_v13, %v8855_v16 }
 0x78f   : > { %v8872_v2 = vperm.slane %v8866_v59, %v19566_v56  ;;  %v9173_v3 = vsel %vm596_vm0, %v9165_v34, %v17964_v5  ;;  %v8890_v8 = vsel %vm1222_vm8, %v8889_v7, %v18068_v22  ;;  %v8860_v62 = vperm.slane %v8854_v15, %v19566_v56  ;;  %v9144_v5 = vpop.permute.xlu2 %9143 }
 0x790   : > { %v8878_v19 = vsel %vm1222_vm8, %v8877_v21, %v8836_v41  ;;  %v8879_v6 = vrot.slane %v8836_v41, 4  ;;  %v18099_v1 = vsel %vm1222_vm8, %v18009_v36, %v8827_v10  ;;  %v8253_v13 = vrot.slane %v19656_v51, 4  ;;  %9312 = vmatpush.bf16.msra.mxu3 %v10719_v0 }
 0x791   : > { %v8864_v32 = vperm.slane %v8856_v44, %v19566_v56  ;;  %v8913_v20 = vrot.slane %v18081_v25, 4  ;;  %v18109_v47 = vperm.slane %v8890_v8, %v19567_v9  ;;  %v9182_v36 = vsel %vm9181_vm10, %v9173_v3, %v17793_v30 }
 0x792   : > { %v8901_v55 = vrot.slane %v8872_v2, 4  ;;  %v8589_v31 = vrot.slane %v17734_v54, 4  ;;  %v9191_v56 = vsel %vm9190_vm11, %v9182_v36, %v9046_v50  ;;  %v8903_v61 = vrot.slane %v8860_v62, 4  ;;  %v9080_v15 = vpop.permute.xlu1 %9079 }
 0x793   : > { %9089 = vrot.lane.b32.xlu0 %v8824_v33, %s18940_s21  ;;  %v8884_v33 = vperm.slane %v8878_v19, %v19567_v9  ;;  %v8880_v17 = vsel %vm1222_vm8, %v8848_v37, %v8879_v6  ;;  %v8254_v54 = vsel %vm1222_vm8, %v8253_v13, %v19657_v35  ;;  %v8701_v50 = vrot.slane %v17888_v12, 4 }
 0x794   : > { %9057 = vrot.lane.b32.xlu1 %v18024_v24, %s11480_s19  ;;  %v18122_v30 = vsel %vm1222_vm8, %v8589_v31, %v17729_v53  ;;  %v8914_v24 = vsel %vm1222_vm8, %v8913_v20, %v8864_v32  ;;  %9313 = vmatpush.bf16.msra.mxu3 %v10718_v39  ;;  %v9166_v45 = vsel %vm5108_vm9, %v8254_v54, %v17966_v40  ;;  %v8935_v46 = vrot.slane %v18109_v47, 4 }
 0x795   : > { %v8902_v18 = vsel %vm1222_vm8, %v8901_v55, %v8860_v62  ;;  %v8927_v53 = vrot.slane %v8884_v33, 4  ;;  %v8888_v16 = vperm.slane %v8880_v17, %v19567_v9  ;;  %v8904_v26 = vsel %vm1222_vm8, %v8872_v2, %v8903_v61 }
 0x796   : > { %9121 = vrot.lane.b32.xlu2 %v8826_v4, %s11479_s0  ;;  %v9200_v4 = vsel %vm9199_vm12, %v9191_v56, %v17984_v38  ;;  %v18138_v37 = vsel %vm1222_vm8, %v8701_v50, %v17839_v14  ;;  %v8920_v12 = vperm.slane %v8914_v24, %v19567_v9  ;;  %v9174_v40 = vsel %vm596_vm0, %v9166_v45, %v18057_v48  ;;  %v19661_v24 = vld [vmem:[#allocation72_spill] sm:$0xff] }
 0x797   : > { %v8813_v7 = vrot.slane %v17950_v28, 4  ;;  %v8908_v38 = vperm.slane %v8902_v18, %v19567_v9  ;;  %v9183_v59 = vsel %vm9181_vm10, %v9174_v40, %v9016_v27  ;;  %v8915_v58 = vrot.slane %v8864_v32, 4 }
 0x798   : > { %v8936_v14 = vsel %vm1222_vm8, %v8920_v12, %v8935_v46  ;;  %v8912_v41 = vperm.slane %v8904_v26, %v19567_v9  ;;  %v9209_v21 = vsel %vm9208_vm13, %v9200_v4, %v17890_v43  ;;  %v8931_v29 = vrot.slane %v8888_v16, 4  ;;  %v9112_v44 = vpop.permute.xlu0 %9111  ;;  %v19658_v43 = vld [vmem:[#allocation11_spill] sm:$0xff]  ;;  %v19662_v46 = vld [vmem:[#allocation73_spill] sm:$0xff] }
 0x799   : > { %v18152_v48 = vsel %vm1222_vm8, %v8813_v7, %v17937_v60  ;;  %v8928_v28 = vsel %vm1222_vm8, %v8908_v38, %v8927_v53  ;;  %v9218_v57 = vsel %vm9217_vm14, %v9209_v21, %v9142_v49  ;;  %v9192_v10 = vsel %vm9190_vm11, %v9183_v59, %v18043_v63  ;;  %v19659_v49 = vld [vmem:[#allocation12_spill] sm:$0xff] }
 0x79a   : > { %v8891_v0 = vrot.slane %v18068_v22, 4  ;;  %v9201_v60 = vsel %vm9199_vm12, %v9192_v10, %v9080_v15  ;;  %v8916_v34 = vsel %vm1222_vm8, %v18081_v25, %v8915_v58  ;;  %v8929_v2 = vrot.slane %v8912_v41, 4 }
 0x79b   : > { %8993 = vrot.lane.b32.xlu0 %v18053_v11, %s11483_s23  ;;  %v9082_v11 = vpop.permute.xlu2 %9081  ;;  %v9210_v3 = vsel %vm9208_vm13, %v9201_v60, %v9112_v44  ;;  %v9226_v8 = vadd.f32 %v9218_v57, %v19658_v43  ;;  %v8932_v62 = vsel %vm1222_vm8, %v8912_v41, %v8931_v29  ;;  %v8933_v19 = vrot.slane %v8920_v12, 4 }
 0x79c   : > { %9091 = vrot.lane.b32.xlu1 %v8936_v14, %s18940_s21  ;;  %v9219_v6 = vsel %vm9217_vm14, %v9210_v3, %v9144_v5  ;;  %v8892_v63 = vsel %vm1222_vm8, %v18046_v52, %v8891_v0  ;;  %v8924_v22 = vperm.slane %v8916_v34, %v19567_v9  ;;  %v8925_v13 = vrot.slane %v8908_v38, 4  ;;  %v19663_v0 = vld [vmem:[#allocation13_spill] sm:$0xff]  ;;  %v19664_v34 = vld [vmem:[#allocation14_spill] sm:$0xff] }
 0x79d   : > { %v9227_v51 = vadd.f32 %v9219_v6, %v19659_v49  ;;  %v8930_v25 = vsel %vm1222_vm8, %v8929_v2, %v8888_v16  ;;  %v8934_v5 = vsel %vm1222_vm8, %v8933_v19, %v18109_v47  ;;  %v8900_v52 = vperm.slane %v8892_v63, %v19567_v9 }
 0x79e   : > { %8963 = vrot.lane.b32.xlu2 %v8928_v28, %s11485_s30  ;;  %v18177_v20 = vsel %vm1222_vm8, %v8925_v13, %v8884_v33  ;;  %v8937_v36 = vrot.slane %v8924_v22, 4  ;;  %v8365_v50 = vrot.slane %v19661_v24, 4  ;;  %v8477_v12 = vrot.slane %v17663_v42, 4 }
 0x79f   : > { %v9234_v32 = vpack.c.bf16 %v9227_v51, %v9226_v8  ;;  %v8939_v55 = vrot.slane %v8900_v52, 4 }
 0x7a0   : > { %v8938_v31 = vsel %vm1222_vm8, %v8937_v36, %v8900_v52  ;;  %v8366_v4 = vsel %vm1222_vm8, %v8365_v50, %v19662_v46  ;;  %v8478_v38 = vsel %vm1222_vm8, %v8477_v12, %v17651_v23 }
 0x7a1   : > { %9314 = vmatmul.bf16.vlgmr.msra.gmra.mxu3 %v9234_v32  ;;  %v8940_v56 = vsel %vm1222_vm8, %v8924_v22, %v8939_v55 }
 0x7a3   : > { %9027 = vrot.lane.b32.xlu0 %v8932_v62, %s11482_s22  ;;  %v8986_v39 = vpop.permute.xlu2 %8985  ;;  %s19660_s22 = smov 112   ;;  %v9018_v9 = vpop.permute.xlu1 %9017 }
 0x7a4   : > { %8995 = vrot.lane.b32.xlu1 %v8930_v25, %s11483_s23  ;;  %s10306_s23 = sshll.u32 %s18574_s18, 4  ;;  %s10307_s23 = int_to_ptr.vmem [resolvable:$true] %s10306_s23 }
 0x7a6   : > { %9059 = vrot.lane.b32.xlu2 %v8934_v5, %s11480_s19 }
 0x7a7   : > { %v8954_v47 = vpop.permute.xlu0 %8953 }
 0x7ab   : > { %9123 = vrot.lane.b32.xlu0 %v8938_v31, %s11479_s0  ;;  %s11434_s0 = scalar_lea.hbm %s18649_s17, 128 }
 0x7ac   : > { %9153 = vrot.lane.b32.xlu1 %v18099_v1, %s19660_s22  ;;  %v9020_v33 = vpop.permute.xlu2 %9019  ;;  %v9167_v1 = vsel %vm5108_vm9, %v8366_v4, %v8954_v47 }
 0x7ad   : > { %v9175_v53 = vsel %vm596_vm0, %v9167_v1, %v8986_v39 }
 0x7ae   : > { %9155 = vrot.lane.b32.xlu2 %v8940_v56, %s19660_s22  ;;  %v9184_v40 = vsel %vm9181_vm10, %v9175_v53, %v9018_v9  ;;  %s10766_s22 = sshll.u32 %s11601_s28, 6  ;;  %s10294_s28 = scalar_lea.sflag [#allocation3], %s565_s29 }
 0x7b2   : > { %v9050_v61 = vpop.permute.xlu0 %9049 }
 0x7b3   : > { %v9193_v7 = vsel %vm9190_vm11, %v9184_v40, %v9050_v61 }
 0x7b4   : > { %v9116_v27 = vpop.permute.xlu2 %9115  ;;  %v9114_v17 = vpop.permute.xlu1 %9113  ;;  %v9202_v59 = vsel %vm9199_vm12, %v9193_v7, %v9082_v11 }
 0x7b5   : > { %v9211_v21 = vsel %vm9208_vm13, %v9202_v59, %v9114_v17 }
 0x7bc   : > { %v9146_v35 = vpop.permute.xlu0 %9145  ;;  %v8958_v54 = vpop.permute.xlu2 %8957 }
 0x7bd   : > { %v9220_v57 = vsel %vm9217_vm14, %v9211_v21, %v9146_v35  ;;  %v9169_v6 = vsel %vm5108_vm9, %v18122_v30, %v8958_v54  ;;  %v19666_v54 = vld [vmem:[#allocation21_spill] sm:$0xff] }
 0x7be   : > { %v9228_v60 = vadd.f32 %v9220_v57, %v19663_v0 }
 0x7c2   : > { %v8956_v45 = vpop.permute.xlu1 %8955 }
 0x7c3   : > { %v9168_v58 = vsel %vm5108_vm9, %v8478_v38, %v8956_v45 }
 0x7c4   : > { %v9054_v16 = vpop.permute.xlu2 %9053 }
 0x7c7   : > { %v9084_v18 = vpop.permute.xlu0 %9083 }
 0x7ca   : > { %v9052_v26 = vpop.permute.xlu1 %9051 }
 0x7cc   : > { %v9150_v42 = vpop.permute.xlu2 %9149 }
 0x7cf   : > { %v8988_v14 = vpop.permute.xlu0 %8987 }
 0x7d0   : > { %v9176_v41 = vsel %vm596_vm0, %v9168_v58, %v8988_v14 }
 0x7d1   : > { %v9185_v28 = vsel %vm9181_vm10, %v9176_v41, %v9020_v33 }
 0x7d2   : > { %v9148_v15 = vpop.permute.xlu1 %9147  ;;  %v9194_v29 = vsel %vm9190_vm11, %v9185_v28, %v9052_v26 }
 0x7d3   : > { %v9203_v10 = vsel %vm9199_vm12, %v9194_v29, %v9084_v18 }
 0x7d4   : > { %v9212_v23 = vsel %vm9208_vm13, %v9203_v10, %v9116_v27  ;;  %v19665_v27 = vld [vmem:[#allocation17_spill] sm:$0xff] }
 0x7d5   : > { %v9221_v11 = vsel %vm9217_vm14, %v9212_v23, %v9148_v15 }
 0x7d6   : > { %v9229_v44 = vadd.f32 %v9221_v11, %v19664_v34  ;;  %v9088_v8 = vpop.permute.xlu2 %9087  ;;  %v19667_v11 = vld [vmem:[#allocation44_spill] sm:$0xff] }
 0x7d7   : > { %v9022_v2 = vpop.permute.xlu0 %9021 }
 0x7d8   : > { %v9235_v3 = vpack.c.bf16 %v9229_v44, %v9228_v60  ;;  %v19668_v60 = vld [vmem:[#allocation41_spill] sm:$0xff] }
 0x7da   : > { %v9086_v43 = vpop.permute.xlu1 %9085  ;;  %9319 = vmatmul.bf16.gmra.mxu3 %v9235_v3 }
 0x7df   : > { %v9118_v62 = vpop.permute.xlu0 %9117 }
 0x7e0   : > { %v8992_v63 = vpop.permute.xlu2 %8991 }
 0x7e2   : > { %v8990_v19 = vpop.permute.xlu1 %8989 }
 0x7e3   : > { %v9177_v22 = vsel %vm596_vm0, %v9169_v6, %v8990_v19 }
 0x7e4   : > { %v9186_v13 = vsel %vm9181_vm10, %v9177_v22, %v9022_v2  ;;  %v11104_v2 = vld [vmem:[%s18642_s10] ss:$0 sm:$0xff]  ;;  %v11407_v22 = vld [vmem:[%s11640_s24 + $0x8] sm:$0xff] }
 0x7e5   : > { %v9195_v32 = vsel %vm9190_vm11, %v9186_v13, %v9054_v16 }
 0x7e6   : > { %v9204_v39 = vsel %vm9199_vm12, %v9195_v32, %v9086_v43  ;;  %v11408_v32 = vld [vmem:[%s11640_s24 + $0x10] sm:$0xff] }
 0x7e7   : > { %v9213_v56 = vsel %vm9208_vm13, %v9204_v39, %v9118_v62 }
 0x7e8   : > { %v9026_v36 = vpop.permute.xlu2 %9025  ;;  %v9222_v33 = vsel %vm9217_vm14, %v9213_v56, %v9150_v42 }
 0x7e9   : > { %v8960_v49 = vpop.permute.xlu0 %8959  ;;  %v9230_v17 = vadd.f32 %v9222_v33, %v19665_v27  ;;  %v11410_v33 = vld [vmem:[%s11640_s24 + $0x20] sm:$0xff] }
 0x7ea   : > { %v9024_v51 = vpop.permute.xlu1 %9023  ;;  %v9170_v25 = vsel %vm5108_vm9, %v18138_v37, %v8960_v49 }
 0x7eb   : > { %v9178_v5 = vsel %vm596_vm0, %v9170_v25, %v8992_v63 }
 0x7ec   : > { %v9187_v30 = vsel %vm9181_vm10, %v9178_v5, %v9024_v51 }
 0x7f0   : > { %v9122_v50 = vpop.permute.xlu2 %9121 }
 0x7f5   : > { %v9056_v52 = vpop.permute.xlu0 %9055 }
 0x7f6   : > { %v9120_v55 = vpop.permute.xlu1 %9119  ;;  %v9196_v31 = vsel %vm9190_vm11, %v9187_v30, %v9056_v52  ;;  %v11409_v30 = vld [vmem:[%s11640_s24 + $0x18] sm:$0xff] }
 0x7f7   : > { %v9205_v47 = vsel %vm9199_vm12, %v9196_v31, %v9088_v8  ;;  %v11406_v8 = vld [vmem:[%s11640_s24] sm:$0xff] }
 0x7f8   : > { %v9214_v9 = vsel %vm9208_vm13, %v9205_v47, %v9120_v55  ;;  %v8964_v1 = vpop.permute.xlu2 %8963 }
 0x7f9   : > { %v9172_v38 = vsel %vm5108_vm9, %v18177_v20, %v8964_v1 }
 0x7fd   : > { %v9152_v37 = vpop.permute.xlu0 %9151 }
 0x7fe   : > { %v9223_v61 = vsel %vm9217_vm14, %v9214_v9, %v9152_v37  ;;  %v8962_v35 = vpop.permute.xlu1 %8961 }
 0x7ff   : > { %v9231_v24 = vadd.f32 %v9223_v61, %v19666_v54  ;;  %v9171_v16 = vsel %vm5108_vm9, %v18152_v48, %v8962_v35 }
 0x800   : > { %v9060_v12 = vpop.permute.xlu2 %9059 }
 0x801   : > { %v9236_v45 = vpack.c.bf16 %v9231_v24, %v9230_v17  ;;  %v11411_v17 = vld [vmem:[%s11640_s24 + $0x28] sm:$0xff] }
 0x803   : > { %9324 = vmatmul.bf16.gmra.mxu3 %v9236_v45 }
 0x805   : > { %v9090_v46 = vpop.permute.xlu0 %9089 }
 0x806   : > { %v9058_v4 = vpop.permute.xlu1 %9057 }
 0x808   : > { %v9156_v42 = vpop.permute.xlu2 %9155 }
 0x80d   : > { %v8994_v18 = vpop.permute.xlu0 %8993 }
 0x80e   : > { %v9092_v53 = vpop.permute.xlu1 %9091  ;;  %v9179_v26 = vsel %vm596_vm0, %v9171_v16, %v8994_v18 }
 0x80f   : > { %v9188_v7 = vsel %vm9181_vm10, %v9179_v26, %v9026_v36  ;;  %v11412_v26 = vld [vmem:[%s11640_s24 + $0x30] sm:$0xff] }
 0x810   : > { %v9197_v14 = vsel %vm9190_vm11, %v9188_v7, %v9058_v4 }
 0x811   : > { %v9206_v48 = vsel %vm9199_vm12, %v9197_v14, %v9090_v46 }
 0x812   : > { %v9215_v20 = vsel %vm9208_vm13, %v9206_v48, %v9122_v50  ;;  %v19669_v50 = vld [vmem:[#allocation10_spill] sm:$0xff] }
 0x815   : > { %v9028_v40 = vpop.permute.xlu0 %9027 }
 0x816   : > { %v8996_v59 = vpop.permute.xlu1 %8995 }
 0x817   : > { %v9180_v58 = vsel %vm596_vm0, %v9172_v38, %v8996_v59 }
 0x818   : > { %v9189_v41 = vsel %vm9181_vm10, %v9180_v58, %v9028_v40 }
 0x819   : > { %v9198_v15 = vsel %vm9190_vm11, %v9189_v41, %v9060_v12 }
 0x81a   : > { %v9207_v21 = vsel %vm9199_vm12, %v9198_v15, %v9092_v53  ;;  %v11413_v15 = vld [vmem:[%s11640_s24 + $0x38] sm:$0xff]  ;;  %s10305_s24 = scalar_lea.hbm %s18649_s17, %s10766_s22 }
 0x81b   : > { %s10308_s30 = sshll.u32 %s10305_s24, 4  ;;  %s10309_s30 = int_to_ptr.hbm [resolvable:$true] %s10308_s30 }
 0x81c   : > { %s11428_s21 = sshra.s32 %s10309_s30, 4  ;;  %s11429_s21 = int_to_ptr.hbm [resolvable:$true] %s11428_s21 }
 0x81d   : > { %v9124_v28 = vpop.permute.xlu0 %9123  ;;  %s11430_s26 = scalar_lea.hbm %s11429_s21, 64  ;;  %p11435_p0 = scmp.lt.s32.totalorder %s11429_s21, %s18649_s17 }
 0x81e   : > { %v9216_v29 = vsel %vm9208_vm13, %v9207_v21, %v9124_v28  ;;  %v9154_v57 = vpop.permute.xlu1 %9153  ;;  %p11431_p11 = scmp.ne.s32.totalorder %s11429_s21, %s11430_s26  ;;  %p11436_p1 = scmp.lt.s32.totalorder %s11434_s0, %s11430_s26 }
 0x81f   : > { %v9225_v10 = vsel %vm9217_vm14, %v9216_v29, %v9156_v42  ;;  %v9224_v23 = vsel %vm9217_vm14, %v9215_v20, %v9154_v57 }
 0x820   : > { %v9233_v0 = vadd.f32 %v9225_v10, %v19667_v11  ;;  %v9232_v34 = vadd.f32 %v9224_v23, %v19668_v60  ;;  %p11432_p12 = pnand %p11431_p11, %p11618_p5  ;;  %p11437_p2 = por %p11436_p1, %p11435_p0 }
 0x822   : > { %v9237_v44 = vpack.c.bf16 %v9233_v0, %v9232_v34  ;;  %p11433_p13 = pneg %p11432_p12 }
 0x824   : > { %9329 = vmatmul.bf16.gmra.mxu3 %v9237_v44  ;;  %v9315_v3 = vpop.f32.mrf.mxu3  ;;  %p11438_p3 = pnand %p11437_p2, %p11433_p13 }
 0x825   : > { %v9316_v43 = vadd.f32 %v11104_v2, %v9315_v3 }
 0x827   : > { %v9335_v62 = vadd.f32 %v11406_v8, %v9316_v43 }
 0x829   : > { %v9345_v19 = vsel %vm596_vm0, %v9335_v62, 0.0 }
 0x82a   : > { %9346 = vadd.xlane.f32.xlu0 %v9345_v19 }
 0x82c   : > { %v9317_v6 = vpop.f32.mrf.mxu3 }
 0x82d   : > { %v9318_v63 = vadd.f32 %v11104_v2, %v9317_v6 }
 0x82f   : > { %v9336_v49 = vadd.f32 %v11407_v22, %v9318_v63 }
 0x831   : > { %v9348_v51 = vsel %vm596_vm0, %v9336_v49, 0.0 }
 0x832   : > { %9349 = vadd.xlane.f32.xlu1 %v9348_v51 }
 0x85d   : > { %v9320_v13 = vpop.f32.mrf.mxu3 }
 0x85e   : > { %v9321_v25 = vadd.f32 %v11104_v2, %v9320_v13 }
 0x860   : > { %v9337_v5 = vadd.f32 %v11408_v32, %v9321_v25  ;;  %v10547_v32 = vld [vmem:[%s18645_s13 + $0x20] sm:$0xf] }
 0x862   : > { %v9351_v52 = vsel %vm596_vm0, %v9337_v5, 0.0 }
 0x863   : > { %9352 = vadd.xlane.f32.xlu2 %v9351_v52  ;;  %v10730_v52 = vld [vmem:[%s18645_s13 + $0x24] sm:$0xf] }
 0x865   : > { %v9322_v39 = vpop.f32.mrf.mxu3 }
 0x866   : > { %v9323_v36 = vadd.f32 %v11104_v2, %v9322_v39 }
 0x868   : > { %v9338_v55 = vadd.f32 %v11409_v30, %v9323_v36  ;;  %v10549_v36 = vld [vmem:[%s18645_s13 + $0x30] sm:$0xf0]  ;;  %v10555_v30 = vld [vmem:[%s18645_s13 + $0x28] sm:$0xf] }
 0x86a   : > { %v9354_v31 = vsel %vm596_vm0, %v9338_v55, 0.0 }
 0x86b   : > { %9355 = vadd.xlane.f32.xlu0 %v9354_v31 }
 0x886   : > { %v9325_v56 = vpop.f32.mrf.mxu3 }
 0x887   : > { %v9326_v47 = vadd.f32 %v11104_v2, %v9325_v56  ;;  %v10552_v56 = vor.u32 %v10730_v52, %v10549_v36 }
 0x889   : > { %v9339_v37 = vadd.f32 %v11410_v33, %v9326_v47  ;;  %v10731_v33 = vld [vmem:[%s18645_s13 + $0x2c] sm:$0xf]  ;;  %9652 = vmatpush.bf16.msrb.mxu2 %v10552_v56 }
 0x88b   : > { %v9357_v9 = vsel %vm596_vm0, %v9339_v37, 0.0 }
 0x88c   : > { %9358 = vadd.xlane.f32.xlu1 %v9357_v9  ;;  %v10531_v9 = vld [vmem:[%s18645_s13] sm:$0xf] }
 0x88e   : > { %v9327_v61 = vpop.f32.mrf.mxu3 }
 0x88f   : > { %v9328_v27 = vadd.f32 %v11104_v2, %v9327_v61 }
 0x891   : > { %v9340_v35 = vadd.f32 %v11411_v17, %v9328_v27  ;;  %v10728_v17 = vld [vmem:[%s18645_s13 + $0xc] sm:$0xf0] }
 0x893   : > { %v9360_v54 = vsel %vm596_vm0, %v9340_v35, 0.0 }
 0x894   : > { %9361 = vadd.xlane.f32.xlu2 %v9360_v54  ;;  %v10533_v54 = vld [vmem:[%s18645_s13 + $0x10] sm:$0xf0] }
 0x89d   : > { %v9347_v24 = vpop.xlane.xlu0 %9346 }
 0x89e   : > { %v9369_v45 = vmul.f32 %v9347_v24, %v19669_v50 }
 0x8a0   : > { %v18264_v46 = vsub.f32 %v9335_v62, %v9369_v45 }
 0x8a2   : > { %v9385_v4 = vmul.f32 %v18264_v46, %v18264_v46 }
 0x8a4   : > { %v9393_v53 = vsel %vm596_vm0, %v9385_v4, 0.0  ;;  %v10532_v4 = vor.u32 %v10728_v17, %v10531_v9 }
 0x8a5   : > { %9394 = vadd.xlane.f32.xlu0 %v9393_v53  ;;  %v9350_v16 = vpop.xlane.xlu1 %9349  ;;  %v10727_v53 = vld [vmem:[%s18645_s13 + $0xc] sm:$0xf] }
 0x8a6   : > { %v9370_v40 = vmul.f32 %v9350_v16, %v19669_v50 }
 0x8a7   : > { %v9330_v1 = vpop.f32.mrf.mxu3 }
 0x8a8   : > { %v9331_v18 = vadd.f32 %v11104_v2, %v9330_v1  ;;  %v18272_v38 = vsub.f32 %v9336_v49, %v9370_v40  ;;  %v10539_v1 = vld [vmem:[%s18645_s13 + $0x8] sm:$0xf] }
 0x8aa   : > { %v9341_v12 = vadd.f32 %v11412_v26, %v9331_v18  ;;  %v9386_v59 = vmul.f32 %v18272_v38, %v18272_v38  ;;  %v10729_v18 = vld [vmem:[%s18645_s13 + $0x14] sm:$0xf0] }
 0x8ab   : > { %v10540_v26 = vor.u32 %v10729_v18, %v10539_v1 }
 0x8ac   : > { %v9363_v7 = vsel %vm596_vm0, %v9341_v12, 0.0  ;;  %v9396_v41 = vsel %vm596_vm0, %v9386_v59, 0.0 }
 0x8ad   : > { %9364 = vadd.xlane.f32.xlu2 %v9363_v7  ;;  %9397 = vadd.xlane.f32.xlu1 %v9396_v41 }
 0x8af   : > { %v9332_v58 = vpop.f32.mrf.mxu3 }
 0x8b0   : > { %v9333_v14 = vadd.f32 %v11104_v2, %v9332_v58 }
 0x8b2   : > { %v18278_v48 = vadd.f32 %v11413_v15, %v9333_v14 }
 0x8b4   : > { %v9366_v28 = vsel %vm596_vm0, %v18278_v48, 0.0 }
 0x8b5   : > { %9367 = vadd.xlane.f32.xlu0 %v9366_v28 }
 0x8d6   : > { %v9353_v21 = vpop.xlane.xlu2 %9352 }
 0x8d7   : > { %v9371_v42 = vmul.f32 %v9353_v21, %v19669_v50 }
 0x8d9   : > { %v18283_v29 = vsub.f32 %v9337_v5, %v9371_v42  ;;  %v10732_v5 = vld [vmem:[%s18645_s13 + $0x2c] sm:$0xf0] }
 0x8da   : > { %v10548_v39 = vor.u32 %v10732_v5, %v10547_v32 }
 0x8db   : > { %v9387_v20 = vmul.f32 %v18283_v29, %v18283_v29 }
 0x8dc   : > { %9623 = vmatpush.bf16.msra.mxu1 %v10548_v39 }
 0x8dd   : > { %v9399_v57 = vsel %vm596_vm0, %v9387_v20, 0.0 }
 0x8de   : > { %v9356_v10 = vpop.xlane.xlu0 %9355  ;;  %9400 = vadd.xlane.f32.xlu1 %v9399_v57 }
 0x8df   : > { %v9372_v23 = vmul.f32 %v9356_v10, %v19669_v50 }
 0x8e0   : > { %9624 = vmatpush.bf16.msra.mxu1 %v10532_v4 }
 0x8e1   : > { %v18289_v11 = vsub.f32 %v9338_v55, %v9372_v23  ;;  %v10733_v55 = vld [vmem:[%s18645_s13 + $0x34] sm:$0xf0] }
 0x8e2   : > { %v10556_v47 = vor.u32 %v10733_v55, %v10555_v30 }
 0x8e3   : > { %v9388_v0 = vmul.f32 %v18289_v11, %v18289_v11 }
 0x8e4   : > { %9681 = vmatpush.bf16.msrb.mxu0 %v10556_v47 }
 0x8e5   : > { %v9402_v60 = vsel %vm596_vm0, %v9388_v0, 0.0 }
 0x8e6   : > { %9403 = vadd.xlane.f32.xlu2 %v9402_v60 }
 0x8e8   : > { %9682 = vmatpush.bf16.msrb.mxu0 %v10540_v26 }
 0x8ff   : > { %v9359_v34 = vpop.xlane.xlu1 %9358 }
 0x900   : > { %v9373_v44 = vmul.f32 %v9359_v34, %v19669_v50 }
 0x902   : > { %v18295_v2 = vsub.f32 %v9339_v37, %v9373_v44  ;;  %v10557_v37 = vld [vmem:[%s18645_s13 + $0x38] sm:$0xf0] }
 0x903   : > { %v10560_v27 = vor.u32 %v10731_v33, %v10557_v37 }
 0x904   : > { %v9389_v3 = vmul.f32 %v18295_v2, %v18295_v2 }
 0x905   : > { %9710 = vmatpush.bf16.msrb.mxu3 %v10560_v27 }
 0x906   : > { %v9405_v43 = vsel %vm596_vm0, %v9389_v3, 0.0 }
 0x907   : > { %v9362_v8 = vpop.xlane.xlu2 %9361  ;;  %9406 = vadd.xlane.f32.xlu0 %v9405_v43 }
 0x908   : > { %v9374_v62 = vmul.f32 %v9362_v8, %v19669_v50 }
 0x90a   : > { %v18301_v19 = vsub.f32 %v9340_v35, %v9374_v62  ;;  %v10726_v35 = vld [vmem:[%s18645_s13 + $0x4] sm:$0xf] }
 0x90b   : > { %v10536_v16 = vor.u32 %v10726_v35, %v10533_v54 }
 0x90c   : > { %v9390_v6 = vmul.f32 %v18301_v19, %v18301_v19 }
 0x90d   : > { %9653 = vmatpush.bf16.msrb.mxu2 %v10536_v16 }
 0x90e   : > { %v9408_v63 = vsel %vm596_vm0, %v9390_v6, 0.0 }
 0x90f   : > { %9409 = vadd.xlane.f32.xlu1 %v9408_v63  ;;  %v18378_v63 = vld [vmem:[%s18644_s12] ss:$0 sm:$0xff] }
 0x918   : > { %v9395_v22 = vpop.xlane.xlu0 %9394 }
 0x919   : > { %v9417_v49 = vmul.f32 %v9395_v22, %v19669_v50 }
 0x91b   : > { %v9425_v51 = vadd.f32 0.001, %v9417_v49 }
 0x91d   : > { %11390 = vrsqrt.f32 %v9425_v51  ;;  %vm9439_vm1 = vweird.f32 %v9425_v51 }
 0x920   : > { %v9365_v13 = vpop.xlane.xlu2 %9364  ;;  %v9398_v61 = vpop.xlane.xlu1 %9397 }
 0x921   : > { %v9375_v25 = vmul.f32 %v9365_v13, %v19669_v50  ;;  %v9418_v45 = vmul.f32 %v9398_v61, %v19669_v50 }
 0x923   : > { %v18326_v31 = vsub.f32 %v9341_v12, %v9375_v25  ;;  %v10541_v12 = vld [vmem:[%s18645_s13 + $0x18] sm:$0xf0]  ;;  %v11391_v40 = vpop.eup %11390  ;;  %v9426_v59 = vadd.f32 0.001, %v9418_v45 }
 0x924   : > { %v10544_v58 = vor.u32 %v10727_v53, %v10541_v12  ;;  %v9434_v14 = vmul.f32 %v11391_v40, %v9425_v51  ;;  %vm9440_vm15 = vweird.f32 %v11391_v40 }
 0x925   : > { %v9391_v24 = vmul.f32 %v18326_v31, %v18326_v31  ;;  %11392 = vrsqrt.f32 %v9426_v59  ;;  %vm9441_vm2 = vmor %vm9439_vm1, %vm9440_vm15  ;;  %vm9449_vm4 = vweird.f32 %v9426_v59 }
 0x926   : > { %v9435_v28 = vmul.f32 %v11391_v40, %v9434_v14  ;;  %9711 = vmatpush.bf16.msrb.mxu3 %v10544_v58 }
 0x927   : > { %v9411_v7 = vsel %vm596_vm0, %v9391_v24, 0.0 }
 0x928   : > { %9412 = vadd.xlane.f32.xlu2 %v9411_v7  ;;  %v9368_v41 = vpop.xlane.xlu0 %9367  ;;  %v9436_v42 = vmul.f32 0.5, %v9435_v28 }
 0x929   : > { %v9376_v15 = vmul.f32 %v9368_v41, %v19669_v50 }
 0x92a   : > { %v9437_v57 = vsub.f32 1.5, %v9436_v42 }
 0x92b   : > { %v18364_v21 = vsub.f32 %v18278_v48, %v9376_v15  ;;  %v11393_v10 = vpop.eup %11392  ;;  %v18372_v48 = vld [vmem:[%s18643_s11] ss:$0 sm:$0xff] }
 0x92c   : > { %v9438_v0 = vmul.f32 %v11391_v40, %v9437_v57  ;;  %v9444_v60 = vmul.f32 %v11393_v10, %v9426_v59  ;;  %vm9450_vm3 = vweird.f32 %v11393_v10 }
 0x92d   : > { %v9392_v20 = vmul.f32 %v18364_v21, %v18364_v21  ;;  %vm9451_vm5 = vmor %vm9449_vm4, %vm9450_vm3 }
 0x92e   : > { %v9445_v34 = vmul.f32 %v11393_v10, %v9444_v60  ;;  %v9442_v44 = vsel %vm9441_vm2, %v11391_v40, %v9438_v0 }
 0x92f   : > { %v9414_v23 = vsel %vm596_vm0, %v9392_v20, 0.0  ;;  %v9513_v8 = vmul.f32 %v9442_v44, %v18264_v46 }
 0x930   : > { %9415 = vadd.xlane.f32.xlu0 %v9414_v23  ;;  %v9446_v3 = vmul.f32 0.5, %v9445_v34 }
 0x931   : > { %v9524_v22 = vmul.f32 %v18372_v48, %v9513_v8 }
 0x932   : > { %v9447_v43 = vsub.f32 1.5, %v9446_v3 }
 0x933   : > { %v9535_v13 = vadd.f32 %v18378_v63, %v9524_v22  ;;  %v10741_v22 = vld [vmem:[%s18647_s15 + $0x38] sm:$0xff] }
 0x934   : > { %v9448_v62 = vmul.f32 %v11393_v10, %v9447_v43  ;;  %10169 = vmatpush.bf16.msrb.mxu1 %v10741_v22 }
 0x936   : > { %v9452_v6 = vsel %vm9451_vm5, %v11393_v10, %v9448_v62 }
 0x937   : > { %v9514_v49 = vmul.f32 %v9452_v6, %v18272_v38 }
 0x939   : > { %v9525_v51 = vmul.f32 %v18372_v48, %v9514_v49  ;;  %v10757_v49 = vld [vmem:[%s18647_s15 + $0xb8] sm:$0xff] }
 0x93a   : > { %10227 = vmatpush.bf16.msra.mxu0 %v10757_v49 }
 0x93b   : > { %v9536_v25 = vadd.f32 %v18378_v63, %v9525_v51 }
 0x93d   : > { %v9543_v46 = vpack.c.bf16 %v9536_v25, %v9535_v13 }
 0x93f   : > { %10561 = vmatmul.msk.bf16.vlgmr.msra.gmra.mxu1 %vm596_vm0, %v9543_v46  ;;  %10565 = vmatmul.msk.bf16.vlgmr.msrb.gmra.mxu2 %vm596_vm0, %v9543_v46 }
 0x940   : > { %10569 = vmatmul.msk.bf16.vlgmr.msrb.gmra.mxu0 %vm596_vm0, %v9543_v46  ;;  %10573 = vmatmul.msk.bf16.vlgmr.msrb.gmra.mxu3 %vm596_vm0, %v9543_v46 }
 0x951   : > { %v9401_v32 = vpop.xlane.xlu1 %9400 }
 0x952   : > { %v9419_v5 = vmul.f32 %v9401_v32, %v19669_v50  ;;  %v10740_v32 = vld [vmem:[%s18647_s15 + $0x30] sm:$0xff] }
 0x953   : > { %10170 = vmatpush.bf16.msrb.mxu1 %v10740_v32 }
 0x954   : > { %v9427_v52 = vadd.f32 0.001, %v9419_v5  ;;  %v10756_v5 = vld [vmem:[%s18647_s15 + $0xb0] sm:$0xff] }
 0x955   : > { %10228 = vmatpush.bf16.msra.mxu0 %v10756_v5 }
 0x956   : > { %11394 = vrsqrt.f32 %v9427_v52  ;;  %vm9459_vm7 = vweird.f32 %v9427_v52 }
 0x959   : > { %v9404_v38 = vpop.xlane.xlu2 %9403 }
 0x95a   : > { %v9420_v39 = vmul.f32 %v9404_v38, %v19669_v50  ;;  %v10749_v38 = vld [vmem:[%s18647_s15 + $0x78] sm:$0xff] }
 0x95b   : > { %10198 = vmatpush.bf16.msra.mxu2 %v10749_v38 }
 0x95c   : > { %v11395_v36 = vpop.eup %11394  ;;  %v9428_v30 = vadd.f32 0.001, %v9420_v39  ;;  %v10765_v39 = vld [vmem:[%s18647_s15 + $0xf8] sm:$0xff] }
 0x95d   : > { %v9454_v55 = vmul.f32 %v11395_v36, %v9427_v52  ;;  %vm9460_vm6 = vweird.f32 %v11395_v36  ;;  %10256 = vmatpush.bf16.msra.mxu3 %v10765_v39 }
 0x95e   : > { %11396 = vrsqrt.f32 %v9428_v30  ;;  %vm9461_vm8 = vmor %vm9459_vm7, %vm9460_vm6  ;;  %vm9469_vm10 = vweird.f32 %v9428_v30 }
 0x95f   : > { %v9455_v56 = vmul.f32 %v11395_v36, %v9454_v55 }
 0x961   : > { %v9456_v47 = vmul.f32 0.5, %v9455_v56 }
 0x963   : > { %v9457_v33 = vsub.f32 1.5, %v9456_v47 }
 0x964   : > { %v11397_v37 = vpop.eup %11396 }
 0x965   : > { %v9458_v9 = vmul.f32 %v11395_v36, %v9457_v33  ;;  %v9464_v61 = vmul.f32 %v11397_v37, %v9428_v30  ;;  %vm9470_vm9 = vweird.f32 %v11397_v37 }
 0x966   : > { %vm9471_vm11 = vmor %vm9469_vm10, %vm9470_vm9 }
 0x967   : > { %v9465_v27 = vmul.f32 %v11397_v37, %v9464_v61  ;;  %v9462_v17 = vsel %vm9461_vm8, %v11395_v36, %v9458_v9  ;;  %v10755_v9 = vld [vmem:[%s18647_s15 + $0xa8] sm:$0xff] }
 0x968   : > { %v9515_v24 = vmul.f32 %v9462_v17, %v18283_v29  ;;  %10229 = vmatpush.bf16.msra.mxu0 %v10755_v9 }
 0x969   : > { %v9466_v35 = vmul.f32 0.5, %v9465_v27  ;;  %v10764_v27 = vld [vmem:[%s18647_s15 + $0xf0] sm:$0xff] }
 0x96a   : > { %v9526_v18 = vmul.f32 %v18372_v48, %v9515_v24  ;;  %10257 = vmatpush.bf16.msra.mxu3 %v10764_v27 }
 0x96b   : > { %v9467_v54 = vsub.f32 1.5, %v9466_v35  ;;  %v10738_v35 = vld [vmem:[%s18647_s15 + $0x20] sm:$0xff] }
 0x96c   : > { %v9537_v26 = vadd.f32 %v18378_v63, %v9526_v18  ;;  %v10763_v18 = vld [vmem:[%s18647_s15 + $0xe8] sm:$0xff] }
 0x96d   : > { %v9468_v45 = vmul.f32 %v11397_v37, %v9467_v54  ;;  %v10754_v54 = vld [vmem:[%s18647_s15 + $0xa0] sm:$0xff] }
 0x96e   : > { %10230 = vmatpush.bf16.msra.mxu0 %v10754_v54  ;;  %10258 = vmatpush.bf16.msra.mxu3 %v10763_v18 }
 0x96f   : > { %v9472_v4 = vsel %vm9471_vm11, %v11397_v37, %v9468_v45  ;;  %v10739_v37 = vld [vmem:[%s18647_s15 + $0x28] sm:$0xff] }
 0x970   : > { %v9516_v1 = vmul.f32 %v9472_v4, %v18289_v11  ;;  %10171 = vmatpush.bf16.msrb.mxu1 %v10739_v37 }
 0x972   : > { %v9527_v53 = vmul.f32 %v18372_v48, %v9516_v1  ;;  %v10747_v1 = vld [vmem:[%s18647_s15 + $0x68] sm:$0xff] }
 0x974   : > { %v9538_v12 = vadd.f32 %v18378_v63, %v9527_v53  ;;  %10172 = vmatpush.bf16.msrb.mxu1 %v10738_v35 }
 0x976   : > { %v9544_v7 = vpack.c.bf16 %v9538_v12, %v9537_v26 }
 0x978   : > { %10562 = vmatmul.msk.bf16.gmra.mxu1 %vm596_vm0, %v9544_v7  ;;  %10566 = vmatmul.msk.bf16.gmra.mxu2 %vm596_vm0, %v9544_v7 }
 0x979   : > { %10570 = vmatmul.msk.bf16.gmra.mxu0 %vm596_vm0, %v9544_v7  ;;  %10574 = vmatmul.msk.bf16.gmra.mxu3 %vm596_vm0, %v9544_v7  ;;  %v10753_v7 = vld [vmem:[%s18647_s15 + $0x98] sm:$0xff] }
 0x97a   : > { %v9407_v16 = vpop.xlane.xlu0 %9406  ;;  %10231 = vmatpush.bf16.msra.mxu0 %v10753_v7 }
 0x97b   : > { %v9421_v40 = vmul.f32 %v9407_v16, %v19669_v50 }
 0x97d   : > { %v9429_v59 = vadd.f32 0.001, %v9421_v40  ;;  %v10737_v40 = vld [vmem:[%s18647_s15 + $0x18] sm:$0xff] }
 0x97e   : > { %10173 = vmatpush.bf16.msrb.mxu1 %v10737_v40 }
 0x97f   : > { %11398 = vrsqrt.f32 %v9429_v59  ;;  %vm9479_vm13 = vweird.f32 %v9429_v59 }
 0x982   : > { %v9410_v29 = vpop.xlane.xlu1 %9409 }
 0x983   : > { %v9422_v11 = vmul.f32 %v9410_v29, %v19669_v50 }
 0x985   : > { %v11399_v58 = vpop.eup %11398  ;;  %v9430_v14 = vadd.f32 0.001, %v9422_v11  ;;  %v10762_v11 = vld [vmem:[%s18647_s15 + $0xe0] sm:$0xff] }
 0x986   : > { %v9474_v41 = vmul.f32 %v11399_v58, %v9429_v59  ;;  %vm9480_vm12 = vweird.f32 %v11399_v58  ;;  %v10746_v59 = vld [vmem:[%s18647_s15 + $0x60] sm:$0xff]  ;;  %10259 = vmatpush.bf16.msra.mxu3 %v10762_v11 }
 0x987   : > { %11400 = vrsqrt.f32 %v9430_v14  ;;  %vm9481_vm14 = vmor %vm9479_vm13, %vm9480_vm12  ;;  %vm9489_vm1 = vweird.f32 %v9430_v14 }
 0x988   : > { %v9475_v15 = vmul.f32 %v11399_v58, %v9474_v41 }
 0x98a   : > { %v9476_v28 = vmul.f32 0.5, %v9475_v15 }
 0x98c   : > { %v9477_v42 = vsub.f32 1.5, %v9476_v28  ;;  %v9555_v28 = vld [vmem:[%s18646_s14] sm:$0xf] }
 0x98d   : > { %v11401_v20 = vpop.eup %11400 }
 0x98e   : > { %v9478_v57 = vmul.f32 %v11399_v58, %v9477_v42  ;;  %v9484_v10 = vmul.f32 %v11401_v20, %v9430_v14  ;;  %vm9490_vm15 = vweird.f32 %v11401_v20 }
 0x98f   : > { %vm9491_vm2 = vmor %vm9489_vm1, %vm9490_vm15 }
 0x990   : > { %v9485_v23 = vmul.f32 %v11401_v20, %v9484_v10  ;;  %v9482_v0 = vsel %vm9481_vm14, %v11399_v58, %v9478_v57  ;;  %v10752_v58 = vld [vmem:[%s18647_s15 + $0x90] sm:$0xff]  ;;  %v10761_v57 = vld [vmem:[%s18647_s15 + $0xd8] sm:$0xff]  ;;  %v18491_v10 = vperm.slane %v9555_v28, 0 }
 0x991   : > { %v9517_v44 = vmul.f32 %v9482_v0, %v18295_v2  ;;  %10232 = vmatpush.bf16.msra.mxu0 %v10752_v58  ;;  %10260 = vmatpush.bf16.msra.mxu3 %v10761_v57 }
 0x992   : > { %v9486_v60 = vmul.f32 0.5, %v9485_v23 }
 0x993   : > { %v9528_v62 = vmul.f32 %v18372_v48, %v9517_v44 }
 0x994   : > { %v9487_v34 = vsub.f32 1.5, %v9486_v60  ;;  %v18498_v60 = vperm.slane %v9555_v28, 2 }
 0x995   : > { %v9539_v13 = vadd.f32 %v18378_v63, %v9528_v62 }
 0x996   : > { %v9488_v3 = vmul.f32 %v11401_v20, %v9487_v34 }
 0x998   : > { %v9492_v43 = vsel %vm9491_vm2, %v11401_v20, %v9488_v3  ;;  %v10745_v20 = vld [vmem:[%s18647_s15 + $0x58] sm:$0xff]  ;;  %v10744_v3 = vld [vmem:[%s18647_s15 + $0x50] sm:$0xff] }
 0x999   : > { %v9518_v8 = vmul.f32 %v9492_v43, %v18301_v19  ;;  %v10760_v43 = vld [vmem:[%s18647_s15 + $0xd0] sm:$0xff] }
 0x99a   : > { %10261 = vmatpush.bf16.msra.mxu3 %v10760_v43 }
 0x99b   : > { %v9529_v6 = vmul.f32 %v18372_v48, %v9518_v8  ;;  %v9413_v51 = vpop.xlane.xlu2 %9412 }
 0x99c   : > { %v9423_v2 = vmul.f32 %v9413_v51, %v19669_v50  ;;  %v18518_v51 = vperm.slane %v9555_v28, 1 }
 0x99d   : > { %v9540_v25 = vadd.f32 %v18378_v63, %v9529_v6  ;;  %v10750_v6 = vld [vmem:[%s18647_s15 + $0x80] sm:$0xff] }
 0x99e   : > { %v9431_v19 = vadd.f32 0.001, %v9423_v2 }
 0x99f   : > { %v9545_v46 = vpack.c.bf16 %v9540_v25, %v9539_v13  ;;  %v18520_v13 = vperm.slane %v9555_v28, 3  ;;  %v10743_v25 = vld [vmem:[%s18647_s15 + $0x48] sm:$0xff] }
 0x9a0   : > { %11402 = vrsqrt.f32 %v9431_v19  ;;  %vm9499_vm4 = vweird.f32 %v9431_v19 }
 0x9a1   : > { %10563 = vmatmul.msk.bf16.gmra.mxu1 %vm596_vm0, %v9545_v46  ;;  %10567 = vmatmul.msk.bf16.gmra.mxu2 %vm596_vm0, %v9545_v46 }
 0x9a2   : > { %10571 = vmatmul.msk.bf16.gmra.mxu0 %vm596_vm0, %v9545_v46  ;;  %10575 = vmatmul.msk.bf16.gmra.mxu3 %vm596_vm0, %v9545_v46 }
 0x9a3   : > { %v9416_v52 = vpop.xlane.xlu0 %9415 }
 0x9a4   : > { %v9424_v36 = vmul.f32 %v9416_v52, %v19669_v50  ;;  %v10748_v50 = vld [vmem:[%s18647_s15 + $0x70] sm:$0xff] }
 0x9a5   : > { %10199 = vmatpush.bf16.msra.mxu2 %v10748_v50 }
 0x9a6   : > { %v11403_v30 = vpop.eup %11402  ;;  %v9432_v55 = vadd.f32 0.001, %v9424_v36 }
 0x9a7   : > { %v9494_v56 = vmul.f32 %v11403_v30, %v9431_v19  ;;  %vm9500_vm3 = vweird.f32 %v11403_v30  ;;  %v10759_v19 = vld [vmem:[%s18647_s15 + $0xc8] sm:$0xff] }
 0x9a8   : > { %11404 = vrsqrt.f32 %v9432_v55  ;;  %vm9501_vm5 = vmor %vm9499_vm4, %vm9500_vm3  ;;  %vm9509_vm7 = vweird.f32 %v9432_v55  ;;  %10262 = vmatpush.bf16.msra.mxu3 %v10759_v19 }
 0x9a9   : > { %v9495_v47 = vmul.f32 %v11403_v30, %v9494_v56  ;;  %10200 = vmatpush.bf16.msra.mxu2 %v10747_v1 }
 0x9ab   : > { %v9496_v33 = vmul.f32 0.5, %v9495_v47 }
 0x9ad   : > { %v9497_v61 = vsub.f32 1.5, %v9496_v33  ;;  %10201 = vmatpush.bf16.msra.mxu2 %v10746_v59 }
 0x9ae   : > { %v11405_v17 = vpop.eup %11404 }
 0x9af   : > { %v9498_v24 = vmul.f32 %v11403_v30, %v9497_v61  ;;  %v9504_v45 = vmul.f32 %v11405_v17, %v9432_v55  ;;  %vm9510_vm6 = vweird.f32 %v11405_v17  ;;  %v10758_v55 = vld [vmem:[%s18647_s15 + $0xc0] sm:$0xff] }
 0x9b0   : > { %vm9511_vm8 = vmor %vm9509_vm7, %vm9510_vm6  ;;  %10263 = vmatpush.bf16.msra.mxu3 %v10758_v55 }
 0x9b1   : > { %v9505_v4 = vmul.f32 %v11405_v17, %v9504_v45  ;;  %v9502_v53 = vsel %vm9501_vm5, %v11403_v30, %v9498_v24  ;;  %10202 = vmatpush.bf16.msra.mxu2 %v10745_v20  ;;  %v10742_v30 = vld [vmem:[%s18647_s15 + $0x40] sm:$0xff] }
 0x9b2   : > { %v9519_v12 = vmul.f32 %v9502_v53, %v18326_v31  ;;  %v10736_v31 = vld [vmem:[%s18647_s15 + $0x10] sm:$0xff] }
 0x9b3   : > { %v9506_v16 = vmul.f32 0.5, %v9505_v4  ;;  %10174 = vmatpush.bf16.msrb.mxu1 %v10736_v31 }
 0x9b4   : > { %v9530_v15 = vmul.f32 %v18372_v48, %v9519_v12 }
 0x9b5   : > { %v9507_v26 = vsub.f32 1.5, %v9506_v16  ;;  %10203 = vmatpush.bf16.msra.mxu2 %v10744_v3 }
 0x9b6   : > { %v9541_v23 = vadd.f32 %v18378_v63, %v9530_v15 }
 0x9b7   : > { %v9508_v29 = vmul.f32 %v11405_v17, %v9507_v26 }
 0x9b9   : > { %v9512_v14 = vsel %vm9511_vm8, %v11405_v17, %v9508_v29  ;;  %10204 = vmatpush.bf16.msra.mxu2 %v10743_v25 }
 0x9ba   : > { %v9520_v41 = vmul.f32 %v9512_v14, %v18364_v21  ;;  %v10735_v21 = vld [vmem:[%s18647_s15 + $0x8] sm:$0xff] }
 0x9bb   : > { %10175 = vmatpush.bf16.msrb.mxu1 %v10735_v21 }
 0x9bc   : > { %v9531_v42 = vmul.f32 %v18372_v48, %v9520_v41  ;;  %v10751_v48 = vld [vmem:[%s18647_s15 + $0x88] sm:$0xff]  ;;  %v9626_v44 = vpop.f32.mrf.mxu1 }
 0x9bd   : > { %10233 = vmatpush.bf16.msra.mxu0 %v10751_v48  ;;  %v9627_v8 = vadd.f32 %v9626_v44, %v18491_v10  ;;  %v9684_v62 = vpop.f32.mrf.mxu0  ;;  %10205 = vmatpush.bf16.msra.mxu2 %v10742_v30 }
 0x9be   : > { %v9542_v0 = vadd.f32 %v18378_v63, %v9531_v42  ;;  %v10734_v63 = vld [vmem:[%s18647_s15] sm:$0xff]  ;;  %v9685_v22 = vadd.f32 %v9684_v62, %v18498_v60 }
 0x9bf   : > { %v9733_v49 = vadd.f32 3.0, %v9627_v8  ;;  %10176 = vmatpush.bf16.msrb.mxu1 %v10734_v63 }
 0x9c0   : > { %v9546_v34 = vpack.c.bf16 %v9542_v0, %v9541_v23  ;;  %v9735_v2 = vadd.f32 3.0, %v9685_v22 }
 0x9c1   : > { %10234 = vmatpush.bf16.msra.mxu0 %v10750_v6  ;;  %v9765_v32 = vmax.f32 %v9733_v49, 0.0 }
 0x9c2   : > { %10564 = vmatmul.msk.bf16.gmra.mxu1 %vm596_vm0, %v9546_v34  ;;  %10568 = vmatmul.msk.bf16.gmra.mxu2 %vm596_vm0, %v9546_v34  ;;  %v9655_v46 = vpop.f32.mrf.mxu2  ;;  %v9767_v38 = vmax.f32 %v9735_v2, 0.0 }
 0x9c3   : > { %10572 = vmatmul.msk.bf16.gmra.mxu0 %vm596_vm0, %v9546_v34  ;;  %10576 = vmatmul.msk.bf16.gmra.mxu3 %vm596_vm0, %v9546_v34  ;;  %v9656_v5 = vadd.f32 %v9655_v46, %v18518_v51  ;;  %v9713_v52 = vpop.f32.mrf.mxu3  ;;  %v9797_v50 = vmin.f32 %v9765_v32, 6.0 }
 0x9c4   : > { %v9714_v39 = vadd.f32 %v9713_v52, %v18520_v13  ;;  %v9628_v36 = vpop.f32.mrf.mxu1  ;;  %v9799_v27 = vmin.f32 %v9767_v38, 6.0 }
 0x9c5   : > { %v9734_v56 = vadd.f32 3.0, %v9656_v5  ;;  %v9629_v47 = vadd.f32 %v9628_v36, %v18491_v10  ;;  %v9686_v33 = vpop.f32.mrf.mxu0  ;;  %v9829_v1 = vmul.f32 %v9797_v50, %v9627_v8 }
 0x9c6   : > { %v9736_v37 = vadd.f32 3.0, %v9714_v39  ;;  %v9687_v9 = vadd.f32 %v9686_v33, %v18498_v60  ;;  %v9831_v26 = vmul.f32 %v9799_v27, %v9685_v22 }
 0x9c7   : > { %v9737_v61 = vadd.f32 3.0, %v9629_v47  ;;  %v9766_v35 = vmax.f32 %v9734_v56, 0.0  ;;  %v9861_v14 = vmul.f32 0.16666667, %v9829_v1 }
 0x9c8   : > { %v9739_v17 = vadd.f32 3.0, %v9687_v9  ;;  %v9768_v24 = vmax.f32 %v9736_v37, 0.0  ;;  %v9863_v28 = vmul.f32 0.16666667, %v9831_v26 }
 0x9c9   : > { %v9769_v54 = vmax.f32 %v9737_v61, 0.0  ;;  %v9798_v7 = vmin.f32 %v9766_v35, 6.0 }
 0x9ca   : > { %v9771_v45 = vmax.f32 %v9739_v17, 0.0  ;;  %v9657_v4 = vpop.f32.mrf.mxu2  ;;  %v9800_v11 = vmin.f32 %v9768_v24, 6.0 }
 0x9cb   : > { %v9801_v18 = vmin.f32 %v9769_v54, 6.0  ;;  %v9658_v53 = vadd.f32 %v9657_v4, %v18518_v51  ;;  %v9715_v16 = vpop.f32.mrf.mxu3  ;;  %v9830_v57 = vmul.f32 %v9798_v7, %v9656_v5 }
 0x9cc   : > { %v9803_v12 = vmin.f32 %v9771_v45, 6.0  ;;  %v9716_v40 = vadd.f32 %v9715_v16, %v18520_v13  ;;  %v9832_v23 = vmul.f32 %v9800_v11, %v9714_v39 }
 0x9cd   : > { %v9833_v59 = vmul.f32 %v9801_v18, %v9629_v47  ;;  %v9738_v29 = vadd.f32 3.0, %v9658_v53  ;;  %v9862_v43 = vmul.f32 0.16666667, %v9830_v57 }
 0x9ce   : > { %v9835_v31 = vmul.f32 %v9803_v12, %v9687_v9  ;;  %v9740_v58 = vadd.f32 3.0, %v9716_v40  ;;  %v9864_v62 = vmul.f32 0.16666667, %v9832_v23 }
 0x9cf   : > { %v9865_v41 = vmul.f32 0.16666667, %v9833_v59  ;;  %v9770_v15 = vmax.f32 %v9738_v29, 0.0 }
 0x9d0   : > { %v9867_v42 = vmul.f32 0.16666667, %v9835_v31  ;;  %v9772_v20 = vmax.f32 %v9740_v58, 0.0 }
 0x9d1   : > { %v9893_v21 = vpack.c.bf16 %v9865_v41, %v9861_v14  ;;  %v9802_v48 = vmin.f32 %v9770_v15, 6.0 }
 0x9d2   : > { %v9895_v0 = vpack.c.bf16 %v9867_v42, %v9863_v28  ;;  %v9804_v34 = vmin.f32 %v9772_v20, 6.0 }
 0x9d3   : > { %v9834_v44 = vmul.f32 %v9802_v48, %v9658_v53  ;;  %10177 = vmatmul.bf16.vlgmr.msrb.gmra.mxu1 %v9893_v21 }
 0x9d4   : > { %v9836_v3 = vmul.f32 %v9804_v34, %v9716_v40  ;;  %10235 = vmatmul.bf16.vlgmr.msra.gmra.mxu0 %v9895_v0 }
 0x9d5   : > { %v9866_v8 = vmul.f32 0.16666667, %v9834_v44 }
 0x9d6   : > { %v9868_v63 = vmul.f32 0.16666667, %v9836_v3 }
 0x9d7   : > { %v9894_v6 = vpack.c.bf16 %v9866_v8, %v9862_v43 }
 0x9d8   : > { %v9896_v22 = vpack.c.bf16 %v9868_v63, %v9864_v62 }
 0x9d9   : > { %10206 = vmatmul.bf16.vlgmr.msra.gmra.mxu2 %v9894_v6 }
 0x9da   : > { %10264 = vmatmul.bf16.vlgmr.msra.gmra.mxu3 %v9896_v22 }
 0x9f5   : > { %v9631_v49 = vpop.f32.mrf.mxu1 }
 0x9f6   : > { %v9632_v2 = vadd.f32 %v9631_v49, %v18491_v10  ;;  %v9689_v25 = vpop.f32.mrf.mxu0 }
 0x9f7   : > { %v9690_v19 = vadd.f32 %v9689_v25, %v18498_v60 }
 0x9f8   : > { %v9741_v46 = vadd.f32 3.0, %v9632_v2 }
 0x9f9   : > { %v9743_v32 = vadd.f32 3.0, %v9690_v19 }
 0x9fa   : > { %v9773_v52 = vmax.f32 %v9741_v46, 0.0 }
 0x9fb   : > { %v9660_v5 = vpop.f32.mrf.mxu2  ;;  %v9775_v36 = vmax.f32 %v9743_v32, 0.0 }
 0x9fc   : > { %v9661_v38 = vadd.f32 %v9660_v5, %v18518_v51  ;;  %v9718_v39 = vpop.f32.mrf.mxu3  ;;  %v9805_v50 = vmin.f32 %v9773_v52, 6.0 }
 0x9fd   : > { %v9719_v30 = vadd.f32 %v9718_v39, %v18520_v13  ;;  %v9633_v55 = vpop.f32.mrf.mxu1  ;;  %v9807_v27 = vmin.f32 %v9775_v36, 6.0 }
 0x9fe   : > { %v9742_v56 = vadd.f32 3.0, %v9661_v38  ;;  %v9634_v47 = vadd.f32 %v9633_v55, %v18491_v10  ;;  %v9691_v33 = vpop.f32.mrf.mxu0  ;;  %v9837_v1 = vmul.f32 %v9805_v50, %v9632_v2 }
 0x9ff   : > { %v9744_v37 = vadd.f32 3.0, %v9719_v30  ;;  %v9692_v9 = vadd.f32 %v9691_v33, %v18498_v60  ;;  %v9839_v26 = vmul.f32 %v9807_v27, %v9690_v19 }
 0xa00   : > { %v9745_v61 = vadd.f32 3.0, %v9634_v47  ;;  %v9774_v35 = vmax.f32 %v9742_v56, 0.0  ;;  %v9869_v14 = vmul.f32 0.16666667, %v9837_v1 }
 0xa01   : > { %v9747_v17 = vadd.f32 3.0, %v9692_v9  ;;  %v9776_v24 = vmax.f32 %v9744_v37, 0.0  ;;  %v9871_v28 = vmul.f32 0.16666667, %v9839_v26 }
 0xa02   : > { %v9777_v54 = vmax.f32 %v9745_v61, 0.0  ;;  %v9806_v7 = vmin.f32 %v9774_v35, 6.0 }
 0xa03   : > { %v9779_v45 = vmax.f32 %v9747_v17, 0.0  ;;  %v9662_v4 = vpop.f32.mrf.mxu2  ;;  %v9808_v11 = vmin.f32 %v9776_v24, 6.0 }
 0xa04   : > { %v9809_v18 = vmin.f32 %v9777_v54, 6.0  ;;  %v9663_v53 = vadd.f32 %v9662_v4, %v18518_v51  ;;  %v9720_v16 = vpop.f32.mrf.mxu3  ;;  %v9838_v57 = vmul.f32 %v9806_v7, %v9661_v38 }
 0xa05   : > { %v9811_v12 = vmin.f32 %v9779_v45, 6.0  ;;  %v9721_v40 = vadd.f32 %v9720_v16, %v18520_v13  ;;  %v9840_v23 = vmul.f32 %v9808_v11, %v9719_v30 }
 0xa06   : > { %v9841_v59 = vmul.f32 %v9809_v18, %v9634_v47  ;;  %v9746_v29 = vadd.f32 3.0, %v9663_v53  ;;  %v9870_v43 = vmul.f32 0.16666667, %v9838_v57 }
 0xa07   : > { %v9843_v31 = vmul.f32 %v9811_v12, %v9692_v9  ;;  %v9748_v58 = vadd.f32 3.0, %v9721_v40  ;;  %v9872_v62 = vmul.f32 0.16666667, %v9840_v23 }
 0xa08   : > { %v9873_v41 = vmul.f32 0.16666667, %v9841_v59  ;;  %v9778_v15 = vmax.f32 %v9746_v29, 0.0 }
 0xa09   : > { %v9875_v42 = vmul.f32 0.16666667, %v9843_v31  ;;  %v9780_v20 = vmax.f32 %v9748_v58, 0.0 }
 0xa0a   : > { %v9810_v21 = vmin.f32 %v9778_v15, 6.0  ;;  %v9897_v48 = vpack.c.bf16 %v9873_v41, %v9869_v14 }
 0xa0b   : > { %v9812_v0 = vmin.f32 %v9780_v20, 6.0  ;;  %v9899_v34 = vpack.c.bf16 %v9875_v42, %v9871_v28 }
 0xa0c   : > { %v9842_v44 = vmul.f32 %v9810_v21, %v9663_v53  ;;  %10182 = vmatmul.bf16.gmra.mxu1 %v9897_v48 }
 0xa0d   : > { %v9844_v3 = vmul.f32 %v9812_v0, %v9721_v40  ;;  %10240 = vmatmul.bf16.gmra.mxu0 %v9899_v34 }
 0xa0e   : > { %v9874_v8 = vmul.f32 0.16666667, %v9842_v44 }
 0xa0f   : > { %v9876_v63 = vmul.f32 0.16666667, %v9844_v3 }
 0xa10   : > { %v9898_v6 = vpack.c.bf16 %v9874_v8, %v9870_v43 }
 0xa11   : > { %v9900_v22 = vpack.c.bf16 %v9876_v63, %v9872_v62 }
 0xa12   : > { %10211 = vmatmul.bf16.gmra.mxu2 %v9898_v6 }
 0xa13   : > { %10269 = vmatmul.bf16.gmra.mxu3 %v9900_v22 }
 0xa1e   : > { %v9636_v49 = vpop.f32.mrf.mxu1 }
 0xa1f   : > { %v9637_v2 = vadd.f32 %v9636_v49, %v18491_v10  ;;  %v9694_v25 = vpop.f32.mrf.mxu0 }
 0xa20   : > { %v9695_v19 = vadd.f32 %v9694_v25, %v18498_v60 }
 0xa21   : > { %v9749_v46 = vadd.f32 3.0, %v9637_v2 }
 0xa22   : > { %v9751_v32 = vadd.f32 3.0, %v9695_v19 }
 0xa23   : > { %v9781_v52 = vmax.f32 %v9749_v46, 0.0 }
 0xa24   : > { %v9665_v5 = vpop.f32.mrf.mxu2  ;;  %v9783_v36 = vmax.f32 %v9751_v32, 0.0 }
 0xa25   : > { %v9666_v38 = vadd.f32 %v9665_v5, %v18518_v51  ;;  %v9723_v39 = vpop.f32.mrf.mxu3  ;;  %v9813_v50 = vmin.f32 %v9781_v52, 6.0 }
 0xa26   : > { %v9724_v30 = vadd.f32 %v9723_v39, %v18520_v13  ;;  %v9638_v55 = vpop.f32.mrf.mxu1  ;;  %v9815_v27 = vmin.f32 %v9783_v36, 6.0 }
 0xa27   : > { %v9750_v56 = vadd.f32 3.0, %v9666_v38  ;;  %v9639_v47 = vadd.f32 %v9638_v55, %v18491_v10  ;;  %v9696_v33 = vpop.f32.mrf.mxu0  ;;  %v9845_v1 = vmul.f32 %v9813_v50, %v9637_v2 }
 0xa28   : > { %v9752_v37 = vadd.f32 3.0, %v9724_v30  ;;  %v9697_v9 = vadd.f32 %v9696_v33, %v18498_v60  ;;  %v9847_v26 = vmul.f32 %v9815_v27, %v9695_v19 }
 0xa29   : > { %v9753_v61 = vadd.f32 3.0, %v9639_v47  ;;  %v9782_v35 = vmax.f32 %v9750_v56, 0.0  ;;  %v9877_v14 = vmul.f32 0.16666667, %v9845_v1 }
 0xa2a   : > { %v9755_v17 = vadd.f32 3.0, %v9697_v9  ;;  %v9784_v24 = vmax.f32 %v9752_v37, 0.0  ;;  %v9879_v28 = vmul.f32 0.16666667, %v9847_v26 }
 0xa2b   : > { %v9785_v54 = vmax.f32 %v9753_v61, 0.0  ;;  %v9814_v7 = vmin.f32 %v9782_v35, 6.0 }
 0xa2c   : > { %v9787_v45 = vmax.f32 %v9755_v17, 0.0  ;;  %v9667_v4 = vpop.f32.mrf.mxu2  ;;  %v9816_v11 = vmin.f32 %v9784_v24, 6.0 }
 0xa2d   : > { %v9817_v18 = vmin.f32 %v9785_v54, 6.0  ;;  %v9668_v53 = vadd.f32 %v9667_v4, %v18518_v51  ;;  %v9725_v16 = vpop.f32.mrf.mxu3  ;;  %v9846_v57 = vmul.f32 %v9814_v7, %v9666_v38 }
 0xa2e   : > { %v9819_v12 = vmin.f32 %v9787_v45, 6.0  ;;  %v9726_v40 = vadd.f32 %v9725_v16, %v18520_v13  ;;  %v9848_v23 = vmul.f32 %v9816_v11, %v9724_v30 }
 0xa2f   : > { %v9849_v59 = vmul.f32 %v9817_v18, %v9639_v47  ;;  %v9754_v29 = vadd.f32 3.0, %v9668_v53  ;;  %v9878_v43 = vmul.f32 0.16666667, %v9846_v57 }
 0xa30   : > { %v9851_v31 = vmul.f32 %v9819_v12, %v9697_v9  ;;  %v9756_v58 = vadd.f32 3.0, %v9726_v40  ;;  %v9880_v62 = vmul.f32 0.16666667, %v9848_v23 }
 0xa31   : > { %v9881_v41 = vmul.f32 0.16666667, %v9849_v59  ;;  %v9786_v15 = vmax.f32 %v9754_v29, 0.0 }
 0xa32   : > { %v9883_v42 = vmul.f32 0.16666667, %v9851_v31  ;;  %v9788_v20 = vmax.f32 %v9756_v58, 0.0 }
 0xa33   : > { %v9818_v21 = vmin.f32 %v9786_v15, 6.0  ;;  %v9901_v48 = vpack.c.bf16 %v9881_v41, %v9877_v14 }
 0xa34   : > { %v9820_v0 = vmin.f32 %v9788_v20, 6.0  ;;  %v9903_v34 = vpack.c.bf16 %v9883_v42, %v9879_v28 }
 0xa35   : > { %v9850_v44 = vmul.f32 %v9818_v21, %v9668_v53  ;;  %10187 = vmatmul.bf16.gmra.mxu1 %v9901_v48 }
 0xa36   : > { %v9852_v3 = vmul.f32 %v9820_v0, %v9726_v40  ;;  %10245 = vmatmul.bf16.gmra.mxu0 %v9903_v34 }
 0xa37   : > { %v9882_v8 = vmul.f32 0.16666667, %v9850_v44 }
 0xa38   : > { %v9884_v63 = vmul.f32 0.16666667, %v9852_v3 }
 0xa39   : > { %v9902_v6 = vpack.c.bf16 %v9882_v8, %v9878_v43 }
 0xa3a   : > { %v9904_v22 = vpack.c.bf16 %v9884_v63, %v9880_v62  ;;  %v18567_v62 = vld [vmem:[%s18648_s16] ss:$0 sm:$0xff] }
 0xa3b   : > { %10216 = vmatmul.bf16.gmra.mxu2 %v9902_v6 }
 0xa3c   : > { %10274 = vmatmul.bf16.gmra.mxu3 %v9904_v22 }
 0xa3f   : > { %v9641_v49 = vpop.f32.mrf.mxu1 }
 0xa40   : > { %v9642_v2 = vadd.f32 %v9641_v49, %v18491_v10  ;;  %v9699_v25 = vpop.f32.mrf.mxu0 }
 0xa41   : > { %v9700_v19 = vadd.f32 %v9699_v25, %v18498_v60 }
 0xa42   : > { %v9757_v46 = vadd.f32 3.0, %v9642_v2 }
 0xa43   : > { %v9759_v32 = vadd.f32 3.0, %v9700_v19 }
 0xa44   : > { %v9789_v52 = vmax.f32 %v9757_v46, 0.0 }
 0xa45   : > { %v9670_v5 = vpop.f32.mrf.mxu2  ;;  %v9791_v36 = vmax.f32 %v9759_v32, 0.0 }
 0xa46   : > { %v9671_v38 = vadd.f32 %v9670_v5, %v18518_v51  ;;  %v9728_v39 = vpop.f32.mrf.mxu3  ;;  %v9821_v50 = vmin.f32 %v9789_v52, 6.0 }
 0xa47   : > { %v9729_v30 = vadd.f32 %v9728_v39, %v18520_v13  ;;  %v9643_v55 = vpop.f32.mrf.mxu1  ;;  %v9823_v27 = vmin.f32 %v9791_v36, 6.0 }
 0xa48   : > { %v9758_v56 = vadd.f32 3.0, %v9671_v38  ;;  %v9644_v47 = vadd.f32 %v9643_v55, %v18491_v10  ;;  %v9701_v33 = vpop.f32.mrf.mxu0  ;;  %v9853_v1 = vmul.f32 %v9821_v50, %v9642_v2 }
 0xa49   : > { %v9760_v37 = vadd.f32 3.0, %v9729_v30  ;;  %v9702_v9 = vadd.f32 %v9701_v33, %v18498_v60  ;;  %v9855_v26 = vmul.f32 %v9823_v27, %v9700_v19 }
 0xa4a   : > { %v9761_v61 = vadd.f32 3.0, %v9644_v47  ;;  %v9790_v35 = vmax.f32 %v9758_v56, 0.0  ;;  %v9885_v31 = vmul.f32 0.16666667, %v9853_v1 }
 0xa4b   : > { %v9763_v17 = vadd.f32 3.0, %v9702_v9  ;;  %v9792_v24 = vmax.f32 %v9760_v37, 0.0  ;;  %v9887_v41 = vmul.f32 0.16666667, %v9855_v26 }
 0xa4c   : > { %v9793_v54 = vmax.f32 %v9761_v61, 0.0  ;;  %v9822_v40 = vmin.f32 %v9790_v35, 6.0 }
 0xa4d   : > { %v9795_v45 = vmax.f32 %v9763_v17, 0.0  ;;  %v9672_v4 = vpop.f32.mrf.mxu2  ;;  %v9824_v59 = vmin.f32 %v9792_v24, 6.0 }
 0xa4e   : > { %v9825_v18 = vmin.f32 %v9793_v54, 6.0  ;;  %v9673_v53 = vadd.f32 %v9672_v4, %v18518_v51  ;;  %v9730_v16 = vpop.f32.mrf.mxu3  ;;  %v9854_v42 = vmul.f32 %v9822_v40, %v9671_v38 }
 0xa4f   : > { %v9827_v10 = vmin.f32 %v9795_v45, 6.0  ;;  %v9731_v12 = vadd.f32 %v9730_v16, %v18520_v13  ;;  %v9856_v57 = vmul.f32 %v9824_v59, %v9729_v30 }
 0xa50   : > { %v9857_v60 = vmul.f32 %v9825_v18, %v9644_v47  ;;  %v9762_v7 = vadd.f32 3.0, %v9673_v53  ;;  %v9886_v0 = vmul.f32 0.16666667, %v9854_v42  ;;  %v10178_v43 = vpop.f32.mrf.mxu1 }
 0xa51   : > { %v9859_v29 = vmul.f32 %v9827_v10, %v9702_v9  ;;  %v9764_v11 = vadd.f32 3.0, %v9731_v12  ;;  %v9888_v44 = vmul.f32 0.16666667, %v9856_v57  ;;  %v10179_v6 = vadd.f32 %v18567_v62, %v10178_v43  ;;  %v10236_v22 = vpop.f32.mrf.mxu0 }
 0xa52   : > { %v9889_v58 = vmul.f32 0.16666667, %v9857_v60  ;;  %v9794_v14 = vmax.f32 %v9762_v7, 0.0 }
 0xa53   : > { %v9891_v15 = vmul.f32 0.16666667, %v9859_v29  ;;  %v9796_v28 = vmax.f32 %v9764_v11, 0.0 }
 0xa54   : > { %v9826_v20 = vmin.f32 %v9794_v14, 6.0  ;;  %v9905_v51 = vpack.c.bf16 %v9889_v58, %v9885_v31 }
 0xa55   : > { %v9828_v21 = vmin.f32 %v9796_v28, 6.0  ;;  %v9907_v48 = vpack.c.bf16 %v9891_v15, %v9887_v41 }
 0xa56   : > { %v9858_v13 = vmul.f32 %v9826_v20, %v9673_v53  ;;  %10192 = vmatmul.bf16.gmra.mxu1 %v9905_v51 }
 0xa57   : > { %v9860_v23 = vmul.f32 %v9828_v21, %v9731_v12  ;;  %10250 = vmatmul.bf16.gmra.mxu0 %v9907_v48 }
 0xa58   : > { %v9890_v34 = vmul.f32 0.16666667, %v9858_v13  ;;  %v10180_v46 = vpop.f32.mrf.mxu1 }
 0xa59   : > { %v9892_v3 = vmul.f32 0.16666667, %v9860_v23  ;;  %v10181_v5 = vadd.f32 %v18567_v62, %v10180_v46  ;;  %v10238_v39 = vpop.f32.mrf.mxu0 }
 0xa5a   : > { %v9906_v8 = vpack.c.bf16 %v9890_v34, %v9886_v0 }
 0xa5b   : > { %v9908_v63 = vpack.c.bf16 %v9892_v3, %v9888_v44 }
 0xa5c   : > { %10221 = vmatmul.bf16.gmra.mxu2 %v9906_v8  ;;  %v10207_v49 = vpop.f32.mrf.mxu2 }
 0xa5d   : > { %10279 = vmatmul.bf16.gmra.mxu3 %v9908_v63  ;;  %v10208_v2 = vadd.f32 %v10207_v49, %v10179_v6  ;;  %v10265_v25 = vpop.f32.mrf.mxu3 }
 0xa5f   : > { %v10237_v19 = vadd.f32 %v10236_v22, %v10208_v2 }
 0xa61   : > { %v10266_v32 = vadd.f32 %v10265_v25, %v10237_v19 }
 0xa63   : > { %10285 = vst.msk [vmem:[%s18574_s18] sm:$0xff] %vm596_vm0, %v10266_v32 }
 0xa64   : > { %v10209_v52 = vpop.f32.mrf.mxu2 }
 0xa65   : > { %v10210_v38 = vadd.f32 %v10209_v52, %v10181_v5  ;;  %v10267_v30 = vpop.f32.mrf.mxu3 }
 0xa67   : > { %v10239_v36 = vadd.f32 %v10238_v39, %v10210_v38 }
 0xa69   : > { %v10268_v55 = vadd.f32 %v10267_v30, %v10239_v36 }
 0xa6b   : > { %10286 = vst.msk [vmem:[%s18574_s18 + $0x8] sm:$0xff] %vm596_vm0, %v10268_v55 }
 0xa89   : > { %v10183_v56 = vpop.f32.mrf.mxu1 }
 0xa8a   : > { %v10184_v47 = vadd.f32 %v18567_v62, %v10183_v56  ;;  %v10241_v33 = vpop.f32.mrf.mxu0 }
 0xa91   : > { %v10185_v27 = vpop.f32.mrf.mxu1 }
 0xa92   : > { %v10186_v35 = vadd.f32 %v18567_v62, %v10185_v27  ;;  %v10243_v45 = vpop.f32.mrf.mxu0 }
 0xa95   : > { %v10212_v37 = vpop.f32.mrf.mxu2 }
 0xa96   : > { %v10213_v9 = vadd.f32 %v10212_v37, %v10184_v47  ;;  %v10270_v50 = vpop.f32.mrf.mxu3 }
 0xa98   : > { %v10242_v61 = vadd.f32 %v10241_v33, %v10213_v9 }
 0xa9a   : > { %v10271_v17 = vadd.f32 %v10270_v50, %v10242_v61 }
 0xa9c   : > { %10287 = vst.msk [vmem:[%s18574_s18 + $0x10] sm:$0xff] %vm596_vm0, %v10271_v17 }
 0xa9d   : > { %v10214_v54 = vpop.f32.mrf.mxu2 }
 0xa9e   : > { %v10215_v24 = vadd.f32 %v10214_v54, %v10186_v35  ;;  %v10272_v1 = vpop.f32.mrf.mxu3 }
 0xaa0   : > { %v10244_v4 = vadd.f32 %v10243_v45, %v10215_v24 }
 0xaa2   : > { %v10273_v18 = vadd.f32 %v10272_v1, %v10244_v4 }
 0xaa4   : > { %10288 = vst.msk [vmem:[%s18574_s18 + $0x18] sm:$0xff] %vm596_vm0, %v10273_v18 }
 0xab2   : > { %v10188_v53 = vpop.f32.mrf.mxu1 }
 0xab3   : > { %v10189_v16 = vadd.f32 %v18567_v62, %v10188_v53  ;;  %v10246_v26 = vpop.f32.mrf.mxu0 }
 0xaba   : > { %v10190_v7 = vpop.f32.mrf.mxu1 }
 0xabb   : > { %v10191_v29 = vadd.f32 %v18567_v62, %v10190_v7  ;;  %v10248_v58 = vpop.f32.mrf.mxu0 }
 0xabe   : > { %v10217_v10 = vpop.f32.mrf.mxu2 }
 0xabf   : > { %v10218_v12 = vadd.f32 %v10217_v10, %v10189_v16  ;;  %v10275_v40 = vpop.f32.mrf.mxu3 }
 0xac1   : > { %v10247_v60 = vadd.f32 %v10246_v26, %v10218_v12 }
 0xac3   : > { %v10276_v59 = vadd.f32 %v10275_v40, %v10247_v60 }
 0xac5   : > { %10289 = vst.msk [vmem:[%s18574_s18 + $0x20] sm:$0xff] %vm596_vm0, %v10276_v59 }
 0xac6   : > { %v10219_v11 = vpop.f32.mrf.mxu2 }
 0xac7   : > { %v10220_v31 = vadd.f32 %v10219_v11, %v10191_v29  ;;  %v10277_v41 = vpop.f32.mrf.mxu3 }
 0xac9   : > { %v10249_v14 = vadd.f32 %v10248_v58, %v10220_v31 }
 0xacb   : > { %v10278_v15 = vadd.f32 %v10277_v41, %v10249_v14 }
 0xacd   : > { %10290 = vst.msk [vmem:[%s18574_s18 + $0x28] sm:$0xff] %vm596_vm0, %v10278_v15 }
 0xad3   : > { %v10193_v28 = vpop.f32.mrf.mxu1 }
 0xad4   : > { %v10194_v42 = vadd.f32 %v18567_v62, %v10193_v28  ;;  %v10251_v20 = vpop.f32.mrf.mxu0 }
 0xadb   : > { %v10195_v13 = vpop.f32.mrf.mxu1 }
 0xadc   : > { %v10196_v0 = vadd.f32 %v18567_v62, %v10195_v13  ;;  %v10253_v3 = vpop.f32.mrf.mxu0 }
 0xadf   : > { %v10222_v51 = vpop.f32.mrf.mxu2 }
 0xae0   : > { %v10223_v57 = vadd.f32 %v10222_v51, %v10194_v42  ;;  %v10280_v21 = vpop.f32.mrf.mxu3 }
 0xae2   : > { %v10252_v48 = vadd.f32 %v10251_v20, %v10223_v57 }
 0xae4   : > { %v10281_v23 = vadd.f32 %v10280_v21, %v10252_v48 }
 0xae6   : > { %10291 = vst.msk [vmem:[%s18574_s18 + $0x30] sm:$0xff] %vm596_vm0, %v10281_v23 }
 0xae7   : > { %v10224_v34 = vpop.f32.mrf.mxu2 }
 0xae8   : > { %v10225_v44 = vadd.f32 %v10224_v34, %v10196_v0  ;;  %v10282_v8 = vpop.f32.mrf.mxu3 }
 0xaea   : > { %v10254_v43 = vadd.f32 %v10253_v3, %v10225_v44 }
 0xaec   : > { %v10283_v63 = vadd.f32 %v10282_v8, %v10254_v43 }
 0xaee   : > { %10292 = vst.msk [vmem:[%s18574_s18 + $0x38] sm:$0xff] %vm596_vm0, %v10283_v63 }
 0xaef   : > { %11441 = shalt.err (!%p11438_p3)
}
 0xaf0   : > { %s11488_s29 = smov 128   ;;  %s11489_s18 = smov 8  }
 0xaf1   : > { %10769 = dma.vmem_to_hbm [thread:$0]  (%p11618_p5), %s10307_s23, 1024, %s10309_s30, %s10294_s28, %s11488_s29, %s11488_s29, %s11489_s18  }
 0xaf2 PF: > { %s19670_s2 = sld [smem:[#allocation5_spill]]  ;;  %p10775_p4 = scmp.ge.s32.totalorder %s11476_s27, 2 }
 0xaf4   : > { %p10772_p7 = pnand %p10775_p4, %p11622_p6 }
 0xaf6   : > { %p10773_p8 = pneg %p10772_p7 }
 0xaf8   : > { %s10323_s20 = sand.u32 1, %s19670_s2  }
 0xaf9   : > { %s10324_s22 = scalar_lea.sflag [#allocation3], %s10323_s20 }
 0xafa   : > { %11459 = dma.done.wait (%p10773_p8), %s10324_s22, 1024  }
 0xafb   : > { %11461 = vsyncadd (%p10773_p8), %s10324_s22, 4294966272  ;;  %s19672_s27 = sld [smem:[#allocation7_spill]]  ;;  %s19675_s24 = smov %s11468_s25 }
 0xafc   : > { %s19673_s21 = sld [smem:[#allocation6_spill]] }
 0xafd   : > { %s19674_s26 = sld [smem:[#allocation8_spill]] }
 0xb01   : > { %p27_p9 = scmp.ge.s32.totalorder %s19672_s27, 4  }
 0xb02   : > { %s19676_s25 = smov %s19673_s21 }
 0xb03   :  { %29 = sbr.rel (!%p27_p9) target bundleno = 8 (0x8), region = 129 }
 0xb08   :  { %10330 = vsyncpa [#allocation3], 1 }
 0xb09   :  { %10332 = vsyncpa [#allocation3 + $0x1], 1 }

</bundles_post_ra>
